<compile_context>
chip_gen: v6e
topology: v6e:2x2x1
jax: 0.10.0
libtpu: 0.0.40
codegen_flags: <defaults>
</compile_context>

<pallas_src>
import jax
import jax.numpy as jnp
from jax.experimental import pallas as pl
from jax.experimental.pallas import tpu as pltpu


# ---------------------------------------------------------------------------
# Static dimensions
# ---------------------------------------------------------------------------
IN_DIM = 32 * 64                 # 2048
H1, H2, H3, H4 = 832, 416, 208, 104
SCORE_DIM, POLICY_DIM = 1, 4672


def _round_up(x, m):
    return ((x + m - 1) // m) * m


# lane-aligned (multiple-of-128) padded widths
P_H1 = _round_up(H1, 128)        # 896
P_H2 = _round_up(H2, 128)        # 512
P_H3 = _round_up(H3, 128)        # 256
P_H4 = _round_up(H4, 128)        # 128
P_SCORE = 128                    # score head padded to one lane block


# ---------------------------------------------------------------------------
# Kernel: fused MLP forward for one batch tile
# ---------------------------------------------------------------------------
def _net_kernel(x_ref,
                w1_ref, b1_ref,
                w2_ref, b2_ref,
                w3_ref, b3_ref,
                w4_ref, b4_ref,
                ws_ref, bs_ref,
                wp_ref, bp_ref,
                score_ref, policy_ref):
    def linear(h_bf16, w_ref, b_ref):
        # bf16 x bf16 -> f32 accumulation on the MXU; bias-add in f32.
        return jnp.dot(h_bf16, w_ref[...],
                       preferred_element_type=jnp.float32) + b_ref[...]

    # f32 -> bf16 cast done in-kernel (VPU work hidden under the fc1 MXU pass)
    h = x_ref[...].astype(jnp.bfloat16)
    h = jnp.maximum(linear(h, w1_ref, b1_ref), 0.0).astype(jnp.bfloat16)   # fc1+relu
    h = jnp.maximum(linear(h, w2_ref, b2_ref), 0.0).astype(jnp.bfloat16)   # fc2+relu
    h = jnp.maximum(linear(h, w3_ref, b3_ref), 0.0).astype(jnp.bfloat16)   # fc3+relu
    h = jnp.maximum(linear(h, w4_ref, b4_ref), 0.0).astype(jnp.bfloat16)   # fc4+relu

    # score head: f32, lane 0 holds the score (padded cols are exactly 0)
    score_ref[...] = linear(h, ws_ref, bs_ref)
    # policy head: lane-dense (tb, 4672) store, bf16 to halve HBM writeback
    policy_ref[...] = linear(h, wp_ref, bp_ref).astype(jnp.bfloat16)


# ---------------------------------------------------------------------------
# Parameter packing: pad to lane multiples, cast weights to bf16 (done once)
# ---------------------------------------------------------------------------
def _pad2(a, rows, cols):
    return jnp.pad(a, ((0, rows - a.shape[0]), (0, cols - a.shape[1])))


def prepare_params(params):
    (w1, b1), (w2, b2), (w3, b3), (w4, b4), (ws, bs), (wp, bp) = params
    return (
        _pad2(w1, IN_DIM, P_H1).astype(jnp.bfloat16), _pad2(b1, 1, P_H1).astype(jnp.float32),
        _pad2(w2, P_H1, P_H2).astype(jnp.bfloat16),   _pad2(b2, 1, P_H2).astype(jnp.float32),
        _pad2(w3, P_H2, P_H3).astype(jnp.bfloat16),   _pad2(b3, 1, P_H3).astype(jnp.float32),
        _pad2(w4, P_H3, P_H4).astype(jnp.bfloat16),   _pad2(b4, 1, P_H4).astype(jnp.float32),
        _pad2(ws, P_H4, P_SCORE).astype(jnp.bfloat16), _pad2(bs, 1, P_SCORE).astype(jnp.float32),
        _pad2(wp, P_H4, POLICY_DIM).astype(jnp.bfloat16), _pad2(bp, 1, POLICY_DIM).astype(jnp.float32),
    )


def _choose_tb(batch):
    """Batch tile: multiple of 16 (bf16 sublanes); >=2 grid steps when possible
    (v7x megacore); 128 for medium batch; 256 only when batch >= 1024 so both
    v7x cores still get >= 2 steps and the VMEM budget stays small."""
    if batch <= 16:
        return 16
    if batch < 1024:
        return min(128, _round_up((batch + 1) // 2, 16))
    return 256


# ---------------------------------------------------------------------------
# Wrapper
# ---------------------------------------------------------------------------
@jax.jit
def net_forward(x, packed_params):
    """x: (batch, 32, 8, 8) f32. packed_params from prepare_params().
    Returns (score (B,1) f32, policy (B,4672) bf16)."""
    batch = x.shape[0]
    # torch: x.flatten().reshape(batch, -1)  ==  row-major reshape (view, no copy)
    x2d = x.reshape(batch, -1).astype(jnp.float32)          # (B, 2048), stays f32

    tb = _choose_tb(batch)
    padded_batch = _round_up(batch, tb)
    if padded_batch != batch:
        x2d = jnp.pad(x2d, ((0, padded_batch - batch), (0, 0)))

    packed = packed_params
    # weights / biases: constant index_map -> loaded once, single-buffered
    weight_specs = [
        pl.BlockSpec(p.shape, lambda i: (0, 0), pipeline_mode=pl.Buffered(1))
        for p in packed
    ]

    flops = 2 * padded_batch * (IN_DIM * H1 + H1 * H2 + H2 * H3 + H3 * H4
                                + H4 * (SCORE_DIM + POLICY_DIM))
    weight_bytes = int(sum(int(p.size) * p.dtype.itemsize for p in packed))
    io_bytes = padded_batch * (IN_DIM * 4 + P_SCORE * 4 + POLICY_DIM * 2)
    cost = pl.CostEstimate(flops=flops, transcendentals=0,
                           bytes_accessed=weight_bytes + io_bytes)

    grid_spec = pltpu.PrefetchScalarGridSpec(
        num_scalar_prefetch=0,
        grid=(padded_batch // tb,),
        in_specs=[pl.BlockSpec((tb, IN_DIM), lambda i: (i, 0))] + weight_specs,
        out_specs=[pl.BlockSpec((tb, P_SCORE), lambda i: (i, 0)),
                   pl.BlockSpec((tb, POLICY_DIM), lambda i: (i, 0))],
    )

    score_out, policy_out = pl.pallas_call(
        _net_kernel,
        out_shape=(jax.ShapeDtypeStruct((padded_batch, P_SCORE), jnp.float32),
                   jax.ShapeDtypeStruct((padded_batch, POLICY_DIM), jnp.bfloat16)),
        grid_spec=grid_spec,
        compiler_params=pltpu.CompilerParams(
            dimension_semantics=("parallel",),          # megacore batch split on v7x
            vmem_limit_bytes=48 * 1024 * 1024,          # fits v7x's 64 MiB physical VMEM
        ),
        cost_estimate=cost,
    )(x2d, *packed)

    score = score_out[:batch, :SCORE_DIM]     # tiny (B,128) slice, negligible
    policy = policy_out[:batch]               # full-row slice; elided when batch % tb == 0
    return score, policy


# ---------------------------------------------------------------------------
# Deterministic parameter init (PyTorch nn.Linear-style uniform bounds)
# Weights stored as bf16 (in_features, out_features); biases f32 (1, out).
# ---------------------------------------------------------------------------
def init_params(key):
    dims = [(IN_DIM, H1), (H1, H2), (H2, H3), (H3, H4),
            (H4, SCORE_DIM), (H4, POLICY_DIM)]
    params = []
    for fan_in, fan_out in dims:
        key, kw, kb = jax.random.split(key, 3)
        bound = 1.0 / jnp.sqrt(jnp.float32(fan_in))
        w = jax.random.uniform(kw, (fan_in, fan_out), jnp.float32,
                               -bound, bound).astype(jnp.bfloat16)
        b = jax.random.uniform(kb, (1, fan_out), jnp.float32, -bound, bound)
        params.append((w, b))
    return params


# Pure-JAX reference (same bf16-operand / f32-accumulate numerics)
def net_reference(x, params):
    batch = x.shape[0]
    h = x.reshape(batch, -1)
    (w1, b1), (w2, b2), (w3, b3), (w4, b4), (ws, bs), (wp, bp) = params

    def lin(h, w, b):
        return jnp.dot(h.astype(jnp.bfloat16), w,
                       preferred_element_type=jnp.float32) + b

    h = jnp.maximum(lin(h, w1, b1), 0.0)
    h = jnp.maximum(lin(h, w2, b2), 0.0)
    h = jnp.maximum(lin(h, w3, b3), 0.0)
    h = jnp.maximum(lin(h, w4, b4), 0.0)
    return lin(h, ws, bs), lin(h, wp, bp)


if __name__ == "__main__":
    key = jax.random.PRNGKey(0)
    key, kx = jax.random.split(key)

    batch = 2
    x = jax.random.normal(kx, (batch, 32, 8, 8), jnp.float32)   # NCHW board planes
    params = init_params(key)
    packed = prepare_params(params)                              # pack/pad once

    score, policy = net_forward(x, packed)
    jax.block_until_ready((score, policy))

    ref_score, ref_policy = net_reference(x, params)
    assert score.shape == (batch, SCORE_DIM) and policy.shape == (batch, POLICY_DIM)
    assert jnp.allclose(score, ref_score, atol=2e-3, rtol=2e-3)
    # policy is emitted in bf16 (perf feedback): compare at bf16 precision
    assert jnp.allclose(policy.astype(jnp.float32), ref_policy, atol=2e-2, rtol=2e-2)

    print("KERNEL_OK")
</pallas_src>

<mosaic_0001>
module attributes {stable_mosaic.version = 11 : i64} {
  func.func @_net_kernel(%arg0: i32, %arg1: memref<16x2048xf32, #tpu.memory_space<vmem>>, %arg2: memref<2048x896xbf16, #tpu.memory_space<vmem>>, %arg3: memref<1x896xf32, #tpu.memory_space<vmem>>, %arg4: memref<896x512xbf16, #tpu.memory_space<vmem>>, %arg5: memref<1x512xf32, #tpu.memory_space<vmem>>, %arg6: memref<512x256xbf16, #tpu.memory_space<vmem>>, %arg7: memref<1x256xf32, #tpu.memory_space<vmem>>, %arg8: memref<256x128xbf16, #tpu.memory_space<vmem>>, %arg9: memref<1x128xf32, #tpu.memory_space<vmem>>, %arg10: memref<128x128xbf16, #tpu.memory_space<vmem>>, %arg11: memref<1x128xf32, #tpu.memory_space<vmem>>, %arg12: memref<128x4672xbf16, #tpu.memory_space<vmem>>, %arg13: memref<1x4672xf32, #tpu.memory_space<vmem>>, %arg14: memref<16x128xf32, #tpu.memory_space<vmem>>, %arg15: memref<16x4672xbf16, #tpu.memory_space<vmem>>) attributes {dimension_semantics = [#tpu.dimension_semantics<parallel>], iteration_bounds = array<i64: 1>, scalar_prefetch = 0 : i64, scratch_operands = 0 : i64, tpu.core_type = #tpu.core_type<tc>, window_params = [{transform_indices = @transform_0, window_bounds = array<i64: 16, 2048>}, {pipeline_mode = #tpu.pipeline_mode<synchronous>, transform_indices = @transform_1, window_bounds = array<i64: 2048, 896>}, {pipeline_mode = #tpu.pipeline_mode<synchronous>, transform_indices = @transform_2, window_bounds = array<i64: 1, 896>}, {pipeline_mode = #tpu.pipeline_mode<synchronous>, transform_indices = @transform_3, window_bounds = array<i64: 896, 512>}, {pipeline_mode = #tpu.pipeline_mode<synchronous>, transform_indices = @transform_4, window_bounds = array<i64: 1, 512>}, {pipeline_mode = #tpu.pipeline_mode<synchronous>, transform_indices = @transform_5, window_bounds = array<i64: 512, 256>}, {pipeline_mode = #tpu.pipeline_mode<synchronous>, transform_indices = @transform_6, window_bounds = array<i64: 1, 256>}, {pipeline_mode = #tpu.pipeline_mode<synchronous>, transform_indices = @transform_7, window_bounds = array<i64: 256, 128>}, {pipeline_mode = #tpu.pipeline_mode<synchronous>, transform_indices = @transform_8, window_bounds = array<i64: 1, 128>}, {pipeline_mode = #tpu.pipeline_mode<synchronous>, transform_indices = @transform_9, window_bounds = array<i64: 128, 128>}, {pipeline_mode = #tpu.pipeline_mode<synchronous>, transform_indices = @transform_10, window_bounds = array<i64: 1, 128>}, {pipeline_mode = #tpu.pipeline_mode<synchronous>, transform_indices = @transform_11, window_bounds = array<i64: 128, 4672>}, {pipeline_mode = #tpu.pipeline_mode<synchronous>, transform_indices = @transform_12, window_bounds = array<i64: 1, 4672>}, {transform_indices = @transform_13, window_bounds = array<i64: 16, 128>}, {transform_indices = @transform_14, window_bounds = array<i64: 16, 4672>}]} {
    %c0 = arith.constant 0 : index
    %c0_0 = arith.constant 0 : index
    %0 = vector.load %arg1[%c0, %c0_0] : memref<16x2048xf32, #tpu.memory_space<vmem>>, vector<16x2048xf32>
    %1 = arith.truncf %0 : vector<16x2048xf32> to vector<16x2048xbf16>
    %c0_1 = arith.constant 0 : index
    %c0_2 = arith.constant 0 : index
    %2 = vector.load %arg2[%c0_1, %c0_2] : memref<2048x896xbf16, #tpu.memory_space<vmem>>, vector<2048x896xbf16>
    %cst = arith.constant dense<0.000000e+00> : vector<16x896xf32>
    %3 = tpu.matmul %1, %2, %cst {dimension_numbers = #tpu.dot_dimension_numbers<[1], [0], [0], [1], [0, 0, 1, 1], [], []>} : vector<16x2048xbf16>, vector<2048x896xbf16>, vector<16x896xf32> -> vector<16x896xf32>
    %c0_3 = arith.constant 0 : index
    %c0_4 = arith.constant 0 : index
    %4 = vector.load %arg3[%c0_3, %c0_4] : memref<1x896xf32, #tpu.memory_space<vmem>>, vector<1x896xf32>
    %5 = vector.broadcast %4 : vector<1x896xf32> to vector<16x896xf32>
    %6 = arith.addf %3, %5 : vector<16x896xf32>
    %cst_5 = arith.constant 0.000000e+00 : f32
    %7 = vector.broadcast %cst_5 : f32 to vector<16x896xf32>
    %8 = arith.maximumf %6, %7 : vector<16x896xf32>
    %9 = arith.truncf %8 : vector<16x896xf32> to vector<16x896xbf16>
    %c0_6 = arith.constant 0 : index
    %c0_7 = arith.constant 0 : index
    %10 = vector.load %arg4[%c0_6, %c0_7] : memref<896x512xbf16, #tpu.memory_space<vmem>>, vector<896x512xbf16>
    %cst_8 = arith.constant dense<0.000000e+00> : vector<16x512xf32>
    %11 = tpu.matmul %9, %10, %cst_8 {dimension_numbers = #tpu.dot_dimension_numbers<[1], [0], [0], [1], [0, 0, 1, 1], [], []>} : vector<16x896xbf16>, vector<896x512xbf16>, vector<16x512xf32> -> vector<16x512xf32>
    %c0_9 = arith.constant 0 : index
    %c0_10 = arith.constant 0 : index
    %12 = vector.load %arg5[%c0_9, %c0_10] : memref<1x512xf32, #tpu.memory_space<vmem>>, vector<1x512xf32>
    %13 = vector.broadcast %12 : vector<1x512xf32> to vector<16x512xf32>
    %14 = arith.addf %11, %13 : vector<16x512xf32>
    %cst_11 = arith.constant 0.000000e+00 : f32
    %15 = vector.broadcast %cst_11 : f32 to vector<16x512xf32>
    %16 = arith.maximumf %14, %15 : vector<16x512xf32>
    %17 = arith.truncf %16 : vector<16x512xf32> to vector<16x512xbf16>
    %c0_12 = arith.constant 0 : index
    %c0_13 = arith.constant 0 : index
    %18 = vector.load %arg6[%c0_12, %c0_13] : memref<512x256xbf16, #tpu.memory_space<vmem>>, vector<512x256xbf16>
    %cst_14 = arith.constant dense<0.000000e+00> : vector<16x256xf32>
    %19 = tpu.matmul %17, %18, %cst_14 {dimension_numbers = #tpu.dot_dimension_numbers<[1], [0], [0], [1], [0, 0, 1, 1], [], []>} : vector<16x512xbf16>, vector<512x256xbf16>, vector<16x256xf32> -> vector<16x256xf32>
    %c0_15 = arith.constant 0 : index
    %c0_16 = arith.constant 0 : index
    %20 = vector.load %arg7[%c0_15, %c0_16] : memref<1x256xf32, #tpu.memory_space<vmem>>, vector<1x256xf32>
    %21 = vector.broadcast %20 : vector<1x256xf32> to vector<16x256xf32>
    %22 = arith.addf %19, %21 : vector<16x256xf32>
    %cst_17 = arith.constant 0.000000e+00 : f32
    %23 = vector.broadcast %cst_17 : f32 to vector<16x256xf32>
    %24 = arith.maximumf %22, %23 : vector<16x256xf32>
    %25 = arith.truncf %24 : vector<16x256xf32> to vector<16x256xbf16>
    %c0_18 = arith.constant 0 : index
    %c0_19 = arith.constant 0 : index
    %26 = vector.load %arg8[%c0_18, %c0_19] : memref<256x128xbf16, #tpu.memory_space<vmem>>, vector<256x128xbf16>
    %cst_20 = arith.constant dense<0.000000e+00> : vector<16x128xf32>
    %27 = tpu.matmul %25, %26, %cst_20 {dimension_numbers = #tpu.dot_dimension_numbers<[1], [0], [0], [1], [0, 0, 1, 1], [], []>} : vector<16x256xbf16>, vector<256x128xbf16>, vector<16x128xf32> -> vector<16x128xf32>
    %c0_21 = arith.constant 0 : index
    %c0_22 = arith.constant 0 : index
    %28 = vector.load %arg9[%c0_21, %c0_22] : memref<1x128xf32, #tpu.memory_space<vmem>>, vector<1x128xf32>
    %29 = vector.broadcast %28 : vector<1x128xf32> to vector<16x128xf32>
    %30 = arith.addf %27, %29 : vector<16x128xf32>
    %cst_23 = arith.constant 0.000000e+00 : f32
    %31 = vector.broadcast %cst_23 : f32 to vector<16x128xf32>
    %32 = arith.maximumf %30, %31 : vector<16x128xf32>
    %33 = arith.truncf %32 : vector<16x128xf32> to vector<16x128xbf16>
    %c0_24 = arith.constant 0 : index
    %c0_25 = arith.constant 0 : index
    %34 = vector.load %arg10[%c0_24, %c0_25] : memref<128x128xbf16, #tpu.memory_space<vmem>>, vector<128x128xbf16>
    %cst_26 = arith.constant dense<0.000000e+00> : vector<16x128xf32>
    %35 = tpu.matmul %33, %34, %cst_26 {dimension_numbers = #tpu.dot_dimension_numbers<[1], [0], [0], [1], [0, 0, 1, 1], [], []>} : vector<16x128xbf16>, vector<128x128xbf16>, vector<16x128xf32> -> vector<16x128xf32>
    %c0_27 = arith.constant 0 : index
    %c0_28 = arith.constant 0 : index
    %36 = vector.load %arg11[%c0_27, %c0_28] : memref<1x128xf32, #tpu.memory_space<vmem>>, vector<1x128xf32>
    %37 = vector.broadcast %36 : vector<1x128xf32> to vector<16x128xf32>
    %38 = arith.addf %35, %37 : vector<16x128xf32>
    %c0_29 = arith.constant 0 : index
    %c0_30 = arith.constant 0 : index
    %39 = vector.load %arg14[%c0_29, %c0_30] : memref<16x128xf32, #tpu.memory_space<vmem>>, vector<16x128xf32>
    tpu.vector_store %arg14[%c0_29, %c0_30], %38 {strides = array<i32>} : memref<16x128xf32, #tpu.memory_space<vmem>>, vector<16x128xf32>,
    %c0_31 = arith.constant 0 : index
    %c0_32 = arith.constant 0 : index
    %40 = vector.load %arg12[%c0_31, %c0_32] : memref<128x4672xbf16, #tpu.memory_space<vmem>>, vector<128x4672xbf16>
    %cst_33 = arith.constant dense<0.000000e+00> : vector<16x4672xf32>
    %41 = tpu.matmul %33, %40, %cst_33 {dimension_numbers = #tpu.dot_dimension_numbers<[1], [0], [0], [1], [0, 0, 1, 1], [], []>} : vector<16x128xbf16>, vector<128x4672xbf16>, vector<16x4672xf32> -> vector<16x4672xf32>
    %c0_34 = arith.constant 0 : index
    %c0_35 = arith.constant 0 : index
    %42 = vector.load %arg13[%c0_34, %c0_35] : memref<1x4672xf32, #tpu.memory_space<vmem>>, vector<1x4672xf32>
    %43 = vector.broadcast %42 : vector<1x4672xf32> to vector<16x4672xf32>
    %44 = arith.addf %41, %43 : vector<16x4672xf32>
    %45 = arith.truncf %44 : vector<16x4672xf32> to vector<16x4672xbf16>
    %c0_36 = arith.constant 0 : index
    %c0_37 = arith.constant 0 : index
    %46 = vector.load %arg15[%c0_36, %c0_37] : memref<16x4672xbf16, #tpu.memory_space<vmem>>, vector<16x4672xbf16>
    tpu.vector_store %arg15[%c0_36, %c0_37], %45 {strides = array<i32>} : memref<16x4672xbf16, #tpu.memory_space<vmem>>, vector<16x4672xbf16>,
    return
  }
  func.func @transform_0(%arg0: i32) -> (i32, i32) {
    %c0_i32 = arith.constant 0 : i32
    %c0_i32_0 = arith.constant 0 : i32
    return %arg0, %c0_i32 : i32, i32
  }
  func.func @transform_1(%arg0: i32) -> (i32, i32) {
    %c0_i32 = arith.constant 0 : i32
    %c0_i32_0 = arith.constant 0 : i32
    %c0_i32_1 = arith.constant 0 : i32
    return %c0_i32, %c0_i32_0 : i32, i32
  }
  func.func @transform_2(%arg0: i32) -> (i32, i32) {
    %c0_i32 = arith.constant 0 : i32
    %c0_i32_0 = arith.constant 0 : i32
    %c0_i32_1 = arith.constant 0 : i32
    return %c0_i32, %c0_i32_0 : i32, i32
  }
  func.func @transform_3(%arg0: i32) -> (i32, i32) {
    %c0_i32 = arith.constant 0 : i32
    %c0_i32_0 = arith.constant 0 : i32
    %c0_i32_1 = arith.constant 0 : i32
    return %c0_i32, %c0_i32_0 : i32, i32
  }
  func.func @transform_4(%arg0: i32) -> (i32, i32) {
    %c0_i32 = arith.constant 0 : i32
    %c0_i32_0 = arith.constant 0 : i32
    %c0_i32_1 = arith.constant 0 : i32
    return %c0_i32, %c0_i32_0 : i32, i32
  }
  func.func @transform_5(%arg0: i32) -> (i32, i32) {
    %c0_i32 = arith.constant 0 : i32
    %c0_i32_0 = arith.constant 0 : i32
    %c0_i32_1 = arith.constant 0 : i32
    return %c0_i32, %c0_i32_0 : i32, i32
  }
  func.func @transform_6(%arg0: i32) -> (i32, i32) {
    %c0_i32 = arith.constant 0 : i32
    %c0_i32_0 = arith.constant 0 : i32
    %c0_i32_1 = arith.constant 0 : i32
    return %c0_i32, %c0_i32_0 : i32, i32
  }
  func.func @transform_7(%arg0: i32) -> (i32, i32) {
    %c0_i32 = arith.constant 0 : i32
    %c0_i32_0 = arith.constant 0 : i32
    %c0_i32_1 = arith.constant 0 : i32
    return %c0_i32, %c0_i32_0 : i32, i32
  }
  func.func @transform_8(%arg0: i32) -> (i32, i32) {
    %c0_i32 = arith.constant 0 : i32
    %c0_i32_0 = arith.constant 0 : i32
    %c0_i32_1 = arith.constant 0 : i32
    return %c0_i32, %c0_i32_0 : i32, i32
  }
  func.func @transform_9(%arg0: i32) -> (i32, i32) {
    %c0_i32 = arith.constant 0 : i32
    %c0_i32_0 = arith.constant 0 : i32
    %c0_i32_1 = arith.constant 0 : i32
    return %c0_i32, %c0_i32_0 : i32, i32
  }
  func.func @transform_10(%arg0: i32) -> (i32, i32) {
    %c0_i32 = arith.constant 0 : i32
    %c0_i32_0 = arith.constant 0 : i32
    %c0_i32_1 = arith.constant 0 : i32
    return %c0_i32, %c0_i32_0 : i32, i32
  }
  func.func @transform_11(%arg0: i32) -> (i32, i32) {
    %c0_i32 = arith.constant 0 : i32
    %c0_i32_0 = arith.constant 0 : i32
    %c0_i32_1 = arith.constant 0 : i32
    return %c0_i32, %c0_i32_0 : i32, i32
  }
  func.func @transform_12(%arg0: i32) -> (i32, i32) {
    %c0_i32 = arith.constant 0 : i32
    %c0_i32_0 = arith.constant 0 : i32
    %c0_i32_1 = arith.constant 0 : i32
    return %c0_i32, %c0_i32_0 : i32, i32
  }
  func.func @transform_13(%arg0: i32) -> (i32, i32) {
    %c0_i32 = arith.constant 0 : i32
    %c0_i32_0 = arith.constant 0 : i32
    return %arg0, %c0_i32 : i32, i32
  }
  func.func @transform_14(%arg0: i32) -> (i32, i32) {
    %c0_i32 = arith.constant 0 : i32
    %c0_i32_0 = arith.constant 0 : i32
    return %arg0, %c0_i32 : i32, i32
  }
}

</mosaic_0001>

<bundles_post_ra>
// kernel: net_forward.1
= control target key start
LH: loop header
LB: loop body
LE: loop exit
PB: predicated region body
PF: predicated region fallthrough
CT: control target
= control target key end

     0   :  { %20 = vsyncpa [#allocation3], 0  ;;  %s16781_s29 = smov [#allocation2]   ;;  %s19429_s0 = inlined_call_operand.vmem [shape: f32[16,2048], index: 0, kind: input, shape index: {}]   ;;  %s19430_s1 = inlined_call_operand.hbm [shape: bf16[2048,896], index: 1, kind: input, shape index: {}]   ;;  %s19431_s2 = inlined_call_operand.vmem [shape: f32[1,896], index: 2, kind: input, shape index: {}]   ;;  %s19432_s3 = inlined_call_operand.vmem [shape: bf16[896,512], index: 3, kind: input, shape index: {}]   ;;  %s19433_s4 = inlined_call_operand.vmem [shape: f32[1,512], index: 4, kind: input, shape index: {}]   ;;  %s19434_s5 = inlined_call_operand.vmem [shape: bf16[512,256], index: 5, kind: input, shape index: {}]   ;;  %s19435_s6 = inlined_call_operand.vmem [shape: f32[1,256], index: 6, kind: input, shape index: {}]   ;;  %s19436_s7 = inlined_call_operand.vmem [shape: bf16[256,128], index: 7, kind: input, shape index: {}]   ;;  %s19437_s8 = inlined_call_operand.vmem [shape: f32[1,128], index: 8, kind: input, shape index: {}]   ;;  %s19438_s9 = inlined_call_operand.vmem [shape: bf16[128,128], index: 9, kind: input, shape index: {}]   ;;  %s19439_s10 = inlined_call_operand.vmem [shape: f32[1,128], index: 10, kind: input, shape index: {}]   ;;  %s19440_s11 = inlined_call_operand.vmem [shape: bf16[128,4672], index: 11, kind: input, shape index: {}]   ;;  %s19441_s12 = inlined_call_operand.vmem [shape: f32[1,4672], index: 12, kind: input, shape index: {}]   ;;  %s19442_s13 = inlined_call_operand.vmem [shape: f32[16,128], index: 13, kind: output, shape index: {0}]   ;;  %s19443_s14 = inlined_call_operand.vmem [shape: bf16[16,4672], index: 14, kind: output, shape index: {1}]  }
   0x1   :  { %s28_s30 = sshll.u32 %s16781_s29, 4  ;;  %s29_s30 = int_to_ptr.vmem [resolvable:$true] %s28_s30 }
   0x2   :  { %s16767_s15 = scalar_lea.vmem %s29_s30, 114688  ;;  %p16772_p1 = scmp.lt.s32.totalorder %s29_s30, %s29_s30 }
   0x3   :  { %p16768_p0 = scmp.ne.s32.totalorder %s29_s30, %s16767_s15  ;;  %p16773_p2 = scmp.lt.s32.totalorder %s16767_s15, %s16767_s15 }
   0x5   :  { %p16774_p3 = por %p16773_p2, %p16772_p1 }
   0x7   :  { %p16775_p4 = pnand %p16774_p3, %p16768_p0 }
   0x9   :  { %16778 = shalt.err (!%p16775_p4)
}
   0xa   :  { %s16782_s16 = smov 448   ;;  %s16783_s17 = smov 28  }
   0xb   :  { %34 = dma.hbm_to_vmem [thread:$0]  %s19430_s1, 114688, %s29_s30, [#allocation3], %s16782_s16, %s16782_s16, %s16783_s17  }
   0xc   :  { %16779 = dma.done.wait [#allocation3], 114688  }
   0xd   :  { %16780 = vsyncadd [#allocation3], 4294852608  ;;  %v14580_v0 = vld [vmem:[#allocation2 + $0x18c] ss:$28 sps:$4 sm:$0xff]   ;;  %v14586_v4 = vld [vmem:[#allocation2 + $0x154] ss:$28 sps:$4 sm:$0xff]  }
   0xe   :  { %v14582_v1 = vld [vmem:[#allocation2 + $0x50c] ss:$28 sps:$4 sm:$0xff]   ;;  %5778 = vmatprep.subr.bf16.mxu0 %v14580_v0  ;;  %v14588_v5 = vld [vmem:[#allocation2 + $0x4d4] ss:$28 sps:$4 sm:$0xff]   ;;  %v14592_v8 = vld [vmem:[#allocation2 + $0x11c] ss:$28 sps:$4 sm:$0xff]  }
   0xf   :  { %v14584_v2 = vld [vmem:[#allocation2 + $0x188] ss:$28 sps:$4 sm:$0xff]   ;;  %5821 = vmatprep.subr.bf16.mxu1 %v14582_v1  ;;  %v14590_v6 = vld [vmem:[#allocation2 + $0x150] ss:$28 sps:$4 sm:$0xff]   ;;  %v14594_v9 = vld [vmem:[#allocation2 + $0x49c] ss:$28 sps:$4 sm:$0xff]  }
  0x10   :  { %v14585_v3 = vld [vmem:[#allocation2 + $0x508] ss:$28 sps:$4 sm:$0xff]   ;;  %5779 = vmatpush1.bf16.msra.mxu0 %v14584_v2  ;;  %v14591_v7 = vld [vmem:[#allocation2 + $0x4d0] ss:$28 sps:$4 sm:$0xff]   ;;  %v14596_v10 = vld [vmem:[#allocation2 + $0x118] ss:$28 sps:$4 sm:$0xff]  }
  0x11   :  { %5822 = vmatpush1.bf16.msra.mxu1 %v14585_v3  ;;  %5780 = vmatprep.subr.bf16.mxu0 %v14586_v4  ;;  %v14597_v11 = vld [vmem:[#allocation2 + $0x498] ss:$28 sps:$4 sm:$0xff]   ;;  %v14598_v12 = vld [vmem:[#allocation2 + $0xe4] ss:$28 sps:$4 sm:$0xff]   ;;  %v14604_v16 = vld [vmem:[#allocation2 + $0xac] ss:$28 sps:$4 sm:$0xff]  }
  0x12   :  { %5823 = vmatprep.subr.bf16.mxu1 %v14588_v5  ;;  %v14600_v13 = vld [vmem:[#allocation2 + $0x464] ss:$28 sps:$4 sm:$0xff]   ;;  %v14606_v17 = vld [vmem:[#allocation2 + $0x42c] ss:$28 sps:$4 sm:$0xff]   ;;  %v14610_v20 = vld [vmem:[#allocation2 + $0x74] ss:$28 sps:$4 sm:$0xff]  }
  0x13   :  { %v14602_v14 = vld [vmem:[#allocation2 + $0xe0] ss:$28 sps:$4 sm:$0xff]   ;;  %v14608_v18 = vld [vmem:[#allocation2 + $0xa8] ss:$28 sps:$4 sm:$0xff]   ;;  %v14612_v21 = vld [vmem:[#allocation2 + $0x3f4] ss:$28 sps:$4 sm:$0xff]  }
  0x14   :  { %5781 = vmatpush1.bf16.msra.mxu0 %v14590_v6  ;;  %v14603_v15 = vld [vmem:[#allocation2 + $0x460] ss:$28 sps:$4 sm:$0xff]   ;;  %v14609_v19 = vld [vmem:[#allocation2 + $0x428] ss:$28 sps:$4 sm:$0xff]   ;;  %v14614_v22 = vld [vmem:[#allocation2 + $0x70] ss:$28 sps:$4 sm:$0xff]  }
  0x15   :  { %5824 = vmatpush1.bf16.msra.mxu1 %v14591_v7  ;;  %5782 = vmatprep.subr.bf16.mxu0 %v14592_v8  ;;  %v14615_v23 = vld [vmem:[#allocation2 + $0x3f0] ss:$28 sps:$4 sm:$0xff]   ;;  %v14616_v24 = vld [vmem:[#allocation2 + $0x3c] ss:$28 sps:$4 sm:$0xff]   ;;  %v14622_v28 = vld [vmem:[#allocation2 + $0x4] ss:$28 sps:$4 sm:$0xff]  }
  0x16   :  { %5825 = vmatprep.subr.bf16.mxu1 %v14594_v9  ;;  %v14618_v25 = vld [vmem:[#allocation2 + $0x3bc] ss:$28 sps:$4 sm:$0xff]   ;;  %v14624_v29 = vld [vmem:[#allocation2 + $0x384] ss:$28 sps:$4 sm:$0xff]   ;;  %v14628_v32 = vld [vmem:[#allocation2 + $0x34c] ss:$28 sps:$4 sm:$0xff]  }
  0x17   :  { %v14620_v26 = vld [vmem:[#allocation2 + $0x38] ss:$28 sps:$4 sm:$0xff]   ;;  %v14626_v30 = vld [vmem:[#allocation2] ss:$28 sps:$4 sm:$0xff]   ;;  %v14630_v33 = vld [vmem:[#allocation2 + $0x6cc] ss:$28 sps:$4 sm:$0xff]  }
  0x18   :  { %5783 = vmatpush1.bf16.msra.mxu0 %v14596_v10  ;;  %v14621_v27 = vld [vmem:[#allocation2 + $0x3b8] ss:$28 sps:$4 sm:$0xff]   ;;  %v14627_v31 = vld [vmem:[#allocation2 + $0x380] ss:$28 sps:$4 sm:$0xff]   ;;  %v14632_v34 = vld [vmem:[#allocation2 + $0x348] ss:$28 sps:$4 sm:$0xff]  }
  0x19   :  { %5826 = vmatpush1.bf16.msra.mxu1 %v14597_v11  ;;  %5784 = vmatprep.subr.bf16.mxu0 %v14598_v12  ;;  %v14633_v35 = vld [vmem:[#allocation2 + $0x6c8] ss:$28 sps:$4 sm:$0xff]   ;;  %v14634_v36 = vld [vmem:[#allocation2 + $0x314] ss:$28 sps:$4 sm:$0xff]   ;;  %v14640_v40 = vld [vmem:[#allocation2 + $0x2dc] ss:$28 sps:$4 sm:$0xff]  }
  0x1a   :  { %5827 = vmatprep.subr.bf16.mxu1 %v14600_v13  ;;  %v14636_v37 = vld [vmem:[#allocation2 + $0x694] ss:$28 sps:$4 sm:$0xff]   ;;  %v14642_v41 = vld [vmem:[#allocation2 + $0x65c] ss:$28 sps:$4 sm:$0xff]   ;;  %v14646_v44 = vld [vmem:[#allocation2 + $0x2a4] ss:$28 sps:$4 sm:$0xff]  }
  0x1b   :  { %v14638_v38 = vld [vmem:[#allocation2 + $0x310] ss:$28 sps:$4 sm:$0xff]   ;;  %v14644_v42 = vld [vmem:[#allocation2 + $0x2d8] ss:$28 sps:$4 sm:$0xff]   ;;  %v14648_v45 = vld [vmem:[#allocation2 + $0x624] ss:$28 sps:$4 sm:$0xff]  }
  0x1c   :  { %5785 = vmatpush1.bf16.msra.mxu0 %v14602_v14  ;;  %v14639_v39 = vld [vmem:[#allocation2 + $0x690] ss:$28 sps:$4 sm:$0xff]   ;;  %v14645_v43 = vld [vmem:[#allocation2 + $0x658] ss:$28 sps:$4 sm:$0xff]   ;;  %v14650_v50 = vld [vmem:[#allocation2 + $0x2a0] ss:$28 sps:$4 sm:$0xff]  }
  0x1d   :  { %5828 = vmatpush1.bf16.msra.mxu1 %v14603_v15  ;;  %5786 = vmatprep.subr.bf16.mxu0 %v14604_v16  ;;  %v62_v46 = vld [vmem:[%s19429_s0 + $0x8] sm:$0xff]  ;;  %v64_v48 = vld [vmem:[%s19429_s0 + $0x18] sm:$0xff]  ;;  %v14658_v58 = vld [vmem:[#allocation2 + $0x234] ss:$28 sps:$4 sm:$0xff]   ;;  %vm16786_vm0 = vmmov 0   ;;  %vm12706_vm1 = vcmask 519168  }
  0x1e   :  { %5829 = vmatprep.subr.bf16.mxu1 %v14606_v17  ;;  %v78_v47 = vld [vmem:[%s19429_s0 + $0x88] sm:$0xff]  ;;  %v80_v49 = vld [vmem:[%s19429_s0 + $0x98] sm:$0xff]  ;;  %v14660_v59 = vld [vmem:[#allocation2 + $0x5b4] ss:$28 sps:$4 sm:$0xff]  }
  0x1f   :  { %v14651_v51 = vld [vmem:[#allocation2 + $0x620] ss:$28 sps:$4 sm:$0xff]   ;;  %v14652_v52 = vld [vmem:[#allocation2 + $0x26c] ss:$28 sps:$4 sm:$0xff]   ;;  %v16877_v53 = vpack.c.bf16 %v78_v47, %v62_v46  ;;  %v16879_v54 = vpack.c.bf16 %v80_v49, %v64_v48  ;;  %v14668_v0 = vld [vmem:[#allocation2 + $0x1f8] ss:$28 sps:$4 sm:$0xff]  }
  0x20   :  { %5787 = vmatpush1.bf16.msra.mxu0 %v14608_v18  ;;  %v14654_v55 = vld [vmem:[#allocation2 + $0x5ec] ss:$28 sps:$4 sm:$0xff]   ;;  %v14664_v62 = vld [vmem:[#allocation2 + $0x1fc] ss:$28 sps:$4 sm:$0xff]   ;;  %v14670_v2 = vld [vmem:[#allocation2 + $0x1c4] ss:$28 sps:$4 sm:$0xff]  }
  0x21   :  { %5830 = vmatpush1.bf16.msra.mxu1 %v14609_v19  ;;  %5788 = vmatprep.subr.bf16.mxu0 %v14610_v20  ;;  %v14656_v56 = vld [vmem:[#allocation2 + $0x268] ss:$28 sps:$4 sm:$0xff]   ;;  %v14662_v60 = vld [vmem:[#allocation2 + $0x230] ss:$28 sps:$4 sm:$0xff]   ;;  %v14666_v63 = vld [vmem:[#allocation2 + $0x57c] ss:$28 sps:$4 sm:$0xff]  }
  0x22   :  { %5831 = vmatprep.subr.bf16.mxu1 %v14612_v21  ;;  %5810 = vmatprep.mubr.bf16.mxu0 %v16877_v53  ;;  %v14657_v57 = vld [vmem:[#allocation2 + $0x5e8] ss:$28 sps:$4 sm:$0xff]   ;;  %v14663_v61 = vld [vmem:[#allocation2 + $0x5b0] ss:$28 sps:$4 sm:$0xff]   ;;  %v14669_v1 = vld [vmem:[#allocation2 + $0x578] ss:$28 sps:$4 sm:$0xff]  }
  0x23   :  { %5853 = vmatprep.mubr.bf16.mxu1 %v16879_v54  ;;  %v14672_v3 = vld [vmem:[#allocation2 + $0x544] ss:$28 sps:$4 sm:$0xff]   ;;  %v63_v8 = vld [vmem:[%s19429_s0 + $0x10] sm:$0xff]  ;;  %v14678_v10 = vld [vmem:[#allocation2 + $0x88c] ss:$28 sps:$4 sm:$0xff]  }
  0x24   :  { %5789 = vmatpush1.bf16.msra.mxu0 %v14614_v22  ;;  %v14674_v4 = vld [vmem:[#allocation2 + $0x1c0] ss:$28 sps:$4 sm:$0xff]   ;;  %v79_v9 = vld [vmem:[%s19429_s0 + $0x90] sm:$0xff]  ;;  %v14681_v11 = vld [vmem:[#allocation2 + $0xc0c] ss:$28 sps:$4 sm:$0xff]  }
  0x25   :  { %5832 = vmatpush1.bf16.msra.mxu1 %v14615_v23  ;;  %5790 = vmatprep.subr.bf16.mxu0 %v14616_v24  ;;  %v14675_v5 = vld [vmem:[#allocation2 + $0x540] ss:$28 sps:$4 sm:$0xff]   ;;  %v16897_v13 = vpack.c.bf16 %v79_v9, %v63_v8  ;;  %v14676_v14 = vld [vmem:[#allocation2 + $0x888] ss:$28 sps:$4 sm:$0xff]   ;;  %v14684_v16 = vld [vmem:[#allocation2 + $0x854] ss:$28 sps:$4 sm:$0xff]  }
  0x26   :  { %5833 = vmatprep.subr.bf16.mxu1 %v14618_v25  ;;  %v61_v6 = vld [vmem:[%s19429_s0] sm:$0xff]  ;;  %v14687_v17 = vld [vmem:[#allocation2 + $0xbd4] ss:$28 sps:$4 sm:$0xff]   ;;  %v14690_v20 = vld [vmem:[#allocation2 + $0x81c] ss:$28 sps:$4 sm:$0xff]  }
  0x27   :  { %v77_v7 = vld [vmem:[%s19429_s0 + $0x80] sm:$0xff]  ;;  %v14682_v18 = vld [vmem:[#allocation2 + $0x850] ss:$28 sps:$4 sm:$0xff]   ;;  %v14693_v21 = vld [vmem:[#allocation2 + $0xb9c] ss:$28 sps:$4 sm:$0xff]  }
  0x28   :  { %5791 = vmatpush1.bf16.msra.mxu0 %v14620_v26  ;;  %v16895_v12 = vpack.c.bf16 %v77_v7, %v61_v6  ;;  %v14679_v15 = vld [vmem:[#allocation2 + $0xc08] ss:$28 sps:$4 sm:$0xff]   ;;  %v14685_v19 = vld [vmem:[#allocation2 + $0xbd0] ss:$28 sps:$4 sm:$0xff]   ;;  %v14688_v22 = vld [vmem:[#allocation2 + $0x818] ss:$28 sps:$4 sm:$0xff]  }
  0x29   :  { %5834 = vmatpush1.bf16.msra.mxu1 %v14621_v27  ;;  %5792 = vmatprep.subr.bf16.mxu0 %v14622_v28  ;;  %v14691_v23 = vld [vmem:[#allocation2 + $0xb98] ss:$28 sps:$4 sm:$0xff]   ;;  %v14696_v24 = vld [vmem:[#allocation2 + $0x7e4] ss:$28 sps:$4 sm:$0xff]   ;;  %v14702_v28 = vld [vmem:[#allocation2 + $0x7ac] ss:$28 sps:$4 sm:$0xff]  }
  0x2a   :  { %5835 = vmatprep.subr.bf16.mxu1 %v14624_v29  ;;  %v14699_v25 = vld [vmem:[#allocation2 + $0xb64] ss:$28 sps:$4 sm:$0xff]   ;;  %v14705_v29 = vld [vmem:[#allocation2 + $0xb2c] ss:$28 sps:$4 sm:$0xff]   ;;  %v84_v46 = vld [vmem:[%s19429_s0 + $0xb8] sm:$0xff] }
  0x2b   :  { %v14694_v26 = vld [vmem:[#allocation2 + $0x7e0] ss:$28 sps:$4 sm:$0xff]   ;;  %v14748_v6 = vld [vmem:[#allocation2 + $0x968] ss:$28 sps:$4 sm:$0xff]   ;;  %v14756_v8 = vld [vmem:[#allocation2 + $0x934] ss:$28 sps:$4 sm:$0xff]  }
  0x2c   :  { %5793 = vmatpush1.bf16.msra.mxu0 %v14626_v30  ;;  %v14697_v27 = vld [vmem:[#allocation2 + $0xb60] ss:$28 sps:$4 sm:$0xff]   ;;  %v14700_v30 = vld [vmem:[#allocation2 + $0x7a8] ss:$28 sps:$4 sm:$0xff]   ;;  %v14759_v9 = vld [vmem:[#allocation2 + $0xcb4] ss:$28 sps:$4 sm:$0xff]  }
  0x2d   :  { %5836 = vmatpush1.bf16.msra.mxu1 %v14627_v31  ;;  %5794 = vmatprep.subr.bf16.mxu0 %v14628_v32  ;;  %v14703_v31 = vld [vmem:[#allocation2 + $0xb28] ss:$28 sps:$4 sm:$0xff]   ;;  %v14708_v32 = vld [vmem:[#allocation2 + $0x774] ss:$28 sps:$4 sm:$0xff]   ;;  %v14718_v48 = vld [vmem:[#allocation2 + $0x700] ss:$28 sps:$4 sm:$0xff]  }
  0x2e   :  { %5837 = vmatprep.subr.bf16.mxu1 %v14630_v33  ;;  %v14711_v33 = vld [vmem:[#allocation2 + $0xaf4] ss:$28 sps:$4 sm:$0xff]   ;;  %v14721_v49 = vld [vmem:[#allocation2 + $0xa80] ss:$28 sps:$4 sm:$0xff]   ;;  %v14751_v7 = vld [vmem:[#allocation2 + $0xce8] ss:$28 sps:$4 sm:$0xff]  }
  0x30   :  { %5795 = vmatpush2.bf16.msra.mxu0 %v14632_v34  ;;  %v14706_v34 = vld [vmem:[#allocation2 + $0x770] ss:$28 sps:$4 sm:$0xff]  }
  0x31   :  { %5838 = vmatpush2.bf16.msra.mxu1 %v14633_v35  ;;  %5796 = vmatprep.subr.bf16.mxu0 %v14634_v36  ;;  %v14709_v35 = vld [vmem:[#allocation2 + $0xaf0] ss:$28 sps:$4 sm:$0xff]   ;;  %v14714_v36 = vld [vmem:[#allocation2 + $0x73c] ss:$28 sps:$4 sm:$0xff]  }
  0x32   :  { %5839 = vmatprep.subr.bf16.mxu1 %v14636_v37  ;;  %v14717_v37 = vld [vmem:[#allocation2 + $0xabc] ss:$28 sps:$4 sm:$0xff]  }
  0x34   :  { %5797 = vmatpush2.bf16.msra.mxu0 %v14638_v38  ;;  %v14712_v38 = vld [vmem:[#allocation2 + $0x738] ss:$28 sps:$4 sm:$0xff]  }
  0x35   :  { %5840 = vmatpush2.bf16.msra.mxu1 %v14639_v39  ;;  %5798 = vmatprep.subr.bf16.mxu0 %v14640_v40  ;;  %v14715_v39 = vld [vmem:[#allocation2 + $0xab8] ss:$28 sps:$4 sm:$0xff]   ;;  %v66_v40 = vld [vmem:[%s19429_s0 + $0x28] sm:$0xff] }
  0x36   :  { %5841 = vmatprep.subr.bf16.mxu1 %v14642_v41  ;;  %v82_v41 = vld [vmem:[%s19429_s0 + $0xa8] sm:$0xff] }
  0x38   :  { %5799 = vmatpush2.bf16.msra.mxu0 %v14644_v42  ;;  %v68_v42 = vld [vmem:[%s19429_s0 + $0x38] sm:$0xff] }
  0x39   :  { %5842 = vmatpush2.bf16.msra.mxu1 %v14645_v43  ;;  %5800 = vmatprep.subr.bf16.mxu0 %v14646_v44  ;;  %v14720_v43 = vld [vmem:[#allocation2 + $0x704] ss:$28 sps:$4 sm:$0xff]   ;;  %v16915_v47 = vpack.c.bf16 %v84_v46, %v68_v42  ;;  %v88_v42 = vld [vmem:[%s19429_s0 + $0xd8] sm:$0xff] }
  0x3a   :  { %5843 = vmatprep.subr.bf16.mxu1 %v14648_v45  ;;  %v14723_v44 = vld [vmem:[#allocation2 + $0xa84] ss:$28 sps:$4 sm:$0xff]   ;;  %v16910_v45 = vpack.c.bf16 %v82_v41, %v66_v40  ;;  %v72_v41 = vld [vmem:[%s19429_s0 + $0x58] sm:$0xff] }
  0x3b   :  { %v16951_v46 = vpack.c.bf16 %v88_v42, %v72_v41  ;;  %v14862_v41 = vld [vmem:[#allocation2 + $0xfc0] ss:$28 sps:$4 sm:$0xff]  }
  0x3c   :  { %5801 = vmatpush2.bf16.msra.mxu0 %v14650_v50  ;;  %v14726_v50 = vld [vmem:[#allocation2 + $0xa4c] ss:$28 sps:$4 sm:$0xff]   ;;  %v14865_v42 = vld [vmem:[#allocation2 + $0x1340] ss:$28 sps:$4 sm:$0xff]  }
  0x3d   :  { %5844 = vmatpush2.bf16.msra.mxu1 %v14651_v51  ;;  %5802 = vmatprep.subr.bf16.mxu0 %v14652_v52  ;;  %v14729_v51 = vld [vmem:[#allocation2 + $0xdcc] ss:$28 sps:$4 sm:$0xff]  }
  0x3e   :  { %5845 = vmatprep.subr.bf16.mxu1 %v14654_v55  ;;  %v14724_v52 = vld [vmem:[#allocation2 + $0xa48] ss:$28 sps:$4 sm:$0xff]  }
  0x3f   :  { %v14727_v55 = vld [vmem:[#allocation2 + $0xdc8] ss:$28 sps:$4 sm:$0xff]  }
  0x40   :  { %5803 = vmatpush2.bf16.msra.mxu0 %v14656_v56  ;;  %v14732_v56 = vld [vmem:[#allocation2 + $0xa14] ss:$28 sps:$4 sm:$0xff]  }
  0x41   :  { %5846 = vmatpush2.bf16.msra.mxu1 %v14657_v57  ;;  %5804 = vmatprep.subr.bf16.mxu0 %v14658_v58  ;;  %v14735_v57 = vld [vmem:[#allocation2 + $0xd94] ss:$28 sps:$4 sm:$0xff]  }
  0x42   :  { %5847 = vmatprep.subr.bf16.mxu1 %v14660_v59  ;;  %v14730_v58 = vld [vmem:[#allocation2 + $0xa10] ss:$28 sps:$4 sm:$0xff]  }
  0x43   :  { %v14733_v59 = vld [vmem:[#allocation2 + $0xd90] ss:$28 sps:$4 sm:$0xff]  }
  0x44   :  { %5805 = vmatpush2.bf16.msra.mxu0 %v14662_v60  ;;  %v14738_v60 = vld [vmem:[#allocation2 + $0x9dc] ss:$28 sps:$4 sm:$0xff]  }
  0x45   :  { %5848 = vmatpush2.bf16.msra.mxu1 %v14663_v61  ;;  %5806 = vmatprep.subr.bf16.mxu0 %v14664_v62  ;;  %v14741_v61 = vld [vmem:[#allocation2 + $0xd5c] ss:$28 sps:$4 sm:$0xff]  }
  0x46   :  { %5849 = vmatprep.subr.bf16.mxu1 %v14666_v63  ;;  %v14736_v62 = vld [vmem:[#allocation2 + $0x9d8] ss:$28 sps:$4 sm:$0xff]  }
  0x47   :  { %v14739_v63 = vld [vmem:[#allocation2 + $0xd58] ss:$28 sps:$4 sm:$0xff]  }
  0x48   :  { %5807 = vmatpush2.bf16.msra.mxu0 %v14668_v0  ;;  %v14744_v0 = vld [vmem:[#allocation2 + $0x9a4] ss:$28 sps:$4 sm:$0xff]  }
  0x49   :  { %5850 = vmatpush2.bf16.msra.mxu1 %v14669_v1  ;;  %5808 = vmatprep.subr.bf16.mxu0 %v14670_v2  ;;  %v14747_v1 = vld [vmem:[#allocation2 + $0xd24] ss:$28 sps:$4 sm:$0xff]  }
  0x4a   :  { %5851 = vmatprep.subr.bf16.mxu1 %v14672_v3  ;;  %v14742_v2 = vld [vmem:[#allocation2 + $0x9a0] ss:$28 sps:$4 sm:$0xff]  }
  0x4b   :  { %v14745_v3 = vld [vmem:[#allocation2 + $0xd20] ss:$28 sps:$4 sm:$0xff]  }
  0x4c   :  { %5809 = vmatpush2.bf16.msra.mxu0 %v14674_v4  ;;  %v14750_v4 = vld [vmem:[#allocation2 + $0x96c] ss:$28 sps:$4 sm:$0xff]  }
  0x4d   :  { %5852 = vmatpush2.bf16.msra.mxu1 %v14675_v5  ;;  %5864 = vmatprep.subr.bf16.mxu0 %v14678_v10  ;;  %v14753_v5 = vld [vmem:[#allocation2 + $0xcec] ss:$28 sps:$4 sm:$0xff]  }
  0x4e   :  { %5907 = vmatprep.subr.bf16.mxu1 %v14681_v11  ;;  %v14754_v10 = vld [vmem:[#allocation2 + $0x930] ss:$28 sps:$4 sm:$0xff]  }
  0x4f   :  { %5811 = vmatmul.mubr.bf16.vlgmr.msra.gmra.mxu0 %v16895_v12  ;;  %v14757_v11 = vld [vmem:[#allocation2 + $0xcb0] ss:$28 sps:$4 sm:$0xff]  }
  0x50   :  { %5854 = vmatmul.mubr.bf16.vlgmr.msra.gmra.mxu1 %v16897_v13  ;;  %5865 = vmatpush1.bf16.msra.mxu0 %v14676_v14  ;;  %v14762_v14 = vld [vmem:[#allocation2 + $0x8fc] ss:$28 sps:$4 sm:$0xff]  }
  0x51   :  { %5908 = vmatpush1.bf16.msra.mxu1 %v14679_v15  ;;  %5866 = vmatprep.subr.bf16.mxu0 %v14684_v16  ;;  %v14765_v15 = vld [vmem:[#allocation2 + $0xc7c] ss:$28 sps:$4 sm:$0xff]  }
  0x52   :  { %5909 = vmatprep.subr.bf16.mxu1 %v14687_v17  ;;  %5896 = vmatprep.mubr.bf16.mxu0 %v16910_v45  ;;  %v14760_v16 = vld [vmem:[#allocation2 + $0x8f8] ss:$28 sps:$4 sm:$0xff]  }
  0x53   :  { %5939 = vmatprep.mubr.bf16.mxu1 %v16915_v47  ;;  %v14763_v17 = vld [vmem:[#allocation2 + $0xc78] ss:$28 sps:$4 sm:$0xff]  }
  0x54   :  { %5867 = vmatpush1.bf16.msra.mxu0 %v14682_v18  ;;  %v14768_v18 = vld [vmem:[#allocation2 + $0x8c4] ss:$28 sps:$4 sm:$0xff]  }
  0x55   :  { %5910 = vmatpush1.bf16.msra.mxu1 %v14685_v19  ;;  %5868 = vmatprep.subr.bf16.mxu0 %v14690_v20  ;;  %v14771_v19 = vld [vmem:[#allocation2 + $0xc44] ss:$28 sps:$4 sm:$0xff]  }
  0x56   :  { %5911 = vmatprep.subr.bf16.mxu1 %v14693_v21  ;;  %v14766_v20 = vld [vmem:[#allocation2 + $0x8c0] ss:$28 sps:$4 sm:$0xff]  }
  0x57   :  { %v14769_v21 = vld [vmem:[#allocation2 + $0xc40] ss:$28 sps:$4 sm:$0xff]  }
  0x58   :  { %5869 = vmatpush1.bf16.msra.mxu0 %v14688_v22  ;;  %v65_v22 = vld [vmem:[%s19429_s0 + $0x20] sm:$0xff] }
  0x59   :  { %5912 = vmatpush1.bf16.msra.mxu1 %v14691_v23  ;;  %5870 = vmatprep.subr.bf16.mxu0 %v14696_v24  ;;  %v81_v23 = vld [vmem:[%s19429_s0 + $0xa0] sm:$0xff]  ;;  %v67_v24 = vld [vmem:[%s19429_s0 + $0x30] sm:$0xff] }
  0x5a   :  { %5913 = vmatprep.subr.bf16.mxu1 %v14699_v25  ;;  %v83_v25 = vld [vmem:[%s19429_s0 + $0xb0] sm:$0xff] }
  0x5c   :  { %5871 = vmatpush1.bf16.msra.mxu0 %v14694_v26  ;;  %v14774_v26 = vld [vmem:[#allocation2 + $0xf8c] ss:$28 sps:$4 sm:$0xff]  }
  0x5d   :  { %5914 = vmatpush1.bf16.msra.mxu1 %v14697_v27  ;;  %5872 = vmatprep.subr.bf16.mxu0 %v14702_v28  ;;  %v14777_v27 = vld [vmem:[#allocation2 + $0x130c] ss:$28 sps:$4 sm:$0xff]   ;;  %v16931_v28 = vpack.c.bf16 %v81_v23, %v65_v22  ;;  %v14838_v22 = vld [vmem:[#allocation2 + $0x10a0] ss:$28 sps:$4 sm:$0xff]  }
  0x5e   :  { %5915 = vmatprep.subr.bf16.mxu1 %v14705_v29  ;;  %v16933_v29 = vpack.c.bf16 %v83_v25, %v67_v24  ;;  %v14841_v23 = vld [vmem:[#allocation2 + $0x1420] ss:$28 sps:$4 sm:$0xff]   ;;  %v14846_v24 = vld [vmem:[#allocation2 + $0x106c] ss:$28 sps:$4 sm:$0xff]  }
  0x5f   :  { %v14849_v25 = vld [vmem:[#allocation2 + $0x13ec] ss:$28 sps:$4 sm:$0xff]  }
  0x60   :  { %5873 = vmatpush1.bf16.msra.mxu0 %v14700_v30  ;;  %v14772_v30 = vld [vmem:[#allocation2 + $0xf88] ss:$28 sps:$4 sm:$0xff]  }
  0x61   :  { %5916 = vmatpush1.bf16.msra.mxu1 %v14703_v31  ;;  %5874 = vmatprep.subr.bf16.mxu0 %v14708_v32  ;;  %v14775_v31 = vld [vmem:[#allocation2 + $0x1308] ss:$28 sps:$4 sm:$0xff]   ;;  %v14780_v32 = vld [vmem:[#allocation2 + $0xf54] ss:$28 sps:$4 sm:$0xff]  }
  0x62   :  { %5917 = vmatprep.subr.bf16.mxu1 %v14711_v33  ;;  %v14783_v33 = vld [vmem:[#allocation2 + $0x12d4] ss:$28 sps:$4 sm:$0xff]  }
  0x64   :  { %5875 = vmatpush1.bf16.msra.mxu0 %v14706_v34  ;;  %v14778_v34 = vld [vmem:[#allocation2 + $0xf50] ss:$28 sps:$4 sm:$0xff]  }
  0x65   :  { %5918 = vmatpush1.bf16.msra.mxu1 %v14709_v35  ;;  %5876 = vmatprep.subr.bf16.mxu0 %v14714_v36  ;;  %v14781_v35 = vld [vmem:[#allocation2 + $0x12d0] ss:$28 sps:$4 sm:$0xff]   ;;  %v14786_v36 = vld [vmem:[#allocation2 + $0xf1c] ss:$28 sps:$4 sm:$0xff]  }
  0x66   :  { %5919 = vmatprep.subr.bf16.mxu1 %v14717_v37  ;;  %v14789_v37 = vld [vmem:[#allocation2 + $0x129c] ss:$28 sps:$4 sm:$0xff]  }
  0x68   :  { %5877 = vmatpush1.bf16.msra.mxu0 %v14712_v38  ;;  %v70_v38 = vld [vmem:[%s19429_s0 + $0x48] sm:$0xff] }
  0x69   :  { %5920 = vmatpush1.bf16.msra.mxu1 %v14715_v39  ;;  %5878 = vmatprep.subr.bf16.mxu0 %v14720_v43  ;;  %v86_v39 = vld [vmem:[%s19429_s0 + $0xc8] sm:$0xff]  ;;  %v14784_v43 = vld [vmem:[#allocation2 + $0xf18] ss:$28 sps:$4 sm:$0xff]  }
  0x6a   :  { %5921 = vmatprep.subr.bf16.mxu1 %v14723_v44  ;;  %v16943_v40 = vpack.c.bf16 %v86_v39, %v70_v38  ;;  %v14787_v44 = vld [vmem:[#allocation2 + $0x1298] ss:$28 sps:$4 sm:$0xff]   ;;  %v14864_v38 = vld [vmem:[#allocation2 + $0xfc4] ss:$28 sps:$4 sm:$0xff]  }
  0x6b   :  { %v14867_v39 = vld [vmem:[#allocation2 + $0x1344] ss:$28 sps:$4 sm:$0xff]  }
  0x6c   :  { %5879 = vmatpush1.bf16.msra.mxu0 %v14718_v48  ;;  %v14792_v48 = vld [vmem:[#allocation2 + $0xee4] ss:$28 sps:$4 sm:$0xff]  }
  0x6d   :  { %5922 = vmatpush1.bf16.msra.mxu1 %v14721_v49  ;;  %5880 = vmatprep.subr.bf16.mxu0 %v14726_v50  ;;  %v14795_v49 = vld [vmem:[#allocation2 + $0x1264] ss:$28 sps:$4 sm:$0xff]  }
  0x6e   :  { %5923 = vmatprep.subr.bf16.mxu1 %v14729_v51  ;;  %v14790_v50 = vld [vmem:[#allocation2 + $0xee0] ss:$28 sps:$4 sm:$0xff]  }
  0x6f   :  { %v14793_v51 = vld [vmem:[#allocation2 + $0x1260] ss:$28 sps:$4 sm:$0xff]  }
  0x70   :  { %5881 = vmatpush2.bf16.msra.mxu0 %v14724_v52  ;;  %v14798_v52 = vld [vmem:[#allocation2 + $0xeac] ss:$28 sps:$4 sm:$0xff]  }
  0x71   :  { %5924 = vmatpush2.bf16.msra.mxu1 %v14727_v55  ;;  %5882 = vmatprep.subr.bf16.mxu0 %v14732_v56  ;;  %v14801_v55 = vld [vmem:[#allocation2 + $0x122c] ss:$28 sps:$4 sm:$0xff]  }
  0x72   :  { %5925 = vmatprep.subr.bf16.mxu1 %v14735_v57  ;;  %v14796_v56 = vld [vmem:[#allocation2 + $0xea8] ss:$28 sps:$4 sm:$0xff]  }
  0x73   :  { %v14799_v57 = vld [vmem:[#allocation2 + $0x1228] ss:$28 sps:$4 sm:$0xff]  }
  0x74   :  { %5883 = vmatpush2.bf16.msra.mxu0 %v14730_v58  ;;  %v14804_v58 = vld [vmem:[#allocation2 + $0xe74] ss:$28 sps:$4 sm:$0xff]  }
  0x75   :  { %5926 = vmatpush2.bf16.msra.mxu1 %v14733_v59  ;;  %5884 = vmatprep.subr.bf16.mxu0 %v14738_v60  ;;  %v14807_v59 = vld [vmem:[#allocation2 + $0x11f4] ss:$28 sps:$4 sm:$0xff]  }
  0x76   :  { %5927 = vmatprep.subr.bf16.mxu1 %v14741_v61  ;;  %v14802_v60 = vld [vmem:[#allocation2 + $0xe70] ss:$28 sps:$4 sm:$0xff]  }
  0x77   :  { %v14805_v61 = vld [vmem:[#allocation2 + $0x11f0] ss:$28 sps:$4 sm:$0xff]  }
  0x78   :  { %5885 = vmatpush2.bf16.msra.mxu0 %v14736_v62  ;;  %v14810_v62 = vld [vmem:[#allocation2 + $0xe3c] ss:$28 sps:$4 sm:$0xff]  }
  0x79   :  { %5928 = vmatpush2.bf16.msra.mxu1 %v14739_v63  ;;  %5886 = vmatprep.subr.bf16.mxu0 %v14744_v0  ;;  %v14813_v63 = vld [vmem:[#allocation2 + $0x11bc] ss:$28 sps:$4 sm:$0xff]  }
  0x7a   :  { %5929 = vmatprep.subr.bf16.mxu1 %v14747_v1  ;;  %v14808_v0 = vld [vmem:[#allocation2 + $0xe38] ss:$28 sps:$4 sm:$0xff]  }
  0x7b   :  { %v14811_v1 = vld [vmem:[#allocation2 + $0x11b8] ss:$28 sps:$4 sm:$0xff]  }
  0x7c   :  { %5887 = vmatpush2.bf16.msra.mxu0 %v14742_v2  ;;  %v14816_v2 = vld [vmem:[#allocation2 + $0xe04] ss:$28 sps:$4 sm:$0xff]  }
  0x7d   :  { %5930 = vmatpush2.bf16.msra.mxu1 %v14745_v3  ;;  %5888 = vmatprep.subr.bf16.mxu0 %v14750_v4  ;;  %v14819_v3 = vld [vmem:[#allocation2 + $0x1184] ss:$28 sps:$4 sm:$0xff]  }
  0x7e   :  { %5931 = vmatprep.subr.bf16.mxu1 %v14753_v5  ;;  %v14814_v4 = vld [vmem:[#allocation2 + $0xe00] ss:$28 sps:$4 sm:$0xff]  }
  0x7f   :  { %v14817_v5 = vld [vmem:[#allocation2 + $0x1180] ss:$28 sps:$4 sm:$0xff]  }
  0x80   :  { %5889 = vmatpush2.bf16.msra.mxu0 %v14748_v6  ;;  %v14822_v6 = vld [vmem:[#allocation2 + $0x114c] ss:$28 sps:$4 sm:$0xff]  }
  0x81   :  { %5932 = vmatpush2.bf16.msra.mxu1 %v14751_v7  ;;  %5890 = vmatprep.subr.bf16.mxu0 %v14756_v8  ;;  %v14825_v7 = vld [vmem:[#allocation2 + $0x14cc] ss:$28 sps:$4 sm:$0xff]  }
  0x82   :  { %5933 = vmatprep.subr.bf16.mxu1 %v14759_v9  ;;  %v14820_v8 = vld [vmem:[#allocation2 + $0x1148] ss:$28 sps:$4 sm:$0xff]  }
  0x83   :  { %v14823_v9 = vld [vmem:[#allocation2 + $0x14c8] ss:$28 sps:$4 sm:$0xff]  }
  0x84   :  { %5891 = vmatpush2.bf16.msra.mxu0 %v14754_v10  ;;  %v14828_v10 = vld [vmem:[#allocation2 + $0x1114] ss:$28 sps:$4 sm:$0xff]  }
  0x85   :  { %5934 = vmatpush2.bf16.msra.mxu1 %v14757_v11  ;;  %5892 = vmatprep.subr.bf16.mxu0 %v14762_v14  ;;  %v14831_v11 = vld [vmem:[#allocation2 + $0x1494] ss:$28 sps:$4 sm:$0xff]  }
  0x86   :  { %5935 = vmatprep.subr.bf16.mxu1 %v14765_v15  ;;  %v14826_v14 = vld [vmem:[#allocation2 + $0x1110] ss:$28 sps:$4 sm:$0xff]  }
  0x87   :  { %v14829_v15 = vld [vmem:[#allocation2 + $0x1490] ss:$28 sps:$4 sm:$0xff]  }
  0x88   :  { %5893 = vmatpush2.bf16.msra.mxu0 %v14760_v16  ;;  %v14834_v16 = vld [vmem:[#allocation2 + $0x10dc] ss:$28 sps:$4 sm:$0xff]  }
  0x89   :  { %5936 = vmatpush2.bf16.msra.mxu1 %v14763_v17  ;;  %5894 = vmatprep.subr.bf16.mxu0 %v14768_v18  ;;  %v14837_v17 = vld [vmem:[#allocation2 + $0x145c] ss:$28 sps:$4 sm:$0xff]  }
  0x8a   :  { %5937 = vmatprep.subr.bf16.mxu1 %v14771_v19  ;;  %v14832_v18 = vld [vmem:[#allocation2 + $0x10d8] ss:$28 sps:$4 sm:$0xff]  }
  0x8b   :  { %v14835_v19 = vld [vmem:[#allocation2 + $0x1458] ss:$28 sps:$4 sm:$0xff]  }
  0x8c   :  { %5895 = vmatpush2.bf16.msra.mxu0 %v14766_v20  ;;  %v14840_v20 = vld [vmem:[#allocation2 + $0x10a4] ss:$28 sps:$4 sm:$0xff]  }
  0x8d   :  { %5938 = vmatpush2.bf16.msra.mxu1 %v14769_v21  ;;  %5950 = vmatprep.subr.bf16.mxu0 %v14774_v26  ;;  %v14843_v21 = vld [vmem:[#allocation2 + $0x1424] ss:$28 sps:$4 sm:$0xff]  }
  0x8e   :  { %5993 = vmatprep.subr.bf16.mxu1 %v14777_v27  ;;  %v14844_v26 = vld [vmem:[#allocation2 + $0x1068] ss:$28 sps:$4 sm:$0xff]  }
  0x8f   :  { %5897 = vmatmul.mubr.bf16.vlgmr.msra.gmra.mxu0 %v16931_v28  ;;  %v14847_v27 = vld [vmem:[#allocation2 + $0x13e8] ss:$28 sps:$4 sm:$0xff]  }
  0x90   :  { %5940 = vmatmul.mubr.bf16.vlgmr.msra.gmra.mxu1 %v16933_v29  ;;  %5951 = vmatpush1.bf16.msra.mxu0 %v14772_v30  ;;  %v14852_v30 = vld [vmem:[#allocation2 + $0x1034] ss:$28 sps:$4 sm:$0xff]  }
  0x91   :  { %5994 = vmatpush1.bf16.msra.mxu1 %v14775_v31  ;;  %5952 = vmatprep.subr.bf16.mxu0 %v14780_v32  ;;  %v14855_v31 = vld [vmem:[#allocation2 + $0x13b4] ss:$28 sps:$4 sm:$0xff]  }
  0x92   :  { %5995 = vmatprep.subr.bf16.mxu1 %v14783_v33  ;;  %5982 = vmatprep.mubr.bf16.mxu0 %v16943_v40  ;;  %v14850_v32 = vld [vmem:[#allocation2 + $0x1030] ss:$28 sps:$4 sm:$0xff]  }
  0x93   :  { %6025 = vmatprep.mubr.bf16.mxu1 %v16951_v46  ;;  %v14853_v33 = vld [vmem:[#allocation2 + $0x13b0] ss:$28 sps:$4 sm:$0xff]  }
  0x94   :  { %5953 = vmatpush1.bf16.msra.mxu0 %v14778_v34  ;;  %v14858_v34 = vld [vmem:[#allocation2 + $0xffc] ss:$28 sps:$4 sm:$0xff]  }
  0x95   :  { %5996 = vmatpush1.bf16.msra.mxu1 %v14781_v35  ;;  %5954 = vmatprep.subr.bf16.mxu0 %v14786_v36  ;;  %v14861_v35 = vld [vmem:[#allocation2 + $0x137c] ss:$28 sps:$4 sm:$0xff]  }
  0x96   :  { %5997 = vmatprep.subr.bf16.mxu1 %v14789_v37  ;;  %v14856_v36 = vld [vmem:[#allocation2 + $0xff8] ss:$28 sps:$4 sm:$0xff]  }
  0x97   :  { %v14859_v37 = vld [vmem:[#allocation2 + $0x1378] ss:$28 sps:$4 sm:$0xff]  }
  0x98   :  { %5955 = vmatpush1.bf16.msra.mxu0 %v14784_v43  ;;  %v69_v43 = vld [vmem:[%s19429_s0 + $0x40] sm:$0xff] }
  0x99   :  { %5998 = vmatpush1.bf16.msra.mxu1 %v14787_v44  ;;  %5956 = vmatprep.subr.bf16.mxu0 %v14792_v48  ;;  %v85_v44 = vld [vmem:[%s19429_s0 + $0xc0] sm:$0xff]  ;;  %v71_v48 = vld [vmem:[%s19429_s0 + $0x50] sm:$0xff] }
  0x9a   :  { %5999 = vmatprep.subr.bf16.mxu1 %v14795_v49  ;;  %v87_v49 = vld [vmem:[%s19429_s0 + $0xd0] sm:$0xff] }
  0x9c   :  { %5957 = vmatpush1.bf16.msra.mxu0 %v14790_v50  ;;  %v14870_v50 = vld [vmem:[#allocation2 + $0x168c] ss:$28 sps:$4 sm:$0xff]  }
  0x9d   :  { %6000 = vmatpush1.bf16.msra.mxu1 %v14793_v51  ;;  %5958 = vmatprep.subr.bf16.mxu0 %v14798_v52  ;;  %v14873_v51 = vld [vmem:[#allocation2 + $0x1a0c] ss:$28 sps:$4 sm:$0xff]  }
  0x9e   :  { %6001 = vmatprep.subr.bf16.mxu1 %v14801_v55  ;;  %v74_v52 = vld [vmem:[%s19429_s0 + $0x68] sm:$0xff] }
  0x9f   :  { %v14868_v55 = vld [vmem:[#allocation2 + $0x1688] ss:$28 sps:$4 sm:$0xff]  }
  0xa0   :  { %5959 = vmatpush1.bf16.msra.mxu0 %v14796_v56  ;;  %v90_v56 = vld [vmem:[%s19429_s0 + $0xe8] sm:$0xff] }
  0xa1   :  { %6002 = vmatpush1.bf16.msra.mxu1 %v14799_v57  ;;  %5960 = vmatprep.subr.bf16.mxu0 %v14804_v58  ;;  %v76_v57 = vld [vmem:[%s19429_s0 + $0x78] sm:$0xff]  ;;  %v16976_v58 = vpack.c.bf16 %v85_v44, %v69_v43 }
  0xa2   :  { %6003 = vmatprep.subr.bf16.mxu1 %v14807_v59  ;;  %v16978_v59 = vpack.c.bf16 %v87_v49, %v71_v48  ;;  %v14928_v43 = vld [vmem:[#allocation2 + $0x17d8] ss:$28 sps:$4 sm:$0xff]   ;;  %v14936_v48 = vld [vmem:[#allocation2 + $0x17a4] ss:$28 sps:$4 sm:$0xff]  }
  0xa3   :  { %v14931_v44 = vld [vmem:[#allocation2 + $0x1b58] ss:$28 sps:$4 sm:$0xff]   ;;  %v14939_v49 = vld [vmem:[#allocation2 + $0x1b24] ss:$28 sps:$4 sm:$0xff]  }
  0xa4   :  { %5961 = vmatpush1.bf16.msra.mxu0 %v14802_v60  ;;  %v92_v60 = vld [vmem:[%s19429_s0 + $0xf8] sm:$0xff] }
  0xa5   :  { %6004 = vmatpush1.bf16.msra.mxu1 %v14805_v61  ;;  %5962 = vmatprep.subr.bf16.mxu0 %v14810_v62  ;;  %v14871_v61 = vld [vmem:[#allocation2 + $0x1a08] ss:$28 sps:$4 sm:$0xff]   ;;  %v14876_v62 = vld [vmem:[#allocation2 + $0x1654] ss:$28 sps:$4 sm:$0xff]  }
  0xa6   :  { %6005 = vmatprep.subr.bf16.mxu1 %v14813_v63  ;;  %v14879_v63 = vld [vmem:[#allocation2 + $0x19d4] ss:$28 sps:$4 sm:$0xff]  }
  0xa8   :  { %5963 = vmatpush1.bf16.msra.mxu0 %v14808_v0  ;;  %v16983_v0 = vpack.c.bf16 %v90_v56, %v74_v52  ;;  %v14942_v52 = vld [vmem:[#allocation2 + $0x176c] ss:$28 sps:$4 sm:$0xff]  }
  0xa9   :  { %6006 = vmatpush1.bf16.msra.mxu1 %v14811_v1  ;;  %5964 = vmatprep.subr.bf16.mxu0 %v14816_v2  ;;  %v16985_v1 = vpack.c.bf16 %v92_v60, %v76_v57  ;;  %v14874_v2 = vld [vmem:[#allocation2 + $0x1650] ss:$28 sps:$4 sm:$0xff]   ;;  %v14940_v56 = vld [vmem:[#allocation2 + $0x1768] ss:$28 sps:$4 sm:$0xff]  }
  0xaa   :  { %6007 = vmatprep.subr.bf16.mxu1 %v14819_v3  ;;  %v14877_v3 = vld [vmem:[#allocation2 + $0x19d0] ss:$28 sps:$4 sm:$0xff]   ;;  %v14943_v57 = vld [vmem:[#allocation2 + $0x1ae8] ss:$28 sps:$4 sm:$0xff]  }
  0xab   :  { %v14948_v60 = vld [vmem:[#allocation2 + $0x1734] ss:$28 sps:$4 sm:$0xff]  }
  0xac   :  { %5965 = vmatpush1.bf16.msra.mxu0 %v14814_v4  ;;  %v14882_v4 = vld [vmem:[#allocation2 + $0x161c] ss:$28 sps:$4 sm:$0xff]  }
  0xad   :  { %6008 = vmatpush1.bf16.msra.mxu1 %v14817_v5  ;;  %5966 = vmatprep.subr.bf16.mxu0 %v14822_v6  ;;  %v14885_v5 = vld [vmem:[#allocation2 + $0x199c] ss:$28 sps:$4 sm:$0xff]  }
  0xae   :  { %6009 = vmatprep.subr.bf16.mxu1 %v14825_v7  ;;  %v14880_v6 = vld [vmem:[#allocation2 + $0x1618] ss:$28 sps:$4 sm:$0xff]  }
  0xaf   :  { %v14883_v7 = vld [vmem:[#allocation2 + $0x1998] ss:$28 sps:$4 sm:$0xff]  }
  0xb0   :  { %5967 = vmatpush2.bf16.msra.mxu0 %v14820_v8  ;;  %v14888_v8 = vld [vmem:[#allocation2 + $0x15e4] ss:$28 sps:$4 sm:$0xff]  }
  0xb1   :  { %6010 = vmatpush2.bf16.msra.mxu1 %v14823_v9  ;;  %5968 = vmatprep.subr.bf16.mxu0 %v14828_v10  ;;  %v14891_v9 = vld [vmem:[#allocation2 + $0x1964] ss:$28 sps:$4 sm:$0xff]  }
  0xb2   :  { %6011 = vmatprep.subr.bf16.mxu1 %v14831_v11  ;;  %v14886_v10 = vld [vmem:[#allocation2 + $0x15e0] ss:$28 sps:$4 sm:$0xff]  }
  0xb3   :  { %v14889_v11 = vld [vmem:[#allocation2 + $0x1960] ss:$28 sps:$4 sm:$0xff]  }
  0xb4   :  { %5969 = vmatpush2.bf16.msra.mxu0 %v14826_v14  ;;  %v14894_v14 = vld [vmem:[#allocation2 + $0x15ac] ss:$28 sps:$4 sm:$0xff]  }
  0xb5   :  { %6012 = vmatpush2.bf16.msra.mxu1 %v14829_v15  ;;  %5970 = vmatprep.subr.bf16.mxu0 %v14834_v16  ;;  %v14897_v15 = vld [vmem:[#allocation2 + $0x192c] ss:$28 sps:$4 sm:$0xff]  }
  0xb6   :  { %6013 = vmatprep.subr.bf16.mxu1 %v14837_v17  ;;  %v14892_v16 = vld [vmem:[#allocation2 + $0x15a8] ss:$28 sps:$4 sm:$0xff]  }
  0xb7   :  { %v14895_v17 = vld [vmem:[#allocation2 + $0x1928] ss:$28 sps:$4 sm:$0xff]  }
  0xb8   :  { %5971 = vmatpush2.bf16.msra.mxu0 %v14832_v18  ;;  %v14900_v18 = vld [vmem:[#allocation2 + $0x1574] ss:$28 sps:$4 sm:$0xff]  }
  0xb9   :  { %6014 = vmatpush2.bf16.msra.mxu1 %v14835_v19  ;;  %5972 = vmatprep.subr.bf16.mxu0 %v14840_v20  ;;  %v14903_v19 = vld [vmem:[#allocation2 + $0x18f4] ss:$28 sps:$4 sm:$0xff]  }
  0xba   :  { %6015 = vmatprep.subr.bf16.mxu1 %v14843_v21  ;;  %v14898_v20 = vld [vmem:[#allocation2 + $0x1570] ss:$28 sps:$4 sm:$0xff]  }
  0xbb   :  { %v14901_v21 = vld [vmem:[#allocation2 + $0x18f0] ss:$28 sps:$4 sm:$0xff]  }
  0xbc   :  { %5973 = vmatpush2.bf16.msra.mxu0 %v14838_v22  ;;  %v14906_v22 = vld [vmem:[#allocation2 + $0x153c] ss:$28 sps:$4 sm:$0xff]  }
  0xbd   :  { %6016 = vmatpush2.bf16.msra.mxu1 %v14841_v23  ;;  %5974 = vmatprep.subr.bf16.mxu0 %v14846_v24  ;;  %v14909_v23 = vld [vmem:[#allocation2 + $0x18bc] ss:$28 sps:$4 sm:$0xff]  }
  0xbe   :  { %6017 = vmatprep.subr.bf16.mxu1 %v14849_v25  ;;  %v14904_v24 = vld [vmem:[#allocation2 + $0x1538] ss:$28 sps:$4 sm:$0xff]  }
  0xbf   :  { %v14907_v25 = vld [vmem:[#allocation2 + $0x18b8] ss:$28 sps:$4 sm:$0xff]  }
  0xc0   :  { %5975 = vmatpush2.bf16.msra.mxu0 %v14844_v26  ;;  %v14912_v26 = vld [vmem:[#allocation2 + $0x1504] ss:$28 sps:$4 sm:$0xff]  }
  0xc1   :  { %6018 = vmatpush2.bf16.msra.mxu1 %v14847_v27  ;;  %5976 = vmatprep.subr.bf16.mxu0 %v14852_v30  ;;  %v14915_v27 = vld [vmem:[#allocation2 + $0x1884] ss:$28 sps:$4 sm:$0xff]  }
  0xc2   :  { %6019 = vmatprep.subr.bf16.mxu1 %v14855_v31  ;;  %v14910_v30 = vld [vmem:[#allocation2 + $0x1500] ss:$28 sps:$4 sm:$0xff]  }
  0xc3   :  { %v14913_v31 = vld [vmem:[#allocation2 + $0x1880] ss:$28 sps:$4 sm:$0xff]  }
  0xc4   :  { %5977 = vmatpush2.bf16.msra.mxu0 %v14850_v32  ;;  %v14918_v32 = vld [vmem:[#allocation2 + $0x184c] ss:$28 sps:$4 sm:$0xff]  }
  0xc5   :  { %6020 = vmatpush2.bf16.msra.mxu1 %v14853_v33  ;;  %5978 = vmatprep.subr.bf16.mxu0 %v14858_v34  ;;  %v14921_v33 = vld [vmem:[#allocation2 + $0x1bcc] ss:$28 sps:$4 sm:$0xff]  }
  0xc6   :  { %6021 = vmatprep.subr.bf16.mxu1 %v14861_v35  ;;  %v14916_v34 = vld [vmem:[#allocation2 + $0x1848] ss:$28 sps:$4 sm:$0xff]  }
  0xc7   :  { %v14919_v35 = vld [vmem:[#allocation2 + $0x1bc8] ss:$28 sps:$4 sm:$0xff]  }
  0xc8   :  { %5979 = vmatpush2.bf16.msra.mxu0 %v14856_v36  ;;  %v14924_v36 = vld [vmem:[#allocation2 + $0x1814] ss:$28 sps:$4 sm:$0xff]  }
  0xc9   :  { %6022 = vmatpush2.bf16.msra.mxu1 %v14859_v37  ;;  %5980 = vmatprep.subr.bf16.mxu0 %v14864_v38  ;;  %v14927_v37 = vld [vmem:[#allocation2 + $0x1b94] ss:$28 sps:$4 sm:$0xff]  }
  0xca   :  { %6023 = vmatprep.subr.bf16.mxu1 %v14867_v39  ;;  %v14922_v38 = vld [vmem:[#allocation2 + $0x1810] ss:$28 sps:$4 sm:$0xff]  }
  0xcb   :  { %v14925_v39 = vld [vmem:[#allocation2 + $0x1b90] ss:$28 sps:$4 sm:$0xff]  }
  0xcc   :  { %5981 = vmatpush2.bf16.msra.mxu0 %v14862_v41  ;;  %v14930_v41 = vld [vmem:[#allocation2 + $0x17dc] ss:$28 sps:$4 sm:$0xff]  }
  0xcd   :  { %6024 = vmatpush2.bf16.msra.mxu1 %v14865_v42  ;;  %6036 = vmatprep.subr.bf16.mxu0 %v14870_v50  ;;  %v14933_v42 = vld [vmem:[#allocation2 + $0x1b5c] ss:$28 sps:$4 sm:$0xff]  }
  0xce   :  { %6079 = vmatprep.subr.bf16.mxu1 %v14873_v51  ;;  %v14934_v50 = vld [vmem:[#allocation2 + $0x17a0] ss:$28 sps:$4 sm:$0xff]  }
  0xcf   :  { %5983 = vmatmul.mubr.bf16.vlgmr.msra.gmra.mxu0 %v16976_v58  ;;  %v14937_v51 = vld [vmem:[#allocation2 + $0x1b20] ss:$28 sps:$4 sm:$0xff]  }
  0xd0   :  { %6026 = vmatmul.mubr.bf16.vlgmr.msra.gmra.mxu1 %v16978_v59  ;;  %6037 = vmatpush1.bf16.msra.mxu0 %v14868_v55  ;;  %v14945_v55 = vld [vmem:[#allocation2 + $0x1aec] ss:$28 sps:$4 sm:$0xff]  }
  0xd1   :  { %6080 = vmatpush1.bf16.msra.mxu1 %v14871_v61  ;;  %6038 = vmatprep.subr.bf16.mxu0 %v14876_v62  ;;  %v14951_v61 = vld [vmem:[#allocation2 + $0x1ab4] ss:$28 sps:$4 sm:$0xff]  }
  0xd2   :  { %6081 = vmatprep.subr.bf16.mxu1 %v14879_v63  ;;  %6068 = vmatprep.mubr.bf16.mxu0 %v16983_v0  ;;  %v14946_v62 = vld [vmem:[#allocation2 + $0x1730] ss:$28 sps:$4 sm:$0xff]  }
  0xd3   :  { %6111 = vmatprep.mubr.bf16.mxu1 %v16985_v1  ;;  %v14949_v63 = vld [vmem:[#allocation2 + $0x1ab0] ss:$28 sps:$4 sm:$0xff]  }
  0xd4   :  { %6039 = vmatpush1.bf16.msra.mxu0 %v14874_v2  ;;  %v1135_v2 = vlaneseq }
  0xd5   :  { %6082 = vmatpush1.bf16.msra.mxu1 %v14877_v3  ;;  %6040 = vmatprep.subr.bf16.mxu0 %v14882_v4  ;;  %v14954_v3 = vld [vmem:[#allocation2 + $0x16fc] ss:$28 sps:$4 sm:$0xff]  }
  0xd6   :  { %6083 = vmatprep.subr.bf16.mxu1 %v14885_v5  ;;  %v14957_v4 = vld [vmem:[#allocation2 + $0x1a7c] ss:$28 sps:$4 sm:$0xff]  }
  0xd7   :  { %v14952_v5 = vld [vmem:[#allocation2 + $0x16f8] ss:$28 sps:$4 sm:$0xff]  }
  0xd8   :  { %6041 = vmatpush1.bf16.msra.mxu0 %v14880_v6  ;;  %v14955_v6 = vld [vmem:[#allocation2 + $0x1a78] ss:$28 sps:$4 sm:$0xff]  }
  0xd9   :  { %6084 = vmatpush1.bf16.msra.mxu1 %v14883_v7  ;;  %6042 = vmatprep.subr.bf16.mxu0 %v14888_v8  ;;  %v16991_v7 = vshrl.u32 %v1135_v2, 7  ;;  %v14960_v8 = vld [vmem:[#allocation2 + $0x16c4] ss:$28 sps:$4 sm:$0xff]   ;;  %v14999_v2 = vld [vmem:[#allocation2 + $0x3fc] ss:$28 sps:$4 sm:$0xff]  }
  0xda   :  { %6085 = vmatprep.subr.bf16.mxu1 %v14891_v9  ;;  %v14963_v9 = vld [vmem:[#allocation2 + $0x1a44] ss:$28 sps:$4 sm:$0xff]  }
  0xdc   :  { %6043 = vmatpush1.bf16.msra.mxu0 %v14886_v10  ;;  %v14958_v10 = vld [vmem:[#allocation2 + $0x16c0] ss:$28 sps:$4 sm:$0xff]  }
  0xdd   :  { %6086 = vmatpush1.bf16.msra.mxu1 %v14889_v11  ;;  %6044 = vmatprep.subr.bf16.mxu0 %v14894_v14  ;;  %v14961_v11 = vld [vmem:[#allocation2 + $0x1a40] ss:$28 sps:$4 sm:$0xff]  }
  0xde   :  { %6087 = vmatprep.subr.bf16.mxu1 %v14897_v15  ;;  %v73_v14 = vld [vmem:[%s19429_s0 + $0x60] sm:$0xff] }
  0xdf   :  { %v89_v15 = vld [vmem:[%s19429_s0 + $0xe0] sm:$0xff] }
  0xe0   :  { %6045 = vmatpush1.bf16.msra.mxu0 %v14892_v16  ;;  %v1133_v16 = vld [vmem:[%s19431_s2] sm:$0xff] }
  0xe1   :  { %6088 = vmatpush1.bf16.msra.mxu1 %v14895_v17  ;;  %6046 = vmatprep.subr.bf16.mxu0 %v14900_v18  ;;  %v75_v17 = vld [vmem:[%s19429_s0 + $0x70] sm:$0xff]  ;;  %v17006_v18 = vsub.s32 0, %v16991_v7 }
  0xe2   :  { %6089 = vmatprep.subr.bf16.mxu1 %v14903_v19  ;;  %v91_v19 = vld [vmem:[%s19429_s0 + $0xf0] sm:$0xff] }
  0xe3   :  { %19451 = vst [vmem:[#allocation5_spill] sm:$0xff] %v17006_v18 }
  0xe4   :  { %6047 = vmatpush1.bf16.msra.mxu0 %v14898_v20  ;;  %v14966_v20 = vld [vmem:[#allocation2 + $0x194] ss:$28 sps:$4 sm:$0xff]  }
  0xe5   :  { %6090 = vmatpush1.bf16.msra.mxu1 %v14901_v21  ;;  %6048 = vmatprep.subr.bf16.mxu0 %v14906_v22  ;;  %v14969_v21 = vld [vmem:[#allocation2 + $0x514] ss:$28 sps:$4 sm:$0xff]   ;;  %v17011_v22 = vpack.c.bf16 %v89_v15, %v73_v14  ;;  %v15006_v14 = vld [vmem:[#allocation2 + $0x8] ss:$28 sps:$4 sm:$0xff]  }
  0xe6   :  { %6091 = vmatprep.subr.bf16.mxu1 %v14909_v23  ;;  %v17013_v23 = vpack.c.bf16 %v91_v19, %v75_v17  ;;  %v15009_v15 = vld [vmem:[#allocation2 + $0x388] ss:$28 sps:$4 sm:$0xff]   ;;  %v15017_v17 = vld [vmem:[#allocation2 + $0x6d4] ss:$28 sps:$4 sm:$0xff]  }
  0xe7   :  { %v15012_v19 = vld [vmem:[#allocation2 + $0x350] ss:$28 sps:$4 sm:$0xff]  }
  0xe8   :  { %6049 = vmatpush1.bf16.msra.mxu0 %v14904_v24  ;;  %v14964_v24 = vld [vmem:[#allocation2 + $0x190] ss:$28 sps:$4 sm:$0xff]  }
  0xe9   :  { %6092 = vmatpush1.bf16.msra.mxu1 %v14907_v25  ;;  %6050 = vmatprep.subr.bf16.mxu0 %v14912_v26  ;;  %v1138_v25 = vrot.slane %v1133_v16, %v17006_v18  ;;  %v14967_v26 = vld [vmem:[#allocation2 + $0x510] ss:$28 sps:$4 sm:$0xff]   ;;  %v15651_v18 = vld [vmem:[#allocation2 + $0x19a8] ss:$28 sps:$4 sm:$0xff]  }
  0xea   :  { %6093 = vmatprep.subr.bf16.mxu1 %v14915_v27  ;;  %v14972_v27 = vld [vmem:[#allocation2 + $0x15c] ss:$28 sps:$4 sm:$0xff]   ;;  %v15014_v16 = vld [vmem:[#allocation2 + $0x354] ss:$28 sps:$4 sm:$0xff]  }
  0xec   :  { %6051 = vmatpush1.bf16.msra.mxu0 %v14910_v30  ;;  %v14975_v30 = vld [vmem:[#allocation2 + $0x4dc] ss:$28 sps:$4 sm:$0xff]  }
  0xed   :  { %6094 = vmatpush1.bf16.msra.mxu1 %v14913_v31  ;;  %6052 = vmatprep.subr.bf16.mxu0 %v14918_v32 }
  0xee   :  { %6095 = vmatprep.subr.bf16.mxu1 %v14921_v33  ;;  %v14970_v33 = vld [vmem:[#allocation2 + $0x158] ss:$28 sps:$4 sm:$0xff]  }
  0xf0   :  { %6053 = vmatpush2.bf16.msra.mxu0 %v14916_v34 }
  0xf1   :  { %6096 = vmatpush2.bf16.msra.mxu1 %v14919_v35  ;;  %6054 = vmatprep.subr.bf16.mxu0 %v14924_v36  ;;  %v14973_v35 = vld [vmem:[#allocation2 + $0x4d8] ss:$28 sps:$4 sm:$0xff]  }
  0xf2   :  { %6097 = vmatprep.subr.bf16.mxu1 %v14927_v37 }
  0xf4   :  { %6055 = vmatpush2.bf16.msra.mxu0 %v14922_v38  ;;  %v14978_v38 = vld [vmem:[#allocation2 + $0x124] ss:$28 sps:$4 sm:$0xff]  }
  0xf5   :  { %6098 = vmatpush2.bf16.msra.mxu1 %v14925_v39  ;;  %6056 = vmatprep.subr.bf16.mxu0 %v14930_v41  ;;  %v14981_v39 = vld [vmem:[#allocation2 + $0x4a4] ss:$28 sps:$4 sm:$0xff]  }
  0xf6   :  { %6099 = vmatprep.subr.bf16.mxu1 %v14933_v42 }
  0xf8   :  { %6057 = vmatpush2.bf16.msra.mxu0 %v14928_v43  ;;  %v14976_v43 = vld [vmem:[#allocation2 + $0x120] ss:$28 sps:$4 sm:$0xff]  }
  0xf9   :  { %6100 = vmatpush2.bf16.msra.mxu1 %v14931_v44  ;;  %6058 = vmatprep.subr.bf16.mxu0 %v14936_v48  ;;  %v14979_v48 = vld [vmem:[#allocation2 + $0x4a0] ss:$28 sps:$4 sm:$0xff]  }
  0xfa   :  { %6101 = vmatprep.subr.bf16.mxu1 %v14939_v49 }
  0xfc   :  { %6059 = vmatpush2.bf16.msra.mxu0 %v14934_v50  ;;  %v14984_v50 = vld [vmem:[#allocation2 + $0xec] ss:$28 sps:$4 sm:$0xff]  }
  0xfd   :  { %6102 = vmatpush2.bf16.msra.mxu1 %v14937_v51  ;;  %6060 = vmatprep.subr.bf16.mxu0 %v14942_v52  ;;  %v14987_v51 = vld [vmem:[#allocation2 + $0x46c] ss:$28 sps:$4 sm:$0xff]  }
  0xfe   :  { %6103 = vmatprep.subr.bf16.mxu1 %v14945_v55  ;;  %v14982_v55 = vld [vmem:[#allocation2 + $0xe8] ss:$28 sps:$4 sm:$0xff]  }
 0x100   :  { %6061 = vmatpush2.bf16.msra.mxu0 %v14940_v56  ;;  %v14985_v56 = vld [vmem:[#allocation2 + $0x468] ss:$28 sps:$4 sm:$0xff]  }
 0x101   :  { %6104 = vmatpush2.bf16.msra.mxu1 %v14943_v57  ;;  %6062 = vmatprep.subr.bf16.mxu0 %v14948_v60  ;;  %v14990_v57 = vld [vmem:[#allocation2 + $0xb4] ss:$28 sps:$4 sm:$0xff]  }
 0x102   :  { %6105 = vmatprep.subr.bf16.mxu1 %v14951_v61  ;;  %v14993_v60 = vld [vmem:[#allocation2 + $0x434] ss:$28 sps:$4 sm:$0xff]  }
 0x103   :  { %v14988_v61 = vld [vmem:[#allocation2 + $0xb0] ss:$28 sps:$4 sm:$0xff]  }
 0x104   :  { %6063 = vmatpush2.bf16.msra.mxu0 %v14946_v62  ;;  %v14991_v62 = vld [vmem:[#allocation2 + $0x430] ss:$28 sps:$4 sm:$0xff]  }
 0x105   :  { %6106 = vmatpush2.bf16.msra.mxu1 %v14949_v63  ;;  %6064 = vmatprep.subr.bf16.mxu0 %v14954_v3  ;;  %v14996_v63 = vld [vmem:[#allocation2 + $0x7c] ss:$28 sps:$4 sm:$0xff]  }
 0x106   :  { %6107 = vmatprep.subr.bf16.mxu1 %v14957_v4  ;;  %v14994_v3 = vld [vmem:[#allocation2 + $0x78] ss:$28 sps:$4 sm:$0xff]  }
 0x107   :  { %v14997_v4 = vld [vmem:[#allocation2 + $0x3f8] ss:$28 sps:$4 sm:$0xff]  }
 0x108   :  { %6065 = vmatpush2.bf16.msra.mxu0 %v14952_v5  ;;  %v15002_v5 = vld [vmem:[#allocation2 + $0x44] ss:$28 sps:$4 sm:$0xff]  }
 0x109   :  { %6108 = vmatpush2.bf16.msra.mxu1 %v14955_v6  ;;  %6066 = vmatprep.subr.bf16.mxu0 %v14960_v8  ;;  %v15005_v6 = vld [vmem:[#allocation2 + $0x3c4] ss:$28 sps:$4 sm:$0xff]  }
 0x10a   :  { %6109 = vmatprep.subr.bf16.mxu1 %v14963_v9  ;;  %v15000_v8 = vld [vmem:[#allocation2 + $0x40] ss:$28 sps:$4 sm:$0xff]  }
 0x10b   :  { %v15003_v9 = vld [vmem:[#allocation2 + $0x3c0] ss:$28 sps:$4 sm:$0xff]  }
 0x10c   :  { %6067 = vmatpush2.bf16.msra.mxu0 %v14958_v10  ;;  %v15008_v10 = vld [vmem:[#allocation2 + $0xc] ss:$28 sps:$4 sm:$0xff]  }
 0x10d   :  { %6110 = vmatpush2.bf16.msra.mxu1 %v14961_v11  ;;  %6122 = vmatprep.subr.bf16.mxu0 %v14966_v20  ;;  %v15011_v11 = vld [vmem:[#allocation2 + $0x38c] ss:$28 sps:$4 sm:$0xff]  }
 0x10e   :  { %6165 = vmatprep.subr.bf16.mxu1 %v14969_v21  ;;  %v15015_v20 = vld [vmem:[#allocation2 + $0x6d0] ss:$28 sps:$4 sm:$0xff]   ;;  %v15020_v21 = vld [vmem:[#allocation2 + $0x31c] ss:$28 sps:$4 sm:$0xff]  }
 0x10f   :  { %v5812_v31 = vpop.f32.mrf.mxu0  ;;  %6069 = vmatmul.mubr.bf16.vlgmr.msra.gmra.mxu0 %v17011_v22 }
 0x110   :  { %v5855_v32 = vpop.f32.mrf.mxu1  ;;  %6112 = vmatmul.mubr.bf16.vlgmr.msra.gmra.mxu1 %v17013_v23  ;;  %v5813_v34 = vadd.f32 %v5812_v31, %v1138_v25  ;;  %6123 = vmatpush1.bf16.msra.mxu0 %v14964_v24  ;;  %v15023_v24 = vld [vmem:[#allocation2 + $0x69c] ss:$28 sps:$4 sm:$0xff]  }
 0x111   :  { %6166 = vmatpush1.bf16.msra.mxu1 %v14967_v26  ;;  %v17018_v36 = vpop.f32.mrf.mxu0  ;;  %6124 = vmatprep.subr.bf16.mxu0 %v14972_v27  ;;  %v15021_v26 = vld [vmem:[#allocation2 + $0x698] ss:$28 sps:$4 sm:$0xff]   ;;  %v15026_v27 = vld [vmem:[#allocation2 + $0x2e4] ss:$28 sps:$4 sm:$0xff]  }
 0x112   :  { %v17020_v37 = vpop.f32.mrf.mxu1  ;;  %6167 = vmatprep.subr.bf16.mxu1 %v14975_v30  ;;  %v17022_v41 = vadd.f32 %v5855_v32, %v5813_v34  ;;  %6154 = vmatprep.mubr.bf16.mxu0 %v16877_v53  ;;  %v15029_v30 = vld [vmem:[#allocation2 + $0x664] ss:$28 sps:$4 sm:$0xff]   ;;  %v15035_v34 = vld [vmem:[#allocation2 + $0x62c] ss:$28 sps:$4 sm:$0xff]  }
 0x113   :  { %6197 = vmatprep.mubr.bf16.mxu1 %v16879_v54  ;;  %v5816_v42 = vpop.f32.mrf.mxu0  ;;  %v15024_v31 = vld [vmem:[#allocation2 + $0x2e0] ss:$28 sps:$4 sm:$0xff]  }
 0x114   :  { %v5817_v44 = vadd.f32 %v5816_v42, %v1138_v25  ;;  %6125 = vmatpush1.bf16.msra.mxu0 %v14970_v33  ;;  %v5859_v49 = vpop.f32.mrf.mxu1  ;;  %v15018_v25 = vld [vmem:[#allocation2 + $0x318] ss:$28 sps:$4 sm:$0xff]   ;;  %v15027_v32 = vld [vmem:[#allocation2 + $0x660] ss:$28 sps:$4 sm:$0xff]   ;;  %v15032_v33 = vld [vmem:[#allocation2 + $0x2ac] ss:$28 sps:$4 sm:$0xff]  }
 0x115   :  { %6168 = vmatpush1.bf16.msra.mxu1 %v14973_v35  ;;  %6126 = vmatprep.subr.bf16.mxu0 %v14978_v38  ;;  %v15030_v35 = vld [vmem:[#allocation2 + $0x2a8] ss:$28 sps:$4 sm:$0xff]   ;;  %v15041_v42 = vld [vmem:[#allocation2 + $0x5f4] ss:$28 sps:$4 sm:$0xff]  }
 0x116   :  { %6169 = vmatprep.subr.bf16.mxu1 %v14981_v39  ;;  %v17026_v52 = vadd.f32 %v5859_v49, %v5817_v44  ;;  %v15033_v38 = vld [vmem:[#allocation2 + $0x628] ss:$28 sps:$4 sm:$0xff]   ;;  %v15038_v39 = vld [vmem:[#allocation2 + $0x274] ss:$28 sps:$4 sm:$0xff]   ;;  %v15047_v49 = vld [vmem:[#allocation2 + $0x5bc] ss:$28 sps:$4 sm:$0xff]  }
 0x117   :  { %v15039_v44 = vld [vmem:[#allocation2 + $0x5f0] ss:$28 sps:$4 sm:$0xff]  }
 0x118   :  { %6127 = vmatpush1.bf16.msra.mxu0 %v14976_v43  ;;  %v15036_v43 = vld [vmem:[#allocation2 + $0x270] ss:$28 sps:$4 sm:$0xff]  }
 0x119   :  { %6170 = vmatpush1.bf16.msra.mxu1 %v14979_v48  ;;  %6128 = vmatprep.subr.bf16.mxu0 %v14984_v50  ;;  %v15044_v48 = vld [vmem:[#allocation2 + $0x23c] ss:$28 sps:$4 sm:$0xff]  }
 0x11a   :  { %6171 = vmatprep.subr.bf16.mxu1 %v14987_v51  ;;  %v15042_v50 = vld [vmem:[#allocation2 + $0x238] ss:$28 sps:$4 sm:$0xff]  }
 0x11b   :  { %v15045_v51 = vld [vmem:[#allocation2 + $0x5b8] ss:$28 sps:$4 sm:$0xff]  }
 0x11c   :  { %6129 = vmatpush1.bf16.msra.mxu0 %v14982_v55  ;;  %v15050_v55 = vld [vmem:[#allocation2 + $0x204] ss:$28 sps:$4 sm:$0xff]  }
 0x11d   :  { %6172 = vmatpush1.bf16.msra.mxu1 %v14985_v56  ;;  %6130 = vmatprep.subr.bf16.mxu0 %v14990_v57  ;;  %v15053_v56 = vld [vmem:[#allocation2 + $0x584] ss:$28 sps:$4 sm:$0xff]  }
 0x11e   :  { %6173 = vmatprep.subr.bf16.mxu1 %v14993_v60  ;;  %v15048_v57 = vld [vmem:[#allocation2 + $0x200] ss:$28 sps:$4 sm:$0xff]  }
 0x11f   :  { %v15051_v60 = vld [vmem:[#allocation2 + $0x580] ss:$28 sps:$4 sm:$0xff]  }
 0x120   :  { %6131 = vmatpush1.bf16.msra.mxu0 %v14988_v61  ;;  %v15056_v61 = vld [vmem:[#allocation2 + $0x1cc] ss:$28 sps:$4 sm:$0xff]  }
 0x121   :  { %6174 = vmatpush1.bf16.msra.mxu1 %v14991_v62  ;;  %6132 = vmatprep.subr.bf16.mxu0 %v14996_v63  ;;  %v15059_v62 = vld [vmem:[#allocation2 + $0x54c] ss:$28 sps:$4 sm:$0xff]  }
 0x122   :  { %6175 = vmatprep.subr.bf16.mxu1 %v14999_v2  ;;  %v15054_v63 = vld [vmem:[#allocation2 + $0x1c8] ss:$28 sps:$4 sm:$0xff]  }
 0x123   :  { %v15057_v2 = vld [vmem:[#allocation2 + $0x548] ss:$28 sps:$4 sm:$0xff]  }
 0x124   :  { %6133 = vmatpush1.bf16.msra.mxu0 %v14994_v3  ;;  %v15062_v3 = vld [vmem:[#allocation2 + $0x894] ss:$28 sps:$4 sm:$0xff]  }
 0x125   :  { %6176 = vmatpush1.bf16.msra.mxu1 %v14997_v4  ;;  %6134 = vmatprep.subr.bf16.mxu0 %v15002_v5  ;;  %v15065_v4 = vld [vmem:[#allocation2 + $0xc14] ss:$28 sps:$4 sm:$0xff]  }
 0x126   :  { %6177 = vmatprep.subr.bf16.mxu1 %v15005_v6  ;;  %v15060_v5 = vld [vmem:[#allocation2 + $0x890] ss:$28 sps:$4 sm:$0xff]  }
 0x127   :  { %v15063_v6 = vld [vmem:[#allocation2 + $0xc10] ss:$28 sps:$4 sm:$0xff]  }
 0x128   :  { %6135 = vmatpush1.bf16.msra.mxu0 %v15000_v8  ;;  %v17028_v8 = vpop.f32.mrf.mxu0 }
 0x129   :  { %6178 = vmatpush1.bf16.msra.mxu1 %v15003_v9  ;;  %6136 = vmatprep.subr.bf16.mxu0 %v15008_v10  ;;  %v17030_v9 = vpop.f32.mrf.mxu1  ;;  %v15068_v10 = vld [vmem:[#allocation2 + $0x85c] ss:$28 sps:$4 sm:$0xff]  }
 0x12a   :  { %6179 = vmatprep.subr.bf16.mxu1 %v15011_v11  ;;  %v15071_v11 = vld [vmem:[#allocation2 + $0xbdc] ss:$28 sps:$4 sm:$0xff]  }
 0x12c   :  { %6137 = vmatpush1.bf16.msra.mxu0 %v15006_v14  ;;  %v15066_v14 = vld [vmem:[#allocation2 + $0x858] ss:$28 sps:$4 sm:$0xff]  }
 0x12d   :  { %6180 = vmatpush1.bf16.msra.mxu1 %v15009_v15  ;;  %6138 = vmatprep.subr.bf16.mxu0 %v15014_v16  ;;  %v15069_v15 = vld [vmem:[#allocation2 + $0xbd8] ss:$28 sps:$4 sm:$0xff]  }
 0x12e   :  { %6181 = vmatprep.subr.bf16.mxu1 %v15017_v17 }
 0x130   :  { %6139 = vmatpush2.bf16.msra.mxu0 %v15012_v19 }
 0x131   :  { %6182 = vmatpush2.bf16.msra.mxu1 %v15015_v20  ;;  %6140 = vmatprep.subr.bf16.mxu0 %v15020_v21 }
 0x132   :  { %6183 = vmatprep.subr.bf16.mxu1 %v15023_v24  ;;  %v15074_v24 = vld [vmem:[#allocation2 + $0x824] ss:$28 sps:$4 sm:$0xff]  }
 0x134   :  { %6141 = vmatpush2.bf16.msra.mxu0 %v15018_v25  ;;  %v15077_v25 = vld [vmem:[#allocation2 + $0xba4] ss:$28 sps:$4 sm:$0xff]  }
 0x135   :  { %6184 = vmatpush2.bf16.msra.mxu1 %v15021_v26  ;;  %6142 = vmatprep.subr.bf16.mxu0 %v15026_v27  ;;  %v15072_v27 = vld [vmem:[#allocation2 + $0x820] ss:$28 sps:$4 sm:$0xff]  }
 0x136   :  { %6185 = vmatprep.subr.bf16.mxu1 %v15029_v30  ;;  %v15075_v30 = vld [vmem:[#allocation2 + $0xba0] ss:$28 sps:$4 sm:$0xff]  }
 0x138   :  { %6143 = vmatpush2.bf16.msra.mxu0 %v15024_v31 }
 0x139   :  { %6186 = vmatpush2.bf16.msra.mxu1 %v15027_v32  ;;  %6144 = vmatprep.subr.bf16.mxu0 %v15032_v33  ;;  %v15080_v33 = vld [vmem:[#allocation2 + $0x7ec] ss:$28 sps:$4 sm:$0xff]  }
 0x13a   :  { %6187 = vmatprep.subr.bf16.mxu1 %v15035_v34  ;;  %v15083_v34 = vld [vmem:[#allocation2 + $0xb6c] ss:$28 sps:$4 sm:$0xff]  }
 0x13c   :  { %6145 = vmatpush2.bf16.msra.mxu0 %v15030_v35 }
 0x13d   :  { %6188 = vmatpush2.bf16.msra.mxu1 %v15033_v38  ;;  %6146 = vmatprep.subr.bf16.mxu0 %v15038_v39  ;;  %v15078_v38 = vld [vmem:[#allocation2 + $0x7e8] ss:$28 sps:$4 sm:$0xff]  }
 0x13e   :  { %6189 = vmatprep.subr.bf16.mxu1 %v15041_v42  ;;  %v15081_v39 = vld [vmem:[#allocation2 + $0xb68] ss:$28 sps:$4 sm:$0xff]   ;;  %v15086_v42 = vld [vmem:[#allocation2 + $0x7b4] ss:$28 sps:$4 sm:$0xff]  }
 0x140   :  { %6147 = vmatpush2.bf16.msra.mxu0 %v15036_v43  ;;  %v15089_v43 = vld [vmem:[#allocation2 + $0xb34] ss:$28 sps:$4 sm:$0xff]  }
 0x141   :  { %6190 = vmatpush2.bf16.msra.mxu1 %v15039_v44  ;;  %6148 = vmatprep.subr.bf16.mxu0 %v15044_v48  ;;  %v15087_v44 = vld [vmem:[#allocation2 + $0xb30] ss:$28 sps:$4 sm:$0xff]   ;;  %v15092_v48 = vld [vmem:[#allocation2 + $0x77c] ss:$28 sps:$4 sm:$0xff]  }
 0x142   :  { %6191 = vmatprep.subr.bf16.mxu1 %v15047_v49  ;;  %v15095_v49 = vld [vmem:[#allocation2 + $0xafc] ss:$28 sps:$4 sm:$0xff]  }
 0x144   :  { %6149 = vmatpush2.bf16.msra.mxu0 %v15042_v50  ;;  %v15090_v50 = vld [vmem:[#allocation2 + $0x778] ss:$28 sps:$4 sm:$0xff]  }
 0x145   :  { %6192 = vmatpush2.bf16.msra.mxu1 %v15045_v51  ;;  %6150 = vmatprep.subr.bf16.mxu0 %v15050_v55  ;;  %v15093_v51 = vld [vmem:[#allocation2 + $0xaf8] ss:$28 sps:$4 sm:$0xff]   ;;  %v15098_v55 = vld [vmem:[#allocation2 + $0x744] ss:$28 sps:$4 sm:$0xff]  }
 0x146   :  { %6193 = vmatprep.subr.bf16.mxu1 %v15053_v56  ;;  %v15101_v56 = vld [vmem:[#allocation2 + $0xac4] ss:$28 sps:$4 sm:$0xff]  }
 0x148   :  { %6151 = vmatpush2.bf16.msra.mxu0 %v15048_v57  ;;  %v15096_v57 = vld [vmem:[#allocation2 + $0x740] ss:$28 sps:$4 sm:$0xff]  }
 0x149   :  { %6194 = vmatpush2.bf16.msra.mxu1 %v15051_v60  ;;  %6152 = vmatprep.subr.bf16.mxu0 %v15056_v61  ;;  %v15099_v60 = vld [vmem:[#allocation2 + $0xac0] ss:$28 sps:$4 sm:$0xff]   ;;  %v15104_v61 = vld [vmem:[#allocation2 + $0x70c] ss:$28 sps:$4 sm:$0xff]  }
 0x14a   :  { %6195 = vmatprep.subr.bf16.mxu1 %v15059_v62  ;;  %v15107_v62 = vld [vmem:[#allocation2 + $0xa8c] ss:$28 sps:$4 sm:$0xff]  }
 0x14c   :  { %6153 = vmatpush2.bf16.msra.mxu0 %v15054_v63  ;;  %v15102_v63 = vld [vmem:[#allocation2 + $0x708] ss:$28 sps:$4 sm:$0xff]  }
 0x14d   :  { %6196 = vmatpush2.bf16.msra.mxu1 %v15057_v2  ;;  %6208 = vmatprep.subr.bf16.mxu0 %v15062_v3  ;;  %v15105_v2 = vld [vmem:[#allocation2 + $0xa88] ss:$28 sps:$4 sm:$0xff]   ;;  %v15110_v3 = vld [vmem:[#allocation2 + $0xa54] ss:$28 sps:$4 sm:$0xff]  }
 0x14e   :  { %6251 = vmatprep.subr.bf16.mxu1 %v15065_v4  ;;  %v15113_v4 = vld [vmem:[#allocation2 + $0xdd4] ss:$28 sps:$4 sm:$0xff]  }
 0x14f   :  { %v5898_v16 = vpop.f32.mrf.mxu0  ;;  %6155 = vmatmul.mubr.bf16.vlgmr.msra.gmra.mxu0 %v16895_v12 }
 0x150   :  { %v5941_v17 = vpop.f32.mrf.mxu1  ;;  %6198 = vmatmul.mubr.bf16.vlgmr.msra.gmra.mxu1 %v16897_v13  ;;  %v5899_v19 = vadd.f32 %v5898_v16, %v17022_v41  ;;  %6209 = vmatpush1.bf16.msra.mxu0 %v15060_v5  ;;  %v15108_v5 = vld [vmem:[#allocation2 + $0xa50] ss:$28 sps:$4 sm:$0xff]   ;;  %v15122_v16 = vld [vmem:[#allocation2 + $0x9e4] ss:$28 sps:$4 sm:$0xff]  }
 0x151   :  { %6252 = vmatpush1.bf16.msra.mxu1 %v15063_v6  ;;  %v17035_v20 = vpop.f32.mrf.mxu0  ;;  %6210 = vmatprep.subr.bf16.mxu0 %v15068_v10  ;;  %v15111_v6 = vld [vmem:[#allocation2 + $0xdd0] ss:$28 sps:$4 sm:$0xff]   ;;  %v15116_v10 = vld [vmem:[#allocation2 + $0xa1c] ss:$28 sps:$4 sm:$0xff]  }
 0x152   :  { %v17037_v21 = vpop.f32.mrf.mxu1  ;;  %6253 = vmatprep.subr.bf16.mxu1 %v15071_v11  ;;  %v17039_v26 = vadd.f32 %v5941_v17, %v5899_v19  ;;  %6240 = vmatprep.mubr.bf16.mxu0 %v16910_v45  ;;  %v15119_v11 = vld [vmem:[#allocation2 + $0xd9c] ss:$28 sps:$4 sm:$0xff]   ;;  %v15125_v17 = vld [vmem:[#allocation2 + $0xd64] ss:$28 sps:$4 sm:$0xff]  }
 0x153   :  { %6283 = vmatprep.mubr.bf16.mxu1 %v16915_v47  ;;  %v5902_v31 = vpop.f32.mrf.mxu0  ;;  %v15120_v19 = vld [vmem:[#allocation2 + $0x9e0] ss:$28 sps:$4 sm:$0xff]  }
 0x154   :  { %v5903_v41 = vadd.f32 %v5902_v31, %v17026_v52  ;;  %6211 = vmatpush1.bf16.msra.mxu0 %v15066_v14  ;;  %v5945_v32 = vpop.f32.mrf.mxu1  ;;  %v15084_v52 = vld [vmem:[#allocation2 + $0x7b0] ss:$28 sps:$4 sm:$0xff]   ;;  %v15114_v14 = vld [vmem:[#allocation2 + $0xa18] ss:$28 sps:$4 sm:$0xff]   ;;  %v15129_v31 = vld [vmem:[#allocation2 + $0xd28] ss:$28 sps:$4 sm:$0xff]  }
 0x155   :  { %6254 = vmatpush1.bf16.msra.mxu1 %v15069_v15  ;;  %6212 = vmatprep.subr.bf16.mxu0 %v15074_v24  ;;  %v15117_v15 = vld [vmem:[#allocation2 + $0xd98] ss:$28 sps:$4 sm:$0xff]   ;;  %v15123_v24 = vld [vmem:[#allocation2 + $0xd60] ss:$28 sps:$4 sm:$0xff]  }
 0x156   :  { %6255 = vmatprep.subr.bf16.mxu1 %v15077_v25  ;;  %v17044_v35 = vadd.f32 %v5945_v32, %v5903_v41  ;;  %v15128_v25 = vld [vmem:[#allocation2 + $0x9ac] ss:$28 sps:$4 sm:$0xff]   ;;  %v15134_v41 = vld [vmem:[#allocation2 + $0x974] ss:$28 sps:$4 sm:$0xff]  }
 0x157   :  { %v15137_v32 = vld [vmem:[#allocation2 + $0xcf4] ss:$28 sps:$4 sm:$0xff]  }
 0x158   :  { %6213 = vmatpush1.bf16.msra.mxu0 %v15072_v27  ;;  %v15131_v27 = vld [vmem:[#allocation2 + $0xd2c] ss:$28 sps:$4 sm:$0xff]  }
 0x159   :  { %6256 = vmatpush1.bf16.msra.mxu1 %v15075_v30  ;;  %6214 = vmatprep.subr.bf16.mxu0 %v15080_v33  ;;  %v15126_v30 = vld [vmem:[#allocation2 + $0x9a8] ss:$28 sps:$4 sm:$0xff]   ;;  %v15132_v33 = vld [vmem:[#allocation2 + $0x970] ss:$28 sps:$4 sm:$0xff]  }
 0x15a   :  { %6257 = vmatprep.subr.bf16.mxu1 %v15083_v34  ;;  %v15135_v34 = vld [vmem:[#allocation2 + $0xcf0] ss:$28 sps:$4 sm:$0xff]  }
 0x15c   :  { %6215 = vmatpush1.bf16.msra.mxu0 %v15078_v38  ;;  %v15140_v38 = vld [vmem:[#allocation2 + $0x93c] ss:$28 sps:$4 sm:$0xff]  }
 0x15d   :  { %6258 = vmatpush1.bf16.msra.mxu1 %v15081_v39  ;;  %6216 = vmatprep.subr.bf16.mxu0 %v15086_v42  ;;  %v15143_v39 = vld [vmem:[#allocation2 + $0xcbc] ss:$28 sps:$4 sm:$0xff]  }
 0x15e   :  { %6259 = vmatprep.subr.bf16.mxu1 %v15089_v43  ;;  %v15138_v42 = vld [vmem:[#allocation2 + $0x938] ss:$28 sps:$4 sm:$0xff]  }
 0x15f   :  { %v15141_v43 = vld [vmem:[#allocation2 + $0xcb8] ss:$28 sps:$4 sm:$0xff]  }
 0x160   :  { %6217 = vmatpush1.bf16.msra.mxu0 %v15084_v52  ;;  %v15146_v52 = vld [vmem:[#allocation2 + $0x904] ss:$28 sps:$4 sm:$0xff]  }
 0x161   :  { %6260 = vmatpush1.bf16.msra.mxu1 %v15087_v44  ;;  %6218 = vmatprep.subr.bf16.mxu0 %v15092_v48  ;;  %v15149_v44 = vld [vmem:[#allocation2 + $0xc84] ss:$28 sps:$4 sm:$0xff]  }
 0x162   :  { %6261 = vmatprep.subr.bf16.mxu1 %v15095_v49  ;;  %v15144_v48 = vld [vmem:[#allocation2 + $0x900] ss:$28 sps:$4 sm:$0xff]  }
 0x163   :  { %v15147_v49 = vld [vmem:[#allocation2 + $0xc80] ss:$28 sps:$4 sm:$0xff]  }
 0x164   :  { %6219 = vmatpush1.bf16.msra.mxu0 %v15090_v50  ;;  %v15152_v50 = vld [vmem:[#allocation2 + $0x8cc] ss:$28 sps:$4 sm:$0xff]  }
 0x165   :  { %6262 = vmatpush1.bf16.msra.mxu1 %v15093_v51  ;;  %6220 = vmatprep.subr.bf16.mxu0 %v15098_v55  ;;  %v15155_v51 = vld [vmem:[#allocation2 + $0xc4c] ss:$28 sps:$4 sm:$0xff]  }
 0x166   :  { %6263 = vmatprep.subr.bf16.mxu1 %v15101_v56  ;;  %v15150_v55 = vld [vmem:[#allocation2 + $0x8c8] ss:$28 sps:$4 sm:$0xff]  }
 0x167   :  { %v15153_v56 = vld [vmem:[#allocation2 + $0xc48] ss:$28 sps:$4 sm:$0xff]  }
 0x168   :  { %6221 = vmatpush1.bf16.msra.mxu0 %v15096_v57  ;;  %v15158_v57 = vld [vmem:[#allocation2 + $0xf94] ss:$28 sps:$4 sm:$0xff]  }
 0x169   :  { %6264 = vmatpush1.bf16.msra.mxu1 %v15099_v60  ;;  %6222 = vmatprep.subr.bf16.mxu0 %v15104_v61  ;;  %v15161_v60 = vld [vmem:[#allocation2 + $0x1314] ss:$28 sps:$4 sm:$0xff]  }
 0x16a   :  { %6265 = vmatprep.subr.bf16.mxu1 %v15107_v62  ;;  %v15156_v61 = vld [vmem:[#allocation2 + $0xf90] ss:$28 sps:$4 sm:$0xff]  }
 0x16b   :  { %v15159_v62 = vld [vmem:[#allocation2 + $0x1310] ss:$28 sps:$4 sm:$0xff]  }
 0x16c   :  { %6223 = vmatpush1.bf16.msra.mxu0 %v15102_v63  ;;  %v17046_v63 = vpop.f32.mrf.mxu0 }
 0x16d   :  { %6266 = vmatpush1.bf16.msra.mxu1 %v15105_v2  ;;  %6224 = vmatprep.subr.bf16.mxu0 %v15110_v3  ;;  %v17048_v2 = vpop.f32.mrf.mxu1  ;;  %v15164_v3 = vld [vmem:[#allocation2 + $0xf5c] ss:$28 sps:$4 sm:$0xff]  }
 0x16e   :  { %6267 = vmatprep.subr.bf16.mxu1 %v15113_v4  ;;  %v15167_v4 = vld [vmem:[#allocation2 + $0x12dc] ss:$28 sps:$4 sm:$0xff]  }
 0x170   :  { %6225 = vmatpush2.bf16.msra.mxu0 %v15108_v5  ;;  %v15162_v5 = vld [vmem:[#allocation2 + $0xf58] ss:$28 sps:$4 sm:$0xff]  }
 0x171   :  { %6268 = vmatpush2.bf16.msra.mxu1 %v15111_v6  ;;  %6226 = vmatprep.subr.bf16.mxu0 %v15116_v10  ;;  %v15165_v6 = vld [vmem:[#allocation2 + $0x12d8] ss:$28 sps:$4 sm:$0xff]  }
 0x172   :  { %6269 = vmatprep.subr.bf16.mxu1 %v15119_v11 }
 0x174   :  { %6227 = vmatpush2.bf16.msra.mxu0 %v15114_v14 }
 0x175   :  { %6270 = vmatpush2.bf16.msra.mxu1 %v15117_v15  ;;  %6228 = vmatprep.subr.bf16.mxu0 %v15122_v16 }
 0x176   :  { %6271 = vmatprep.subr.bf16.mxu1 %v15125_v17  ;;  %v15170_v17 = vld [vmem:[#allocation2 + $0xf24] ss:$28 sps:$4 sm:$0xff]  }
 0x178   :  { %6229 = vmatpush2.bf16.msra.mxu0 %v15120_v19  ;;  %v15173_v19 = vld [vmem:[#allocation2 + $0x12a4] ss:$28 sps:$4 sm:$0xff]  }
 0x179   :  { %6272 = vmatpush2.bf16.msra.mxu1 %v15123_v24  ;;  %6230 = vmatprep.subr.bf16.mxu0 %v15128_v25  ;;  %v15168_v25 = vld [vmem:[#allocation2 + $0xf20] ss:$28 sps:$4 sm:$0xff]  }
 0x17a   :  { %6273 = vmatprep.subr.bf16.mxu1 %v15131_v27  ;;  %v15171_v27 = vld [vmem:[#allocation2 + $0x12a0] ss:$28 sps:$4 sm:$0xff]  }
 0x17c   :  { %6231 = vmatpush2.bf16.msra.mxu0 %v15126_v30 }
 0x17d   :  { %6274 = vmatpush2.bf16.msra.mxu1 %v15129_v31  ;;  %6232 = vmatprep.subr.bf16.mxu0 %v15134_v41  ;;  %v15176_v41 = vld [vmem:[#allocation2 + $0xeec] ss:$28 sps:$4 sm:$0xff]  }
 0x17e   :  { %6275 = vmatprep.subr.bf16.mxu1 %v15137_v32  ;;  %v15179_v32 = vld [vmem:[#allocation2 + $0x126c] ss:$28 sps:$4 sm:$0xff]  }
 0x180   :  { %6233 = vmatpush2.bf16.msra.mxu0 %v15132_v33 }
 0x181   :  { %6276 = vmatpush2.bf16.msra.mxu1 %v15135_v34  ;;  %6234 = vmatprep.subr.bf16.mxu0 %v15140_v38  ;;  %v15174_v34 = vld [vmem:[#allocation2 + $0xee8] ss:$28 sps:$4 sm:$0xff]  }
 0x182   :  { %6277 = vmatprep.subr.bf16.mxu1 %v15143_v39  ;;  %v15177_v38 = vld [vmem:[#allocation2 + $0x1268] ss:$28 sps:$4 sm:$0xff]   ;;  %v15182_v39 = vld [vmem:[#allocation2 + $0xeb4] ss:$28 sps:$4 sm:$0xff]  }
 0x184   :  { %6235 = vmatpush2.bf16.msra.mxu0 %v15138_v42  ;;  %v15185_v42 = vld [vmem:[#allocation2 + $0x1234] ss:$28 sps:$4 sm:$0xff]  }
 0x185   :  { %6278 = vmatpush2.bf16.msra.mxu1 %v15141_v43  ;;  %6236 = vmatprep.subr.bf16.mxu0 %v15146_v52  ;;  %v15183_v43 = vld [vmem:[#allocation2 + $0x1230] ss:$28 sps:$4 sm:$0xff]   ;;  %v15188_v52 = vld [vmem:[#allocation2 + $0xe7c] ss:$28 sps:$4 sm:$0xff]  }
 0x186   :  { %6279 = vmatprep.subr.bf16.mxu1 %v15149_v44  ;;  %v15191_v44 = vld [vmem:[#allocation2 + $0x11fc] ss:$28 sps:$4 sm:$0xff]  }
 0x188   :  { %6237 = vmatpush2.bf16.msra.mxu0 %v15144_v48  ;;  %v15186_v48 = vld [vmem:[#allocation2 + $0xe78] ss:$28 sps:$4 sm:$0xff]  }
 0x189   :  { %6280 = vmatpush2.bf16.msra.mxu1 %v15147_v49  ;;  %6238 = vmatprep.subr.bf16.mxu0 %v15152_v50  ;;  %v15189_v49 = vld [vmem:[#allocation2 + $0x11f8] ss:$28 sps:$4 sm:$0xff]   ;;  %v15194_v50 = vld [vmem:[#allocation2 + $0xe44] ss:$28 sps:$4 sm:$0xff]  }
 0x18a   :  { %6281 = vmatprep.subr.bf16.mxu1 %v15155_v51  ;;  %v15197_v51 = vld [vmem:[#allocation2 + $0x11c4] ss:$28 sps:$4 sm:$0xff]  }
 0x18c   :  { %6239 = vmatpush2.bf16.msra.mxu0 %v15150_v55  ;;  %v15192_v55 = vld [vmem:[#allocation2 + $0xe40] ss:$28 sps:$4 sm:$0xff]  }
 0x18d   :  { %6282 = vmatpush2.bf16.msra.mxu1 %v15153_v56  ;;  %6294 = vmatprep.subr.bf16.mxu0 %v15158_v57  ;;  %v15195_v56 = vld [vmem:[#allocation2 + $0x11c0] ss:$28 sps:$4 sm:$0xff]   ;;  %v15200_v57 = vld [vmem:[#allocation2 + $0xe0c] ss:$28 sps:$4 sm:$0xff]  }
 0x18e   :  { %6337 = vmatprep.subr.bf16.mxu1 %v15161_v60  ;;  %v15203_v60 = vld [vmem:[#allocation2 + $0x118c] ss:$28 sps:$4 sm:$0xff]  }
 0x18f   :  { %v5984_v10 = vpop.f32.mrf.mxu0  ;;  %6241 = vmatmul.mubr.bf16.vlgmr.msra.gmra.mxu0 %v16931_v28 }
 0x190   :  { %v6027_v11 = vpop.f32.mrf.mxu1  ;;  %6284 = vmatmul.mubr.bf16.vlgmr.msra.gmra.mxu1 %v16933_v29  ;;  %v5985_v14 = vadd.f32 %v5984_v10, %v17039_v26  ;;  %6295 = vmatpush1.bf16.msra.mxu0 %v15156_v61  ;;  %v15198_v61 = vld [vmem:[#allocation2 + $0xe08] ss:$28 sps:$4 sm:$0xff]   ;;  %v15212_v10 = vld [vmem:[#allocation2 + $0x111c] ss:$28 sps:$4 sm:$0xff]  }
 0x191   :  { %6338 = vmatpush1.bf16.msra.mxu1 %v15159_v62  ;;  %v17053_v15 = vpop.f32.mrf.mxu0  ;;  %6296 = vmatprep.subr.bf16.mxu0 %v15164_v3  ;;  %v15201_v62 = vld [vmem:[#allocation2 + $0x1188] ss:$28 sps:$4 sm:$0xff]   ;;  %v15206_v3 = vld [vmem:[#allocation2 + $0x1154] ss:$28 sps:$4 sm:$0xff]  }
 0x192   :  { %v17055_v16 = vpop.f32.mrf.mxu1  ;;  %6339 = vmatprep.subr.bf16.mxu1 %v15167_v4  ;;  %v17057_v24 = vadd.f32 %v6027_v11, %v5985_v14  ;;  %6326 = vmatprep.mubr.bf16.mxu0 %v16943_v40  ;;  %v15209_v4 = vld [vmem:[#allocation2 + $0x14d4] ss:$28 sps:$4 sm:$0xff]   ;;  %v15215_v11 = vld [vmem:[#allocation2 + $0x149c] ss:$28 sps:$4 sm:$0xff]  }
 0x193   :  { %6369 = vmatprep.mubr.bf16.mxu1 %v16951_v46  ;;  %v5988_v30 = vpop.f32.mrf.mxu0  ;;  %v15210_v14 = vld [vmem:[#allocation2 + $0x1118] ss:$28 sps:$4 sm:$0xff]  }
 0x194   :  { %v5989_v26 = vadd.f32 %v5988_v30, %v17044_v35  ;;  %6297 = vmatpush1.bf16.msra.mxu0 %v15162_v5  ;;  %v6031_v31 = vpop.f32.mrf.mxu1  ;;  %v15180_v35 = vld [vmem:[#allocation2 + $0xeb0] ss:$28 sps:$4 sm:$0xff]   ;;  %v15219_v30 = vld [vmem:[#allocation2 + $0x1460] ss:$28 sps:$4 sm:$0xff]  }
 0x195   :  { %6340 = vmatpush1.bf16.msra.mxu1 %v15165_v6  ;;  %6298 = vmatprep.subr.bf16.mxu0 %v15170_v17  ;;  %v15204_v5 = vld [vmem:[#allocation2 + $0x1150] ss:$28 sps:$4 sm:$0xff]   ;;  %v15213_v17 = vld [vmem:[#allocation2 + $0x1498] ss:$28 sps:$4 sm:$0xff]  }
 0x196   :  { %6341 = vmatprep.subr.bf16.mxu1 %v15173_v19  ;;  %v17062_v33 = vadd.f32 %v6031_v31, %v5989_v26  ;;  %v15207_v6 = vld [vmem:[#allocation2 + $0x14d0] ss:$28 sps:$4 sm:$0xff]   ;;  %v15218_v19 = vld [vmem:[#allocation2 + $0x10e4] ss:$28 sps:$4 sm:$0xff]  }
 0x197   :  { %v15224_v26 = vld [vmem:[#allocation2 + $0x10ac] ss:$28 sps:$4 sm:$0xff]  }
 0x198   :  { %6299 = vmatpush1.bf16.msra.mxu0 %v15168_v25  ;;  %v15221_v25 = vld [vmem:[#allocation2 + $0x1464] ss:$28 sps:$4 sm:$0xff]   ;;  %v15227_v31 = vld [vmem:[#allocation2 + $0x142c] ss:$28 sps:$4 sm:$0xff]  }
 0x199   :  { %6342 = vmatpush1.bf16.msra.mxu1 %v15171_v27  ;;  %6300 = vmatprep.subr.bf16.mxu0 %v15176_v41  ;;  %v15216_v27 = vld [vmem:[#allocation2 + $0x10e0] ss:$28 sps:$4 sm:$0xff]   ;;  %v15222_v41 = vld [vmem:[#allocation2 + $0x10a8] ss:$28 sps:$4 sm:$0xff]  }
 0x19a   :  { %6343 = vmatprep.subr.bf16.mxu1 %v15179_v32  ;;  %v15225_v32 = vld [vmem:[#allocation2 + $0x1428] ss:$28 sps:$4 sm:$0xff]  }
 0x19c   :  { %6301 = vmatpush1.bf16.msra.mxu0 %v15174_v34  ;;  %v15230_v34 = vld [vmem:[#allocation2 + $0x1074] ss:$28 sps:$4 sm:$0xff]  }
 0x19d   :  { %6344 = vmatpush1.bf16.msra.mxu1 %v15177_v38  ;;  %6302 = vmatprep.subr.bf16.mxu0 %v15182_v39  ;;  %v15233_v38 = vld [vmem:[#allocation2 + $0x13f4] ss:$28 sps:$4 sm:$0xff]  }
 0x19e   :  { %6345 = vmatprep.subr.bf16.mxu1 %v15185_v42  ;;  %v15228_v39 = vld [vmem:[#allocation2 + $0x1070] ss:$28 sps:$4 sm:$0xff]  }
 0x19f   :  { %v15231_v42 = vld [vmem:[#allocation2 + $0x13f0] ss:$28 sps:$4 sm:$0xff]  }
 0x1a0   :  { %6303 = vmatpush1.bf16.msra.mxu0 %v15180_v35  ;;  %v15236_v35 = vld [vmem:[#allocation2 + $0x103c] ss:$28 sps:$4 sm:$0xff]  }
 0x1a1   :  { %6346 = vmatpush1.bf16.msra.mxu1 %v15183_v43  ;;  %6304 = vmatprep.subr.bf16.mxu0 %v15188_v52  ;;  %v15239_v43 = vld [vmem:[#allocation2 + $0x13bc] ss:$28 sps:$4 sm:$0xff]  }
 0x1a2   :  { %6347 = vmatprep.subr.bf16.mxu1 %v15191_v44  ;;  %v15234_v52 = vld [vmem:[#allocation2 + $0x1038] ss:$28 sps:$4 sm:$0xff]  }
 0x1a3   :  { %v15237_v44 = vld [vmem:[#allocation2 + $0x13b8] ss:$28 sps:$4 sm:$0xff]  }
 0x1a4   :  { %6305 = vmatpush1.bf16.msra.mxu0 %v15186_v48  ;;  %v15242_v48 = vld [vmem:[#allocation2 + $0x1004] ss:$28 sps:$4 sm:$0xff]  }
 0x1a5   :  { %6348 = vmatpush1.bf16.msra.mxu1 %v15189_v49  ;;  %6306 = vmatprep.subr.bf16.mxu0 %v15194_v50  ;;  %v15245_v49 = vld [vmem:[#allocation2 + $0x1384] ss:$28 sps:$4 sm:$0xff]  }
 0x1a6   :  { %6349 = vmatprep.subr.bf16.mxu1 %v15197_v51  ;;  %v15240_v50 = vld [vmem:[#allocation2 + $0x1000] ss:$28 sps:$4 sm:$0xff]  }
 0x1a7   :  { %v15243_v51 = vld [vmem:[#allocation2 + $0x1380] ss:$28 sps:$4 sm:$0xff]  }
 0x1a8   :  { %6307 = vmatpush1.bf16.msra.mxu0 %v15192_v55  ;;  %v15248_v55 = vld [vmem:[#allocation2 + $0xfcc] ss:$28 sps:$4 sm:$0xff]  }
 0x1a9   :  { %6350 = vmatpush1.bf16.msra.mxu1 %v15195_v56  ;;  %6308 = vmatprep.subr.bf16.mxu0 %v15200_v57  ;;  %v15251_v56 = vld [vmem:[#allocation2 + $0x134c] ss:$28 sps:$4 sm:$0xff]  }
 0x1aa   :  { %6351 = vmatprep.subr.bf16.mxu1 %v15203_v60  ;;  %v15246_v57 = vld [vmem:[#allocation2 + $0xfc8] ss:$28 sps:$4 sm:$0xff]  }
 0x1ab   :  { %v15249_v60 = vld [vmem:[#allocation2 + $0x1348] ss:$28 sps:$4 sm:$0xff]  }
 0x1ac   :  { %6309 = vmatpush1.bf16.msra.mxu0 %v15198_v61  ;;  %v15254_v61 = vld [vmem:[#allocation2 + $0x1694] ss:$28 sps:$4 sm:$0xff]  }
 0x1ad   :  { %6352 = vmatpush1.bf16.msra.mxu1 %v15201_v62  ;;  %6310 = vmatprep.subr.bf16.mxu0 %v15206_v3  ;;  %v15257_v62 = vld [vmem:[#allocation2 + $0x1a14] ss:$28 sps:$4 sm:$0xff]  }
 0x1ae   :  { %6353 = vmatprep.subr.bf16.mxu1 %v15209_v4  ;;  %v15252_v3 = vld [vmem:[#allocation2 + $0x1690] ss:$28 sps:$4 sm:$0xff]  }
 0x1af   :  { %v15255_v4 = vld [vmem:[#allocation2 + $0x1a10] ss:$28 sps:$4 sm:$0xff]  }
 0x1b0   :  { %6311 = vmatpush2.bf16.msra.mxu0 %v15204_v5  ;;  %v17064_v5 = vpop.f32.mrf.mxu0 }
 0x1b1   :  { %6354 = vmatpush2.bf16.msra.mxu1 %v15207_v6  ;;  %6312 = vmatprep.subr.bf16.mxu0 %v15212_v10  ;;  %v17066_v6 = vpop.f32.mrf.mxu1  ;;  %v15260_v10 = vld [vmem:[#allocation2 + $0x165c] ss:$28 sps:$4 sm:$0xff]  }
 0x1b2   :  { %6355 = vmatprep.subr.bf16.mxu1 %v15215_v11  ;;  %v15263_v11 = vld [vmem:[#allocation2 + $0x19dc] ss:$28 sps:$4 sm:$0xff]  }
 0x1b4   :  { %6313 = vmatpush2.bf16.msra.mxu0 %v15210_v14  ;;  %v15258_v14 = vld [vmem:[#allocation2 + $0x1658] ss:$28 sps:$4 sm:$0xff]  }
 0x1b5   :  { %6356 = vmatpush2.bf16.msra.mxu1 %v15213_v17  ;;  %6314 = vmatprep.subr.bf16.mxu0 %v15218_v19  ;;  %v15261_v17 = vld [vmem:[#allocation2 + $0x19d8] ss:$28 sps:$4 sm:$0xff]  }
 0x1b6   :  { %6357 = vmatprep.subr.bf16.mxu1 %v15221_v25 }
 0x1b8   :  { %6315 = vmatpush2.bf16.msra.mxu0 %v15216_v27 }
 0x1b9   :  { %6358 = vmatpush2.bf16.msra.mxu1 %v15219_v30  ;;  %6316 = vmatprep.subr.bf16.mxu0 %v15224_v26 }
 0x1ba   :  { %6359 = vmatprep.subr.bf16.mxu1 %v15227_v31  ;;  %v15266_v31 = vld [vmem:[#allocation2 + $0x1624] ss:$28 sps:$4 sm:$0xff]  }
 0x1bc   :  { %6317 = vmatpush2.bf16.msra.mxu0 %v15222_v41  ;;  %v15269_v41 = vld [vmem:[#allocation2 + $0x19a4] ss:$28 sps:$4 sm:$0xff]  }
 0x1bd   :  { %6360 = vmatpush2.bf16.msra.mxu1 %v15225_v32  ;;  %6318 = vmatprep.subr.bf16.mxu0 %v15230_v34  ;;  %v15264_v34 = vld [vmem:[#allocation2 + $0x1620] ss:$28 sps:$4 sm:$0xff]  }
 0x1be   :  { %6361 = vmatprep.subr.bf16.mxu1 %v15233_v38  ;;  %v15267_v38 = vld [vmem:[#allocation2 + $0x19a0] ss:$28 sps:$4 sm:$0xff]  }
 0x1c0   :  { %6319 = vmatpush2.bf16.msra.mxu0 %v15228_v39 }
 0x1c1   :  { %6362 = vmatpush2.bf16.msra.mxu1 %v15231_v42  ;;  %6320 = vmatprep.subr.bf16.mxu0 %v15236_v35  ;;  %v15272_v35 = vld [vmem:[#allocation2 + $0x15ec] ss:$28 sps:$4 sm:$0xff]  }
 0x1c2   :  { %6363 = vmatprep.subr.bf16.mxu1 %v15239_v43  ;;  %v15275_v43 = vld [vmem:[#allocation2 + $0x196c] ss:$28 sps:$4 sm:$0xff]  }
 0x1c4   :  { %6321 = vmatpush2.bf16.msra.mxu0 %v15234_v52 }
 0x1c5   :  { %6364 = vmatpush2.bf16.msra.mxu1 %v15237_v44  ;;  %6322 = vmatprep.subr.bf16.mxu0 %v15242_v48  ;;  %v15270_v44 = vld [vmem:[#allocation2 + $0x15e8] ss:$28 sps:$4 sm:$0xff]  }
 0x1c6   :  { %6365 = vmatprep.subr.bf16.mxu1 %v15245_v49 }
 0x1c8   :  { %6323 = vmatpush2.bf16.msra.mxu0 %v15240_v50  ;;  %v15273_v50 = vld [vmem:[#allocation2 + $0x1968] ss:$28 sps:$4 sm:$0xff]  }
 0x1c9   :  { %6366 = vmatpush2.bf16.msra.mxu1 %v15243_v51  ;;  %6324 = vmatprep.subr.bf16.mxu0 %v15248_v55  ;;  %v15278_v51 = vld [vmem:[#allocation2 + $0x15b4] ss:$28 sps:$4 sm:$0xff]  }
 0x1ca   :  { %6367 = vmatprep.subr.bf16.mxu1 %v15251_v56  ;;  %v15281_v55 = vld [vmem:[#allocation2 + $0x1934] ss:$28 sps:$4 sm:$0xff]  }
 0x1cc   :  { %6325 = vmatpush2.bf16.msra.mxu0 %v15246_v57  ;;  %v15279_v57 = vld [vmem:[#allocation2 + $0x1930] ss:$28 sps:$4 sm:$0xff]  }
 0x1cd   :  { %6368 = vmatpush2.bf16.msra.mxu1 %v15249_v60  ;;  %6380 = vmatprep.subr.bf16.mxu0 %v15254_v61  ;;  %v15284_v60 = vld [vmem:[#allocation2 + $0x157c] ss:$28 sps:$4 sm:$0xff]  }
 0x1ce   :  { %6423 = vmatprep.subr.bf16.mxu1 %v15257_v62  ;;  %v15287_v61 = vld [vmem:[#allocation2 + $0x18fc] ss:$28 sps:$4 sm:$0xff]  }
 0x1cf   :  { %v6070_v19 = vpop.f32.mrf.mxu0  ;;  %6327 = vmatmul.mubr.bf16.vlgmr.msra.gmra.mxu0 %v16976_v58  ;;  %v15282_v62 = vld [vmem:[#allocation2 + $0x1578] ss:$28 sps:$4 sm:$0xff]  }
 0x1d0   :  { %v6113_v25 = vpop.f32.mrf.mxu1  ;;  %6370 = vmatmul.mubr.bf16.vlgmr.msra.gmra.mxu1 %v16978_v59  ;;  %v6071_v27 = vadd.f32 %v6070_v19, %v17057_v24  ;;  %6381 = vmatpush1.bf16.msra.mxu0 %v15252_v3  ;;  %v15285_v3 = vld [vmem:[#allocation2 + $0x18f8] ss:$28 sps:$4 sm:$0xff]   ;;  %v15299_v19 = vld [vmem:[#allocation2 + $0x188c] ss:$28 sps:$4 sm:$0xff]  }
 0x1d1   :  { %6424 = vmatpush1.bf16.msra.mxu1 %v15255_v4  ;;  %v17071_v30 = vpop.f32.mrf.mxu0  ;;  %6382 = vmatprep.subr.bf16.mxu0 %v15260_v10  ;;  %v15290_v4 = vld [vmem:[#allocation2 + $0x1544] ss:$28 sps:$4 sm:$0xff]  }
 0x1d2   :  { %v17073_v26 = vpop.f32.mrf.mxu1  ;;  %6425 = vmatprep.subr.bf16.mxu1 %v15263_v11  ;;  %v6114_v32 = vadd.f32 %v6113_v25, %v6071_v27  ;;  %6412 = vmatprep.mubr.bf16.mxu0 %v16983_v0  ;;  %v15293_v10 = vld [vmem:[#allocation2 + $0x18c4] ss:$28 sps:$4 sm:$0xff]  }
 0x1d3   :  { %19452 = vst [vmem:[#allocation6_spill] sm:$0xff] %v17073_v26  ;;  %6455 = vmatprep.mubr.bf16.mxu1 %v16985_v1  ;;  %v6074_v39 = vpop.f32.mrf.mxu0  ;;  %v15288_v11 = vld [vmem:[#allocation2 + $0x1540] ss:$28 sps:$4 sm:$0xff]   ;;  %v15294_v25 = vld [vmem:[#allocation2 + $0x1508] ss:$28 sps:$4 sm:$0xff]  }
 0x1d4   :  { %v6075_v24 = vadd.f32 %v6074_v39, %v17062_v33  ;;  %6383 = vmatpush1.bf16.msra.mxu0 %v15258_v14  ;;  %v6117_v42 = vpop.f32.mrf.mxu1  ;;  %v7138_v48 = vmax.f32 %v6114_v32, 0.0  ;;  %v15276_v33 = vld [vmem:[#allocation2 + $0x15b0] ss:$28 sps:$4 sm:$0xff]   ;;  %v15291_v14 = vld [vmem:[#allocation2 + $0x18c0] ss:$28 sps:$4 sm:$0xff]  }
 0x1d5   :  { %6426 = vmatpush1.bf16.msra.mxu1 %v15261_v17  ;;  %6384 = vmatprep.subr.bf16.mxu0 %v15266_v31  ;;  %v15296_v17 = vld [vmem:[#allocation2 + $0x150c] ss:$28 sps:$4 sm:$0xff]   ;;  %v15302_v31 = vld [vmem:[#allocation2 + $0x1854] ss:$28 sps:$4 sm:$0xff]   ;;  %v15311_v39 = vld [vmem:[#allocation2 + $0x1b9c] ss:$28 sps:$4 sm:$0xff]  }
 0x1d6   :  { %6427 = vmatprep.subr.bf16.mxu1 %v15269_v41  ;;  %v6118_v52 = vadd.f32 %v6117_v42, %v6075_v24  ;;  %v15297_v27 = vld [vmem:[#allocation2 + $0x1888] ss:$28 sps:$4 sm:$0xff]   ;;  %v15305_v41 = vld [vmem:[#allocation2 + $0x1bd4] ss:$28 sps:$4 sm:$0xff]   ;;  %v15662_v26 = vld [vmem:[#allocation2 + $0x15bc] ss:$28 sps:$4 sm:$0xff]  }
 0x1d7   :  { %v15300_v32 = vld [vmem:[#allocation2 + $0x1850] ss:$28 sps:$4 sm:$0xff]   ;;  %v15306_v24 = vld [vmem:[#allocation2 + $0x1818] ss:$28 sps:$4 sm:$0xff]  }
 0x1d8   :  { %v7145_v49 = vmax.f32 %v6118_v52, 0.0  ;;  %6385 = vmatpush1.bf16.msra.mxu0 %v15264_v34  ;;  %v15303_v34 = vld [vmem:[#allocation2 + $0x1bd0] ss:$28 sps:$4 sm:$0xff]   ;;  %v15309_v42 = vld [vmem:[#allocation2 + $0x1b98] ss:$28 sps:$4 sm:$0xff]  }
 0x1d9   :  { %6428 = vmatpush1.bf16.msra.mxu1 %v15267_v38  ;;  %6386 = vmatprep.subr.bf16.mxu0 %v15272_v35  ;;  %v15308_v38 = vld [vmem:[#allocation2 + $0x181c] ss:$28 sps:$4 sm:$0xff]   ;;  %v15314_v35 = vld [vmem:[#allocation2 + $0x17e4] ss:$28 sps:$4 sm:$0xff]  }
 0x1da   :  { %6429 = vmatprep.subr.bf16.mxu1 %v15275_v43  ;;  %v17078_v56 = vpack.c.bf16 %v7145_v49, %v7138_v48  ;;  %v15317_v43 = vld [vmem:[#allocation2 + $0x1b64] ss:$28 sps:$4 sm:$0xff]   ;;  %v15320_v48 = vld [vmem:[#allocation2 + $0x17ac] ss:$28 sps:$4 sm:$0xff]  }
 0x1db   :  { %v15312_v52 = vld [vmem:[#allocation2 + $0x17e0] ss:$28 sps:$4 sm:$0xff]   ;;  %v15323_v49 = vld [vmem:[#allocation2 + $0x1b2c] ss:$28 sps:$4 sm:$0xff]  }
 0x1dc   :  { %19453 = vst [vmem:[#allocation7_spill] sm:$0xff] %v17078_v56  ;;  %6387 = vmatpush1.bf16.msra.mxu0 %v15270_v44  ;;  %v15315_v44 = vld [vmem:[#allocation2 + $0x1b60] ss:$28 sps:$4 sm:$0xff]  }
 0x1dd   :  { %6430 = vmatpush1.bf16.msra.mxu1 %v15273_v50  ;;  %6388 = vmatprep.subr.bf16.mxu0 %v15278_v51  ;;  %v15318_v50 = vld [vmem:[#allocation2 + $0x17a8] ss:$28 sps:$4 sm:$0xff]  }
 0x1de   :  { %6431 = vmatprep.subr.bf16.mxu1 %v15281_v55  ;;  %v15321_v51 = vld [vmem:[#allocation2 + $0x1b28] ss:$28 sps:$4 sm:$0xff]   ;;  %v15326_v55 = vld [vmem:[#allocation2 + $0x1774] ss:$28 sps:$4 sm:$0xff]  }
 0x1e0   :  { %6389 = vmatpush1.bf16.msra.mxu0 %v15276_v33  ;;  %v15329_v33 = vld [vmem:[#allocation2 + $0x1af4] ss:$28 sps:$4 sm:$0xff]  }
 0x1e1   :  { %6432 = vmatpush1.bf16.msra.mxu1 %v15279_v57  ;;  %6390 = vmatprep.subr.bf16.mxu0 %v15284_v60  ;;  %v15324_v57 = vld [vmem:[#allocation2 + $0x1770] ss:$28 sps:$4 sm:$0xff]  }
 0x1e2   :  { %6433 = vmatprep.subr.bf16.mxu1 %v15287_v61  ;;  %v15327_v60 = vld [vmem:[#allocation2 + $0x1af0] ss:$28 sps:$4 sm:$0xff]   ;;  %v15332_v61 = vld [vmem:[#allocation2 + $0x173c] ss:$28 sps:$4 sm:$0xff]  }
 0x1e4   :  { %6391 = vmatpush1.bf16.msra.mxu0 %v15282_v62  ;;  %v15335_v62 = vld [vmem:[#allocation2 + $0x1abc] ss:$28 sps:$4 sm:$0xff]  }
 0x1e5   :  { %6434 = vmatpush1.bf16.msra.mxu1 %v15285_v3  ;;  %6392 = vmatprep.subr.bf16.mxu0 %v15290_v4  ;;  %v15330_v3 = vld [vmem:[#allocation2 + $0x1738] ss:$28 sps:$4 sm:$0xff]  }
 0x1e6   :  { %6435 = vmatprep.subr.bf16.mxu1 %v15293_v10  ;;  %v15333_v4 = vld [vmem:[#allocation2 + $0x1ab8] ss:$28 sps:$4 sm:$0xff]   ;;  %v15338_v10 = vld [vmem:[#allocation2 + $0x1704] ss:$28 sps:$4 sm:$0xff]  }
 0x1e8   :  { %6393 = vmatpush1.bf16.msra.mxu0 %v15288_v11  ;;  %v15341_v11 = vld [vmem:[#allocation2 + $0x1a84] ss:$28 sps:$4 sm:$0xff]  }
 0x1e9   :  { %6436 = vmatpush1.bf16.msra.mxu1 %v15291_v14  ;;  %6394 = vmatprep.subr.bf16.mxu0 %v15296_v17  ;;  %v15336_v14 = vld [vmem:[#allocation2 + $0x1700] ss:$28 sps:$4 sm:$0xff]  }
 0x1ea   :  { %6437 = vmatprep.subr.bf16.mxu1 %v15299_v19  ;;  %v15339_v17 = vld [vmem:[#allocation2 + $0x1a80] ss:$28 sps:$4 sm:$0xff]   ;;  %v15344_v19 = vld [vmem:[#allocation2 + $0x16cc] ss:$28 sps:$4 sm:$0xff]  }
 0x1ec   :  { %6395 = vmatpush1.bf16.msra.mxu0 %v15294_v25  ;;  %v15347_v25 = vld [vmem:[#allocation2 + $0x1a4c] ss:$28 sps:$4 sm:$0xff]  }
 0x1ed   :  { %6438 = vmatpush1.bf16.msra.mxu1 %v15297_v27  ;;  %6396 = vmatprep.subr.bf16.mxu0 %v15302_v31  ;;  %v15342_v27 = vld [vmem:[#allocation2 + $0x16c8] ss:$28 sps:$4 sm:$0xff]  }
 0x1ee   :  { %6439 = vmatprep.subr.bf16.mxu1 %v15305_v41  ;;  %v15345_v31 = vld [vmem:[#allocation2 + $0x1a48] ss:$28 sps:$4 sm:$0xff]   ;;  %v17081_v41 = vsub.s32 2, %v16991_v7 }
 0x1f0   :  { %6397 = vmatpush2.bf16.msra.mxu0 %v15300_v32  ;;  %19454 = vst [vmem:[#allocation8_spill] sm:$0xff] %v17081_v41  ;;  %v15350_v32 = vld [vmem:[#allocation2 + $0x19c] ss:$28 sps:$4 sm:$0xff]  }
 0x1f1   :  { %6440 = vmatpush2.bf16.msra.mxu1 %v15303_v34  ;;  %6398 = vmatprep.subr.bf16.mxu0 %v15308_v38  ;;  %v15353_v34 = vld [vmem:[#allocation2 + $0x51c] ss:$28 sps:$4 sm:$0xff]  }
 0x1f2   :  { %6441 = vmatprep.subr.bf16.mxu1 %v15311_v39  ;;  %v15348_v38 = vld [vmem:[#allocation2 + $0x198] ss:$28 sps:$4 sm:$0xff]  }
 0x1f3   :  { %v15351_v39 = vld [vmem:[#allocation2 + $0x518] ss:$28 sps:$4 sm:$0xff]  }
 0x1f4   :  { %6399 = vmatpush2.bf16.msra.mxu0 %v15306_v24  ;;  %v16756_v24 = vld [vmem:[%s19431_s2] sm:$0xff] }
 0x1f5   :  { %6442 = vmatpush2.bf16.msra.mxu1 %v15309_v42  ;;  %6400 = vmatprep.subr.bf16.mxu0 %v15314_v35  ;;  %v1146_v42 = vrot.slane %v16756_v24, %v17081_v41  ;;  %v17087_v35 = vpop.f32.mrf.mxu0  ;;  %v15380_v24 = vld [vmem:[#allocation2 + $0x84] ss:$28 sps:$4 sm:$0xff]   ;;  %v15564_v41 = vld [vmem:[#allocation2 + $0xeb8] ss:$28 sps:$4 sm:$0xff]  }
 0x1f6   :  { %6443 = vmatprep.subr.bf16.mxu1 %v15317_v43  ;;  %v17089_v43 = vpop.f32.mrf.mxu1 }
 0x1f7   :  { %19455 = vst [vmem:[#allocation9_spill] sm:$0xff] %v17089_v43  ;;  %v15665_v43 = vld [vmem:[#allocation2 + $0x193c] ss:$28 sps:$4 sm:$0xff]  }
 0x1f8   :  { %6401 = vmatpush2.bf16.msra.mxu0 %v15312_v52  ;;  %v15356_v52 = vld [vmem:[#allocation2 + $0x164] ss:$28 sps:$4 sm:$0xff]  }
 0x1f9   :  { %6444 = vmatpush2.bf16.msra.mxu1 %v15315_v44  ;;  %6402 = vmatprep.subr.bf16.mxu0 %v15320_v48  ;;  %v15359_v44 = vld [vmem:[#allocation2 + $0x4e4] ss:$28 sps:$4 sm:$0xff]  }
 0x1fa   :  { %6445 = vmatprep.subr.bf16.mxu1 %v15323_v49  ;;  %v15354_v48 = vld [vmem:[#allocation2 + $0x160] ss:$28 sps:$4 sm:$0xff]  }
 0x1fb   :  { %v15357_v49 = vld [vmem:[#allocation2 + $0x4e0] ss:$28 sps:$4 sm:$0xff]  }
 0x1fc   :  { %6403 = vmatpush2.bf16.msra.mxu0 %v15318_v50 }
 0x1fd   :  { %6446 = vmatpush2.bf16.msra.mxu1 %v15321_v51  ;;  %6404 = vmatprep.subr.bf16.mxu0 %v15326_v55 }
 0x1fe   :  { %6447 = vmatprep.subr.bf16.mxu1 %v15329_v33 }
 0x200   :  { %6405 = vmatpush2.bf16.msra.mxu0 %v15324_v57 }
 0x201   :  { %6448 = vmatpush2.bf16.msra.mxu1 %v15327_v60  ;;  %6406 = vmatprep.subr.bf16.mxu0 %v15332_v61  ;;  %v15362_v60 = vld [vmem:[#allocation2 + $0x12c] ss:$28 sps:$4 sm:$0xff]  }
 0x202   :  { %6449 = vmatprep.subr.bf16.mxu1 %v15335_v62  ;;  %v15365_v61 = vld [vmem:[#allocation2 + $0x4ac] ss:$28 sps:$4 sm:$0xff]  }
 0x204   :  { %6407 = vmatpush2.bf16.msra.mxu0 %v15330_v3  ;;  %v15360_v3 = vld [vmem:[#allocation2 + $0x128] ss:$28 sps:$4 sm:$0xff]  }
 0x205   :  { %6450 = vmatpush2.bf16.msra.mxu1 %v15333_v4  ;;  %6408 = vmatprep.subr.bf16.mxu0 %v15338_v10  ;;  %v15363_v4 = vld [vmem:[#allocation2 + $0x4a8] ss:$28 sps:$4 sm:$0xff]  }
 0x206   :  { %6451 = vmatprep.subr.bf16.mxu1 %v15341_v11 }
 0x208   :  { %6409 = vmatpush2.bf16.msra.mxu0 %v15336_v14 }
 0x209   :  { %6452 = vmatpush2.bf16.msra.mxu1 %v15339_v17  ;;  %6410 = vmatprep.subr.bf16.mxu0 %v15344_v19  ;;  %v15368_v17 = vld [vmem:[#allocation2 + $0xf4] ss:$28 sps:$4 sm:$0xff]  }
 0x20a   :  { %6453 = vmatprep.subr.bf16.mxu1 %v15347_v25  ;;  %v15371_v19 = vld [vmem:[#allocation2 + $0x474] ss:$28 sps:$4 sm:$0xff]  }
 0x20c   :  { %6411 = vmatpush2.bf16.msra.mxu0 %v15342_v27  ;;  %v15366_v27 = vld [vmem:[#allocation2 + $0xf0] ss:$28 sps:$4 sm:$0xff]  }
 0x20d   :  { %6454 = vmatpush2.bf16.msra.mxu1 %v15345_v31  ;;  %6466 = vmatprep.subr.bf16.mxu0 %v15350_v32  ;;  %v15369_v31 = vld [vmem:[#allocation2 + $0x470] ss:$28 sps:$4 sm:$0xff]   ;;  %v15374_v32 = vld [vmem:[#allocation2 + $0xbc] ss:$28 sps:$4 sm:$0xff]  }
 0x20e   :  { %6509 = vmatprep.subr.bf16.mxu1 %v15353_v34  ;;  %v15377_v34 = vld [vmem:[#allocation2 + $0x43c] ss:$28 sps:$4 sm:$0xff]  }
 0x20f   :  { %v6156_v50 = vpop.f32.mrf.mxu0  ;;  %6413 = vmatmul.mubr.bf16.vlgmr.msra.gmra.mxu0 %v17011_v22 }
 0x210   :  { %v6199_v51 = vpop.f32.mrf.mxu1  ;;  %6456 = vmatmul.mubr.bf16.vlgmr.msra.gmra.mxu1 %v17013_v23  ;;  %v6157_v55 = vadd.f32 %v6156_v50, %v1146_v42  ;;  %6467 = vmatpush1.bf16.msra.mxu0 %v15348_v38  ;;  %v15372_v38 = vld [vmem:[#allocation2 + $0xb8] ss:$28 sps:$4 sm:$0xff]   ;;  %v15384_v50 = vld [vmem:[#allocation2 + $0x48] ss:$28 sps:$4 sm:$0xff]  }
 0x211   :  { %6510 = vmatpush1.bf16.msra.mxu1 %v15351_v39  ;;  %v17093_v33 = vpop.f32.mrf.mxu0  ;;  %6468 = vmatprep.subr.bf16.mxu0 %v15356_v52  ;;  %v15375_v39 = vld [vmem:[#allocation2 + $0x438] ss:$28 sps:$4 sm:$0xff]   ;;  %v15378_v52 = vld [vmem:[#allocation2 + $0x80] ss:$28 sps:$4 sm:$0xff]  }
 0x212   :  { %v17095_v57 = vpop.f32.mrf.mxu1  ;;  %6511 = vmatprep.subr.bf16.mxu1 %v15359_v44  ;;  %v17097_v62 = vadd.f32 %v6199_v51, %v6157_v55  ;;  %6498 = vmatprep.mubr.bf16.mxu0 %v16877_v53  ;;  %v15381_v44 = vld [vmem:[#allocation2 + $0x400] ss:$28 sps:$4 sm:$0xff]   ;;  %v15387_v51 = vld [vmem:[#allocation2 + $0x3c8] ss:$28 sps:$4 sm:$0xff]   ;;  %v15392_v55 = vld [vmem:[#allocation2 + $0x14] ss:$28 sps:$4 sm:$0xff]  }
 0x213   :  { %6541 = vmatprep.mubr.bf16.mxu1 %v16879_v54  ;;  %v6160_v10 = vpop.f32.mrf.mxu0 }
 0x214   :  { %v6161_v11 = vadd.f32 %v6160_v10, %v1146_v42  ;;  %6469 = vmatpush1.bf16.msra.mxu0 %v15354_v48  ;;  %v6203_v14 = vpop.f32.mrf.mxu1  ;;  %v15383_v42 = vld [vmem:[#allocation2 + $0x404] ss:$28 sps:$4 sm:$0xff]   ;;  %v15386_v48 = vld [vmem:[#allocation2 + $0x4c] ss:$28 sps:$4 sm:$0xff]   ;;  %v15401_v10 = vld [vmem:[#allocation2 + $0x6dc] ss:$28 sps:$4 sm:$0xff]  }
 0x215   :  { %6512 = vmatpush1.bf16.msra.mxu1 %v15357_v49  ;;  %6470 = vmatprep.subr.bf16.mxu0 %v15362_v60  ;;  %v15389_v49 = vld [vmem:[#allocation2 + $0x3cc] ss:$28 sps:$4 sm:$0xff]   ;;  %v15395_v60 = vld [vmem:[#allocation2 + $0x394] ss:$28 sps:$4 sm:$0xff]  }
 0x216   :  { %6513 = vmatprep.subr.bf16.mxu1 %v15365_v61  ;;  %v17101_v25 = vadd.f32 %v6203_v14, %v6161_v11  ;;  %v15390_v61 = vld [vmem:[#allocation2 + $0x10] ss:$28 sps:$4 sm:$0xff]   ;;  %v15396_v11 = vld [vmem:[#allocation2 + $0x358] ss:$28 sps:$4 sm:$0xff]  }
 0x217   :  { %v15399_v14 = vld [vmem:[#allocation2 + $0x6d8] ss:$28 sps:$4 sm:$0xff]  }
 0x218   :  { %6471 = vmatpush1.bf16.msra.mxu0 %v15360_v3  ;;  %v15393_v3 = vld [vmem:[#allocation2 + $0x390] ss:$28 sps:$4 sm:$0xff]  }
 0x219   :  { %6514 = vmatpush1.bf16.msra.mxu1 %v15363_v4  ;;  %6472 = vmatprep.subr.bf16.mxu0 %v15368_v17  ;;  %v15398_v4 = vld [vmem:[#allocation2 + $0x35c] ss:$28 sps:$4 sm:$0xff]   ;;  %v15404_v17 = vld [vmem:[#allocation2 + $0x324] ss:$28 sps:$4 sm:$0xff]  }
 0x21a   :  { %6515 = vmatprep.subr.bf16.mxu1 %v15371_v19  ;;  %v15407_v19 = vld [vmem:[#allocation2 + $0x6a4] ss:$28 sps:$4 sm:$0xff]  }
 0x21c   :  { %6473 = vmatpush1.bf16.msra.mxu0 %v15366_v27  ;;  %v15402_v27 = vld [vmem:[#allocation2 + $0x320] ss:$28 sps:$4 sm:$0xff]  }
 0x21d   :  { %6516 = vmatpush1.bf16.msra.mxu1 %v15369_v31  ;;  %6474 = vmatprep.subr.bf16.mxu0 %v15374_v32  ;;  %v15405_v31 = vld [vmem:[#allocation2 + $0x6a0] ss:$28 sps:$4 sm:$0xff]   ;;  %v15410_v32 = vld [vmem:[#allocation2 + $0x2ec] ss:$28 sps:$4 sm:$0xff]  }
 0x21e   :  { %6517 = vmatprep.subr.bf16.mxu1 %v15377_v34  ;;  %v15413_v34 = vld [vmem:[#allocation2 + $0x66c] ss:$28 sps:$4 sm:$0xff]  }
 0x220   :  { %6475 = vmatpush1.bf16.msra.mxu0 %v15372_v38  ;;  %v15408_v38 = vld [vmem:[#allocation2 + $0x2e8] ss:$28 sps:$4 sm:$0xff]  }
 0x221   :  { %6518 = vmatpush1.bf16.msra.mxu1 %v15375_v39  ;;  %6476 = vmatprep.subr.bf16.mxu0 %v15380_v24  ;;  %v15411_v39 = vld [vmem:[#allocation2 + $0x668] ss:$28 sps:$4 sm:$0xff]   ;;  %v15416_v24 = vld [vmem:[#allocation2 + $0x2b4] ss:$28 sps:$4 sm:$0xff]  }
 0x222   :  { %6519 = vmatprep.subr.bf16.mxu1 %v15383_v42  ;;  %v15419_v42 = vld [vmem:[#allocation2 + $0x634] ss:$28 sps:$4 sm:$0xff]  }
 0x224   :  { %6477 = vmatpush1.bf16.msra.mxu0 %v15378_v52  ;;  %v15414_v52 = vld [vmem:[#allocation2 + $0x2b0] ss:$28 sps:$4 sm:$0xff]  }
 0x225   :  { %6520 = vmatpush1.bf16.msra.mxu1 %v15381_v44  ;;  %6478 = vmatprep.subr.bf16.mxu0 %v15386_v48  ;;  %v15417_v44 = vld [vmem:[#allocation2 + $0x630] ss:$28 sps:$4 sm:$0xff]   ;;  %v15422_v48 = vld [vmem:[#allocation2 + $0x27c] ss:$28 sps:$4 sm:$0xff]  }
 0x226   :  { %6521 = vmatprep.subr.bf16.mxu1 %v15389_v49  ;;  %v15425_v49 = vld [vmem:[#allocation2 + $0x5fc] ss:$28 sps:$4 sm:$0xff]  }
 0x228   :  { %6479 = vmatpush1.bf16.msra.mxu0 %v15384_v50  ;;  %v15420_v50 = vld [vmem:[#allocation2 + $0x278] ss:$28 sps:$4 sm:$0xff]  }
 0x229   :  { %6522 = vmatpush1.bf16.msra.mxu1 %v15387_v51  ;;  %6480 = vmatprep.subr.bf16.mxu0 %v15392_v55  ;;  %v15423_v51 = vld [vmem:[#allocation2 + $0x5f8] ss:$28 sps:$4 sm:$0xff]   ;;  %v15428_v55 = vld [vmem:[#allocation2 + $0x244] ss:$28 sps:$4 sm:$0xff]  }
 0x22a   :  { %6523 = vmatprep.subr.bf16.mxu1 %v15395_v60  ;;  %v15431_v60 = vld [vmem:[#allocation2 + $0x5c4] ss:$28 sps:$4 sm:$0xff]  }
 0x22c   :  { %6481 = vmatpush1.bf16.msra.mxu0 %v15390_v61  ;;  %v15426_v61 = vld [vmem:[#allocation2 + $0x240] ss:$28 sps:$4 sm:$0xff]  }
 0x22d   :  { %6524 = vmatpush1.bf16.msra.mxu1 %v15393_v3  ;;  %6482 = vmatprep.subr.bf16.mxu0 %v15398_v4  ;;  %v15429_v3 = vld [vmem:[#allocation2 + $0x5c0] ss:$28 sps:$4 sm:$0xff]   ;;  %v15434_v4 = vld [vmem:[#allocation2 + $0x20c] ss:$28 sps:$4 sm:$0xff]  }
 0x22e   :  { %6525 = vmatprep.subr.bf16.mxu1 %v15401_v10  ;;  %v15437_v10 = vld [vmem:[#allocation2 + $0x58c] ss:$28 sps:$4 sm:$0xff]  }
 0x230   :  { %6483 = vmatpush2.bf16.msra.mxu0 %v15396_v11  ;;  %v15432_v11 = vld [vmem:[#allocation2 + $0x208] ss:$28 sps:$4 sm:$0xff]  }
 0x231   :  { %6526 = vmatpush2.bf16.msra.mxu1 %v15399_v14  ;;  %6484 = vmatprep.subr.bf16.mxu0 %v15404_v17  ;;  %v15435_v14 = vld [vmem:[#allocation2 + $0x588] ss:$28 sps:$4 sm:$0xff]   ;;  %v15440_v17 = vld [vmem:[#allocation2 + $0x1d4] ss:$28 sps:$4 sm:$0xff]  }
 0x232   :  { %6527 = vmatprep.subr.bf16.mxu1 %v15407_v19  ;;  %v15443_v19 = vld [vmem:[#allocation2 + $0x554] ss:$28 sps:$4 sm:$0xff]  }
 0x234   :  { %6485 = vmatpush2.bf16.msra.mxu0 %v15402_v27  ;;  %v15438_v27 = vld [vmem:[#allocation2 + $0x1d0] ss:$28 sps:$4 sm:$0xff]  }
 0x235   :  { %6528 = vmatpush2.bf16.msra.mxu1 %v15405_v31  ;;  %6486 = vmatprep.subr.bf16.mxu0 %v15410_v32  ;;  %v15441_v31 = vld [vmem:[#allocation2 + $0x550] ss:$28 sps:$4 sm:$0xff]   ;;  %v15446_v32 = vld [vmem:[#allocation2 + $0x89c] ss:$28 sps:$4 sm:$0xff]  }
 0x236   :  { %6529 = vmatprep.subr.bf16.mxu1 %v15413_v34  ;;  %v15449_v34 = vld [vmem:[#allocation2 + $0xc1c] ss:$28 sps:$4 sm:$0xff]  }
 0x238   :  { %6487 = vmatpush2.bf16.msra.mxu0 %v15408_v38  ;;  %v15444_v38 = vld [vmem:[#allocation2 + $0x898] ss:$28 sps:$4 sm:$0xff]  }
 0x239   :  { %6530 = vmatpush2.bf16.msra.mxu1 %v15411_v39  ;;  %6488 = vmatprep.subr.bf16.mxu0 %v15416_v24  ;;  %v15447_v39 = vld [vmem:[#allocation2 + $0xc18] ss:$28 sps:$4 sm:$0xff]   ;;  %v17103_v24 = vpop.f32.mrf.mxu0 }
 0x23a   :  { %6531 = vmatprep.subr.bf16.mxu1 %v15419_v42  ;;  %v17105_v42 = vpop.f32.mrf.mxu1 }
 0x23c   :  { %6489 = vmatpush2.bf16.msra.mxu0 %v15414_v52  ;;  %v15452_v52 = vld [vmem:[#allocation2 + $0x864] ss:$28 sps:$4 sm:$0xff]  }
 0x23d   :  { %6532 = vmatpush2.bf16.msra.mxu1 %v15417_v44  ;;  %6490 = vmatprep.subr.bf16.mxu0 %v15422_v48  ;;  %v15455_v44 = vld [vmem:[#allocation2 + $0xbe4] ss:$28 sps:$4 sm:$0xff]  }
 0x23e   :  { %6533 = vmatprep.subr.bf16.mxu1 %v15425_v49  ;;  %v15450_v48 = vld [vmem:[#allocation2 + $0x860] ss:$28 sps:$4 sm:$0xff]  }
 0x23f   :  { %v15453_v49 = vld [vmem:[#allocation2 + $0xbe0] ss:$28 sps:$4 sm:$0xff]  }
 0x240   :  { %6491 = vmatpush2.bf16.msra.mxu0 %v15420_v50 }
 0x241   :  { %6534 = vmatpush2.bf16.msra.mxu1 %v15423_v51  ;;  %6492 = vmatprep.subr.bf16.mxu0 %v15428_v55 }
 0x242   :  { %6535 = vmatprep.subr.bf16.mxu1 %v15431_v60 }
 0x244   :  { %6493 = vmatpush2.bf16.msra.mxu0 %v15426_v61 }
 0x245   :  { %6536 = vmatpush2.bf16.msra.mxu1 %v15429_v3  ;;  %6494 = vmatprep.subr.bf16.mxu0 %v15434_v4  ;;  %v15458_v3 = vld [vmem:[#allocation2 + $0x82c] ss:$28 sps:$4 sm:$0xff]  }
 0x246   :  { %6537 = vmatprep.subr.bf16.mxu1 %v15437_v10  ;;  %v15461_v4 = vld [vmem:[#allocation2 + $0xbac] ss:$28 sps:$4 sm:$0xff]  }
 0x248   :  { %6495 = vmatpush2.bf16.msra.mxu0 %v15432_v11  ;;  %v15456_v11 = vld [vmem:[#allocation2 + $0x828] ss:$28 sps:$4 sm:$0xff]  }
 0x249   :  { %6538 = vmatpush2.bf16.msra.mxu1 %v15435_v14  ;;  %6496 = vmatprep.subr.bf16.mxu0 %v15440_v17  ;;  %v15459_v14 = vld [vmem:[#allocation2 + $0xba8] ss:$28 sps:$4 sm:$0xff]  }
 0x24a   :  { %6539 = vmatprep.subr.bf16.mxu1 %v15443_v19 }
 0x24c   :  { %6497 = vmatpush2.bf16.msra.mxu0 %v15438_v27  ;;  %v15464_v27 = vld [vmem:[#allocation2 + $0x7f4] ss:$28 sps:$4 sm:$0xff]  }
 0x24d   :  { %6540 = vmatpush2.bf16.msra.mxu1 %v15441_v31  ;;  %6552 = vmatprep.subr.bf16.mxu0 %v15446_v32  ;;  %v15467_v31 = vld [vmem:[#allocation2 + $0xb74] ss:$28 sps:$4 sm:$0xff]  }
 0x24e   :  { %6595 = vmatprep.subr.bf16.mxu1 %v15449_v34  ;;  %v15462_v34 = vld [vmem:[#allocation2 + $0x7f0] ss:$28 sps:$4 sm:$0xff]  }
 0x24f   :  { %v6242_v50 = vpop.f32.mrf.mxu0  ;;  %6499 = vmatmul.mubr.bf16.vlgmr.msra.gmra.mxu0 %v16895_v12 }
 0x250   :  { %v6285_v51 = vpop.f32.mrf.mxu1  ;;  %6542 = vmatmul.mubr.bf16.vlgmr.msra.gmra.mxu1 %v16897_v13  ;;  %v6243_v55 = vadd.f32 %v6242_v50, %v17097_v62  ;;  %6553 = vmatpush1.bf16.msra.mxu0 %v15444_v38  ;;  %v15465_v38 = vld [vmem:[#allocation2 + $0xb70] ss:$28 sps:$4 sm:$0xff]   ;;  %v15474_v50 = vld [vmem:[#allocation2 + $0x780] ss:$28 sps:$4 sm:$0xff]  }
 0x251   :  { %6596 = vmatpush1.bf16.msra.mxu1 %v15447_v39  ;;  %v17110_v60 = vpop.f32.mrf.mxu0  ;;  %6554 = vmatprep.subr.bf16.mxu0 %v15452_v52  ;;  %v15470_v39 = vld [vmem:[#allocation2 + $0x7bc] ss:$28 sps:$4 sm:$0xff]  }
 0x252   :  { %v17112_v61 = vpop.f32.mrf.mxu1  ;;  %6597 = vmatprep.subr.bf16.mxu1 %v15455_v44  ;;  %v17114_v10 = vadd.f32 %v6285_v51, %v6243_v55  ;;  %6584 = vmatprep.mubr.bf16.mxu0 %v16910_v45  ;;  %v15473_v52 = vld [vmem:[#allocation2 + $0xb3c] ss:$28 sps:$4 sm:$0xff]   ;;  %v15482_v55 = vld [vmem:[#allocation2 + $0x74c] ss:$28 sps:$4 sm:$0xff]  }
 0x253   :  { %6627 = vmatprep.mubr.bf16.mxu1 %v16915_v47  ;;  %v6246_v17 = vpop.f32.mrf.mxu0  ;;  %v15471_v44 = vld [vmem:[#allocation2 + $0xb38] ss:$28 sps:$4 sm:$0xff]   ;;  %v15477_v51 = vld [vmem:[#allocation2 + $0xb00] ss:$28 sps:$4 sm:$0xff]  }
 0x254   :  { %v6247_v62 = vadd.f32 %v6246_v17, %v17101_v25  ;;  %6555 = vmatpush1.bf16.msra.mxu0 %v15450_v48  ;;  %v6289_v19 = vpop.f32.mrf.mxu1  ;;  %v15468_v25 = vld [vmem:[#allocation2 + $0x7b8] ss:$28 sps:$4 sm:$0xff]   ;;  %v15476_v48 = vld [vmem:[#allocation2 + $0x784] ss:$28 sps:$4 sm:$0xff]  }
 0x255   :  { %6598 = vmatpush1.bf16.msra.mxu1 %v15453_v49  ;;  %6556 = vmatprep.subr.bf16.mxu0 %v15458_v3  ;;  %v15479_v49 = vld [vmem:[#allocation2 + $0xb04] ss:$28 sps:$4 sm:$0xff]   ;;  %v15485_v3 = vld [vmem:[#allocation2 + $0xacc] ss:$28 sps:$4 sm:$0xff]   ;;  %v15491_v17 = vld [vmem:[#allocation2 + $0xa94] ss:$28 sps:$4 sm:$0xff]  }
 0x256   :  { %6599 = vmatprep.subr.bf16.mxu1 %v15461_v4  ;;  %v17119_v32 = vadd.f32 %v6289_v19, %v6247_v62  ;;  %v15480_v4 = vld [vmem:[#allocation2 + $0x748] ss:$28 sps:$4 sm:$0xff]   ;;  %v15486_v62 = vld [vmem:[#allocation2 + $0x710] ss:$28 sps:$4 sm:$0xff]  }
 0x257   :  { %v15489_v19 = vld [vmem:[#allocation2 + $0xa90] ss:$28 sps:$4 sm:$0xff]  }
 0x258   :  { %6557 = vmatpush1.bf16.msra.mxu0 %v15456_v11  ;;  %v15483_v11 = vld [vmem:[#allocation2 + $0xac8] ss:$28 sps:$4 sm:$0xff]  }
 0x259   :  { %6600 = vmatpush1.bf16.msra.mxu1 %v15459_v14  ;;  %6558 = vmatprep.subr.bf16.mxu0 %v15464_v27  ;;  %v15488_v14 = vld [vmem:[#allocation2 + $0x714] ss:$28 sps:$4 sm:$0xff]   ;;  %v15494_v27 = vld [vmem:[#allocation2 + $0xa5c] ss:$28 sps:$4 sm:$0xff]  }
 0x25a   :  { %6601 = vmatprep.subr.bf16.mxu1 %v15467_v31  ;;  %v15497_v31 = vld [vmem:[#allocation2 + $0xddc] ss:$28 sps:$4 sm:$0xff]  }
 0x25c   :  { %6559 = vmatpush1.bf16.msra.mxu0 %v15462_v34  ;;  %v15492_v34 = vld [vmem:[#allocation2 + $0xa58] ss:$28 sps:$4 sm:$0xff]  }
 0x25d   :  { %6602 = vmatpush1.bf16.msra.mxu1 %v15465_v38  ;;  %6560 = vmatprep.subr.bf16.mxu0 %v15470_v39  ;;  %v15495_v38 = vld [vmem:[#allocation2 + $0xdd8] ss:$28 sps:$4 sm:$0xff]   ;;  %v15500_v39 = vld [vmem:[#allocation2 + $0xa24] ss:$28 sps:$4 sm:$0xff]  }
 0x25e   :  { %6603 = vmatprep.subr.bf16.mxu1 %v15473_v52  ;;  %v15503_v52 = vld [vmem:[#allocation2 + $0xda4] ss:$28 sps:$4 sm:$0xff]  }
 0x260   :  { %6561 = vmatpush1.bf16.msra.mxu0 %v15468_v25  ;;  %v15498_v25 = vld [vmem:[#allocation2 + $0xa20] ss:$28 sps:$4 sm:$0xff]  }
 0x261   :  { %6604 = vmatpush1.bf16.msra.mxu1 %v15471_v44  ;;  %6562 = vmatprep.subr.bf16.mxu0 %v15476_v48  ;;  %v15501_v44 = vld [vmem:[#allocation2 + $0xda0] ss:$28 sps:$4 sm:$0xff]   ;;  %v15506_v48 = vld [vmem:[#allocation2 + $0x9ec] ss:$28 sps:$4 sm:$0xff]  }
 0x262   :  { %6605 = vmatprep.subr.bf16.mxu1 %v15479_v49  ;;  %v15509_v49 = vld [vmem:[#allocation2 + $0xd6c] ss:$28 sps:$4 sm:$0xff]  }
 0x264   :  { %6563 = vmatpush1.bf16.msra.mxu0 %v15474_v50  ;;  %v15504_v50 = vld [vmem:[#allocation2 + $0x9e8] ss:$28 sps:$4 sm:$0xff]  }
 0x265   :  { %6606 = vmatpush1.bf16.msra.mxu1 %v15477_v51  ;;  %6564 = vmatprep.subr.bf16.mxu0 %v15482_v55  ;;  %v15507_v51 = vld [vmem:[#allocation2 + $0xd68] ss:$28 sps:$4 sm:$0xff]   ;;  %v15512_v55 = vld [vmem:[#allocation2 + $0x9b4] ss:$28 sps:$4 sm:$0xff]  }
 0x266   :  { %6607 = vmatprep.subr.bf16.mxu1 %v15485_v3  ;;  %v15515_v3 = vld [vmem:[#allocation2 + $0xd34] ss:$28 sps:$4 sm:$0xff]  }
 0x268   :  { %6565 = vmatpush1.bf16.msra.mxu0 %v15480_v4  ;;  %v15510_v4 = vld [vmem:[#allocation2 + $0x9b0] ss:$28 sps:$4 sm:$0xff]  }
 0x269   :  { %6608 = vmatpush1.bf16.msra.mxu1 %v15483_v11  ;;  %6566 = vmatprep.subr.bf16.mxu0 %v15488_v14  ;;  %v15513_v11 = vld [vmem:[#allocation2 + $0xd30] ss:$28 sps:$4 sm:$0xff]   ;;  %v15518_v14 = vld [vmem:[#allocation2 + $0x97c] ss:$28 sps:$4 sm:$0xff]  }
 0x26a   :  { %6609 = vmatprep.subr.bf16.mxu1 %v15491_v17  ;;  %v15521_v17 = vld [vmem:[#allocation2 + $0xcfc] ss:$28 sps:$4 sm:$0xff]  }
 0x26c   :  { %6567 = vmatpush1.bf16.msra.mxu0 %v15486_v62  ;;  %v15516_v62 = vld [vmem:[#allocation2 + $0x978] ss:$28 sps:$4 sm:$0xff]  }
 0x26d   :  { %6610 = vmatpush1.bf16.msra.mxu1 %v15489_v19  ;;  %6568 = vmatprep.subr.bf16.mxu0 %v15494_v27  ;;  %v15519_v19 = vld [vmem:[#allocation2 + $0xcf8] ss:$28 sps:$4 sm:$0xff]   ;;  %v15524_v27 = vld [vmem:[#allocation2 + $0x944] ss:$28 sps:$4 sm:$0xff]  }
 0x26e   :  { %6611 = vmatprep.subr.bf16.mxu1 %v15497_v31  ;;  %v15527_v31 = vld [vmem:[#allocation2 + $0xcc4] ss:$28 sps:$4 sm:$0xff]  }
 0x270   :  { %6569 = vmatpush2.bf16.msra.mxu0 %v15492_v34  ;;  %v15522_v34 = vld [vmem:[#allocation2 + $0x940] ss:$28 sps:$4 sm:$0xff]  }
 0x271   :  { %6612 = vmatpush2.bf16.msra.mxu1 %v15495_v38  ;;  %6570 = vmatprep.subr.bf16.mxu0 %v15500_v39  ;;  %v15525_v38 = vld [vmem:[#allocation2 + $0xcc0] ss:$28 sps:$4 sm:$0xff]   ;;  %v15530_v39 = vld [vmem:[#allocation2 + $0x90c] ss:$28 sps:$4 sm:$0xff]  }
 0x272   :  { %6613 = vmatprep.subr.bf16.mxu1 %v15503_v52  ;;  %v15533_v52 = vld [vmem:[#allocation2 + $0xc8c] ss:$28 sps:$4 sm:$0xff]  }
 0x274   :  { %6571 = vmatpush2.bf16.msra.mxu0 %v15498_v25  ;;  %v15528_v25 = vld [vmem:[#allocation2 + $0x908] ss:$28 sps:$4 sm:$0xff]  }
 0x275   :  { %6614 = vmatpush2.bf16.msra.mxu1 %v15501_v44  ;;  %6572 = vmatprep.subr.bf16.mxu0 %v15506_v48  ;;  %v15531_v44 = vld [vmem:[#allocation2 + $0xc88] ss:$28 sps:$4 sm:$0xff]   ;;  %v15536_v48 = vld [vmem:[#allocation2 + $0x8d4] ss:$28 sps:$4 sm:$0xff]  }
 0x276   :  { %6615 = vmatprep.subr.bf16.mxu1 %v15509_v49  ;;  %v15539_v49 = vld [vmem:[#allocation2 + $0xc54] ss:$28 sps:$4 sm:$0xff]  }
 0x278   :  { %6573 = vmatpush2.bf16.msra.mxu0 %v15504_v50  ;;  %v15534_v50 = vld [vmem:[#allocation2 + $0x8d0] ss:$28 sps:$4 sm:$0xff]  }
 0x279   :  { %6616 = vmatpush2.bf16.msra.mxu1 %v15507_v51  ;;  %6574 = vmatprep.subr.bf16.mxu0 %v15512_v55  ;;  %v15537_v51 = vld [vmem:[#allocation2 + $0xc50] ss:$28 sps:$4 sm:$0xff]   ;;  %v15542_v55 = vld [vmem:[#allocation2 + $0xf9c] ss:$28 sps:$4 sm:$0xff]  }
 0x27a   :  { %6617 = vmatprep.subr.bf16.mxu1 %v15515_v3  ;;  %v15545_v3 = vld [vmem:[#allocation2 + $0x131c] ss:$28 sps:$4 sm:$0xff]  }
 0x27c   :  { %6575 = vmatpush2.bf16.msra.mxu0 %v15510_v4  ;;  %v15540_v4 = vld [vmem:[#allocation2 + $0xf98] ss:$28 sps:$4 sm:$0xff]  }
 0x27d   :  { %6618 = vmatpush2.bf16.msra.mxu1 %v15513_v11  ;;  %6576 = vmatprep.subr.bf16.mxu0 %v15518_v14  ;;  %v15543_v11 = vld [vmem:[#allocation2 + $0x1318] ss:$28 sps:$4 sm:$0xff]   ;;  %v17121_v14 = vpop.f32.mrf.mxu0 }
 0x27e   :  { %6619 = vmatprep.subr.bf16.mxu1 %v15521_v17  ;;  %v17123_v17 = vpop.f32.mrf.mxu1 }
 0x280   :  { %6577 = vmatpush2.bf16.msra.mxu0 %v15516_v62  ;;  %v15548_v62 = vld [vmem:[#allocation2 + $0xf64] ss:$28 sps:$4 sm:$0xff]  }
 0x281   :  { %6620 = vmatpush2.bf16.msra.mxu1 %v15519_v19  ;;  %6578 = vmatprep.subr.bf16.mxu0 %v15524_v27  ;;  %v15551_v19 = vld [vmem:[#allocation2 + $0x12e4] ss:$28 sps:$4 sm:$0xff]  }
 0x282   :  { %6621 = vmatprep.subr.bf16.mxu1 %v15527_v31  ;;  %v15546_v27 = vld [vmem:[#allocation2 + $0xf60] ss:$28 sps:$4 sm:$0xff]  }
 0x283   :  { %v15549_v31 = vld [vmem:[#allocation2 + $0x12e0] ss:$28 sps:$4 sm:$0xff]  }
 0x284   :  { %6579 = vmatpush2.bf16.msra.mxu0 %v15522_v34 }
 0x285   :  { %6622 = vmatpush2.bf16.msra.mxu1 %v15525_v38  ;;  %6580 = vmatprep.subr.bf16.mxu0 %v15530_v39 }
 0x286   :  { %6623 = vmatprep.subr.bf16.mxu1 %v15533_v52 }
 0x288   :  { %6581 = vmatpush2.bf16.msra.mxu0 %v15528_v25 }
 0x289   :  { %6624 = vmatpush2.bf16.msra.mxu1 %v15531_v44  ;;  %6582 = vmatprep.subr.bf16.mxu0 %v15536_v48  ;;  %v15554_v44 = vld [vmem:[#allocation2 + $0xf2c] ss:$28 sps:$4 sm:$0xff]  }
 0x28a   :  { %6625 = vmatprep.subr.bf16.mxu1 %v15539_v49  ;;  %v15557_v48 = vld [vmem:[#allocation2 + $0x12ac] ss:$28 sps:$4 sm:$0xff]  }
 0x28c   :  { %6583 = vmatpush2.bf16.msra.mxu0 %v15534_v50  ;;  %v15552_v50 = vld [vmem:[#allocation2 + $0xf28] ss:$28 sps:$4 sm:$0xff]  }
 0x28d   :  { %6626 = vmatpush2.bf16.msra.mxu1 %v15537_v51  ;;  %6638 = vmatprep.subr.bf16.mxu0 %v15542_v55  ;;  %v15555_v51 = vld [vmem:[#allocation2 + $0x12a8] ss:$28 sps:$4 sm:$0xff]  }
 0x28e   :  { %6681 = vmatprep.subr.bf16.mxu1 %v15545_v3 }
 0x28f   :  { %v6328_v34 = vpop.f32.mrf.mxu0  ;;  %6585 = vmatmul.mubr.bf16.vlgmr.msra.gmra.mxu0 %v16931_v28 }
 0x290   :  { %v6371_v38 = vpop.f32.mrf.mxu1  ;;  %6628 = vmatmul.mubr.bf16.vlgmr.msra.gmra.mxu1 %v16933_v29  ;;  %v6329_v39 = vadd.f32 %v6328_v34, %v17114_v10  ;;  %6639 = vmatpush1.bf16.msra.mxu0 %v15540_v4  ;;  %v15560_v4 = vld [vmem:[#allocation2 + $0xef4] ss:$28 sps:$4 sm:$0xff]  }
 0x291   :  { %6682 = vmatpush1.bf16.msra.mxu1 %v15543_v11  ;;  %v17128_v52 = vpop.f32.mrf.mxu0  ;;  %6640 = vmatprep.subr.bf16.mxu0 %v15548_v62  ;;  %v15563_v11 = vld [vmem:[#allocation2 + $0x1274] ss:$28 sps:$4 sm:$0xff]  }
 0x292   :  { %v17130_v25 = vpop.f32.mrf.mxu1  ;;  %6683 = vmatprep.subr.bf16.mxu1 %v15551_v19  ;;  %v17132_v49 = vadd.f32 %v6371_v38, %v6329_v39  ;;  %6670 = vmatprep.mubr.bf16.mxu0 %v16943_v40  ;;  %v15558_v19 = vld [vmem:[#allocation2 + $0xef0] ss:$28 sps:$4 sm:$0xff]   ;;  %v15566_v38 = vld [vmem:[#allocation2 + $0xebc] ss:$28 sps:$4 sm:$0xff]  }
 0x293   :  { %6713 = vmatprep.mubr.bf16.mxu1 %v16951_v46  ;;  %v6332_v55 = vpop.f32.mrf.mxu0  ;;  %v15561_v34 = vld [vmem:[#allocation2 + $0x1270] ss:$28 sps:$4 sm:$0xff]   ;;  %v15569_v39 = vld [vmem:[#allocation2 + $0x123c] ss:$28 sps:$4 sm:$0xff]  }
 0x294   :  { %v6333_v10 = vadd.f32 %v6332_v55, %v17119_v32  ;;  %6641 = vmatpush1.bf16.msra.mxu0 %v15546_v27  ;;  %v6375_v3 = vpop.f32.mrf.mxu1  ;;  %v15567_v32 = vld [vmem:[#allocation2 + $0x1238] ss:$28 sps:$4 sm:$0xff]   ;;  %v15572_v27 = vld [vmem:[#allocation2 + $0xe84] ss:$28 sps:$4 sm:$0xff]  }
 0x295   :  { %6684 = vmatpush1.bf16.msra.mxu1 %v15549_v31  ;;  %6642 = vmatprep.subr.bf16.mxu0 %v15554_v44  ;;  %v15575_v31 = vld [vmem:[#allocation2 + $0x1204] ss:$28 sps:$4 sm:$0xff]  }
 0x296   :  { %6685 = vmatprep.subr.bf16.mxu1 %v15557_v48  ;;  %v17137_v62 = vadd.f32 %v6375_v3, %v6333_v10  ;;  %v15570_v44 = vld [vmem:[#allocation2 + $0xe80] ss:$28 sps:$4 sm:$0xff]   ;;  %v15576_v55 = vld [vmem:[#allocation2 + $0xe48] ss:$28 sps:$4 sm:$0xff]   ;;  %v15584_v3 = vld [vmem:[#allocation2 + $0xe14] ss:$28 sps:$4 sm:$0xff]  }
 0x297   :  { %v15573_v48 = vld [vmem:[#allocation2 + $0x1200] ss:$28 sps:$4 sm:$0xff]   ;;  %v15579_v10 = vld [vmem:[#allocation2 + $0x11c8] ss:$28 sps:$4 sm:$0xff]  }
 0x298   :  { %6643 = vmatpush1.bf16.msra.mxu0 %v15552_v50  ;;  %v15578_v50 = vld [vmem:[#allocation2 + $0xe4c] ss:$28 sps:$4 sm:$0xff]  }
 0x299   :  { %6686 = vmatpush1.bf16.msra.mxu1 %v15555_v51  ;;  %6644 = vmatprep.subr.bf16.mxu0 %v15560_v4  ;;  %v15581_v51 = vld [vmem:[#allocation2 + $0x11cc] ss:$28 sps:$4 sm:$0xff]   ;;  %v15587_v4 = vld [vmem:[#allocation2 + $0x1194] ss:$28 sps:$4 sm:$0xff]  }
 0x29a   :  { %6687 = vmatprep.subr.bf16.mxu1 %v15563_v11  ;;  %v15582_v11 = vld [vmem:[#allocation2 + $0xe10] ss:$28 sps:$4 sm:$0xff]  }
 0x29c   :  { %6645 = vmatpush1.bf16.msra.mxu0 %v15558_v19  ;;  %v15585_v19 = vld [vmem:[#allocation2 + $0x1190] ss:$28 sps:$4 sm:$0xff]  }
 0x29d   :  { %6688 = vmatpush1.bf16.msra.mxu1 %v15561_v34  ;;  %6646 = vmatprep.subr.bf16.mxu0 %v15566_v38  ;;  %v15593_v34 = vld [vmem:[#allocation2 + $0x14dc] ss:$28 sps:$4 sm:$0xff]  }
 0x29e   :  { %6689 = vmatprep.subr.bf16.mxu1 %v15569_v39  ;;  %v15588_v38 = vld [vmem:[#allocation2 + $0x1158] ss:$28 sps:$4 sm:$0xff]  }
 0x29f   :  { %v15591_v39 = vld [vmem:[#allocation2 + $0x14d8] ss:$28 sps:$4 sm:$0xff]  }
 0x2a0   :  { %6647 = vmatpush1.bf16.msra.mxu0 %v15564_v41  ;;  %v15590_v41 = vld [vmem:[#allocation2 + $0x115c] ss:$28 sps:$4 sm:$0xff]  }
 0x2a1   :  { %6690 = vmatpush1.bf16.msra.mxu1 %v15567_v32  ;;  %6648 = vmatprep.subr.bf16.mxu0 %v15572_v27  ;;  %v15596_v32 = vld [vmem:[#allocation2 + $0x1124] ss:$28 sps:$4 sm:$0xff]  }
 0x2a2   :  { %6691 = vmatprep.subr.bf16.mxu1 %v15575_v31  ;;  %v15599_v27 = vld [vmem:[#allocation2 + $0x14a4] ss:$28 sps:$4 sm:$0xff]  }
 0x2a3   :  { %v15594_v31 = vld [vmem:[#allocation2 + $0x1120] ss:$28 sps:$4 sm:$0xff]  }
 0x2a4   :  { %6649 = vmatpush1.bf16.msra.mxu0 %v15570_v44  ;;  %v15597_v44 = vld [vmem:[#allocation2 + $0x14a0] ss:$28 sps:$4 sm:$0xff]  }
 0x2a5   :  { %6692 = vmatpush1.bf16.msra.mxu1 %v15573_v48  ;;  %6650 = vmatprep.subr.bf16.mxu0 %v15578_v50  ;;  %v15602_v48 = vld [vmem:[#allocation2 + $0x10ec] ss:$28 sps:$4 sm:$0xff]  }
 0x2a6   :  { %6693 = vmatprep.subr.bf16.mxu1 %v15581_v51  ;;  %v15605_v50 = vld [vmem:[#allocation2 + $0x146c] ss:$28 sps:$4 sm:$0xff]  }
 0x2a7   :  { %v15600_v51 = vld [vmem:[#allocation2 + $0x10e8] ss:$28 sps:$4 sm:$0xff]  }
 0x2a8   :  { %6651 = vmatpush1.bf16.msra.mxu0 %v15576_v55  ;;  %v15603_v55 = vld [vmem:[#allocation2 + $0x1468] ss:$28 sps:$4 sm:$0xff]  }
 0x2a9   :  { %6694 = vmatpush1.bf16.msra.mxu1 %v15579_v10  ;;  %6652 = vmatprep.subr.bf16.mxu0 %v15584_v3  ;;  %v15608_v10 = vld [vmem:[#allocation2 + $0x10b4] ss:$28 sps:$4 sm:$0xff]  }
 0x2aa   :  { %6695 = vmatprep.subr.bf16.mxu1 %v15587_v4  ;;  %v15611_v3 = vld [vmem:[#allocation2 + $0x1434] ss:$28 sps:$4 sm:$0xff]  }
 0x2ab   :  { %v15606_v4 = vld [vmem:[#allocation2 + $0x10b0] ss:$28 sps:$4 sm:$0xff]  }
 0x2ac   :  { %6653 = vmatpush1.bf16.msra.mxu0 %v15582_v11  ;;  %v15609_v11 = vld [vmem:[#allocation2 + $0x1430] ss:$28 sps:$4 sm:$0xff]  }
 0x2ad   :  { %6696 = vmatpush1.bf16.msra.mxu1 %v15585_v19  ;;  %6654 = vmatprep.subr.bf16.mxu0 %v15590_v41  ;;  %v15614_v19 = vld [vmem:[#allocation2 + $0x107c] ss:$28 sps:$4 sm:$0xff]  }
 0x2ae   :  { %6697 = vmatprep.subr.bf16.mxu1 %v15593_v34  ;;  %v15617_v41 = vld [vmem:[#allocation2 + $0x13fc] ss:$28 sps:$4 sm:$0xff]  }
 0x2af   :  { %v15612_v34 = vld [vmem:[#allocation2 + $0x1078] ss:$28 sps:$4 sm:$0xff]  }
 0x2b0   :  { %6655 = vmatpush2.bf16.msra.mxu0 %v15588_v38  ;;  %v15615_v38 = vld [vmem:[#allocation2 + $0x13f8] ss:$28 sps:$4 sm:$0xff]  }
 0x2b1   :  { %6698 = vmatpush2.bf16.msra.mxu1 %v15591_v39  ;;  %6656 = vmatprep.subr.bf16.mxu0 %v15596_v32  ;;  %v15620_v39 = vld [vmem:[#allocation2 + $0x1044] ss:$28 sps:$4 sm:$0xff]  }
 0x2b2   :  { %6699 = vmatprep.subr.bf16.mxu1 %v15599_v27  ;;  %v15623_v32 = vld [vmem:[#allocation2 + $0x13c4] ss:$28 sps:$4 sm:$0xff]  }
 0x2b3   :  { %v15618_v27 = vld [vmem:[#allocation2 + $0x1040] ss:$28 sps:$4 sm:$0xff]  }
 0x2b4   :  { %6657 = vmatpush2.bf16.msra.mxu0 %v15594_v31  ;;  %v15621_v31 = vld [vmem:[#allocation2 + $0x13c0] ss:$28 sps:$4 sm:$0xff]  }
 0x2b5   :  { %6700 = vmatpush2.bf16.msra.mxu1 %v15597_v44  ;;  %6658 = vmatprep.subr.bf16.mxu0 %v15602_v48  ;;  %v15626_v44 = vld [vmem:[#allocation2 + $0x100c] ss:$28 sps:$4 sm:$0xff]  }
 0x2b6   :  { %6701 = vmatprep.subr.bf16.mxu1 %v15605_v50  ;;  %v15629_v48 = vld [vmem:[#allocation2 + $0x138c] ss:$28 sps:$4 sm:$0xff]  }
 0x2b7   :  { %v15624_v50 = vld [vmem:[#allocation2 + $0x1008] ss:$28 sps:$4 sm:$0xff]  }
 0x2b8   :  { %6659 = vmatpush2.bf16.msra.mxu0 %v15600_v51  ;;  %v15627_v51 = vld [vmem:[#allocation2 + $0x1388] ss:$28 sps:$4 sm:$0xff]  }
 0x2b9   :  { %6702 = vmatpush2.bf16.msra.mxu1 %v15603_v55  ;;  %6660 = vmatprep.subr.bf16.mxu0 %v15608_v10  ;;  %v15632_v55 = vld [vmem:[#allocation2 + $0xfd4] ss:$28 sps:$4 sm:$0xff]  }
 0x2ba   :  { %6703 = vmatprep.subr.bf16.mxu1 %v15611_v3  ;;  %v15635_v10 = vld [vmem:[#allocation2 + $0x1354] ss:$28 sps:$4 sm:$0xff]  }
 0x2bb   :  { %v15630_v3 = vld [vmem:[#allocation2 + $0xfd0] ss:$28 sps:$4 sm:$0xff]  }
 0x2bc   :  { %6661 = vmatpush2.bf16.msra.mxu0 %v15606_v4  ;;  %v15633_v4 = vld [vmem:[#allocation2 + $0x1350] ss:$28 sps:$4 sm:$0xff]  }
 0x2bd   :  { %6704 = vmatpush2.bf16.msra.mxu1 %v15609_v11  ;;  %6662 = vmatprep.subr.bf16.mxu0 %v15614_v19  ;;  %v15638_v11 = vld [vmem:[#allocation2 + $0x169c] ss:$28 sps:$4 sm:$0xff]  }
 0x2be   :  { %6705 = vmatprep.subr.bf16.mxu1 %v15617_v41  ;;  %v15641_v19 = vld [vmem:[#allocation2 + $0x1a1c] ss:$28 sps:$4 sm:$0xff]  }
 0x2bf   :  { %v15636_v41 = vld [vmem:[#allocation2 + $0x1698] ss:$28 sps:$4 sm:$0xff]  }
 0x2c0   :  { %6663 = vmatpush2.bf16.msra.mxu0 %v15612_v34  ;;  %v15639_v34 = vld [vmem:[#allocation2 + $0x1a18] ss:$28 sps:$4 sm:$0xff]  }
 0x2c1   :  { %6706 = vmatpush2.bf16.msra.mxu1 %v15615_v38  ;;  %6664 = vmatprep.subr.bf16.mxu0 %v15620_v39  ;;  %v17139_v38 = vpop.f32.mrf.mxu0  ;;  %v17141_v39 = vpop.f32.mrf.mxu1 }
 0x2c2   :  { %6707 = vmatprep.subr.bf16.mxu1 %v15623_v32  ;;  %v15644_v32 = vld [vmem:[#allocation2 + $0x1664] ss:$28 sps:$4 sm:$0xff]  }
 0x2c4   :  { %6665 = vmatpush2.bf16.msra.mxu0 %v15618_v27  ;;  %v15647_v27 = vld [vmem:[#allocation2 + $0x19e4] ss:$28 sps:$4 sm:$0xff]  }
 0x2c5   :  { %6708 = vmatpush2.bf16.msra.mxu1 %v15621_v31  ;;  %6666 = vmatprep.subr.bf16.mxu0 %v15626_v44  ;;  %v15642_v31 = vld [vmem:[#allocation2 + $0x1660] ss:$28 sps:$4 sm:$0xff]  }
 0x2c6   :  { %6709 = vmatprep.subr.bf16.mxu1 %v15629_v48  ;;  %v15645_v44 = vld [vmem:[#allocation2 + $0x19e0] ss:$28 sps:$4 sm:$0xff]  }
 0x2c8   :  { %6667 = vmatpush2.bf16.msra.mxu0 %v15624_v50 }
 0x2c9   :  { %6710 = vmatpush2.bf16.msra.mxu1 %v15627_v51  ;;  %6668 = vmatprep.subr.bf16.mxu0 %v15632_v55 }
 0x2ca   :  { %6711 = vmatprep.subr.bf16.mxu1 %v15635_v10 }
 0x2cc   :  { %6669 = vmatpush2.bf16.msra.mxu0 %v15630_v3  ;;  %v15650_v3 = vld [vmem:[#allocation2 + $0x162c] ss:$28 sps:$4 sm:$0xff]  }
 0x2cd   :  { %6712 = vmatpush2.bf16.msra.mxu1 %v15633_v4  ;;  %6724 = vmatprep.subr.bf16.mxu0 %v15638_v11  ;;  %v15653_v4 = vld [vmem:[#allocation2 + $0x19ac] ss:$28 sps:$4 sm:$0xff]  }
 0x2ce   :  { %6767 = vmatprep.subr.bf16.mxu1 %v15641_v19  ;;  %v15648_v19 = vld [vmem:[#allocation2 + $0x1628] ss:$28 sps:$4 sm:$0xff]  }
 0x2cf   :  { %v6414_v48 = vpop.f32.mrf.mxu0  ;;  %6671 = vmatmul.mubr.bf16.vlgmr.msra.gmra.mxu0 %v16976_v58 }
 0x2d0   :  { %v6457_v50 = vpop.f32.mrf.mxu1  ;;  %6714 = vmatmul.mubr.bf16.vlgmr.msra.gmra.mxu1 %v16978_v59  ;;  %v6415_v51 = vadd.f32 %v6414_v48, %v17132_v49  ;;  %6725 = vmatpush1.bf16.msra.mxu0 %v15636_v41  ;;  %v15654_v48 = vld [vmem:[#allocation2 + $0x15f0] ss:$28 sps:$4 sm:$0xff]  }
 0x2d1   :  { %6768 = vmatpush1.bf16.msra.mxu1 %v15639_v34  ;;  %v17146_v55 = vpop.f32.mrf.mxu0  ;;  %6726 = vmatprep.subr.bf16.mxu0 %v15644_v32  ;;  %v15656_v34 = vld [vmem:[#allocation2 + $0x15f4] ss:$28 sps:$4 sm:$0xff]  }
 0x2d2   :  { %19456 = vst [vmem:[#allocation10_spill] sm:$0xff] %v17146_v55  ;;  %v17148_v10 = vpop.f32.mrf.mxu1  ;;  %6769 = vmatprep.subr.bf16.mxu1 %v15647_v27  ;;  %v6458_v11 = vadd.f32 %v6457_v50, %v6415_v51  ;;  %6756 = vmatprep.mubr.bf16.mxu0 %v16983_v0  ;;  %v15659_v32 = vld [vmem:[#allocation2 + $0x1974] ss:$28 sps:$4 sm:$0xff]  }
 0x2d3   :  { %19457 = vst [vmem:[#allocation11_spill] sm:$0xff] %v17148_v10  ;;  %6799 = vmatprep.mubr.bf16.mxu1 %v16985_v1  ;;  %v6418_v56 = vpop.f32.mrf.mxu0  ;;  %v15657_v51 = vld [vmem:[#allocation2 + $0x1970] ss:$28 sps:$4 sm:$0xff]  }
 0x2d4   :  { %v6419_v49 = vadd.f32 %v6418_v56, %v17137_v62  ;;  %6727 = vmatpush1.bf16.msra.mxu0 %v15642_v31  ;;  %v6461_v41 = vpop.f32.mrf.mxu1  ;;  %v7140_v10 = vmax.f32 %v6458_v11, 0.0  ;;  %v15660_v56 = vld [vmem:[#allocation2 + $0x15b8] ss:$28 sps:$4 sm:$0xff]   ;;  %v15668_v31 = vld [vmem:[#allocation2 + $0x1584] ss:$28 sps:$4 sm:$0xff]  }
 0x2d5   :  { %6770 = vmatpush1.bf16.msra.mxu1 %v15645_v44  ;;  %6728 = vmatprep.subr.bf16.mxu0 %v15650_v3  ;;  %v15663_v62 = vld [vmem:[#allocation2 + $0x1938] ss:$28 sps:$4 sm:$0xff]   ;;  %v15671_v44 = vld [vmem:[#allocation2 + $0x1904] ss:$28 sps:$4 sm:$0xff]   ;;  %v15677_v11 = vld [vmem:[#allocation2 + $0x18cc] ss:$28 sps:$4 sm:$0xff]  }
 0x2d6   :  { %6771 = vmatprep.subr.bf16.mxu1 %v15653_v4  ;;  %v6462_v27 = vadd.f32 %v6461_v41, %v6419_v49  ;;  %v15666_v3 = vld [vmem:[#allocation2 + $0x1580] ss:$28 sps:$4 sm:$0xff]   ;;  %v15680_v49 = vld [vmem:[#allocation2 + $0x1514] ss:$28 sps:$4 sm:$0xff]  }
 0x2d7   :  { %v15669_v4 = vld [vmem:[#allocation2 + $0x1900] ss:$28 sps:$4 sm:$0xff]   ;;  %v15683_v41 = vld [vmem:[#allocation2 + $0x1894] ss:$28 sps:$4 sm:$0xff]  }
 0x2d8   :  { %v7147_v50 = vmax.f32 %v6462_v27, 0.0  ;;  %6729 = vmatpush1.bf16.msra.mxu0 %v15648_v19  ;;  %v15672_v19 = vld [vmem:[#allocation2 + $0x1548] ss:$28 sps:$4 sm:$0xff]   ;;  %v15684_v27 = vld [vmem:[#allocation2 + $0x1858] ss:$28 sps:$4 sm:$0xff]  }
 0x2d9   :  { %6772 = vmatpush1.bf16.msra.mxu1 %v15651_v18  ;;  %6730 = vmatprep.subr.bf16.mxu0 %v15656_v34  ;;  %v15674_v18 = vld [vmem:[#allocation2 + $0x154c] ss:$28 sps:$4 sm:$0xff]   ;;  %v15686_v34 = vld [vmem:[#allocation2 + $0x185c] ss:$28 sps:$4 sm:$0xff]  }
 0x2da   :  { %6773 = vmatprep.subr.bf16.mxu1 %v15659_v32  ;;  %v17153_v55 = vpack.c.bf16 %v7147_v50, %v7140_v10  ;;  %v15675_v10 = vld [vmem:[#allocation2 + $0x18c8] ss:$28 sps:$4 sm:$0xff]   ;;  %v15689_v32 = vld [vmem:[#allocation2 + $0x1bdc] ss:$28 sps:$4 sm:$0xff]  }
 0x2db   :  { %v15692_v50 = vld [vmem:[#allocation2 + $0x1824] ss:$28 sps:$4 sm:$0xff]  }
 0x2dc   :  { %6731 = vmatpush1.bf16.msra.mxu0 %v15654_v48  ;;  %v15687_v48 = vld [vmem:[#allocation2 + $0x1bd8] ss:$28 sps:$4 sm:$0xff]  }
 0x2dd   :  { %6774 = vmatpush1.bf16.msra.mxu1 %v15657_v51  ;;  %6732 = vmatprep.subr.bf16.mxu0 %v15662_v26  ;;  %v15678_v26 = vld [vmem:[#allocation2 + $0x1510] ss:$28 sps:$4 sm:$0xff]   ;;  %v15695_v51 = vld [vmem:[#allocation2 + $0x1ba4] ss:$28 sps:$4 sm:$0xff]  }
 0x2de   :  { %6775 = vmatprep.subr.bf16.mxu1 %v15665_v43  ;;  %v15681_v43 = vld [vmem:[#allocation2 + $0x1890] ss:$28 sps:$4 sm:$0xff]  }
 0x2e0   :  { %6733 = vmatpush1.bf16.msra.mxu0 %v15660_v56  ;;  %v15690_v56 = vld [vmem:[#allocation2 + $0x1820] ss:$28 sps:$4 sm:$0xff]  }
 0x2e1   :  { %6776 = vmatpush1.bf16.msra.mxu1 %v15663_v62  ;;  %6734 = vmatprep.subr.bf16.mxu0 %v15668_v31  ;;  %v15693_v62 = vld [vmem:[#allocation2 + $0x1ba0] ss:$28 sps:$4 sm:$0xff]   ;;  %v15698_v31 = vld [vmem:[#allocation2 + $0x17ec] ss:$28 sps:$4 sm:$0xff]  }
 0x2e2   :  { %6777 = vmatprep.subr.bf16.mxu1 %v15671_v44  ;;  %v15701_v44 = vld [vmem:[#allocation2 + $0x1b6c] ss:$28 sps:$4 sm:$0xff]  }
 0x2e4   :  { %6735 = vmatpush1.bf16.msra.mxu0 %v15666_v3  ;;  %v15696_v3 = vld [vmem:[#allocation2 + $0x17e8] ss:$28 sps:$4 sm:$0xff]  }
 0x2e5   :  { %6778 = vmatpush1.bf16.msra.mxu1 %v15669_v4  ;;  %6736 = vmatprep.subr.bf16.mxu0 %v15674_v18  ;;  %v15699_v4 = vld [vmem:[#allocation2 + $0x1b68] ss:$28 sps:$4 sm:$0xff]   ;;  %v15704_v18 = vld [vmem:[#allocation2 + $0x17b4] ss:$28 sps:$4 sm:$0xff]  }
 0x2e6   :  { %6779 = vmatprep.subr.bf16.mxu1 %v15677_v11  ;;  %v15707_v11 = vld [vmem:[#allocation2 + $0x1b34] ss:$28 sps:$4 sm:$0xff]  }
 0x2e8   :  { %6737 = vmatpush1.bf16.msra.mxu0 %v15672_v19  ;;  %v15702_v19 = vld [vmem:[#allocation2 + $0x17b0] ss:$28 sps:$4 sm:$0xff]  }
 0x2e9   :  { %6780 = vmatpush1.bf16.msra.mxu1 %v15675_v10  ;;  %6738 = vmatprep.subr.bf16.mxu0 %v15680_v49  ;;  %v15705_v10 = vld [vmem:[#allocation2 + $0x1b30] ss:$28 sps:$4 sm:$0xff]   ;;  %v15710_v49 = vld [vmem:[#allocation2 + $0x177c] ss:$28 sps:$4 sm:$0xff]  }
 0x2ea   :  { %6781 = vmatprep.subr.bf16.mxu1 %v15683_v41  ;;  %v15713_v41 = vld [vmem:[#allocation2 + $0x1afc] ss:$28 sps:$4 sm:$0xff]  }
 0x2ec   :  { %6739 = vmatpush1.bf16.msra.mxu0 %v15678_v26  ;;  %v15708_v26 = vld [vmem:[#allocation2 + $0x1778] ss:$28 sps:$4 sm:$0xff]  }
 0x2ed   :  { %6782 = vmatpush1.bf16.msra.mxu1 %v15681_v43  ;;  %6740 = vmatprep.subr.bf16.mxu0 %v15686_v34  ;;  %v15711_v43 = vld [vmem:[#allocation2 + $0x1af8] ss:$28 sps:$4 sm:$0xff]   ;;  %v15716_v34 = vld [vmem:[#allocation2 + $0x1744] ss:$28 sps:$4 sm:$0xff]  }
 0x2ee   :  { %6783 = vmatprep.subr.bf16.mxu1 %v15689_v32  ;;  %v15719_v32 = vld [vmem:[#allocation2 + $0x1ac4] ss:$28 sps:$4 sm:$0xff]  }
 0x2f0   :  { %6741 = vmatpush2.bf16.msra.mxu0 %v15684_v27  ;;  %v15714_v27 = vld [vmem:[#allocation2 + $0x1740] ss:$28 sps:$4 sm:$0xff]  }
 0x2f1   :  { %6784 = vmatpush2.bf16.msra.mxu1 %v15687_v48  ;;  %6742 = vmatprep.subr.bf16.mxu0 %v15692_v50  ;;  %v15717_v48 = vld [vmem:[#allocation2 + $0x1ac0] ss:$28 sps:$4 sm:$0xff]   ;;  %v15722_v50 = vld [vmem:[#allocation2 + $0x170c] ss:$28 sps:$4 sm:$0xff]  }
 0x2f2   :  { %6785 = vmatprep.subr.bf16.mxu1 %v15695_v51  ;;  %v15725_v51 = vld [vmem:[#allocation2 + $0x1a8c] ss:$28 sps:$4 sm:$0xff]  }
 0x2f4   :  { %6743 = vmatpush2.bf16.msra.mxu0 %v15690_v56  ;;  %v15720_v56 = vld [vmem:[#allocation2 + $0x1708] ss:$28 sps:$4 sm:$0xff]  }
 0x2f5   :  { %6786 = vmatpush2.bf16.msra.mxu1 %v15693_v62  ;;  %6744 = vmatprep.subr.bf16.mxu0 %v15698_v31  ;;  %v15723_v62 = vld [vmem:[#allocation2 + $0x1a88] ss:$28 sps:$4 sm:$0xff]   ;;  %v15728_v31 = vld [vmem:[#allocation2 + $0x16d4] ss:$28 sps:$4 sm:$0xff]  }
 0x2f6   :  { %6787 = vmatprep.subr.bf16.mxu1 %v15701_v44  ;;  %v15731_v44 = vld [vmem:[#allocation2 + $0x1a54] ss:$28 sps:$4 sm:$0xff]  }
 0x2f8   :  { %6745 = vmatpush2.bf16.msra.mxu0 %v15696_v3  ;;  %v15726_v3 = vld [vmem:[#allocation2 + $0x16d0] ss:$28 sps:$4 sm:$0xff]  }
 0x2f9   :  { %6788 = vmatpush2.bf16.msra.mxu1 %v15699_v4  ;;  %6746 = vmatprep.subr.bf16.mxu0 %v15704_v18  ;;  %v15729_v4 = vld [vmem:[#allocation2 + $0x1a50] ss:$28 sps:$4 sm:$0xff]   ;;  %v17156_v18 = vsub.s32 4, %v16991_v7 }
 0x2fa   :  { %6789 = vmatprep.subr.bf16.mxu1 %v15707_v11  ;;  %v15732_v11 = vld [vmem:[#allocation2 + $0x360] ss:$28 sps:$4 sm:$0xff]  }
 0x2fb   :  { %19458 = vst [vmem:[#allocation12_spill] sm:$0xff] %v17156_v18 }
 0x2fc   :  { %6747 = vmatpush2.bf16.msra.mxu0 %v15702_v19  ;;  %v15733_v19 = vld [vmem:[#allocation2 + $0x6e0] ss:$28 sps:$4 sm:$0xff]  }
 0x2fd   :  { %6790 = vmatpush2.bf16.msra.mxu1 %v15705_v10  ;;  %6748 = vmatprep.subr.bf16.mxu0 %v15710_v49  ;;  %v15734_v10 = vld [vmem:[#allocation2 + $0x1a0] ss:$28 sps:$4 sm:$0xff]  }
 0x2fe   :  { %6791 = vmatprep.subr.bf16.mxu1 %v15713_v41  ;;  %v15735_v49 = vld [vmem:[#allocation2 + $0x520] ss:$28 sps:$4 sm:$0xff]  }
 0x2ff   :  { %v17161_v41 = vld [vmem:[%s19431_s2] sm:$0xff] }
 0x300   :  { %6749 = vmatpush2.bf16.msra.mxu0 %v15708_v26  ;;  %v17165_v26 = vrot.slane %v17161_v41, %v17156_v18  ;;  %v15745_v18 = vld [vmem:[#allocation2 + $0x638] ss:$28 sps:$4 sm:$0xff]  }
 0x301   :  { %6792 = vmatpush2.bf16.msra.mxu1 %v15711_v43  ;;  %6750 = vmatprep.subr.bf16.mxu0 %v15716_v34  ;;  %v17167_v43 = vpop.f32.mrf.mxu0  ;;  %v15736_v34 = vld [vmem:[#allocation2 + $0x328] ss:$28 sps:$4 sm:$0xff]  }
 0x302   :  { %6793 = vmatprep.subr.bf16.mxu1 %v15719_v32  ;;  %v15737_v32 = vld [vmem:[#allocation2 + $0x6a8] ss:$28 sps:$4 sm:$0xff]  }
 0x304   :  { %6751 = vmatpush2.bf16.msra.mxu0 %v15714_v27  ;;  %v15738_v27 = vld [vmem:[#allocation2 + $0x168] ss:$28 sps:$4 sm:$0xff]  }
 0x305   :  { %6794 = vmatpush2.bf16.msra.mxu1 %v15717_v48  ;;  %6752 = vmatprep.subr.bf16.mxu0 %v15722_v50  ;;  %v15739_v48 = vld [vmem:[#allocation2 + $0x4e8] ss:$28 sps:$4 sm:$0xff]   ;;  %v17169_v50 = vpop.f32.mrf.mxu1 }
 0x306   :  { %6795 = vmatprep.subr.bf16.mxu1 %v15725_v51 }
 0x308   :  { %6753 = vmatpush2.bf16.msra.mxu0 %v15720_v56  ;;  %v15740_v56 = vld [vmem:[#allocation2 + $0x2f0] ss:$28 sps:$4 sm:$0xff]  }
 0x309   :  { %6796 = vmatpush2.bf16.msra.mxu1 %v15723_v62  ;;  %6754 = vmatprep.subr.bf16.mxu0 %v15728_v31  ;;  %v15741_v62 = vld [vmem:[#allocation2 + $0x670] ss:$28 sps:$4 sm:$0xff]  }
 0x30a   :  { %6797 = vmatprep.subr.bf16.mxu1 %v15731_v44 }
 0x30c   :  { %6755 = vmatpush2.bf16.msra.mxu0 %v15726_v3 }
 0x30d   :  { %6798 = vmatpush2.bf16.msra.mxu1 %v15729_v4  ;;  %14318 = vmatprep.subr.bf16.mxu0 %v15732_v11  ;;  %v15742_v4 = vld [vmem:[#allocation2 + $0x130] ss:$28 sps:$4 sm:$0xff]  }
 0x30e   :  { %14340 = vmatprep.subr.bf16.mxu1 %v15733_v19  ;;  %v15743_v11 = vld [vmem:[#allocation2 + $0x4b0] ss:$28 sps:$4 sm:$0xff]   ;;  %v15744_v19 = vld [vmem:[#allocation2 + $0x2b8] ss:$28 sps:$4 sm:$0xff]  }
 0x30f   :  { %v6500_v51 = vpop.f32.mrf.mxu0  ;;  %6757 = vmatmul.mubr.bf16.vlgmr.msra.gmra.mxu0 %v17011_v22 }
 0x310   :  { %6800 = vmatmul.mubr.bf16.vlgmr.msra.gmra.mxu1 %v17013_v23  ;;  %v6501_v31 = vadd.f32 %v6500_v51, %v17165_v26  ;;  %14319 = vmatpush3.bf16.msra.mxu0 %v15734_v10  ;;  %v6543_v44 = vpop.f32.mrf.mxu1  ;;  %v15746_v51 = vld [vmem:[#allocation2 + $0xf8] ss:$28 sps:$4 sm:$0xff]  }
 0x311   :  { %14341 = vmatpush3.bf16.msra.mxu1 %v15735_v49  ;;  %14320 = vmatprep.subr.bf16.mxu0 %v15736_v34  ;;  %v15747_v10 = vld [vmem:[#allocation2 + $0x478] ss:$28 sps:$4 sm:$0xff]   ;;  %v15748_v49 = vld [vmem:[#allocation2 + $0x280] ss:$28 sps:$4 sm:$0xff]  }
 0x312   :  { %14342 = vmatprep.subr.bf16.mxu1 %v15737_v32  ;;  %v17174_v3 = vadd.f32 %v6543_v44, %v6501_v31  ;;  %6842 = vmatprep.mubr.bf16.mxu0 %v16877_v53  ;;  %v15749_v34 = vld [vmem:[#allocation2 + $0x600] ss:$28 sps:$4 sm:$0xff]   ;;  %v15752_v53 = vld [vmem:[#allocation2 + $0x248] ss:$28 sps:$4 sm:$0xff]   ;;  %v15758_v44 = vld [vmem:[#allocation2 + $0x50] ss:$28 sps:$4 sm:$0xff]  }
 0x313   :  { %6883 = vmatprep.mubr.bf16.mxu1 %v16879_v54  ;;  %v15750_v32 = vld [vmem:[#allocation2 + $0xc0] ss:$28 sps:$4 sm:$0xff]   ;;  %v15753_v54 = vld [vmem:[#allocation2 + $0x5c8] ss:$28 sps:$4 sm:$0xff]  }
 0x314   :  { %14321 = vmatpush3.bf16.msra.mxu0 %v15738_v27  ;;  %v15751_v31 = vld [vmem:[#allocation2 + $0x440] ss:$28 sps:$4 sm:$0xff]   ;;  %v15754_v27 = vld [vmem:[#allocation2 + $0x88] ss:$28 sps:$4 sm:$0xff]  }
 0x315   :  { %14343 = vmatpush3.bf16.msra.mxu1 %v15739_v48  ;;  %14322 = vmatprep.subr.bf16.mxu0 %v15740_v56  ;;  %v15755_v48 = vld [vmem:[#allocation2 + $0x408] ss:$28 sps:$4 sm:$0xff]   ;;  %v15756_v56 = vld [vmem:[#allocation2 + $0x210] ss:$28 sps:$4 sm:$0xff]  }
 0x316   :  { %14344 = vmatprep.subr.bf16.mxu1 %v15741_v62  ;;  %v15757_v62 = vld [vmem:[#allocation2 + $0x590] ss:$28 sps:$4 sm:$0xff]  }
 0x318   :  { %14323 = vmatpush3.bf16.msra.mxu0 %v15742_v4  ;;  %v15760_v4 = vld [vmem:[#allocation2 + $0x1d8] ss:$28 sps:$4 sm:$0xff]  }
 0x319   :  { %14345 = vmatpush3.bf16.msra.mxu1 %v15743_v11  ;;  %14324 = vmatprep.subr.bf16.mxu0 %v15744_v19  ;;  %v15761_v11 = vld [vmem:[#allocation2 + $0x558] ss:$28 sps:$4 sm:$0xff]  }
 0x31a   :  { %14346 = vmatprep.subr.bf16.mxu1 %v15745_v18  ;;  %v15759_v18 = vld [vmem:[#allocation2 + $0x3d0] ss:$28 sps:$4 sm:$0xff]   ;;  %v15762_v19 = vld [vmem:[#allocation2 + $0x18] ss:$28 sps:$4 sm:$0xff]  }
 0x31c   :  { %14325 = vmatpush3.bf16.msra.mxu0 %v15746_v51  ;;  %v15763_v51 = vld [vmem:[#allocation2 + $0x398] ss:$28 sps:$4 sm:$0xff]  }
 0x31d   :  { %14347 = vmatpush3.bf16.msra.mxu1 %v15747_v10  ;;  %14326 = vmatprep.subr.bf16.mxu0 %v15748_v49  ;;  %v15764_v10 = vld [vmem:[#allocation2 + $0xa60] ss:$28 sps:$4 sm:$0xff]  }
 0x31e   :  { %14348 = vmatprep.subr.bf16.mxu1 %v15749_v34  ;;  %v15765_v49 = vld [vmem:[#allocation2 + $0xde0] ss:$28 sps:$4 sm:$0xff]  }
 0x31f   :  { %v15766_v34 = vld [vmem:[#allocation2 + $0x8a0] ss:$28 sps:$4 sm:$0xff]  }
 0x320   :  { %14327 = vmatpush3.bf16.msra.mxu0 %v15750_v32  ;;  %v15767_v32 = vld [vmem:[#allocation2 + $0xc20] ss:$28 sps:$4 sm:$0xff]  }
 0x321   :  { %14349 = vmatpush3.bf16.msra.mxu1 %v15751_v31  ;;  %14328 = vmatprep.subr.bf16.mxu0 %v15752_v53  ;;  %v15768_v31 = vld [vmem:[#allocation2 + $0xa28] ss:$28 sps:$4 sm:$0xff]  }
 0x322   :  { %14350 = vmatprep.subr.bf16.mxu1 %v15753_v54  ;;  %v15769_v53 = vld [vmem:[#allocation2 + $0xda8] ss:$28 sps:$4 sm:$0xff]  }
 0x323   :  { %v15770_v54 = vld [vmem:[#allocation2 + $0x868] ss:$28 sps:$4 sm:$0xff]  }
 0x324   :  { %14329 = vmatpush3.bf16.msra.mxu0 %v15754_v27  ;;  %v15771_v27 = vld [vmem:[#allocation2 + $0xbe8] ss:$28 sps:$4 sm:$0xff]  }
 0x325   :  { %14351 = vmatpush3.bf16.msra.mxu1 %v15755_v48  ;;  %14330 = vmatprep.subr.bf16.mxu0 %v15756_v56  ;;  %v15772_v48 = vld [vmem:[#allocation2 + $0x9f0] ss:$28 sps:$4 sm:$0xff]  }
 0x326   :  { %14352 = vmatprep.subr.bf16.mxu1 %v15757_v62  ;;  %v15773_v56 = vld [vmem:[#allocation2 + $0xd70] ss:$28 sps:$4 sm:$0xff]  }
 0x327   :  { %v15774_v62 = vld [vmem:[#allocation2 + $0x830] ss:$28 sps:$4 sm:$0xff]  }
 0x328   :  { %14331 = vmatpush3.bf16.msra.mxu0 %v15758_v44  ;;  %v15775_v44 = vld [vmem:[#allocation2 + $0xbb0] ss:$28 sps:$4 sm:$0xff]  }
 0x329   :  { %14353 = vmatpush3.bf16.msra.mxu1 %v15759_v18  ;;  %14332 = vmatprep.subr.bf16.mxu0 %v15760_v4  ;;  %v15776_v18 = vld [vmem:[#allocation2 + $0x9b8] ss:$28 sps:$4 sm:$0xff]  }
 0x32a   :  { %14354 = vmatprep.subr.bf16.mxu1 %v15761_v11  ;;  %v15778_v4 = vld [vmem:[#allocation2 + $0x7f8] ss:$28 sps:$4 sm:$0xff]   ;;  %v15780_v11 = vld [vmem:[#allocation2 + $0x980] ss:$28 sps:$4 sm:$0xff]  }
 0x32c   :  { %14333 = vmatpush3.bf16.msra.mxu0 %v15762_v19  ;;  %v15781_v19 = vld [vmem:[#allocation2 + $0xd00] ss:$28 sps:$4 sm:$0xff]  }
 0x32d   :  { %14355 = vmatpush3.bf16.msra.mxu1 %v15763_v51  ;;  %14362 = vmatprep.subr.bf16.mxu0 %v15764_v10  ;;  %v15782_v51 = vld [vmem:[#allocation2 + $0x7c0] ss:$28 sps:$4 sm:$0xff]  }
 0x32e   :  { %14384 = vmatprep.subr.bf16.mxu1 %v15765_v49  ;;  %v15783_v10 = vld [vmem:[#allocation2 + $0xb40] ss:$28 sps:$4 sm:$0xff]   ;;  %v15786_v49 = vld [vmem:[#allocation2 + $0x788] ss:$28 sps:$4 sm:$0xff]  }
 0x32f   :  { %6843 = vmatmul.mubr.bf16.vlgmr.msra.gmra.mxu0 %v16895_v12  ;;  %v15777_v12 = vld [vmem:[#allocation2 + $0xd38] ss:$28 sps:$4 sm:$0xff]  }
 0x330   :  { %6884 = vmatmul.mubr.bf16.vlgmr.msra.gmra.mxu1 %v16897_v13  ;;  %14363 = vmatpush3.bf16.msra.mxu0 %v15766_v34  ;;  %v15779_v13 = vld [vmem:[#allocation2 + $0xb78] ss:$28 sps:$4 sm:$0xff]   ;;  %v15787_v34 = vld [vmem:[#allocation2 + $0xb08] ss:$28 sps:$4 sm:$0xff]  }
 0x331   :  { %14385 = vmatpush3.bf16.msra.mxu1 %v15767_v32  ;;  %14364 = vmatprep.subr.bf16.mxu0 %v15768_v31  ;;  %v15788_v32 = vld [vmem:[#allocation2 + $0x910] ss:$28 sps:$4 sm:$0xff]  }
 0x332   :  { %14386 = vmatprep.subr.bf16.mxu1 %v15769_v53  ;;  %6924 = vmatprep.mubr.bf16.mxu0 %v16910_v45  ;;  %v15784_v45 = vld [vmem:[#allocation2 + $0x948] ss:$28 sps:$4 sm:$0xff]   ;;  %v15789_v31 = vld [vmem:[#allocation2 + $0xc90] ss:$28 sps:$4 sm:$0xff]  }
 0x333   :  { %6965 = vmatprep.mubr.bf16.mxu1 %v16915_v47  ;;  %v15785_v47 = vld [vmem:[#allocation2 + $0xcc8] ss:$28 sps:$4 sm:$0xff]   ;;  %v15790_v53 = vld [vmem:[#allocation2 + $0x750] ss:$28 sps:$4 sm:$0xff]  }
 0x334   :  { %14365 = vmatpush3.bf16.msra.mxu0 %v15770_v54  ;;  %v15791_v54 = vld [vmem:[#allocation2 + $0xad0] ss:$28 sps:$4 sm:$0xff]  }
 0x335   :  { %14387 = vmatpush3.bf16.msra.mxu1 %v15771_v27  ;;  %14366 = vmatprep.subr.bf16.mxu0 %v15772_v48  ;;  %v15792_v27 = vld [vmem:[#allocation2 + $0x8d8] ss:$28 sps:$4 sm:$0xff]  }
 0x336   :  { %14388 = vmatprep.subr.bf16.mxu1 %v15773_v56  ;;  %v15793_v48 = vld [vmem:[#allocation2 + $0xc58] ss:$28 sps:$4 sm:$0xff]  }
 0x337   :  { %v15794_v56 = vld [vmem:[#allocation2 + $0x718] ss:$28 sps:$4 sm:$0xff]  }
 0x338   :  { %14367 = vmatpush3.bf16.msra.mxu0 %v15774_v62  ;;  %v15795_v62 = vld [vmem:[#allocation2 + $0xa98] ss:$28 sps:$4 sm:$0xff]  }
 0x339   :  { %14389 = vmatpush3.bf16.msra.mxu1 %v15775_v44  ;;  %14368 = vmatprep.subr.bf16.mxu0 %v15776_v18  ;;  %v15796_v44 = vld [vmem:[#allocation2 + $0x1160] ss:$28 sps:$4 sm:$0xff]  }
 0x33a   :  { %14390 = vmatprep.subr.bf16.mxu1 %v15777_v12  ;;  %v15797_v18 = vld [vmem:[#allocation2 + $0x14e0] ss:$28 sps:$4 sm:$0xff]  }
 0x33b   :  { %v15798_v12 = vld [vmem:[#allocation2 + $0xfa0] ss:$28 sps:$4 sm:$0xff]  }
 0x33c   :  { %14369 = vmatpush3.bf16.msra.mxu0 %v15778_v4  ;;  %v15799_v4 = vld [vmem:[#allocation2 + $0x1320] ss:$28 sps:$4 sm:$0xff]  }
 0x33d   :  { %14391 = vmatpush3.bf16.msra.mxu1 %v15779_v13  ;;  %14370 = vmatprep.subr.bf16.mxu0 %v15780_v11  ;;  %v15800_v13 = vld [vmem:[#allocation2 + $0x1128] ss:$28 sps:$4 sm:$0xff]  }
 0x33e   :  { %14392 = vmatprep.subr.bf16.mxu1 %v15781_v19  ;;  %v15801_v11 = vld [vmem:[#allocation2 + $0x14a8] ss:$28 sps:$4 sm:$0xff]  }
 0x33f   :  { %v15802_v19 = vld [vmem:[#allocation2 + $0xf68] ss:$28 sps:$4 sm:$0xff]  }
 0x340   :  { %14371 = vmatpush3.bf16.msra.mxu0 %v15782_v51  ;;  %v15803_v51 = vld [vmem:[#allocation2 + $0x12e8] ss:$28 sps:$4 sm:$0xff]  }
 0x341   :  { %14393 = vmatpush3.bf16.msra.mxu1 %v15783_v10  ;;  %14372 = vmatprep.subr.bf16.mxu0 %v15784_v45  ;;  %v15804_v10 = vld [vmem:[#allocation2 + $0x10f0] ss:$28 sps:$4 sm:$0xff]  }
 0x342   :  { %14394 = vmatprep.subr.bf16.mxu1 %v15785_v47  ;;  %v15805_v45 = vld [vmem:[#allocation2 + $0x1470] ss:$28 sps:$4 sm:$0xff]  }
 0x343   :  { %v15806_v47 = vld [vmem:[#allocation2 + $0xf30] ss:$28 sps:$4 sm:$0xff]  }
 0x344   :  { %14373 = vmatpush3.bf16.msra.mxu0 %v15786_v49  ;;  %v15807_v49 = vld [vmem:[#allocation2 + $0x12b0] ss:$28 sps:$4 sm:$0xff]  }
 0x345   :  { %14395 = vmatpush3.bf16.msra.mxu1 %v15787_v34  ;;  %14374 = vmatprep.subr.bf16.mxu0 %v15788_v32  ;;  %v15808_v34 = vld [vmem:[#allocation2 + $0x10b8] ss:$28 sps:$4 sm:$0xff]  }
 0x346   :  { %14396 = vmatprep.subr.bf16.mxu1 %v15789_v31  ;;  %v15809_v32 = vld [vmem:[#allocation2 + $0x1438] ss:$28 sps:$4 sm:$0xff]   ;;  %v15812_v31 = vld [vmem:[#allocation2 + $0x1080] ss:$28 sps:$4 sm:$0xff]  }
 0x348   :  { %14375 = vmatpush3.bf16.msra.mxu0 %v15790_v53  ;;  %v15813_v53 = vld [vmem:[#allocation2 + $0x1400] ss:$28 sps:$4 sm:$0xff]  }
 0x349   :  { %14397 = vmatpush3.bf16.msra.mxu1 %v15791_v54  ;;  %14376 = vmatprep.subr.bf16.mxu0 %v15792_v27  ;;  %v15814_v54 = vld [vmem:[#allocation2 + $0xec0] ss:$28 sps:$4 sm:$0xff]  }
 0x34a   :  { %14398 = vmatprep.subr.bf16.mxu1 %v15793_v48  ;;  %v15815_v27 = vld [vmem:[#allocation2 + $0x1240] ss:$28 sps:$4 sm:$0xff]   ;;  %v15816_v48 = vld [vmem:[#allocation2 + $0x1048] ss:$28 sps:$4 sm:$0xff]  }
 0x34c   :  { %14377 = vmatpush3.bf16.msra.mxu0 %v15794_v56  ;;  %v15819_v56 = vld [vmem:[#allocation2 + $0x1208] ss:$28 sps:$4 sm:$0xff]  }
 0x34d   :  { %14399 = vmatpush3.bf16.msra.mxu1 %v15795_v62  ;;  %14406 = vmatprep.subr.bf16.mxu0 %v15796_v44  ;;  %v15820_v62 = vld [vmem:[#allocation2 + $0x1010] ss:$28 sps:$4 sm:$0xff]  }
 0x34e   :  { %14428 = vmatprep.subr.bf16.mxu1 %v15797_v18  ;;  %v15821_v44 = vld [vmem:[#allocation2 + $0x1390] ss:$28 sps:$4 sm:$0xff]  }
 0x34f   :  { %6925 = vmatmul.mubr.bf16.vlgmr.msra.gmra.mxu0 %v16931_v28  ;;  %v15810_v28 = vld [vmem:[#allocation2 + $0xef8] ss:$28 sps:$4 sm:$0xff]   ;;  %v15822_v18 = vld [vmem:[#allocation2 + $0xe50] ss:$28 sps:$4 sm:$0xff]  }
 0x350   :  { %6966 = vmatmul.mubr.bf16.vlgmr.msra.gmra.mxu1 %v16933_v29  ;;  %14407 = vmatpush3.bf16.msra.mxu0 %v15798_v12  ;;  %v15811_v29 = vld [vmem:[#allocation2 + $0x1278] ss:$28 sps:$4 sm:$0xff]   ;;  %v15823_v12 = vld [vmem:[#allocation2 + $0x11d0] ss:$28 sps:$4 sm:$0xff]  }
 0x351   :  { %14429 = vmatpush3.bf16.msra.mxu1 %v15799_v4  ;;  %14408 = vmatprep.subr.bf16.mxu0 %v15800_v13  ;;  %v15824_v4 = vld [vmem:[#allocation2 + $0xfd8] ss:$28 sps:$4 sm:$0xff]  }
 0x352   :  { %14430 = vmatprep.subr.bf16.mxu1 %v15801_v11  ;;  %7006 = vmatprep.mubr.bf16.mxu0 %v16943_v40  ;;  %v15817_v40 = vld [vmem:[#allocation2 + $0x13c8] ss:$28 sps:$4 sm:$0xff]   ;;  %v15825_v13 = vld [vmem:[#allocation2 + $0x1358] ss:$28 sps:$4 sm:$0xff]  }
 0x353   :  { %7047 = vmatprep.mubr.bf16.mxu1 %v16951_v46  ;;  %v15818_v46 = vld [vmem:[#allocation2 + $0xe88] ss:$28 sps:$4 sm:$0xff]   ;;  %v15826_v11 = vld [vmem:[#allocation2 + $0xe18] ss:$28 sps:$4 sm:$0xff]  }
 0x354   :  { %14409 = vmatpush3.bf16.msra.mxu0 %v15802_v19  ;;  %v15827_v19 = vld [vmem:[#allocation2 + $0x1198] ss:$28 sps:$4 sm:$0xff]  }
 0x355   :  { %14431 = vmatpush3.bf16.msra.mxu1 %v15803_v51  ;;  %14410 = vmatprep.subr.bf16.mxu0 %v15804_v10  ;;  %v15828_v51 = vld [vmem:[#allocation2 + $0x1860] ss:$28 sps:$4 sm:$0xff]  }
 0x356   :  { %14432 = vmatprep.subr.bf16.mxu1 %v15805_v45  ;;  %v15829_v10 = vld [vmem:[#allocation2 + $0x1be0] ss:$28 sps:$4 sm:$0xff]   ;;  %v17187_v45 = vsub.s32 1, %v16991_v7 }
 0x358   :  { %14411 = vmatpush3.bf16.msra.mxu0 %v15806_v47  ;;  %v15830_v47 = vld [vmem:[#allocation2 + $0x16a0] ss:$28 sps:$4 sm:$0xff]  }
 0x359   :  { %14433 = vmatpush3.bf16.msra.mxu1 %v15807_v49  ;;  %14412 = vmatprep.subr.bf16.mxu0 %v15808_v34  ;;  %v15831_v49 = vld [vmem:[#allocation2 + $0x1a20] ss:$28 sps:$4 sm:$0xff]   ;;  %v17190_v34 = vsub.s32 3, %v16991_v7 }
 0x35a   :  { %14434 = vmatprep.subr.bf16.mxu1 %v15809_v32  ;;  %v15832_v32 = vld [vmem:[#allocation2 + $0x1828] ss:$28 sps:$4 sm:$0xff]  }
 0x35c   :  { %14413 = vmatpush3.bf16.msra.mxu0 %v15810_v28  ;;  %v15833_v28 = vld [vmem:[#allocation2 + $0x1ba8] ss:$28 sps:$4 sm:$0xff]  }
 0x35d   :  { %14435 = vmatpush3.bf16.msra.mxu1 %v15811_v29  ;;  %14414 = vmatprep.subr.bf16.mxu0 %v15812_v31  ;;  %v1142_v29 = vrot.slane %v17161_v41, %v17187_v45  ;;  %v15834_v31 = vld [vmem:[#allocation2 + $0x1668] ss:$28 sps:$4 sm:$0xff]  }
 0x35e   :  { %14436 = vmatprep.subr.bf16.mxu1 %v15813_v53  ;;  %v15835_v53 = vld [vmem:[#allocation2 + $0x19e8] ss:$28 sps:$4 sm:$0xff]  }
 0x360   :  { %14415 = vmatpush3.bf16.msra.mxu0 %v15814_v54  ;;  %v1150_v54 = vrot.slane %v17161_v41, %v17190_v34  ;;  %v15841_v41 = vld [vmem:[#allocation2 + $0x1b38] ss:$28 sps:$4 sm:$0xff]  }
 0x361   :  { %14437 = vmatpush3.bf16.msra.mxu1 %v15815_v27  ;;  %14416 = vmatprep.subr.bf16.mxu0 %v15816_v48  ;;  %v15836_v27 = vld [vmem:[#allocation2 + $0x17f0] ss:$28 sps:$4 sm:$0xff]  }
 0x362   :  { %14438 = vmatprep.subr.bf16.mxu1 %v15817_v40  ;;  %v15837_v48 = vld [vmem:[#allocation2 + $0x1b70] ss:$28 sps:$4 sm:$0xff]   ;;  %v5819_v40 = vadd.f32 %v17028_v8, %v1142_v29 }
 0x364   :  { %14417 = vmatpush3.bf16.msra.mxu0 %v15818_v46  ;;  %v6163_v46 = vadd.f32 %v17103_v24, %v1150_v54  ;;  %v5862_v8 = vadd.f32 %v17030_v9, %v5819_v40  ;;  %v15858_v40 = vld [vmem:[#allocation2 + $0x1518] ss:$28 sps:$4 sm:$0xff]  }
 0x365   :  { %14439 = vmatpush3.bf16.msra.mxu1 %v15819_v56  ;;  %14418 = vmatprep.subr.bf16.mxu0 %v15820_v62  ;;  %v5815_v56 = vadd.f32 %v17018_v36, %v1142_v29  ;;  %v15838_v62 = vld [vmem:[#allocation2 + $0x1630] ss:$28 sps:$4 sm:$0xff]  }
 0x366   :  { %14440 = vmatprep.subr.bf16.mxu1 %v15821_v44  ;;  %v15839_v44 = vld [vmem:[#allocation2 + $0x19b0] ss:$28 sps:$4 sm:$0xff]   ;;  %v6206_v24 = vadd.f32 %v17105_v42, %v6163_v46 }
 0x367   :  { %v5858_v36 = vadd.f32 %v17020_v37, %v5815_v56  ;;  %v15854_v29 = vld [vmem:[#allocation2 + $0x1550] ss:$28 sps:$4 sm:$0xff]  }
 0x368   :  { %14419 = vmatpush3.bf16.msra.mxu0 %v15822_v18  ;;  %v5905_v18 = vadd.f32 %v17046_v63, %v5862_v8  ;;  %v15847_v63 = vld [vmem:[#allocation2 + $0x1940] ss:$28 sps:$4 sm:$0xff]   ;;  %v19461_v56 = vld [vmem:[#allocation6_spill] sm:$0xff] }
 0x369   :  { %14441 = vmatpush3.bf16.msra.mxu1 %v15823_v12  ;;  %14420 = vmatprep.subr.bf16.mxu0 %v15824_v4  ;;  %v15842_v12 = vld [vmem:[#allocation2 + $0x15f8] ss:$28 sps:$4 sm:$0xff]   ;;  %v15844_v4 = vld [vmem:[#allocation2 + $0x1780] ss:$28 sps:$4 sm:$0xff]   ;;  %v5901_v9 = vadd.f32 %v17035_v20, %v5858_v36  ;;  %v15849_v20 = vld [vmem:[#allocation2 + $0x1ac8] ss:$28 sps:$4 sm:$0xff]  }
 0x36a   :  { %14442 = vmatprep.subr.bf16.mxu1 %v15825_v13  ;;  %v15845_v13 = vld [vmem:[#allocation2 + $0x1b00] ss:$28 sps:$4 sm:$0xff]   ;;  %v5948_v37 = vadd.f32 %v17048_v2, %v5905_v18  ;;  %v15868_v18 = vld [vmem:[%s19432_s3 + $0xc4] ss:$16 sps:$4 sm:$0xff]  }
 0x36c   :  { %14421 = vmatpush3.bf16.msra.mxu0 %v15826_v11  ;;  %v15846_v11 = vld [vmem:[#allocation2 + $0x15c0] ss:$28 sps:$4 sm:$0xff]  }
 0x36d   :  { %14443 = vmatpush3.bf16.msra.mxu1 %v15827_v19  ;;  %14450 = vmatprep.subr.bf16.mxu0 %v15828_v51  ;;  %v15848_v51 = vld [vmem:[#allocation2 + $0x1748] ss:$28 sps:$4 sm:$0xff]  }
 0x36e   :  { %14472 = vmatprep.subr.bf16.mxu1 %v15829_v10 }
 0x36f   :  { %7007 = vmatmul.mubr.bf16.vlgmr.msra.gmra.mxu0 %v16976_v58  ;;  %v6159_v58 = vadd.f32 %v17093_v33, %v1150_v54  ;;  %v6249_v33 = vadd.f32 %v17121_v14, %v6206_v24  ;;  %v5991_v14 = vadd.f32 %v17064_v5, %v5948_v37  ;;  %v15852_v5 = vld [vmem:[#allocation2 + $0x1710] ss:$28 sps:$4 sm:$0xff]   ;;  %v15857_v54 = vld [vmem:[#allocation2 + $0x1a58] ss:$28 sps:$4 sm:$0xff]  }
 0x370   :  { %7048 = vmatmul.mubr.bf16.vlgmr.msra.gmra.mxu1 %v16978_v59  ;;  %14451 = vmatpush3.bf16.msra.mxu0 %v15830_v47  ;;  %v15840_v59 = vld [vmem:[#allocation2 + $0x17b8] ss:$28 sps:$4 sm:$0xff]   ;;  %v15850_v47 = vld [vmem:[#allocation2 + $0x1588] ss:$28 sps:$4 sm:$0xff]   ;;  %v15863_v24 = vld [vmem:[%s19432_s3 + $0x2e0] ss:$16 sps:$4 sm:$0xff]  }
 0x371   :  { %14473 = vmatpush3.bf16.msra.mxu1 %v15831_v49  ;;  %14452 = vmatprep.subr.bf16.mxu0 %v15832_v32  ;;  %v6292_v19 = vadd.f32 %v17123_v17, %v6249_v33  ;;  %v15851_v49 = vld [vmem:[#allocation2 + $0x1908] ss:$28 sps:$4 sm:$0xff]   ;;  %v15853_v32 = vld [vmem:[#allocation2 + $0x1a90] ss:$28 sps:$4 sm:$0xff]  }
 0x372   :  { %14474 = vmatprep.subr.bf16.mxu1 %v15833_v28  ;;  %7088 = vmatprep.mubr.bf16.mxu0 %v16983_v0  ;;  %v15843_v0 = vld [vmem:[#allocation2 + $0x1978] ss:$28 sps:$4 sm:$0xff]   ;;  %v15869_v33 = vld [vmem:[%s19432_s3 + $0x2c0] ss:$16 sps:$4 sm:$0xff]  }
 0x373   :  { %7129 = vmatprep.mubr.bf16.mxu1 %v16985_v1  ;;  %v6202_v1 = vadd.f32 %v17095_v57, %v6159_v58  ;;  %v5944_v57 = vadd.f32 %v17037_v21, %v5901_v9  ;;  %v6034_v21 = vadd.f32 %v17066_v6, %v5991_v14  ;;  %v15880_v9 = vld [vmem:[%s19432_s3 + $0x84] ss:$16 sps:$4 sm:$0xff]   ;;  %v15878_v37 = vld [vmem:[%s19432_s3 + $0x80] ss:$16 sps:$4 sm:$0xff]  }
 0x374   :  { %14453 = vmatpush3.bf16.msra.mxu0 %v15834_v31  ;;  %v15887_v14 = vld [vmem:[%s19432_s3 + $0x260] ss:$16 sps:$4 sm:$0xff]  }
 0x375   :  { %14475 = vmatpush3.bf16.msra.mxu1 %v15835_v53  ;;  %14454 = vmatprep.subr.bf16.mxu0 %v15836_v27  ;;  %v6245_v42 = vadd.f32 %v17110_v60, %v6202_v1  ;;  %v6335_v60 = vadd.f32 %v17139_v38, %v6292_v19  ;;  %v5987_v2 = vadd.f32 %v17053_v15, %v5944_v57  ;;  %v15855_v15 = vld [vmem:[#allocation2 + $0x18d0] ss:$28 sps:$4 sm:$0xff]   ;;  %v15856_v53 = vld [vmem:[#allocation2 + $0x16d8] ss:$28 sps:$4 sm:$0xff]  }
 0x376   :  { %14476 = vmatprep.subr.bf16.mxu1 %v15837_v48  ;;  %v6077_v38 = vadd.f32 %v17087_v35, %v6034_v21  ;;  %v19459_v27 = vld [vmem:[#allocation10_spill] sm:$0xff]  ;;  %v19460_v48 = vld [vmem:[#allocation9_spill] sm:$0xff]  ;;  %v15859_v35 = vld [vmem:[#allocation2 + $0x1898] ss:$28 sps:$4 sm:$0xff]  }
 0x377   :  { %v6288_v10 = vadd.f32 %v17112_v61, %v6245_v42  ;;  %v6378_v28 = vadd.f32 %v17141_v39, %v6335_v60  ;;  %v6030_v61 = vadd.f32 %v17055_v16, %v5987_v2  ;;  %v15866_v1 = vld [vmem:[%s19432_s3 + $0xc0] ss:$16 sps:$4 sm:$0xff]   ;;  %v15883_v42 = vld [vmem:[%s19432_s3 + $0x284] ss:$16 sps:$4 sm:$0xff]  }
 0x378   :  { %14455 = vmatpush3.bf16.msra.mxu0 %v15838_v62  ;;  %v6120_v16 = vadd.f32 %v19460_v48, %v6077_v38  ;;  %v19462_v62 = vld [vmem:[#allocation11_spill] sm:$0xff] }
 0x379   :  { %14477 = vmatpush3.bf16.msra.mxu1 %v15839_v44  ;;  %14456 = vmatprep.subr.bf16.mxu0 %v15840_v59  ;;  %v6331_v17 = vadd.f32 %v17128_v52, %v6288_v10  ;;  %v6421_v52 = vadd.f32 %v17167_v43, %v6378_v28  ;;  %v6073_v6 = vadd.f32 %v17071_v30, %v6030_v61  ;;  %v15862_v30 = vld [vmem:[%s19432_s3 + $0xe4] ss:$16 sps:$4 sm:$0xff]   ;;  %v15884_v57 = vld [vmem:[%s19432_s3 + $0x60] ss:$16 sps:$4 sm:$0xff]   ;;  %v17333_v28 = vpop.f32.mrf.mxu0  ;;  %v17335_v61 = vpop.f32.mrf.mxu1 }
 0x37a   :  { %14478 = vmatprep.subr.bf16.mxu1 %v15841_v41  ;;  %v15865_v43 = vld [vmem:[%s19432_s3 + $0x2e4] ss:$16 sps:$4 sm:$0xff]   ;;  %v7146_v58 = vmax.f32 %v6120_v16, 0.0  ;;  %v15890_v10 = vld [vmem:[%s19432_s3 + $0x40] ss:$16 sps:$4 sm:$0xff]  }
 0x37b   :  { %v6374_v31 = vadd.f32 %v17130_v25, %v6331_v17  ;;  %v6464_v46 = vadd.f32 %v17169_v50, %v6421_v52  ;;  %v6116_v25 = vadd.f32 %v19461_v56, %v6073_v6  ;;  %v15860_v50 = vld [vmem:[%s19432_s3 + $0xe0] ss:$16 sps:$4 sm:$0xff]   ;;  %v15889_v19 = vld [vmem:[%s19432_s3 + $0x264] ss:$16 sps:$4 sm:$0xff]   ;;  %v17349_v52 = vpop.f32.mrf.mxu0  ;;  %v17351_v6 = vpop.f32.mrf.mxu1 }
 0x37c   :  { %14457 = vmatpush3.bf16.msra.mxu0 %v15842_v12  ;;  %v15871_v12 = vld [vmem:[%s19432_s3 + $0x2c4] ss:$16 sps:$4 sm:$0xff]   ;;  %v15893_v60 = vld [vmem:[%s19432_s3 + $0x240] ss:$16 sps:$4 sm:$0xff]  }
 0x37d   :  { %14479 = vmatpush3.bf16.msra.mxu1 %v15843_v0  ;;  %14458 = vmatprep.subr.bf16.mxu0 %v15844_v4  ;;  %v6417_v39 = vadd.f32 %v19459_v27, %v6374_v31  ;;  %v7148_v59 = vmax.f32 %v6464_v46, 0.0  ;;  %v7139_v41 = vmax.f32 %v6116_v25, 0.0  ;;  %v15872_v4 = vld [vmem:[%s19432_s3 + $0xa0] ss:$16 sps:$4 sm:$0xff]   ;;  %v15898_v2 = vld [vmem:[%s19432_s3 + $0x24] ss:$16 sps:$4 sm:$0xff]   ;;  %v6506_v48 = vpop.f32.mrf.mxu0  ;;  %v17365_v16 = vpop.f32.mrf.mxu1 }
 0x37e   :  { %14480 = vmatprep.subr.bf16.mxu1 %v15845_v13  ;;  %v15875_v13 = vld [vmem:[%s19432_s3 + $0x2a0] ss:$16 sps:$4 sm:$0xff]   ;;  %v15904_v21 = vld [vmem:[%s19432_s3 + $0x4] ss:$16 sps:$4 sm:$0xff]  }
 0x37f   :  { %v6460_v44 = vadd.f32 %v19462_v62, %v6417_v39  ;;  %v17244_v36 = vpack.c.bf16 %v7146_v58, %v7139_v41  ;;  %v15899_v17 = vld [vmem:[%s19432_s3 + $0x220] ss:$16 sps:$4 sm:$0xff]   ;;  %v15919_v27 = vld [vmem:[%s19432_s3 + $0x3c4] ss:$16 sps:$4 sm:$0xff]   ;;  %v17376_v56 = vpop.f32.mrf.mxu0  ;;  %v17378_v25 = vpop.f32.mrf.mxu1  ;;  %v17393_v41 = vsub.s32 5, %v16991_v7 }
 0x380   :  { %14459 = vmatpush3.bf16.msra.mxu0 %v15846_v11  ;;  %v15881_v11 = vld [vmem:[%s19432_s3 + $0x280] ss:$16 sps:$4 sm:$0xff]   ;;  %v15925_v46 = vld [vmem:[%s19432_s3 + $0x3a4] ss:$16 sps:$4 sm:$0xff]  }
 0x381   :  { %14481 = vmatpush3.bf16.msra.mxu1 %v15847_v63  ;;  %14460 = vmatprep.subr.bf16.mxu0 %v15848_v51  ;;  %v7141_v8 = vmax.f32 %v6460_v44, 0.0  ;;  %v15886_v63 = vld [vmem:[%s19432_s3 + $0x64] ss:$16 sps:$4 sm:$0xff]   ;;  %v15905_v38 = vld [vmem:[%s19432_s3 + $0x200] ss:$16 sps:$4 sm:$0xff]   ;;  %v6588_v58 = vpop.f32.mrf.mxu0 }
 0x382   :  { %14482 = vmatprep.subr.bf16.mxu1 %v15849_v20  ;;  %v15892_v51 = vld [vmem:[%s19432_s3 + $0x44] ss:$16 sps:$4 sm:$0xff]   ;;  %v15908_v31 = vld [vmem:[%s19432_s3 + $0x1e0] ss:$16 sps:$4 sm:$0xff]  }
 0x383   :  { %v17252_v0 = vpack.c.bf16 %v7148_v59, %v7141_v8  ;;  %v15895_v20 = vld [vmem:[%s19432_s3 + $0x244] ss:$16 sps:$4 sm:$0xff]   ;;  %v15914_v39 = vld [vmem:[%s19432_s3 + $0x1c0] ss:$16 sps:$4 sm:$0xff]   ;;  %v6631_v59 = vpop.f32.mrf.mxu1 }
 0x384   :  { %14461 = vmatpush3.bf16.msra.mxu0 %v15850_v47  ;;  %v15901_v47 = vld [vmem:[%s19432_s3 + $0x224] ss:$16 sps:$4 sm:$0xff]   ;;  %v15929_v8 = vld [vmem:[%s19432_s3 + $0x380] ss:$16 sps:$4 sm:$0xff]  }
 0x385   :  { %14483 = vmatpush3.bf16.msra.mxu1 %v15851_v49  ;;  %14462 = vmatprep.subr.bf16.mxu0 %v15852_v5  ;;  %v15896_v49 = vld [vmem:[%s19432_s3 + $0x20] ss:$16 sps:$4 sm:$0xff]   ;;  %v15907_v5 = vld [vmem:[%s19432_s3 + $0x204] ss:$16 sps:$4 sm:$0xff]  }
 0x386   :  { %14484 = vmatprep.subr.bf16.mxu1 %v15853_v32  ;;  %v15902_v32 = vld [vmem:[%s19432_s3] ss:$16 sps:$4 sm:$0xff]   ;;  %v15928_v62 = vld [vmem:[%s19432_s3 + $0x184] ss:$16 sps:$4 sm:$0xff]  }
 0x387   :  { %v15931_v44 = vld [vmem:[%s19432_s3 + $0x384] ss:$16 sps:$4 sm:$0xff]  }
 0x388   :  { %14463 = vmatpush3.bf16.msra.mxu0 %v15854_v29  ;;  %v15910_v29 = vld [vmem:[%s19432_s3 + $0x1e4] ss:$16 sps:$4 sm:$0xff]  }
 0x389   :  { %14485 = vmatpush3.bf16.msra.mxu1 %v15855_v15  ;;  %14464 = vmatprep.subr.bf16.mxu0 %v15856_v53  ;;  %v15913_v15 = vld [vmem:[%s19432_s3 + $0x3e4] ss:$16 sps:$4 sm:$0xff]   ;;  %v15911_v53 = vld [vmem:[%s19432_s3 + $0x3e0] ss:$16 sps:$4 sm:$0xff]  }
 0x38a   :  { %14486 = vmatprep.subr.bf16.mxu1 %v15857_v54  ;;  %v15916_v54 = vld [vmem:[%s19432_s3 + $0x1c4] ss:$16 sps:$4 sm:$0xff]  }
 0x38c   :  { %14465 = vmatpush3.bf16.msra.mxu0 %v15858_v40  ;;  %v15917_v40 = vld [vmem:[%s19432_s3 + $0x3c0] ss:$16 sps:$4 sm:$0xff]  }
 0x38d   :  { %14487 = vmatpush3.bf16.msra.mxu1 %v15859_v35  ;;  %8525 = vmatprep.subr.bf16.mxu0 %v15862_v30  ;;  %v15922_v35 = vld [vmem:[%s19432_s3 + $0x1a4] ss:$16 sps:$4 sm:$0xff]   ;;  %v15920_v30 = vld [vmem:[%s19432_s3 + $0x1a0] ss:$16 sps:$4 sm:$0xff]  }
 0x38e   :  { %8568 = vmatprep.subr.bf16.mxu1 %v15865_v43  ;;  %v15923_v43 = vld [vmem:[%s19432_s3 + $0x3a0] ss:$16 sps:$4 sm:$0xff]  }
 0x38f   :  { %7089 = vmatmul.mubr.bf16.vlgmr.msra.gmra.mxu0 %v17011_v22  ;;  %v15874_v22 = vld [vmem:[%s19432_s3 + $0xa4] ss:$16 sps:$4 sm:$0xff]  }
 0x390   :  { %7130 = vmatmul.mubr.bf16.vlgmr.msra.gmra.mxu1 %v17013_v23  ;;  %8526 = vmatpush1.bf16.msra.mxu0 %v15860_v50  ;;  %v15877_v23 = vld [vmem:[%s19432_s3 + $0x2a4] ss:$16 sps:$4 sm:$0xff]   ;;  %v15926_v50 = vld [vmem:[%s19432_s3 + $0x180] ss:$16 sps:$4 sm:$0xff]  }
 0x391   :  { %8557 = vmatprep.mubr.bf16.mxu0 %v17244_v36  ;;  %8569 = vmatpush1.bf16.msra.mxu1 %v15863_v24  ;;  %v15934_v24 = vld [vmem:[%s19432_s3 + $0x164] ss:$16 sps:$4 sm:$0xff]  }
 0x392   :  { %8600 = vmatprep.mubr.bf16.mxu1 %v17252_v0  ;;  %8527 = vmatprep.subr.bf16.mxu0 %v15868_v18  ;;  %v15937_v18 = vld [vmem:[%s19432_s3 + $0x364] ss:$16 sps:$4 sm:$0xff]  }
 0x393   :  { %8570 = vmatprep.subr.bf16.mxu1 %v15871_v12  ;;  %v17407_v12 = vpop.f32.mrf.mxu0 }
 0x394   :  { %8528 = vmatpush1.bf16.msra.mxu0 %v15866_v1  ;;  %v17409_v1 = vpop.f32.mrf.mxu1 }
 0x395   :  { %8571 = vmatpush1.bf16.msra.mxu1 %v15869_v33  ;;  %8529 = vmatprep.subr.bf16.mxu0 %v15874_v22  ;;  %v17414_v33 = vld [vmem:[%s19431_s2] sm:$0xff] }
 0x396   :  { %8572 = vmatprep.subr.bf16.mxu1 %v15877_v23  ;;  %v1158_v22 = vrot.slane %v17414_v33, %v17393_v41  ;;  %v15932_v23 = vld [vmem:[%s19432_s3 + $0x160] ss:$16 sps:$4 sm:$0xff]  }
 0x398   :  { %8530 = vmatpush1.bf16.msra.mxu0 %v15872_v4  ;;  %v15935_v4 = vld [vmem:[%s19432_s3 + $0x360] ss:$16 sps:$4 sm:$0xff]  }
 0x399   :  { %8573 = vmatpush1.bf16.msra.mxu1 %v15875_v13  ;;  %8531 = vmatprep.subr.bf16.mxu0 %v15880_v9  ;;  %v15940_v13 = vld [vmem:[%s19432_s3 + $0x144] ss:$16 sps:$4 sm:$0xff]  }
 0x39a   :  { %8574 = vmatprep.subr.bf16.mxu1 %v15883_v42  ;;  %v15943_v9 = vld [vmem:[%s19432_s3 + $0x344] ss:$16 sps:$4 sm:$0xff]   ;;  %v6592_v42 = vpop.f32.mrf.mxu0 }
 0x39c   :  { %8532 = vmatpush1.bf16.msra.mxu0 %v15878_v37  ;;  %v6635_v37 = vpop.f32.mrf.mxu1 }
 0x39d   :  { %8575 = vmatpush1.bf16.msra.mxu1 %v15881_v11  ;;  %8533 = vmatprep.subr.bf16.mxu0 %v15886_v63  ;;  %v6503_v11 = vadd.f32 %v17333_v28, %v1158_v22  ;;  %v15938_v63 = vld [vmem:[%s19432_s3 + $0x140] ss:$16 sps:$4 sm:$0xff]  }
 0x39e   :  { %8576 = vmatprep.subr.bf16.mxu1 %v15889_v19  ;;  %v17434_v19 = vpop.f32.mrf.mxu0 }
 0x3a0   :  { %8534 = vmatpush1.bf16.msra.mxu0 %v15884_v57  ;;  %v17436_v57 = vpop.f32.mrf.mxu1 }
 0x3a1   :  { %8577 = vmatpush1.bf16.msra.mxu1 %v15887_v14  ;;  %8535 = vmatprep.subr.bf16.mxu0 %v15892_v51  ;;  %v15941_v14 = vld [vmem:[%s19432_s3 + $0x340] ss:$16 sps:$4 sm:$0xff]   ;;  %v15946_v51 = vld [vmem:[%s19432_s3 + $0x124] ss:$16 sps:$4 sm:$0xff]  }
 0x3a2   :  { %8578 = vmatprep.subr.bf16.mxu1 %v15895_v20  ;;  %v15949_v20 = vld [vmem:[%s19432_s3 + $0x324] ss:$16 sps:$4 sm:$0xff]  }
 0x3a4   :  { %8536 = vmatpush1.bf16.msra.mxu0 %v15890_v10  ;;  %v6546_v10 = vadd.f32 %v17335_v61, %v6503_v11  ;;  %v15950_v61 = vld [vmem:[%s19432_s3 + $0x100] ss:$16 sps:$4 sm:$0xff]  }
 0x3a5   :  { %8579 = vmatpush1.bf16.msra.mxu1 %v15893_v60  ;;  %8537 = vmatprep.subr.bf16.mxu0 %v15898_v2  ;;  %v6507_v60 = vadd.f32 %v6506_v48, %v1158_v22  ;;  %v15944_v2 = vld [vmem:[%s19432_s3 + $0x120] ss:$16 sps:$4 sm:$0xff]   ;;  %v15964_v22 = vld [vmem:[%s19432_s3 + $0x4a4] ss:$16 sps:$4 sm:$0xff]  }
 0x3a6   :  { %8580 = vmatprep.subr.bf16.mxu1 %v15901_v47  ;;  %v6674_v47 = vpop.f32.mrf.mxu0  ;;  %v15956_v48 = vld [vmem:[%s19432_s3 + $0x4e0] ss:$16 sps:$4 sm:$0xff]  }
 0x3a7   :  { %v6550_v28 = vadd.f32 %v17365_v16, %v6507_v60  ;;  %v15962_v11 = vld [vmem:[%s19432_s3 + $0x4a0] ss:$16 sps:$4 sm:$0xff]   ;;  %v16060_v60 = vld [vmem:[%s19432_s3 + $0x684] ss:$16 sps:$4 sm:$0xff]  }
 0x3a8   :  { %8538 = vmatpush1.bf16.msra.mxu0 %v15896_v49  ;;  %v6717_v49 = vpop.f32.mrf.mxu1 }
 0x3a9   :  { %8581 = vmatpush1.bf16.msra.mxu1 %v15899_v17  ;;  %8539 = vmatprep.subr.bf16.mxu0 %v15904_v21  ;;  %v15947_v17 = vld [vmem:[%s19432_s3 + $0x320] ss:$16 sps:$4 sm:$0xff]   ;;  %v15952_v21 = vld [vmem:[%s19432_s3 + $0x104] ss:$16 sps:$4 sm:$0xff]  }
 0x3aa   :  { %8582 = vmatprep.subr.bf16.mxu1 %v15907_v5  ;;  %v6589_v5 = vadd.f32 %v6588_v58, %v6546_v10  ;;  %v19463_v58 = vld [vmem:[#allocation7_spill] sm:$0xff] }
 0x3ac   :  { %8540 = vmatpush1.bf16.msra.mxu0 %v15902_v32  ;;  %v15955_v32 = vld [vmem:[%s19432_s3 + $0x304] ss:$16 sps:$4 sm:$0xff]  }
 0x3ad   :  { %8583 = vmatpush1.bf16.msra.mxu1 %v15905_v38  ;;  %8541 = vmatprep.subr.bf16.mxu0 %v15910_v29  ;;  %v17464_v38 = vpop.f32.mrf.mxu0  ;;  %v17466_v29 = vpop.f32.mrf.mxu1 }
 0x3ae   :  { %8584 = vmatprep.subr.bf16.mxu1 %v15913_v15  ;;  %v15953_v15 = vld [vmem:[%s19432_s3 + $0x300] ss:$16 sps:$4 sm:$0xff]  }
 0x3af   :  { %v6678_v16 = vpop.f32.mrf.mxu0 }
 0x3b0   :  { %8542 = vmatpush2.bf16.msra.mxu0 %v15908_v31  ;;  %v15958_v31 = vld [vmem:[%s19432_s3 + $0x4e4] ss:$16 sps:$4 sm:$0xff]  }
 0x3b1   :  { %8585 = vmatpush2.bf16.msra.mxu1 %v15911_v53  ;;  %8543 = vmatprep.subr.bf16.mxu0 %v15916_v54  ;;  %v6632_v53 = vadd.f32 %v6631_v59, %v6589_v5  ;;  %v6593_v54 = vadd.f32 %v6592_v42, %v6550_v28  ;;  %v16066_v28 = vld [vmem:[%s19432_s3 + $0x664] ss:$16 sps:$4 sm:$0xff]  }
 0x3b2   :  { %8586 = vmatprep.subr.bf16.mxu1 %v15919_v27  ;;  %v16042_v27 = vld [vmem:[%s19432_s3 + $0x6e4] ss:$16 sps:$4 sm:$0xff]  }
 0x3b4   :  { %8544 = vmatpush2.bf16.msra.mxu0 %v15914_v39  ;;  %v6675_v39 = vadd.f32 %v6674_v47, %v6632_v53  ;;  %v16064_v53 = vld [vmem:[%s19432_s3 + $0x660] ss:$16 sps:$4 sm:$0xff]  }
 0x3b5   :  { %8587 = vmatpush2.bf16.msra.mxu1 %v15917_v40  ;;  %8545 = vmatprep.subr.bf16.mxu0 %v15922_v35  ;;  %v6721_v40 = vpop.f32.mrf.mxu1  ;;  %v15961_v35 = vld [vmem:[%s19432_s3 + $0x4c4] ss:$16 sps:$4 sm:$0xff]  }
 0x3b6   :  { %8588 = vmatprep.subr.bf16.mxu1 %v15925_v46  ;;  %v16040_v46 = vld [vmem:[%s19432_s3 + $0x6e0] ss:$16 sps:$4 sm:$0xff]   ;;  %v6718_v59 = vadd.f32 %v6717_v49, %v6675_v39 }
 0x3b7   :  { %v15965_v49 = vld [vmem:[%s19432_s3 + $0x480] ss:$16 sps:$4 sm:$0xff]  }
 0x3b8   :  { %8546 = vmatpush2.bf16.msra.mxu0 %v15920_v30  ;;  %v6636_v30 = vadd.f32 %v6635_v37, %v6593_v54  ;;  %v16072_v54 = vld [vmem:[%s19432_s3 + $0x644] ss:$16 sps:$4 sm:$0xff]   ;;  %v15971_v39 = vld [vmem:[%s19432_s3 + $0x440] ss:$16 sps:$4 sm:$0xff]  }
 0x3b9   :  { %8589 = vmatpush2.bf16.msra.mxu1 %v15923_v43  ;;  %8547 = vmatprep.subr.bf16.mxu0 %v15928_v62  ;;  %v16048_v43 = vld [vmem:[%s19432_s3 + $0x6c4] ss:$16 sps:$4 sm:$0xff]  }
 0x3ba   :  { %8590 = vmatprep.subr.bf16.mxu1 %v15931_v44 }
 0x3bc   :  { %8548 = vmatpush2.bf16.msra.mxu0 %v15926_v50  ;;  %v6679_v50 = vadd.f32 %v6678_v16, %v6636_v30  ;;  %v16070_v16 = vld [vmem:[%s19432_s3 + $0x640] ss:$16 sps:$4 sm:$0xff]  }
 0x3bd   :  { %8591 = vmatpush2.bf16.msra.mxu1 %v15929_v8  ;;  %8549 = vmatprep.subr.bf16.mxu0 %v15934_v24  ;;  %v15959_v8 = vld [vmem:[%s19432_s3 + $0x4c0] ss:$16 sps:$4 sm:$0xff]  }
 0x3be   :  { %8592 = vmatprep.subr.bf16.mxu1 %v15937_v18  ;;  %v6722_v37 = vadd.f32 %v6721_v40, %v6679_v50  ;;  %v16078_v40 = vld [vmem:[%s19432_s3 + $0x624] ss:$16 sps:$4 sm:$0xff]   ;;  %v16076_v30 = vld [vmem:[%s19432_s3 + $0x620] ss:$16 sps:$4 sm:$0xff]  }
 0x3bf   :  { %v15982_v50 = vld [vmem:[%s19432_s3 + $0x5e4] ss:$16 sps:$4 sm:$0xff]  }
 0x3c0   :  { %8550 = vmatpush2.bf16.msra.mxu0 %v15932_v23  ;;  %v16046_v23 = vld [vmem:[%s19432_s3 + $0x6c0] ss:$16 sps:$4 sm:$0xff]  }
 0x3c1   :  { %8593 = vmatpush2.bf16.msra.mxu1 %v15935_v4  ;;  %8551 = vmatprep.subr.bf16.mxu0 %v15940_v13  ;;  %v16054_v13 = vld [vmem:[%s19432_s3 + $0x6a4] ss:$16 sps:$4 sm:$0xff]  }
 0x3c2   :  { %8594 = vmatprep.subr.bf16.mxu1 %v15943_v9 }
 0x3c4   :  { %8552 = vmatpush2.bf16.msra.mxu0 %v15938_v63 }
 0x3c5   :  { %8595 = vmatpush2.bf16.msra.mxu1 %v15941_v14  ;;  %8553 = vmatprep.subr.bf16.mxu0 %v15946_v51  ;;  %v15967_v14 = vld [vmem:[%s19432_s3 + $0x484] ss:$16 sps:$4 sm:$0xff]   ;;  %v16052_v51 = vld [vmem:[%s19432_s3 + $0x6a0] ss:$16 sps:$4 sm:$0xff]  }
 0x3c6   :  { %8596 = vmatprep.subr.bf16.mxu1 %v15949_v20 }
 0x3c8   :  { %8554 = vmatpush2.bf16.msra.mxu0 %v15944_v2 }
 0x3c9   :  { %8597 = vmatpush2.bf16.msra.mxu1 %v15947_v17  ;;  %8555 = vmatprep.subr.bf16.mxu0 %v15952_v21  ;;  %v15970_v17 = vld [vmem:[%s19432_s3 + $0x464] ss:$16 sps:$4 sm:$0xff]   ;;  %v16058_v21 = vld [vmem:[%s19432_s3 + $0x680] ss:$16 sps:$4 sm:$0xff]  }
 0x3ca   :  { %8598 = vmatprep.subr.bf16.mxu1 %v15955_v32 }
 0x3cc   :  { %8556 = vmatpush2.bf16.msra.mxu0 %v15950_v61 }
 0x3cd   :  { %8599 = vmatpush2.bf16.msra.mxu1 %v15953_v15  ;;  %8611 = vmatprep.subr.bf16.mxu0 %v15958_v31  ;;  %v15968_v15 = vld [vmem:[%s19432_s3 + $0x460] ss:$16 sps:$4 sm:$0xff]   ;;  %v15973_v31 = vld [vmem:[%s19432_s3 + $0x444] ss:$16 sps:$4 sm:$0xff]  }
 0x3ce   :  { %8654 = vmatprep.subr.bf16.mxu1 %v16042_v27  ;;  %v16784_v27 = vmov 0  }
 0x3cf   :  { %v17489_v62 = vpop.f32.mrf.mxu0  ;;  %8558 = vmatmul.mubr.bf16.vlgmr.msra.gmra.mxu0 %v19463_v58 }
 0x3d0   :  { %v17491_v44 = vpop.f32.mrf.mxu1  ;;  %8601 = vmatmul.mubr.bf16.vlgmr.msra.gmra.mxu1 %v17153_v55  ;;  %8612 = vmatpush1.bf16.msra.mxu0 %v15956_v48  ;;  %v15976_v48 = vld [vmem:[%s19432_s3 + $0x424] ss:$16 sps:$4 sm:$0xff]  }
 0x3d1   :  { %v6760_v24 = vpop.f32.mrf.mxu0  ;;  %8613 = vmatprep.subr.bf16.mxu0 %v15961_v35  ;;  %8655 = vmatpush1.bf16.msra.mxu1 %v16040_v46  ;;  %v15974_v35 = vld [vmem:[%s19432_s3 + $0x420] ss:$16 sps:$4 sm:$0xff]   ;;  %v15979_v46 = vld [vmem:[%s19432_s3 + $0x404] ss:$16 sps:$4 sm:$0xff]  }
 0x3d2   :  { %v6803_v18 = vpop.f32.mrf.mxu1  ;;  %v6761_v4 = vadd.f32 %v6760_v24, %v6718_v59  ;;  %8656 = vmatprep.subr.bf16.mxu1 %v16048_v43  ;;  %8686 = vmatprep.mubr.bf16.mxu1 %v16784_v27  ;;  %v16084_v43 = vld [vmem:[%s19432_s3 + $0x604] ss:$16 sps:$4 sm:$0xff]   ;;  %v15977_v59 = vld [vmem:[%s19432_s3 + $0x400] ss:$16 sps:$4 sm:$0xff]   ;;  %v16090_v24 = vld [vmem:[%s19432_s3 + $0xec] ss:$16 sps:$4 sm:$0xff]  }
 0x3d3   :  { %v17507_v9 = vpop.f32.mrf.mxu0 }
 0x3d4   :  { %v17509_v42 = vpop.f32.mrf.mxu1  ;;  %8614 = vmatpush1.bf16.msra.mxu0 %v15959_v8  ;;  %v6804_v20 = vadd.f32 %v6803_v18, %v6761_v4  ;;  %v16082_v8 = vld [vmem:[%s19432_s3 + $0x600] ss:$16 sps:$4 sm:$0xff]  }
 0x3d5   :  { %v6764_v63 = vpop.f32.mrf.mxu0  ;;  %8615 = vmatprep.subr.bf16.mxu0 %v15964_v22  ;;  %8657 = vmatpush1.bf16.msra.mxu1 %v16046_v23  ;;  %v15980_v18 = vld [vmem:[%s19432_s3 + $0x5e0] ss:$16 sps:$4 sm:$0xff]   ;;  %v15985_v22 = vld [vmem:[%s19432_s3 + $0x5c4] ss:$16 sps:$4 sm:$0xff]   ;;  %v6505_v23 = vadd.f32 %v17349_v52, %v17165_v26  ;;  %v6587_v52 = vadd.f32 %v17376_v56, %v17174_v3 }
 0x3d6   :  { %v6765_v10 = vadd.f32 %v6764_v63, %v6722_v37  ;;  %8658 = vmatprep.subr.bf16.mxu1 %v16054_v13  ;;  %v6807_v2 = vpop.f32.mrf.mxu1  ;;  %v7143_v5 = vmax.f32 %v6804_v20, 0.0  ;;  %v15983_v4 = vld [vmem:[%s19432_s3 + $0x5c0] ss:$16 sps:$4 sm:$0xff]   ;;  %v15988_v13 = vld [vmem:[%s19432_s3 + $0x5a4] ss:$16 sps:$4 sm:$0xff]  }
 0x3d7   :  { %v6548_v37 = vadd.f32 %v17351_v6, %v6505_v23  ;;  %v15991_v26 = vld [vmem:[%s19432_s3 + $0x584] ss:$16 sps:$4 sm:$0xff]   ;;  %v15989_v6 = vld [vmem:[%s19432_s3 + $0x580] ss:$16 sps:$4 sm:$0xff]   ;;  %v16033_v23 = vld [vmem:[%s19432_s3 + $0x3cc] ss:$16 sps:$4 sm:$0xff]  }
 0x3d8   :  { %v6808_v47 = vadd.f32 %v6807_v2, %v6765_v10  ;;  %8616 = vmatpush1.bf16.msra.mxu0 %v15962_v11  ;;  %v15986_v11 = vld [vmem:[%s19432_s3 + $0x5a0] ss:$16 sps:$4 sm:$0xff]  }
 0x3d9   :  { %8617 = vmatprep.subr.bf16.mxu0 %v15967_v14  ;;  %8659 = vmatpush1.bf16.msra.mxu1 %v16052_v51  ;;  %v6591_v63 = vadd.f32 %v17407_v12, %v6548_v37  ;;  %v15994_v12 = vld [vmem:[%s19432_s3 + $0x564] ss:$16 sps:$4 sm:$0xff]   ;;  %v6630_v51 = vadd.f32 %v17378_v25, %v6587_v52  ;;  %v15992_v3 = vld [vmem:[%s19432_s3 + $0x560] ss:$16 sps:$4 sm:$0xff]   ;;  %v16034_v52 = vld [vmem:[%s19432_s3 + $0x3a8] ss:$16 sps:$4 sm:$0xff]  }
 0x3da   :  { %v7150_v32 = vmax.f32 %v6808_v47, 0.0  ;;  %8660 = vmatprep.subr.bf16.mxu1 %v16060_v60  ;;  %v15995_v25 = vld [vmem:[%s19432_s3 + $0x540] ss:$16 sps:$4 sm:$0xff]  }
 0x3db   :  { %v6634_v14 = vadd.f32 %v17409_v1, %v6591_v63  ;;  %v6673_v56 = vadd.f32 %v17434_v19, %v6630_v51  ;;  %v15997_v1 = vld [vmem:[%s19432_s3 + $0x544] ss:$16 sps:$4 sm:$0xff]   ;;  %v16036_v63 = vld [vmem:[%s19432_s3 + $0x3ac] ss:$16 sps:$4 sm:$0xff]   ;;  %v16037_v51 = vld [vmem:[%s19432_s3 + $0x388] ss:$16 sps:$4 sm:$0xff]  }
 0x3dc   :  { %v17535_v61 = vpack.c.bf16 %v7150_v32, %v7143_v5  ;;  %8618 = vmatpush1.bf16.msra.mxu0 %v15965_v49  ;;  %v16000_v19 = vld [vmem:[%s19432_s3 + $0x524] ss:$16 sps:$4 sm:$0xff]   ;;  %v16001_v49 = vld [vmem:[%s19432_s3 + $0x500] ss:$16 sps:$4 sm:$0xff]   ;;  %v16007_v32 = vld [vmem:[%s19432_s3 + $0x2c8] ss:$16 sps:$4 sm:$0xff]  }
 0x3dd   :  { %8619 = vmatprep.subr.bf16.mxu0 %v15970_v17  ;;  %8661 = vmatpush1.bf16.msra.mxu1 %v16058_v21  ;;  %v6677_v20 = vadd.f32 %v17464_v38, %v6634_v14  ;;  %v6716_v38 = vadd.f32 %v17436_v57, %v6673_v56  ;;  %v16003_v57 = vld [vmem:[%s19432_s3 + $0x504] ss:$16 sps:$4 sm:$0xff]   ;;  %v16006_v17 = vld [vmem:[%s19432_s3 + $0x2ec] ss:$16 sps:$4 sm:$0xff]   ;;  %v17728_v56 = vsub.s32 6, %v16991_v7 }
 0x3de   :  { %8643 = vmatprep.mubr.bf16.mxu0 %v17535_v61  ;;  %8662 = vmatprep.subr.bf16.mxu1 %v16066_v28  ;;  %v16012_v28 = vld [vmem:[%s19432_s3 + $0x2ac] ss:$16 sps:$4 sm:$0xff]  }
 0x3df   :  { %v6720_v10 = vadd.f32 %v17466_v29, %v6677_v20  ;;  %v6759_v2 = vadd.f32 %v17489_v62, %v6716_v38  ;;  %v15998_v29 = vld [vmem:[%s19432_s3 + $0x520] ss:$16 sps:$4 sm:$0xff]   ;;  %v16039_v14 = vld [vmem:[%s19432_s3 + $0x38c] ss:$16 sps:$4 sm:$0xff]  }
 0x3e0   :  { %8620 = vmatpush1.bf16.msra.mxu0 %v15968_v15  ;;  %v16010_v15 = vld [vmem:[%s19432_s3 + $0x2a8] ss:$16 sps:$4 sm:$0xff]   ;;  %v16051_v38 = vld [vmem:[%s19432_s3 + $0x34c] ss:$16 sps:$4 sm:$0xff]  }
 0x3e1   :  { %8621 = vmatprep.subr.bf16.mxu0 %v15973_v31  ;;  %8663 = vmatpush1.bf16.msra.mxu1 %v16064_v53  ;;  %v6763_v60 = vadd.f32 %v17507_v9, %v6720_v10  ;;  %v6802_v9 = vadd.f32 %v17491_v44, %v6759_v2  ;;  %v16009_v44 = vld [vmem:[%s19432_s3 + $0x2cc] ss:$16 sps:$4 sm:$0xff]   ;;  %v16043_v10 = vld [vmem:[%s19432_s3 + $0x368] ss:$16 sps:$4 sm:$0xff]  }
 0x3e2   :  { %8664 = vmatprep.subr.bf16.mxu1 %v16072_v54  ;;  %v16015_v31 = vld [vmem:[%s19432_s3 + $0x28c] ss:$16 sps:$4 sm:$0xff]   ;;  %v16016_v54 = vld [vmem:[%s19432_s3 + $0x268] ss:$16 sps:$4 sm:$0xff]  }
 0x3e3   :  { %v6806_v47 = vadd.f32 %v17509_v42, %v6763_v60  ;;  %v7142_v21 = vmax.f32 %v6802_v9, 0.0  ;;  %v16004_v42 = vld [vmem:[%s19432_s3 + $0x2e8] ss:$16 sps:$4 sm:$0xff]   ;;  %v16018_v53 = vld [vmem:[%s19432_s3 + $0x26c] ss:$16 sps:$4 sm:$0xff]   ;;  %v1162_v60 = vrot.slane %v17414_v33, %v17728_v56 }
 0x3e4   :  { %8622 = vmatpush1.bf16.msra.mxu0 %v15971_v39  ;;  %v16021_v39 = vld [vmem:[%s19432_s3 + $0x24c] ss:$16 sps:$4 sm:$0xff]   ;;  %v16055_v33 = vld [vmem:[%s19432_s3 + $0x328] ss:$16 sps:$4 sm:$0xff]  }
 0x3e5   :  { %8623 = vmatprep.subr.bf16.mxu0 %v15976_v48  ;;  %8665 = vmatpush1.bf16.msra.mxu1 %v16070_v16  ;;  %v7149_v62 = vmax.f32 %v6806_v47, 0.0  ;;  %v16019_v48 = vld [vmem:[%s19432_s3 + $0x248] ss:$16 sps:$4 sm:$0xff]   ;;  %v16024_v16 = vld [vmem:[%s19432_s3 + $0x22c] ss:$16 sps:$4 sm:$0xff]  }
 0x3e6   :  { %8666 = vmatprep.subr.bf16.mxu1 %v16078_v40  ;;  %v16049_v47 = vld [vmem:[%s19432_s3 + $0x348] ss:$16 sps:$4 sm:$0xff]   ;;  %v16057_v9 = vld [vmem:[%s19432_s3 + $0x32c] ss:$16 sps:$4 sm:$0xff]  }
 0x3e7   :  { %v17654_v5 = vpack.c.bf16 %v7149_v62, %v7142_v21 }
 0x3e8   :  { %8624 = vmatpush1.bf16.msra.mxu0 %v15974_v35  ;;  %v16022_v35 = vld [vmem:[%s19432_s3 + $0x228] ss:$16 sps:$4 sm:$0xff]  }
 0x3e9   :  { %8625 = vmatprep.subr.bf16.mxu0 %v15979_v46  ;;  %8667 = vmatpush1.bf16.msra.mxu1 %v16076_v30  ;;  %v16027_v30 = vld [vmem:[%s19432_s3 + $0x20c] ss:$16 sps:$4 sm:$0xff]  }
 0x3ea   :  { %8668 = vmatprep.subr.bf16.mxu1 %v16084_v43 }
 0x3ec   :  { %8626 = vmatpush1.bf16.msra.mxu0 %v15977_v59  ;;  %v16025_v59 = vld [vmem:[%s19432_s3 + $0x208] ss:$16 sps:$4 sm:$0xff]  }
 0x3ed   :  { %8627 = vmatprep.subr.bf16.mxu0 %v15982_v50  ;;  %8669 = vmatpush1.bf16.msra.mxu1 %v16082_v8  ;;  %v16030_v8 = vld [vmem:[%s19432_s3 + $0x3ec] ss:$16 sps:$4 sm:$0xff]  }
 0x3ee   :  { %8697 = vmatprep.subr.bf16.mxu1 %v16090_v24 }
 0x3ef   :  { %v14334_v40 = vpop.f32.mrf.mxu0 }
 0x3f0   :  { %8628 = vmatpush2.bf16.msra.mxu0 %v15980_v18  ;;  %v14356_v46 = vpop.f32.mrf.mxu1  ;;  %v16028_v18 = vld [vmem:[%s19432_s3 + $0x3e8] ss:$16 sps:$4 sm:$0xff]  }
 0x3f1   :  { %8629 = vmatprep.subr.bf16.mxu0 %v15985_v22  ;;  %v14335_v43 = vpop.f32.mrf.mxu0 }
 0x3f2   :  { %v14357_v50 = vpop.f32.mrf.mxu1 }
 0x3f3   :  { %v14337_v24 = vpop.f32.mrf.mxu0  ;;  %v14358_v62 = vadd.f32 %v14357_v50, %v14356_v46  ;;  %v16067_v50 = vld [vmem:[%s19432_s3 + $0x6e8] ss:$16 sps:$4 sm:$0xff]  }
 0x3f4   :  { %8630 = vmatpush2.bf16.msra.mxu0 %v15983_v4  ;;  %v14359_v22 = vpop.f32.mrf.mxu1 }
 0x3f5   :  { %8631 = vmatprep.subr.bf16.mxu0 %v15988_v13  ;;  %v14338_v4 = vpop.f32.mrf.mxu0  ;;  %v16031_v13 = vld [vmem:[%s19432_s3 + $0x3c8] ss:$16 sps:$4 sm:$0xff]  }
 0x3f6   :  { %v14360_v37 = vpop.f32.mrf.mxu1 }
 0x3f8   :  { %8632 = vmatpush2.bf16.msra.mxu0 %v15986_v11 }
 0x3f9   :  { %8633 = vmatprep.subr.bf16.mxu0 %v15991_v26 }
 0x3fc   :  { %8634 = vmatpush2.bf16.msra.mxu0 %v15989_v6 }
 0x3fd   :  { %8635 = vmatprep.subr.bf16.mxu0 %v15994_v12 }
 0x400   :  { %8636 = vmatpush2.bf16.msra.mxu0 %v15992_v3  ;;  %v16045_v3 = vld [vmem:[%s19432_s3 + $0x36c] ss:$16 sps:$4 sm:$0xff]  }
 0x401   :  { %8637 = vmatprep.subr.bf16.mxu0 %v15997_v1 }
 0x404   :  { %8638 = vmatpush2.bf16.msra.mxu0 %v15995_v25 }
 0x405   :  { %8639 = vmatprep.subr.bf16.mxu0 %v16000_v19  ;;  %v14336_v19 = vadd.f32 %v14335_v43, %v14334_v40  ;;  %v16069_v40 = vld [vmem:[%s19432_s3 + $0x6ec] ss:$16 sps:$4 sm:$0xff]  }
 0x408   :  { %8640 = vmatpush2.bf16.msra.mxu0 %v15998_v29 }
 0x409   :  { %8641 = vmatprep.subr.bf16.mxu0 %v16003_v57 }
 0x40c   :  { %8642 = vmatpush2.bf16.msra.mxu0 %v16001_v49  ;;  %v6845_v49 = vadd.f32 %v14336_v19, %v1162_v60 }
 0x40d   :  { %8740 = vmatprep.subr.bf16.mxu0 %v16006_v17  ;;  %v14339_v17 = vadd.f32 %v14338_v4, %v14337_v24  ;;  %v16075_v24 = vld [vmem:[%s19432_s3 + $0x6cc] ss:$16 sps:$4 sm:$0xff]  }
 0x40f   :  { %8644 = vmatmul.mubr.bf16.vlgmr.msra.gmra.mxu0 %v17654_v5  ;;  %v14378_v11 = vpop.f32.mrf.mxu0 }
 0x410   :  { %8741 = vmatpush1.bf16.msra.mxu0 %v16004_v42  ;;  %8772 = vmatprep.mubr.bf16.mxu0 %v17252_v0  ;;  %v16013_v0 = vld [vmem:[%s19432_s3 + $0x288] ss:$16 sps:$4 sm:$0xff]   ;;  %v14400_v26 = vpop.f32.mrf.mxu1 }
 0x411   :  { %8742 = vmatprep.subr.bf16.mxu0 %v16009_v44  ;;  %v14379_v6 = vpop.f32.mrf.mxu0 }
 0x412   :  { %v14401_v12 = vpop.f32.mrf.mxu1  ;;  %v14380_v42 = vadd.f32 %v14379_v6, %v14378_v11  ;;  %v16081_v6 = vld [vmem:[%s19432_s3 + $0x6ac] ss:$16 sps:$4 sm:$0xff]  }
 0x413   :  { %v14381_v20 = vpop.f32.mrf.mxu0 }
 0x414   :  { %8743 = vmatpush1.bf16.msra.mxu0 %v16007_v32  ;;  %v14403_v1 = vpop.f32.mrf.mxu1  ;;  %v16063_v32 = vld [vmem:[%s19432_s3 + $0x30c] ss:$16 sps:$4 sm:$0xff]  }
 0x415   :  { %8744 = vmatprep.subr.bf16.mxu0 %v16012_v28  ;;  %v14382_v25 = vpop.f32.mrf.mxu0  ;;  %v6886_v28 = vadd.f32 %v14358_v62, %v6845_v49  ;;  %v16085_v49 = vld [vmem:[%s19432_s3 + $0x688] ss:$16 sps:$4 sm:$0xff]   ;;  %v16093_v62 = vld [vmem:[%s19432_s3 + $0x66c] ss:$16 sps:$4 sm:$0xff]  }
 0x416   :  { %v14404_v2 = vpop.f32.mrf.mxu1 }
 0x418   :  { %8745 = vmatpush1.bf16.msra.mxu0 %v16010_v15  ;;  %v6848_v15 = vadd.f32 %v14339_v17, %v1162_v60  ;;  %v16087_v60 = vld [vmem:[%s19432_s3 + $0x68c] ss:$16 sps:$4 sm:$0xff]  }
 0x419   :  { %8746 = vmatprep.subr.bf16.mxu0 %v16015_v31 }
 0x41c   :  { %8747 = vmatpush1.bf16.msra.mxu0 %v16013_v0  ;;  %v14361_v0 = vadd.f32 %v14360_v37, %v14359_v22 }
 0x41d   :  { %8748 = vmatprep.subr.bf16.mxu0 %v16018_v53  ;;  %v6927_v53 = vadd.f32 %v14380_v42, %v6886_v28  ;;  %v16096_v28 = vld [vmem:[%s19432_s3 + $0xcc] ss:$16 sps:$4 sm:$0xff]  }
 0x420   :  { %8749 = vmatpush1.bf16.msra.mxu0 %v16016_v54  ;;  %v14402_v54 = vadd.f32 %v14401_v12, %v14400_v26 }
 0x421   :  { %8750 = vmatprep.subr.bf16.mxu0 %v16021_v39  ;;  %v14383_v39 = vadd.f32 %v14382_v25, %v14381_v20 }
 0x422   :  { %v6968_v43 = vadd.f32 %v14402_v54, %v6927_v53  ;;  %v16105_v53 = vld [vmem:[%s19432_s3 + $0x62c] ss:$16 sps:$4 sm:$0xff]  }
 0x423   :  { %v16102_v54 = vld [vmem:[%s19432_s3 + $0xac] ss:$16 sps:$4 sm:$0xff]  }
 0x424   :  { %8751 = vmatpush1.bf16.msra.mxu0 %v16019_v48  ;;  %v16061_v48 = vld [vmem:[%s19432_s3 + $0x308] ss:$16 sps:$4 sm:$0xff]  }
 0x425   :  { %8752 = vmatprep.subr.bf16.mxu0 %v16024_v16 }
 0x428   :  { %8753 = vmatpush1.bf16.msra.mxu0 %v16022_v35  ;;  %v6889_v35 = vadd.f32 %v14361_v0, %v6848_v15  ;;  %v16099_v15 = vld [vmem:[%s19432_s3 + $0x64c] ss:$16 sps:$4 sm:$0xff]   ;;  %v16094_v0 = vld [vmem:[%s19432_s3 + $0xc8] ss:$16 sps:$4 sm:$0xff]  }
 0x429   :  { %8754 = vmatprep.subr.bf16.mxu0 %v16027_v30 }
 0x42c   :  { %8755 = vmatpush1.bf16.msra.mxu0 %v16025_v59  ;;  %v6930_v59 = vadd.f32 %v14383_v39, %v6889_v35  ;;  %v16103_v39 = vld [vmem:[%s19432_s3 + $0x628] ss:$16 sps:$4 sm:$0xff]  }
 0x42d   :  { %8756 = vmatprep.subr.bf16.mxu0 %v16030_v8  ;;  %v16106_v35 = vld [vmem:[%s19432_s3 + $0x88] ss:$16 sps:$4 sm:$0xff]  }
 0x42f   :  { %v14422_v29 = vpop.f32.mrf.mxu0 }
 0x430   :  { %8757 = vmatpush2.bf16.msra.mxu0 %v16028_v18  ;;  %v14444_v57 = vpop.f32.mrf.mxu1  ;;  %v14405_v18 = vadd.f32 %v14404_v2, %v14403_v1 }
 0x431   :  { %8758 = vmatprep.subr.bf16.mxu0 %v16033_v23  ;;  %v14423_v21 = vpop.f32.mrf.mxu0 }
 0x432   :  { %v14445_v44 = vpop.f32.mrf.mxu1  ;;  %v14424_v46 = vadd.f32 %v14423_v21, %v14422_v29  ;;  %v6971_v11 = vadd.f32 %v14405_v18, %v6930_v59  ;;  %v16112_v59 = vld [vmem:[%s19432_s3 + $0x68] ss:$16 sps:$4 sm:$0xff]  }
 0x433   :  { %v14425_v31 = vpop.f32.mrf.mxu0  ;;  %v14446_v23 = vadd.f32 %v14445_v44, %v14444_v57  ;;  %v16088_v44 = vld [vmem:[%s19432_s3 + $0xe8] ss:$16 sps:$4 sm:$0xff]  }
 0x434   :  { %8759 = vmatpush2.bf16.msra.mxu0 %v16031_v13  ;;  %v14447_v16 = vpop.f32.mrf.mxu1  ;;  %v7009_v22 = vadd.f32 %v14424_v46, %v6968_v43  ;;  %v16198_v46 = vld [vmem:[%s19434_s5 + $0x74] ss:$8 sps:$4 sm:$0xff]   ;;  %v16196_v43 = vld [vmem:[%s19434_s5 + $0x70] ss:$8 sps:$4 sm:$0xff]  }
 0x435   :  { %8760 = vmatprep.subr.bf16.mxu0 %v16036_v63  ;;  %v14426_v30 = vpop.f32.mrf.mxu0  ;;  %v16073_v63 = vld [vmem:[%s19432_s3 + $0x6c8] ss:$16 sps:$4 sm:$0xff]  }
 0x436   :  { %v14448_v8 = vpop.f32.mrf.mxu1  ;;  %v14427_v4 = vadd.f32 %v14426_v30, %v14425_v31  ;;  %v16097_v31 = vld [vmem:[%s19432_s3 + $0x648] ss:$16 sps:$4 sm:$0xff]   ;;  %v16114_v30 = vld [vmem:[%s19432_s3 + $0x6c] ss:$16 sps:$4 sm:$0xff]  }
 0x437   :  { %v16115_v18 = vld [vmem:[%s19432_s3 + $0x48] ss:$16 sps:$4 sm:$0xff]  }
 0x438   :  { %8761 = vmatpush2.bf16.msra.mxu0 %v16034_v52  ;;  %v7012_v12 = vadd.f32 %v14427_v4, %v6971_v11  ;;  %v16202_v4 = vld [vmem:[%s19434_s5 + $0x50] ss:$8 sps:$4 sm:$0xff]   ;;  %v16123_v11 = vld [vmem:[%s19432_s3 + $0xc] ss:$16 sps:$4 sm:$0xff]  }
 0x439   :  { %8762 = vmatprep.subr.bf16.mxu0 %v16039_v14  ;;  %v7050_v14 = vadd.f32 %v14446_v23, %v7009_v22  ;;  %v16204_v22 = vld [vmem:[%s19434_s5 + $0x54] ss:$8 sps:$4 sm:$0xff]  }
 0x43a   :  { %v16120_v23 = vld [vmem:[%s19432_s3 + $0x2c] ss:$16 sps:$4 sm:$0xff]  }
 0x43c   :  { %8763 = vmatpush2.bf16.msra.mxu0 %v16037_v51 }
 0x43d   :  { %8764 = vmatprep.subr.bf16.mxu0 %v16045_v3  ;;  %v14449_v3 = vadd.f32 %v14448_v8, %v14447_v16  ;;  %v16108_v16 = vld [vmem:[%s19432_s3 + $0x8c] ss:$16 sps:$4 sm:$0xff]  }
 0x43e   :  { %v16117_v8 = vld [vmem:[%s19432_s3 + $0x4c] ss:$16 sps:$4 sm:$0xff]  }
 0x43f   :  { %v7053_v19 = vadd.f32 %v14449_v3, %v7012_v12  ;;  %v16124_v12 = vld [vmem:[%s19432_s3 + $0x1e8] ss:$16 sps:$4 sm:$0xff]  }
 0x440   :  { %8765 = vmatpush2.bf16.msra.mxu0 %v16043_v10  ;;  %v16079_v10 = vld [vmem:[%s19432_s3 + $0x6a8] ss:$16 sps:$4 sm:$0xff]  }
 0x441   :  { %8766 = vmatprep.subr.bf16.mxu0 %v16051_v38  ;;  %v16127_v3 = vld [vmem:[%s19432_s3 + $0x1c8] ss:$16 sps:$4 sm:$0xff]  }
 0x444   :  { %8767 = vmatpush2.bf16.msra.mxu0 %v16049_v47 }
 0x445   :  { %8768 = vmatprep.subr.bf16.mxu0 %v16057_v9 }
 0x448   :  { %8769 = vmatpush2.bf16.msra.mxu0 %v16055_v33  ;;  %v16091_v33 = vld [vmem:[%s19432_s3 + $0x668] ss:$16 sps:$4 sm:$0xff]  }
 0x449   :  { %8770 = vmatprep.subr.bf16.mxu0 %v16063_v32 }
 0x44c   :  { %8771 = vmatpush2.bf16.msra.mxu0 %v16061_v48  ;;  %v16111_v48 = vld [vmem:[%s19432_s3 + $0x60c] ss:$16 sps:$4 sm:$0xff]  }
 0x44d   :  { %8826 = vmatprep.subr.bf16.mxu0 %v16069_v40  ;;  %v16109_v40 = vld [vmem:[%s19432_s3 + $0x608] ss:$16 sps:$4 sm:$0xff]  }
 0x44f   :  { %v14466_v13 = vpop.f32.mrf.mxu0  ;;  %8773 = vmatmul.mubr.bf16.vlgmr.msra.gmra.mxu0 %v17153_v55 }
 0x450   :  { %v14488_v37 = vpop.f32.mrf.mxu1  ;;  %8827 = vmatpush1.bf16.msra.mxu0 %v16067_v50  ;;  %8858 = vmatprep.mubr.bf16.mxu0 %v16784_v27  ;;  %v16201_v50 = vld [vmem:[%s19434_s5 + $0x64] ss:$8 sps:$4 sm:$0xff]  }
 0x451   :  { %v14467_v26 = vpop.f32.mrf.mxu0  ;;  %8828 = vmatprep.subr.bf16.mxu0 %v16075_v24  ;;  %v16199_v24 = vld [vmem:[%s19434_s5 + $0x60] ss:$8 sps:$4 sm:$0xff]  }
 0x452   :  { %v14489_v52 = vpop.f32.mrf.mxu1  ;;  %v14468_v51 = vadd.f32 %v14467_v26, %v14466_v13  ;;  %v16118_v13 = vld [vmem:[%s19432_s3 + $0x28] ss:$16 sps:$4 sm:$0xff]  }
 0x453   :  { %v14469_v20 = vpop.f32.mrf.mxu0  ;;  %v14490_v2 = vadd.f32 %v14489_v52, %v14488_v37  ;;  %v16207_v37 = vld [vmem:[%s19434_s5 + $0x44] ss:$8 sps:$4 sm:$0xff]   ;;  %v16121_v26 = vld [vmem:[%s19432_s3 + $0x8] ss:$16 sps:$4 sm:$0xff]   ;;  %v16210_v52 = vld [vmem:[%s19434_s5 + $0x34] ss:$8 sps:$4 sm:$0xff]  }
 0x454   :  { %v14491_v55 = vpop.f32.mrf.mxu1  ;;  %v7091_v1 = vadd.f32 %v14468_v51, %v7050_v14  ;;  %8829 = vmatpush1.bf16.msra.mxu0 %v16073_v63  ;;  %v16205_v63 = vld [vmem:[%s19434_s5 + $0x40] ss:$8 sps:$4 sm:$0xff]   ;;  %v16208_v14 = vld [vmem:[%s19434_s5 + $0x30] ss:$8 sps:$4 sm:$0xff]   ;;  %v16213_v51 = vld [vmem:[%s19434_s5 + $0x24] ss:$8 sps:$4 sm:$0xff]  }
 0x455   :  { %v14470_v25 = vpop.f32.mrf.mxu0  ;;  %8830 = vmatprep.subr.bf16.mxu0 %v16081_v6  ;;  %v16126_v6 = vld [vmem:[%s19432_s3 + $0x1ec] ss:$16 sps:$4 sm:$0xff]  }
 0x456   :  { %v14492_v38 = vpop.f32.mrf.mxu1  ;;  %v14471_v29 = vadd.f32 %v14470_v25, %v14469_v20  ;;  %v7132_v47 = vadd.f32 %v14490_v2, %v7091_v1  ;;  %v16129_v20 = vld [vmem:[%s19432_s3 + $0x1cc] ss:$16 sps:$4 sm:$0xff]   ;;  %v16214_v25 = vld [vmem:[%s19434_s5 + $0x10] ss:$8 sps:$4 sm:$0xff]   ;;  %v16217_v2 = vld [vmem:[%s19434_s5] ss:$8 sps:$4 sm:$0xff]  }
 0x457   :  { %v14493_v9 = vadd.f32 %v14492_v38, %v14491_v55  ;;  %v16211_v55 = vld [vmem:[%s19434_s5 + $0x20] ss:$8 sps:$4 sm:$0xff]   ;;  %v16216_v1 = vld [vmem:[%s19434_s5 + $0x14] ss:$8 sps:$4 sm:$0xff]  }
 0x458   :  { %v7094_v57 = vadd.f32 %v14471_v29, %v7053_v19  ;;  %8831 = vmatpush1.bf16.msra.mxu0 %v16079_v10  ;;  %v7144_v21 = vmax.f32 %v7132_v47, 0.0  ;;  %v16132_v10 = vld [vmem:[%s19432_s3 + $0x1ac] ss:$16 sps:$4 sm:$0xff]   ;;  %v16130_v38 = vld [vmem:[%s19432_s3 + $0x1a8] ss:$16 sps:$4 sm:$0xff]  }
 0x459   :  { %8832 = vmatprep.subr.bf16.mxu0 %v16087_v60  ;;  %v16219_v60 = vld [vmem:[%s19434_s5 + $0x4] ss:$8 sps:$4 sm:$0xff]   ;;  %v16133_v29 = vld [vmem:[%s19432_s3 + $0x188] ss:$16 sps:$4 sm:$0xff]   ;;  %v16222_v47 = vld [vmem:[%s19434_s5 + $0xf4] ss:$8 sps:$4 sm:$0xff]  }
 0x45a   :  { %v7135_v17 = vadd.f32 %v14493_v9, %v7094_v57  ;;  %v16135_v19 = vld [vmem:[%s19432_s3 + $0x18c] ss:$16 sps:$4 sm:$0xff]   ;;  %v16220_v9 = vld [vmem:[%s19434_s5 + $0xf0] ss:$8 sps:$4 sm:$0xff]  }
 0x45b   :  { %v16138_v57 = vld [vmem:[%s19432_s3 + $0x16c] ss:$16 sps:$4 sm:$0xff]  }
 0x45c   :  { %v7151_v42 = vmax.f32 %v7135_v17, 0.0  ;;  %8833 = vmatpush1.bf16.msra.mxu0 %v16085_v49  ;;  %v16136_v49 = vld [vmem:[%s19432_s3 + $0x168] ss:$16 sps:$4 sm:$0xff]  }
 0x45d   :  { %8834 = vmatprep.subr.bf16.mxu0 %v16093_v62  ;;  %v16141_v62 = vld [vmem:[%s19432_s3 + $0x14c] ss:$16 sps:$4 sm:$0xff]   ;;  %v16139_v17 = vld [vmem:[%s19432_s3 + $0x148] ss:$16 sps:$4 sm:$0xff]  }
 0x45e   :  { %v7158_v32 = vpack.c.bf16 %v7151_v42, %v7144_v21  ;;  %v16223_v21 = vld [vmem:[%s19434_s5 + $0xe0] ss:$8 sps:$4 sm:$0xff]   ;;  %v16225_v42 = vld [vmem:[%s19434_s5 + $0xe4] ss:$8 sps:$4 sm:$0xff]  }
 0x460   :  { %8687 = vmatmul.mubr.bf16.vlgmr.msra.gmra.mxu1 %v7158_v32  ;;  %8835 = vmatpush1.bf16.msra.mxu0 %v16091_v33  ;;  %v16144_v33 = vld [vmem:[%s19432_s3 + $0x12c] ss:$16 sps:$4 sm:$0xff]  }
 0x461   :  { %8698 = vmatpush1.bf16.msra.mxu1 %v16088_v44  ;;  %8729 = vmatprep.mubr.bf16.mxu1 %v17244_v36  ;;  %v16100_v36 = vld [vmem:[%s19432_s3 + $0xa8] ss:$16 sps:$4 sm:$0xff]  }
 0x462   :  { %8699 = vmatprep.subr.bf16.mxu1 %v16096_v28  ;;  %8836 = vmatprep.subr.bf16.mxu0 %v16099_v15  ;;  %v16142_v44 = vld [vmem:[%s19432_s3 + $0x128] ss:$16 sps:$4 sm:$0xff]   ;;  %v16228_v28 = vld [vmem:[%s19434_s5 + $0xd4] ss:$8 sps:$4 sm:$0xff]  }
 0x463   :  { %v16147_v15 = vld [vmem:[%s19432_s3 + $0x10c] ss:$16 sps:$4 sm:$0xff]  }
 0x464   :  { %8837 = vmatpush1.bf16.msra.mxu0 %v16097_v31  ;;  %v16231_v31 = vld [vmem:[%s19434_s5 + $0xc4] ss:$8 sps:$4 sm:$0xff]  }
 0x465   :  { %8700 = vmatpush1.bf16.msra.mxu1 %v16094_v0  ;;  %8838 = vmatprep.subr.bf16.mxu0 %v16105_v53  ;;  %v16229_v0 = vld [vmem:[%s19434_s5 + $0xc0] ss:$8 sps:$4 sm:$0xff]  }
 0x466   :  { %8701 = vmatprep.subr.bf16.mxu1 %v16102_v54  ;;  %v16145_v53 = vld [vmem:[%s19432_s3 + $0x108] ss:$16 sps:$4 sm:$0xff]   ;;  %v16234_v54 = vld [vmem:[%s19434_s5 + $0xb4] ss:$8 sps:$4 sm:$0xff]  }
 0x468   :  { %8839 = vmatpush1.bf16.msra.mxu0 %v16103_v39  ;;  %v16150_v39 = vld [vmem:[%s19432_s3 + $0x4ec] ss:$16 sps:$4 sm:$0xff]  }
 0x469   :  { %8702 = vmatpush1.bf16.msra.mxu1 %v16100_v36  ;;  %8840 = vmatprep.subr.bf16.mxu0 %v16111_v48  ;;  %v16232_v36 = vld [vmem:[%s19434_s5 + $0xb0] ss:$8 sps:$4 sm:$0xff]  }
 0x46a   :  { %8703 = vmatprep.subr.bf16.mxu1 %v16108_v16  ;;  %v16148_v48 = vld [vmem:[%s19432_s3 + $0x4e8] ss:$16 sps:$4 sm:$0xff]   ;;  %v16153_v16 = vld [vmem:[%s19432_s3 + $0x4cc] ss:$16 sps:$4 sm:$0xff]  }
 0x46c   :  { %8841 = vmatpush1.bf16.msra.mxu0 %v16109_v40  ;;  %v16151_v40 = vld [vmem:[%s19432_s3 + $0x4c8] ss:$16 sps:$4 sm:$0xff]  }
 0x46d   :  { %8704 = vmatpush1.bf16.msra.mxu1 %v16106_v35  ;;  %9277 = vmatprep.subr.bf16.mxu0 %v16198_v46  ;;  %v16237_v35 = vld [vmem:[%s19434_s5 + $0xa4] ss:$8 sps:$4 sm:$0xff]  }
 0x46e   :  { %8705 = vmatprep.subr.bf16.mxu1 %v16114_v30  ;;  %v16156_v46 = vld [vmem:[%s19432_s3 + $0x4ac] ss:$16 sps:$4 sm:$0xff]  }
 0x46f   :  { %8859 = vmatmul.mubr.bf16.vlgmr.msra.gmra.mxu0 %v7158_v32  ;;  %v16226_v32 = vld [vmem:[%s19434_s5 + $0xd0] ss:$8 sps:$4 sm:$0xff]   ;;  %v16240_v30 = vld [vmem:[%s19434_s5 + $0x94] ss:$8 sps:$4 sm:$0xff]  }
 0x470   :  { %9278 = vmatpush1.bf16.msra.mxu0 %v16196_v43  ;;  %v16159_v43 = vld [vmem:[%s19432_s3 + $0x48c] ss:$16 sps:$4 sm:$0xff]  }
 0x471   :  { %8706 = vmatpush1.bf16.msra.mxu1 %v16112_v59  ;;  %9279 = vmatprep.subr.bf16.mxu0 %v16201_v50  ;;  %v16238_v59 = vld [vmem:[%s19434_s5 + $0x90] ss:$8 sps:$4 sm:$0xff]  }
 0x472   :  { %8707 = vmatprep.subr.bf16.mxu1 %v16117_v8  ;;  %v16157_v50 = vld [vmem:[%s19432_s3 + $0x488] ss:$16 sps:$4 sm:$0xff]   ;;  %v16243_v8 = vld [vmem:[%s19434_s5 + $0x84] ss:$8 sps:$4 sm:$0xff]  }
 0x474   :  { %9280 = vmatpush1.bf16.msra.mxu0 %v16199_v24  ;;  %v16162_v24 = vld [vmem:[%s19432_s3 + $0x46c] ss:$16 sps:$4 sm:$0xff]  }
 0x475   :  { %8708 = vmatpush1.bf16.msra.mxu1 %v16115_v18  ;;  %9281 = vmatprep.subr.bf16.mxu0 %v16204_v22  ;;  %v16241_v18 = vld [vmem:[%s19434_s5 + $0x80] ss:$8 sps:$4 sm:$0xff]  }
 0x476   :  { %8709 = vmatprep.subr.bf16.mxu1 %v16120_v23  ;;  %v16160_v22 = vld [vmem:[%s19432_s3 + $0x468] ss:$16 sps:$4 sm:$0xff]   ;;  %v16165_v23 = vld [vmem:[%s19432_s3 + $0x44c] ss:$16 sps:$4 sm:$0xff]  }
 0x478   :  { %9282 = vmatpush1.bf16.msra.mxu0 %v16202_v4  ;;  %v16163_v4 = vld [vmem:[%s19432_s3 + $0x448] ss:$16 sps:$4 sm:$0xff]  }
 0x479   :  { %8710 = vmatpush1.bf16.msra.mxu1 %v16118_v13  ;;  %9283 = vmatprep.subr.bf16.mxu0 %v16207_v37  ;;  %v16168_v13 = vld [vmem:[%s19432_s3 + $0x42c] ss:$16 sps:$4 sm:$0xff]   ;;  %v16166_v37 = vld [vmem:[%s19432_s3 + $0x428] ss:$16 sps:$4 sm:$0xff]  }
 0x47a   :  { %8711 = vmatprep.subr.bf16.mxu1 %v16123_v11  ;;  %v16171_v11 = vld [vmem:[%s19432_s3 + $0x40c] ss:$16 sps:$4 sm:$0xff]  }
 0x47c   :  { %9284 = vmatpush1.bf16.msra.mxu0 %v16205_v63  ;;  %v16169_v63 = vld [vmem:[%s19432_s3 + $0x408] ss:$16 sps:$4 sm:$0xff]  }
 0x47d   :  { %8712 = vmatpush1.bf16.msra.mxu1 %v16121_v26  ;;  %9285 = vmatprep.subr.bf16.mxu0 %v16210_v52  ;;  %v16174_v26 = vld [vmem:[%s19432_s3 + $0x5ec] ss:$16 sps:$4 sm:$0xff]   ;;  %v16172_v52 = vld [vmem:[%s19432_s3 + $0x5e8] ss:$16 sps:$4 sm:$0xff]  }
 0x47e   :  { %8713 = vmatprep.subr.bf16.mxu1 %v16126_v6  ;;  %v16177_v6 = vld [vmem:[%s19432_s3 + $0x5cc] ss:$16 sps:$4 sm:$0xff]  }
 0x480   :  { %9286 = vmatpush1.bf16.msra.mxu0 %v16208_v14  ;;  %v16175_v14 = vld [vmem:[%s19432_s3 + $0x5c8] ss:$16 sps:$4 sm:$0xff]  }
 0x481   :  { %8714 = vmatpush2.bf16.msra.mxu1 %v16124_v12  ;;  %9287 = vmatprep.subr.bf16.mxu0 %v16213_v51  ;;  %v16180_v12 = vld [vmem:[%s19432_s3 + $0x5ac] ss:$16 sps:$4 sm:$0xff]   ;;  %v16178_v51 = vld [vmem:[%s19432_s3 + $0x5a8] ss:$16 sps:$4 sm:$0xff]  }
 0x482   :  { %8715 = vmatprep.subr.bf16.mxu1 %v16129_v20  ;;  %v16183_v20 = vld [vmem:[%s19432_s3 + $0x58c] ss:$16 sps:$4 sm:$0xff]  }
 0x484   :  { %9288 = vmatpush1.bf16.msra.mxu0 %v16211_v55  ;;  %v16181_v55 = vld [vmem:[%s19432_s3 + $0x588] ss:$16 sps:$4 sm:$0xff]  }
 0x485   :  { %8716 = vmatpush2.bf16.msra.mxu1 %v16127_v3  ;;  %9289 = vmatprep.subr.bf16.mxu0 %v16216_v1  ;;  %v16186_v3 = vld [vmem:[%s19432_s3 + $0x56c] ss:$16 sps:$4 sm:$0xff]   ;;  %v16184_v1 = vld [vmem:[%s19432_s3 + $0x568] ss:$16 sps:$4 sm:$0xff]  }
 0x486   :  { %8717 = vmatprep.subr.bf16.mxu1 %v16132_v10  ;;  %v16189_v10 = vld [vmem:[%s19432_s3 + $0x54c] ss:$16 sps:$4 sm:$0xff]  }
 0x488   :  { %9290 = vmatpush1.bf16.msra.mxu0 %v16214_v25  ;;  %v16187_v25 = vld [vmem:[%s19432_s3 + $0x548] ss:$16 sps:$4 sm:$0xff]  }
 0x489   :  { %8718 = vmatpush2.bf16.msra.mxu1 %v16130_v38  ;;  %9291 = vmatprep.subr.bf16.mxu0 %v16219_v60  ;;  %v16192_v38 = vld [vmem:[%s19432_s3 + $0x52c] ss:$16 sps:$4 sm:$0xff]   ;;  %v16190_v60 = vld [vmem:[%s19432_s3 + $0x528] ss:$16 sps:$4 sm:$0xff]  }
 0x48a   :  { %8719 = vmatprep.subr.bf16.mxu1 %v16135_v19  ;;  %v16195_v19 = vld [vmem:[%s19432_s3 + $0x50c] ss:$16 sps:$4 sm:$0xff]  }
 0x48c   :  { %9292 = vmatpush1.bf16.msra.mxu0 %v16217_v2  ;;  %v16193_v2 = vld [vmem:[%s19432_s3 + $0x508] ss:$16 sps:$4 sm:$0xff]  }
 0x48d   :  { %8720 = vmatpush2.bf16.msra.mxu1 %v16133_v29  ;;  %9293 = vmatprep.subr.bf16.mxu0 %v16222_v47  ;;  %v16244_v29 = vld [vmem:[%s19434_s5 + $0x170] ss:$8 sps:$4 sm:$0xff]   ;;  %v16246_v47 = vld [vmem:[%s19434_s5 + $0x174] ss:$8 sps:$4 sm:$0xff]  }
 0x48e   :  { %8721 = vmatprep.subr.bf16.mxu1 %v16138_v57  ;;  %v16249_v57 = vld [vmem:[%s19434_s5 + $0x164] ss:$8 sps:$4 sm:$0xff]  }
 0x490   :  { %9294 = vmatpush2.bf16.msra.mxu0 %v16220_v9  ;;  %v16247_v9 = vld [vmem:[%s19434_s5 + $0x160] ss:$8 sps:$4 sm:$0xff]  }
 0x491   :  { %8722 = vmatpush2.bf16.msra.mxu1 %v16136_v49  ;;  %9295 = vmatprep.subr.bf16.mxu0 %v16225_v42  ;;  %v16250_v49 = vld [vmem:[%s19434_s5 + $0x150] ss:$8 sps:$4 sm:$0xff]  }
 0x492   :  { %8723 = vmatprep.subr.bf16.mxu1 %v16141_v62  ;;  %v16255_v62 = vld [vmem:[%s19434_s5 + $0x144] ss:$8 sps:$4 sm:$0xff]   ;;  %v16256_v42 = vld [vmem:[%s19434_s5 + $0x130] ss:$8 sps:$4 sm:$0xff]  }
 0x494   :  { %9296 = vmatpush2.bf16.msra.mxu0 %v16223_v21  ;;  %v16258_v21 = vld [vmem:[%s19434_s5 + $0x134] ss:$8 sps:$4 sm:$0xff]  }
 0x495   :  { %8724 = vmatpush2.bf16.msra.mxu1 %v16139_v17  ;;  %9297 = vmatprep.subr.bf16.mxu0 %v16228_v28  ;;  %v16253_v17 = vld [vmem:[%s19434_s5 + $0x140] ss:$8 sps:$4 sm:$0xff]   ;;  %v16262_v28 = vld [vmem:[%s19434_s5 + $0x110] ss:$8 sps:$4 sm:$0xff]  }
 0x496   :  { %8725 = vmatprep.subr.bf16.mxu1 %v16144_v33  ;;  %v16261_v33 = vld [vmem:[%s19434_s5 + $0x124] ss:$8 sps:$4 sm:$0xff]  }
 0x498   :  { %9298 = vmatpush2.bf16.msra.mxu0 %v16226_v32  ;;  %v16264_v32 = vld [vmem:[%s19434_s5 + $0x114] ss:$8 sps:$4 sm:$0xff]  }
 0x499   :  { %8726 = vmatpush2.bf16.msra.mxu1 %v16142_v44  ;;  %9299 = vmatprep.subr.bf16.mxu0 %v16231_v31  ;;  %v16259_v44 = vld [vmem:[%s19434_s5 + $0x120] ss:$8 sps:$4 sm:$0xff]  }
 0x49a   :  { %8727 = vmatprep.subr.bf16.mxu1 %v16147_v15  ;;  %v16267_v15 = vld [vmem:[%s19434_s5 + $0x104] ss:$8 sps:$4 sm:$0xff]   ;;  %v16265_v31 = vld [vmem:[%s19434_s5 + $0x100] ss:$8 sps:$4 sm:$0xff]  }
 0x49c   :  { %9300 = vmatpush2.bf16.msra.mxu0 %v16229_v0  ;;  %v16270_v0 = vld [vmem:[%s19434_s5 + $0x1f4] ss:$8 sps:$4 sm:$0xff]  }
 0x49d   :  { %8728 = vmatpush2.bf16.msra.mxu1 %v16145_v53  ;;  %9301 = vmatprep.subr.bf16.mxu0 %v16234_v54  ;;  %v16268_v53 = vld [vmem:[%s19434_s5 + $0x1f0] ss:$8 sps:$4 sm:$0xff]   ;;  %v16273_v54 = vld [vmem:[%s19434_s5 + $0x1e4] ss:$8 sps:$4 sm:$0xff]  }
 0x49e   :  { %8783 = vmatprep.subr.bf16.mxu1 %v16150_v39  ;;  %v8559_v39 = vpop.f32.mrf.mxu0 }
 0x4a0   :  { %8730 = vmatmul.mubr.bf16.vlgmr.msra.gmra.mxu1 %v19463_v58  ;;  %9302 = vmatpush2.bf16.msra.mxu0 %v16232_v36  ;;  %v16235_v58 = vld [vmem:[%s19434_s5 + $0xa0] ss:$8 sps:$4 sm:$0xff]  }
 0x4a1   :  { %8784 = vmatpush1.bf16.msra.mxu1 %v16148_v48  ;;  %8815 = vmatprep.mubr.bf16.mxu1 %v17535_v61  ;;  %v16154_v61 = vld [vmem:[%s19432_s3 + $0x4a8] ss:$16 sps:$4 sm:$0xff]   ;;  %v16276_v48 = vld [vmem:[%s19434_s5 + $0x1d4] ss:$8 sps:$4 sm:$0xff]  }
 0x4a2   :  { %8785 = vmatprep.subr.bf16.mxu1 %v16153_v16  ;;  %9303 = vmatprep.subr.bf16.mxu0 %v16237_v35  ;;  %v16271_v36 = vld [vmem:[%s19434_s5 + $0x1e0] ss:$8 sps:$4 sm:$0xff]   ;;  %v8561_v16 = vpop.f32.mrf.mxu0  ;;  %v16279_v35 = vld [vmem:[%s19434_s5 + $0x1c4] ss:$8 sps:$4 sm:$0xff]  }
 0x4a4   :  { %9304 = vmatpush2.bf16.msra.mxu0 %v16235_v58  ;;  %v8602_v58 = vpop.f32.mrf.mxu1 }
 0x4a5   :  { %8786 = vmatpush1.bf16.msra.mxu1 %v16151_v40  ;;  %9305 = vmatprep.subr.bf16.mxu0 %v16240_v30  ;;  %v16274_v40 = vld [vmem:[%s19434_s5 + $0x1d0] ss:$8 sps:$4 sm:$0xff]  }
 0x4a6   :  { %8787 = vmatprep.subr.bf16.mxu1 %v16156_v46  ;;  %v8563_v46 = vpop.f32.mrf.mxu0 }
 0x4a8   :  { %9306 = vmatpush2.bf16.msra.mxu0 %v16238_v59  ;;  %v8565_v30 = vpop.f32.mrf.mxu0 }
 0x4a9   :  { %8788 = vmatpush1.bf16.msra.mxu1 %v16154_v61  ;;  %9307 = vmatprep.subr.bf16.mxu0 %v16243_v8  ;;  %v16277_v61 = vld [vmem:[%s19434_s5 + $0x1c0] ss:$8 sps:$4 sm:$0xff]  }
 0x4aa   :  { %8789 = vmatprep.subr.bf16.mxu1 %v16159_v43  ;;  %v8604_v43 = vpop.f32.mrf.mxu1 }
 0x4ac   :  { %9308 = vmatpush2.bf16.msra.mxu0 %v16241_v18 }
 0x4ad   :  { %8790 = vmatpush1.bf16.msra.mxu1 %v16157_v50  ;;  %v18167_v50 = vld [vmem:[%s19433_s4] sm:$0xf] }
 0x4ae   :  { %8791 = vmatprep.subr.bf16.mxu1 %v16162_v24  ;;  %v7392_v8 = vrot.slane %v18167_v50, %v17187_v45  ;;  %v19464_v24 = vld [vmem:[#allocation5_spill] sm:$0xff] }
 0x4af   :  { %v7388_v18 = vrot.slane %v18167_v50, %v19464_v24 }
 0x4b1   :  { %8792 = vmatpush1.bf16.msra.mxu1 %v16160_v22  ;;  %v8606_v22 = vpop.f32.mrf.mxu1 }
 0x4b2   :  { %8793 = vmatprep.subr.bf16.mxu1 %v16165_v23 }
 0x4b5   :  { %8794 = vmatpush1.bf16.msra.mxu1 %v16163_v4  ;;  %v8562_v4 = vadd.f32 %v8561_v16, %v7392_v8  ;;  %v16298_v16 = vld [vmem:[%s19436_s7 + $0x60] sm:$0xff]  }
 0x4b6   :  { %8795 = vmatprep.subr.bf16.mxu1 %v16168_v13  ;;  %v8564_v13 = vadd.f32 %v8563_v46, %v7388_v18  ;;  %v16301_v46 = vld [vmem:[%s19436_s7 + $0x18] sm:$0xff]  }
 0x4b9   :  { %8796 = vmatpush1.bf16.msra.mxu1 %v16166_v37  ;;  %v8560_v37 = vadd.f32 %v8559_v39, %v7388_v18  ;;  %v16295_v39 = vld [vmem:[%s19436_s7 + $0x30] sm:$0xff]  }
 0x4ba   :  { %8797 = vmatprep.subr.bf16.mxu1 %v16171_v11  ;;  %v8608_v11 = vpop.f32.mrf.mxu1 }
 0x4bd   :  { %8798 = vmatpush1.bf16.msra.mxu1 %v16169_v63 }
 0x4be   :  { %8799 = vmatprep.subr.bf16.mxu1 %v16174_v26  ;;  %v16282_v26 = vld [vmem:[%s19434_s5 + $0x1b4] ss:$8 sps:$4 sm:$0xff]  }
 0x4c1   :  { %8800 = vmatpush2.bf16.msra.mxu1 %v16172_v52  ;;  %v8566_v52 = vadd.f32 %v8565_v30, %v7392_v8  ;;  %v7400_v8 = vrot.slane %v18167_v50, %v17190_v34 }
 0x4c2   :  { %8801 = vmatprep.subr.bf16.mxu1 %v16177_v6  ;;  %v16280_v6 = vld [vmem:[%s19434_s5 + $0x1b0] ss:$8 sps:$4 sm:$0xff]  }
 0x4c5   :  { %8802 = vmatpush2.bf16.msra.mxu1 %v16175_v14 }
 0x4c6   :  { %8803 = vmatprep.subr.bf16.mxu1 %v16180_v12  ;;  %v8605_v12 = vadd.f32 %v8604_v43, %v8562_v4 }
 0x4c9   :  { %8804 = vmatpush2.bf16.msra.mxu1 %v16178_v51  ;;  %v8607_v51 = vadd.f32 %v8606_v22, %v8564_v13  ;;  %v19465_v22 = vld [vmem:[#allocation8_spill] sm:$0xff] }
 0x4ca   :  { %8805 = vmatprep.subr.bf16.mxu1 %v16183_v20  ;;  %v8603_v20 = vadd.f32 %v8602_v58, %v8560_v37 }
 0x4cd   :  { %8806 = vmatpush2.bf16.msra.mxu1 %v16181_v55 }
 0x4ce   :  { %8807 = vmatprep.subr.bf16.mxu1 %v16186_v3 }
 0x4cf   :  { %v8645_v59 = vpop.f32.mrf.mxu0 }
 0x4d1   :  { %8808 = vmatpush2.bf16.msra.mxu1 %v16184_v1  ;;  %v8647_v23 = vpop.f32.mrf.mxu0  ;;  %v16285_v1 = vld [vmem:[%s19434_s5 + $0x1a4] ss:$8 sps:$4 sm:$0xff]  }
 0x4d2   :  { %8809 = vmatprep.subr.bf16.mxu1 %v16189_v10  ;;  %v8609_v10 = vadd.f32 %v8608_v11, %v8566_v52 }
 0x4d3   :  { %v8649_v63 = vpop.f32.mrf.mxu0 }
 0x4d5   :  { %8810 = vmatpush2.bf16.msra.mxu1 %v16187_v25  ;;  %v8651_v55 = vpop.f32.mrf.mxu0  ;;  %v8648_v25 = vadd.f32 %v8647_v23, %v8605_v12  ;;  %v7396_v23 = vrot.slane %v18167_v50, %v19465_v22 }
 0x4d6   :  { %8811 = vmatprep.subr.bf16.mxu1 %v16192_v38  ;;  %v8650_v38 = vadd.f32 %v8649_v63, %v8607_v51 }
 0x4d9   :  { %8812 = vmatpush2.bf16.msra.mxu1 %v16190_v60  ;;  %v16283_v60 = vld [vmem:[%s19434_s5 + $0x1a0] ss:$8 sps:$4 sm:$0xff]  }
 0x4da   :  { %8813 = vmatprep.subr.bf16.mxu1 %v16195_v19  ;;  %v8646_v19 = vadd.f32 %v8645_v59, %v8603_v20 }
 0x4dd   :  { %8814 = vmatpush2.bf16.msra.mxu1 %v16193_v2 }
 0x4de   :  { %9320 = vmatprep.subr.bf16.mxu1 %v16246_v47 }
 0x4e0   :  { %8816 = vmatmul.mubr.bf16.vlgmr.msra.gmra.mxu1 %v17654_v5  ;;  %v16252_v5 = vld [vmem:[%s19434_s5 + $0x154] ss:$8 sps:$4 sm:$0xff]  }
 0x4e1   :  { %9321 = vmatpush1.bf16.msra.mxu1 %v16244_v29  ;;  %v8652_v29 = vadd.f32 %v8651_v55, %v8609_v10 }
 0x4e2   :  { %9322 = vmatprep.subr.bf16.mxu1 %v16249_v57 }
 0x4e5   :  { %9323 = vmatpush1.bf16.msra.mxu1 %v16247_v9 }
 0x4e6   :  { %9324 = vmatprep.subr.bf16.mxu1 %v16252_v5 }
 0x4e9   :  { %9325 = vmatpush1.bf16.msra.mxu1 %v16250_v49  ;;  %v16288_v49 = vld [vmem:[%s19434_s5 + $0x194] ss:$8 sps:$4 sm:$0xff]  }
 0x4ea   :  { %9326 = vmatprep.subr.bf16.mxu1 %v16255_v62 }
 0x4ed   :  { %9327 = vmatpush1.bf16.msra.mxu1 %v16253_v17  ;;  %v16286_v17 = vld [vmem:[%s19434_s5 + $0x190] ss:$8 sps:$4 sm:$0xff]  }
 0x4ee   :  { %9328 = vmatprep.subr.bf16.mxu1 %v16258_v21 }
 0x4f1   :  { %9329 = vmatpush1.bf16.msra.mxu1 %v16256_v42 }
 0x4f2   :  { %9330 = vmatprep.subr.bf16.mxu1 %v16261_v33 }
 0x4f5   :  { %9331 = vmatpush1.bf16.msra.mxu1 %v16259_v44 }
 0x4f6   :  { %9332 = vmatprep.subr.bf16.mxu1 %v16264_v32  ;;  %v16291_v32 = vld [vmem:[%s19434_s5 + $0x184] ss:$8 sps:$4 sm:$0xff]  }
 0x4f9   :  { %9333 = vmatpush1.bf16.msra.mxu1 %v16262_v28 }
 0x4fa   :  { %9334 = vmatprep.subr.bf16.mxu1 %v16267_v15  ;;  %v16289_v15 = vld [vmem:[%s19434_s5 + $0x180] ss:$8 sps:$4 sm:$0xff]  }
 0x4fd   :  { %9335 = vmatpush1.bf16.msra.mxu1 %v16265_v31 }
 0x4fe   :  { %9336 = vmatprep.subr.bf16.mxu1 %v16270_v0  ;;  %v16292_v0 = vld [vmem:[%s19436_s7 + $0x78] sm:$0xff]  }
 0x4ff   :  { %14494 = vmatprep.subr.bf16.mxu0 %v16292_v0  ;;  %v16310_v0 = vld [vmem:[%s19440_s11 + $0x81c] ss:$148 sps:$4 sm:$0xff]  }
 0x501   :  { %9337 = vmatpush2.bf16.msra.mxu1 %v16268_v53  ;;  %v16293_v53 = vld [vmem:[%s19436_s7 + $0x38] sm:$0xff]  }
 0x502   :  { %9338 = vmatprep.subr.bf16.mxu1 %v16273_v54  ;;  %v16294_v54 = vld [vmem:[%s19436_s7 + $0x70] sm:$0xff]  }
 0x505   :  { %9339 = vmatpush2.bf16.msra.mxu1 %v16271_v36  ;;  %v16296_v36 = vld [vmem:[%s19436_s7 + $0x68] sm:$0xff]  }
 0x506   :  { %9340 = vmatprep.subr.bf16.mxu1 %v16276_v48  ;;  %v16297_v48 = vld [vmem:[%s19436_s7 + $0x28] sm:$0xff]  }
 0x509   :  { %9341 = vmatpush2.bf16.msra.mxu1 %v16274_v40  ;;  %v16299_v40 = vld [vmem:[%s19436_s7 + $0x20] sm:$0xff]  }
 0x50a   :  { %9342 = vmatprep.subr.bf16.mxu1 %v16279_v35  ;;  %v16300_v35 = vld [vmem:[%s19436_s7 + $0x58] sm:$0xff]  }
 0x50d   :  { %9343 = vmatpush2.bf16.msra.mxu1 %v16277_v61 }
 0x50e   :  { %9344 = vmatprep.subr.bf16.mxu1 %v16282_v26 }
 0x50f   :  { %v8774_v58 = vpop.f32.mrf.mxu0 }
 0x511   :  { %9345 = vmatpush2.bf16.msra.mxu1 %v16280_v6  ;;  %v8776_v61 = vpop.f32.mrf.mxu0 }
 0x512   :  { %9346 = vmatprep.subr.bf16.mxu1 %v16285_v1 }
 0x513   :  { %v8778_v43 = vpop.f32.mrf.mxu0 }
 0x515   :  { %9347 = vmatpush2.bf16.msra.mxu1 %v16283_v60  ;;  %v8780_v18 = vpop.f32.mrf.mxu0 }
 0x516   :  { %9348 = vmatprep.subr.bf16.mxu1 %v16288_v49 }
 0x519   :  { %9349 = vmatpush2.bf16.msra.mxu1 %v16286_v17 }
 0x51a   :  { %9350 = vmatprep.subr.bf16.mxu1 %v16291_v32  ;;  %v16304_v32 = vld [vmem:[%s19436_s7 + $0x48] sm:$0xff]  }
 0x51d   :  { %9351 = vmatpush2.bf16.msra.mxu1 %v16289_v15  ;;  %v16306_v15 = vld [vmem:[%s19436_s7 + $0x40] sm:$0xff]  }
 0x520   :  { %v8688_v14 = vpop.f32.mrf.mxu1 }
 0x521   :  { %v8689_v9 = vadd.f32 %v8688_v14, %v8646_v19 }
 0x522   :  { %v8690_v3 = vpop.f32.mrf.mxu1 }
 0x523   :  { %v8691_v47 = vadd.f32 %v8690_v3, %v8648_v25  ;;  %v8869_v44 = vmax.f32 %v8689_v9, 0.0 }
 0x524   :  { %v8692_v2 = vpop.f32.mrf.mxu1 }
 0x525   :  { %v8693_v57 = vadd.f32 %v8692_v2, %v8650_v38  ;;  %v8870_v42 = vmax.f32 %v8691_v47, 0.0 }
 0x526   :  { %v8694_v5 = vpop.f32.mrf.mxu1 }
 0x527   :  { %v8695_v62 = vadd.f32 %v8694_v5, %v8652_v29  ;;  %v8873_v21 = vmax.f32 %v8693_v57, 0.0 }
 0x529   :  { %v8874_v33 = vmax.f32 %v8695_v62, 0.0  ;;  %v8877_v31 = vpack.c.bf16 %v8873_v21, %v8869_v44  ;;  %v16303_v44 = vld [vmem:[%s19436_s7 + $0x10] sm:$0xff]  }
 0x52b   :  { %v8878_v28 = vpack.c.bf16 %v8874_v33, %v8870_v42  ;;  %v16302_v33 = vld [vmem:[%s19436_s7 + $0x50] sm:$0xff]  }
 0x52d   :  { %9309 = vmatprep.mubr.bf16.mxu0 %v8878_v28  ;;  %v16305_v28 = vld [vmem:[%s19436_s7 + $0x8] sm:$0xff]  }
 0x52e   :  { %9310 = vmatmul.mubr.bf16.vlgmr.msra.gmra.mxu0 %v8877_v31  ;;  %v16307_v31 = vld [vmem:[%s19436_s7] sm:$0xff]  }
 0x52f   :  { %14495 = vmatpush3.bf16.msra.mxu0 %v16293_v53  ;;  %v8860_v13 = vpop.f32.mrf.mxu0  ;;  %v16311_v53 = vld [vmem:[%s19438_s9 + $0x38] sm:$0xff]  }
 0x530   :  { %14496 = vmatprep.subr.bf16.mxu0 %v16294_v54  ;;  %v16785_v54 = vmov 0.0  }
 0x531   :  { %v8862_v52 = vpop.f32.mrf.mxu0  ;;  %14534 = vmatprep.subr.bf16.mxu1 %v16785_v54 }
 0x533   :  { %14497 = vmatpush3.bf16.msra.mxu0 %v16295_v39  ;;  %v8864_v1 = vpop.f32.mrf.mxu0  ;;  %v16315_v39 = vld [vmem:[%s19438_s9 + $0x30] sm:$0xff]  }
 0x534   :  { %14498 = vmatprep.subr.bf16.mxu0 %v16296_v36  ;;  %v16319_v36 = vld [vmem:[%s19438_s9 + $0x28] sm:$0xff]  }
 0x535   :  { %v8866_v47 = vpop.f32.mrf.mxu0 }
 0x537   :  { %14499 = vmatpush3.bf16.msra.mxu0 %v16297_v48  ;;  %v16323_v48 = vld [vmem:[%s19438_s9 + $0x20] sm:$0xff]  }
 0x538   :  { %14500 = vmatprep.subr.bf16.mxu0 %v16298_v16  ;;  %v16327_v16 = vld [vmem:[%s19438_s9 + $0x18] sm:$0xff]  }
 0x53b   :  { %14501 = vmatpush3.bf16.msra.mxu0 %v16299_v40 }
 0x53c   :  { %14502 = vmatprep.subr.bf16.mxu0 %v16300_v35 }
 0x53f   :  { %14503 = vmatpush3.bf16.msra.mxu0 %v16301_v46  ;;  %v8945_v46 = vld [vmem:[%s19435_s6] sm:$0x3] }
 0x540   :  { %14504 = vmatprep.subr.bf16.mxu0 %v16302_v33  ;;  %v16342_v33 = vld [vmem:[%s19440_s11 + $0x824] ss:$148 sps:$4 sm:$0xff]  }
 0x543   :  { %14505 = vmatpush3.bf16.msra.mxu0 %v16303_v44  ;;  %v16345_v44 = vld [vmem:[%s19440_s11 + $0x82c] ss:$148 sps:$4 sm:$0xff]  }
 0x544   :  { %14506 = vmatprep.subr.bf16.mxu0 %v16304_v32 }
 0x547   :  { %14507 = vmatpush3.bf16.msra.mxu0 %v16305_v28 }
 0x548   :  { %14508 = vmatprep.subr.bf16.mxu0 %v16306_v15 }
 0x54b   :  { %14509 = vmatpush3.bf16.msra.mxu0 %v16307_v31  ;;  %v13920_v31 = vld [vmem:[%s19437_s8] ss:$0 sm:$0xff] }
 0x54c   :  { %11649 = vmatprep.subr.bf16.mxu0 %v16310_v0 }
 0x560   :  { %v8731_v30 = vpop.f32.mrf.mxu1 }
 0x561   :  { %v8732_v11 = vadd.f32 %v8731_v30, %v7396_v23  ;;  %v8950_v30 = vrot.slane %v8945_v46, %v19464_v24 }
 0x562   :  { %v8733_v59 = vpop.f32.mrf.mxu1 }
 0x563   :  { %v8734_v37 = vadd.f32 %v8733_v59, %v7400_v8  ;;  %v8775_v51 = vadd.f32 %v8774_v58, %v8732_v11 }
 0x564   :  { %v8735_v4 = vpop.f32.mrf.mxu1 }
 0x565   :  { %v8736_v26 = vadd.f32 %v8735_v4, %v7396_v23  ;;  %v8777_v12 = vadd.f32 %v8776_v61, %v8734_v37  ;;  %v8954_v61 = vrot.slane %v8945_v46, %v17187_v45  ;;  %v16343_v46 = vld [vmem:[%s19440_s11 + $0x828] ss:$148 sps:$4 sm:$0xff]  }
 0x566   :  { %v8737_v63 = vpop.f32.mrf.mxu1 }
 0x567   :  { %v8738_v14 = vadd.f32 %v8737_v63, %v7400_v8  ;;  %v8779_v3 = vadd.f32 %v8778_v43, %v8736_v26 }
 0x569   :  { %v8781_v60 = vadd.f32 %v8780_v18, %v8738_v14 }
 0x5a0   :  { %v8817_v6 = vpop.f32.mrf.mxu1 }
 0x5a1   :  { %v8818_v10 = vadd.f32 %v8817_v6, %v8775_v51 }
 0x5a2   :  { %v8819_v20 = vpop.f32.mrf.mxu1 }
 0x5a3   :  { %v8820_v55 = vadd.f32 %v8819_v20, %v8777_v12  ;;  %v8861_v57 = vadd.f32 %v8860_v13, %v8818_v10  ;;  %v16314_v10 = vld [vmem:[%s19440_s11 + $0x6f4] ss:$148 sps:$4 sm:$0xff]  }
 0x5a4   :  { %v8821_v25 = vpop.f32.mrf.mxu1 }
 0x5a5   :  { %v8822_v38 = vadd.f32 %v8821_v25, %v8779_v3  ;;  %v8863_v19 = vadd.f32 %v8862_v52, %v8820_v55  ;;  %v8871_v17 = vmax.f32 %v8861_v57, 0.0  ;;  %v16308_v3 = vld [vmem:[%s19440_s11 + $0x818] ss:$148 sps:$4 sm:$0xff]   ;;  %v16312_v25 = vld [vmem:[%s19440_s11 + $0x6f0] ss:$148 sps:$4 sm:$0xff]  }
 0x5a6   :  { %v8823_v50 = vpop.f32.mrf.mxu1  ;;  %v16328_v57 = vld [vmem:[%s19440_s11 + $0x250] ss:$148 sps:$4 sm:$0xff]  }
 0x5a7   :  { %v8865_v2 = vadd.f32 %v8864_v1, %v8822_v38  ;;  %v8824_v29 = vadd.f32 %v8823_v50, %v8781_v60  ;;  %v8872_v49 = vmax.f32 %v8863_v19, 0.0  ;;  %v16318_v38 = vld [vmem:[%s19440_s11 + $0x5cc] ss:$148 sps:$4 sm:$0xff]   ;;  %v16316_v60 = vld [vmem:[%s19440_s11 + $0x5c8] ss:$148 sps:$4 sm:$0xff]  }
 0x5a8   :  { %v16322_v50 = vld [vmem:[%s19440_s11 + $0x4a4] ss:$148 sps:$4 sm:$0xff]   ;;  %v16320_v19 = vld [vmem:[%s19440_s11 + $0x4a0] ss:$148 sps:$4 sm:$0xff]  }
 0x5a9   :  { %v8867_v9 = vadd.f32 %v8866_v47, %v8824_v29  ;;  %v8875_v5 = vmax.f32 %v8865_v2, 0.0  ;;  %v16326_v2 = vld [vmem:[%s19440_s11 + $0x37c] ss:$148 sps:$4 sm:$0xff]   ;;  %v16324_v29 = vld [vmem:[%s19440_s11 + $0x378] ss:$148 sps:$4 sm:$0xff]  }
 0x5aa   :  { %v16330_v47 = vld [vmem:[%s19440_s11 + $0x254] ss:$148 sps:$4 sm:$0xff]  }
 0x5ab   :  { %v8876_v62 = vmax.f32 %v8867_v9, 0.0  ;;  %v8879_v42 = vpack.c.bf16 %v8875_v5, %v8871_v17  ;;  %v16331_v9 = vld [vmem:[%s19438_s9 + $0x10] sm:$0xff]   ;;  %v16334_v5 = vld [vmem:[%s19440_s11 + $0x12c] ss:$148 sps:$4 sm:$0xff]   ;;  %v16338_v17 = vld [vmem:[%s19440_s11 + $0x4] ss:$148 sps:$4 sm:$0xff]  }
 0x5ad   :  { %v8880_v21 = vpack.c.bf16 %v8876_v62, %v8872_v49  ;;  %v16332_v49 = vld [vmem:[%s19440_s11 + $0x128] ss:$148 sps:$4 sm:$0xff]  }
 0x5ae   :  { %v16335_v62 = vld [vmem:[%s19438_s9 + $0x8] sm:$0xff]  }
 0x5af   :  { %9352 = vmatprep.mubr.bf16.mxu1 %v8880_v21  ;;  %v16336_v21 = vld [vmem:[%s19440_s11] ss:$148 sps:$4 sm:$0xff]  }
 0x5b0   :  { %9353 = vmatmul.mubr.bf16.vlgmr.msra.gmra.mxu1 %v8879_v42  ;;  %v16339_v42 = vld [vmem:[%s19438_s9] sm:$0xff]  }
 0x5b1   :  { %14535 = vmatpush3.bf16.msra.mxu1 %v16311_v53  ;;  %14550 = vmatprep.mubr.msk.bf16.mxu1 %vm16786_vm0, %v16785_v54 }
 0x5b2   :  { %14536 = vmatprep.subr.bf16.mxu1 %v16785_v54 }
 0x5b5   :  { %14537 = vmatpush3.bf16.msra.mxu1 %v16315_v39 }
 0x5b6   :  { %14538 = vmatprep.subr.bf16.mxu1 %v16785_v54 }
 0x5b9   :  { %14539 = vmatpush3.bf16.msra.mxu1 %v16319_v36 }
 0x5ba   :  { %14540 = vmatprep.subr.bf16.mxu1 %v16785_v54 }
 0x5bd   :  { %14541 = vmatpush3.bf16.msra.mxu1 %v16323_v48 }
 0x5be   :  { %14542 = vmatprep.subr.bf16.mxu1 %v16785_v54 }
 0x5c1   :  { %14543 = vmatpush3.bf16.msra.mxu1 %v16327_v16 }
 0x5c2   :  { %14544 = vmatprep.subr.bf16.mxu1 %v16785_v54 }
 0x5c5   :  { %14545 = vmatpush3.bf16.msra.mxu1 %v16331_v9  ;;  %v16396_v9 = vld [vmem:[%s19440_s11 + $0x70c] ss:$148 sps:$4 sm:$0xff]  }
 0x5c6   :  { %14546 = vmatprep.subr.bf16.mxu1 %v16785_v54 }
 0x5c9   :  { %14547 = vmatpush3.bf16.msra.mxu1 %v16335_v62  ;;  %v16397_v62 = vld [vmem:[%s19440_s11 + $0x710] ss:$148 sps:$4 sm:$0xff]  }
 0x5ca   :  { %14548 = vmatprep.subr.bf16.mxu1 %v16785_v54 }
 0x5cd   :  { %14549 = vmatpush3.bf16.msra.mxu1 %v16339_v42  ;;  %v16400_v42 = vld [vmem:[%s19440_s11 + $0x5e0] ss:$148 sps:$4 sm:$0xff]  }
 0x5ce   :  { %11692 = vmatprep.subr.bf16.mxu1 %v16342_v33  ;;  %v16403_v33 = vld [vmem:[%s19440_s11 + $0x5e8] ss:$148 sps:$4 sm:$0xff]  }
 0x5ee   :  { %v9311_v40 = vpop.f32.mrf.mxu0 }
 0x5ef   :  { %v9312_v4 = vadd.f32 %v9311_v40, %v8950_v30 }
 0x5f0   :  { %v9313_v35 = vpop.f32.mrf.mxu0 }
 0x5f1   :  { %v9314_v18 = vadd.f32 %v9313_v35, %v8954_v61  ;;  %v16340_v35 = vld [vmem:[%s19440_s11 + $0x820] ss:$148 sps:$4 sm:$0xff]  }
 0x5f2   :  { %v9315_v58 = vpop.f32.mrf.mxu0 }
 0x5f3   :  { %v9316_v23 = vadd.f32 %v9315_v58, %v8950_v30  ;;  %v16351_v30 = vld [vmem:[%s19440_s11 + $0x704] ss:$148 sps:$4 sm:$0xff]  }
 0x5f4   :  { %v9317_v59 = vpop.f32.mrf.mxu0 }
 0x5f5   :  { %v9318_v37 = vadd.f32 %v9317_v59, %v8954_v61  ;;  %v16348_v61 = vld [vmem:[%s19440_s11 + $0x6fc] ss:$148 sps:$4 sm:$0xff]   ;;  %v16349_v59 = vld [vmem:[%s19440_s11 + $0x700] ss:$148 sps:$4 sm:$0xff]  }
 0x670   :  { %v9354_v43 = vpop.f32.mrf.mxu1 }
 0x671   :  { %v9355_v26 = vadd.f32 %v9354_v43, %v9312_v4  ;;  %v16346_v43 = vld [vmem:[%s19440_s11 + $0x6f8] ss:$148 sps:$4 sm:$0xff]  }
 0x672   :  { %v9356_v8 = vpop.f32.mrf.mxu1  ;;  %v16355_v4 = vld [vmem:[%s19440_s11 + $0x5d8] ss:$148 sps:$4 sm:$0xff]  }
 0x673   :  { %v9357_v11 = vadd.f32 %v9356_v8, %v9314_v18  ;;  %v9363_v20 = vmax.f32 %v9355_v26, 0.0  ;;  %v16354_v8 = vld [vmem:[%s19440_s11 + $0x5d4] ss:$148 sps:$4 sm:$0xff]   ;;  %v16357_v18 = vld [vmem:[%s19440_s11 + $0x5dc] ss:$148 sps:$4 sm:$0xff]  }
 0x674   :  { %v9358_v13 = vpop.f32.mrf.mxu1  ;;  %v16366_v26 = vld [vmem:[%s19440_s11 + $0x384] ss:$148 sps:$4 sm:$0xff]  }
 0x675   :  { %v9359_v63 = vadd.f32 %v9358_v13, %v9316_v23  ;;  %v9364_v12 = vmax.f32 %v9357_v11, 0.0  ;;  %v16352_v23 = vld [vmem:[%s19440_s11 + $0x5d0] ss:$148 sps:$4 sm:$0xff]   ;;  %v16360_v13 = vld [vmem:[%s19440_s11 + $0x4ac] ss:$148 sps:$4 sm:$0xff]  }
 0x676   :  { %v9360_v52 = vpop.f32.mrf.mxu1  ;;  %v16358_v11 = vld [vmem:[%s19440_s11 + $0x4a8] ss:$148 sps:$4 sm:$0xff]  }
 0x677   :  { %v9361_v6 = vadd.f32 %v9360_v52, %v9318_v37  ;;  %v9365_v14 = vmax.f32 %v9359_v63, 0.0  ;;  %v16363_v37 = vld [vmem:[%s19440_s11 + $0x4b4] ss:$148 sps:$4 sm:$0xff]   ;;  %v16361_v63 = vld [vmem:[%s19440_s11 + $0x4b0] ss:$148 sps:$4 sm:$0xff]  }
 0x678   :  { %v16369_v52 = vld [vmem:[%s19440_s11 + $0x38c] ss:$148 sps:$4 sm:$0xff]  }
 0x679   :  { %v9366_v51 = vmax.f32 %v9361_v6, 0.0  ;;  %v9367_v1 = vpack.c.bf16 %v9365_v14, %v9363_v20  ;;  %v16364_v6 = vld [vmem:[%s19440_s11 + $0x380] ss:$148 sps:$4 sm:$0xff]   ;;  %v16367_v14 = vld [vmem:[%s19440_s11 + $0x388] ss:$148 sps:$4 sm:$0xff]  }
 0x67a   :  { %v16370_v20 = vld [vmem:[%s19440_s11 + $0x258] ss:$148 sps:$4 sm:$0xff]  }
 0x67b   :  { %v9368_v55 = vpack.c.bf16 %v9366_v51, %v9364_v12  ;;  %v16372_v12 = vld [vmem:[%s19440_s11 + $0x25c] ss:$148 sps:$4 sm:$0xff]   ;;  %v16375_v51 = vld [vmem:[%s19440_s11 + $0x264] ss:$148 sps:$4 sm:$0xff]  }
 0x67d   :  { %9536 = vmatprep.mubr.bf16.mxu0 %v9368_v55  ;;  %v16373_v55 = vld [vmem:[%s19440_s11 + $0x260] ss:$148 sps:$4 sm:$0xff]  }
 0x67e   :  { %9537 = vmatmul.mubr.bf16.vlgmr.msra.gmra.mxu0 %v9367_v1  ;;  %v16381_v1 = vld [vmem:[%s19440_s11 + $0x13c] ss:$148 sps:$4 sm:$0xff]  }
 0x67f   :  { %11650 = vmatpush1.bf16.msra.mxu0 %v16308_v3  ;;  %11681 = vmatprep.mubr.bf16.mxu0 %v16784_v27  ;;  %v16378_v3 = vld [vmem:[%s19440_s11 + $0x134] ss:$148 sps:$4 sm:$0xff]  }
 0x680   :  { %11651 = vmatprep.subr.bf16.mxu0 %v16314_v10  ;;  %v16376_v10 = vld [vmem:[%s19440_s11 + $0x130] ss:$148 sps:$4 sm:$0xff]  }
 0x683   :  { %11652 = vmatpush1.bf16.msra.mxu0 %v16312_v25  ;;  %v16379_v25 = vld [vmem:[%s19440_s11 + $0x138] ss:$148 sps:$4 sm:$0xff]  }
 0x684   :  { %11653 = vmatprep.subr.bf16.mxu0 %v16318_v38  ;;  %v16384_v38 = vld [vmem:[%s19440_s11 + $0xc] ss:$148 sps:$4 sm:$0xff]  }
 0x687   :  { %11654 = vmatpush1.bf16.msra.mxu0 %v16316_v60  ;;  %v16387_v60 = vld [vmem:[%s19440_s11 + $0x14] ss:$148 sps:$4 sm:$0xff]  }
 0x688   :  { %11655 = vmatprep.subr.bf16.mxu0 %v16322_v50  ;;  %v16382_v50 = vld [vmem:[%s19440_s11 + $0x8] ss:$148 sps:$4 sm:$0xff]  }
 0x68b   :  { %11656 = vmatpush1.bf16.msra.mxu0 %v16320_v19  ;;  %v16385_v19 = vld [vmem:[%s19440_s11 + $0x10] ss:$148 sps:$4 sm:$0xff]  }
 0x68c   :  { %11657 = vmatprep.subr.bf16.mxu0 %v16326_v2  ;;  %v16390_v2 = vld [vmem:[%s19440_s11 + $0x834] ss:$148 sps:$4 sm:$0xff]  }
 0x68f   :  { %11658 = vmatpush1.bf16.msra.mxu0 %v16324_v29  ;;  %v16393_v29 = vld [vmem:[%s19440_s11 + $0x83c] ss:$148 sps:$4 sm:$0xff]  }
 0x690   :  { %11659 = vmatprep.subr.bf16.mxu0 %v16330_v47  ;;  %v16388_v47 = vld [vmem:[%s19440_s11 + $0x830] ss:$148 sps:$4 sm:$0xff]  }
 0x693   :  { %11660 = vmatpush1.bf16.msra.mxu0 %v16328_v57  ;;  %v16391_v57 = vld [vmem:[%s19440_s11 + $0x838] ss:$148 sps:$4 sm:$0xff]  }
 0x694   :  { %11661 = vmatprep.subr.bf16.mxu0 %v16334_v5  ;;  %v16399_v5 = vld [vmem:[%s19440_s11 + $0x714] ss:$148 sps:$4 sm:$0xff]  }
 0x697   :  { %11662 = vmatpush1.bf16.msra.mxu0 %v16332_v49  ;;  %v16394_v49 = vld [vmem:[%s19440_s11 + $0x708] ss:$148 sps:$4 sm:$0xff]  }
 0x698   :  { %11663 = vmatprep.subr.bf16.mxu0 %v16338_v17  ;;  %v16402_v17 = vld [vmem:[%s19440_s11 + $0x5e4] ss:$148 sps:$4 sm:$0xff]  }
 0x69b   :  { %11664 = vmatpush1.bf16.msra.mxu0 %v16336_v21  ;;  %v16405_v21 = vld [vmem:[%s19440_s11 + $0x5ec] ss:$148 sps:$4 sm:$0xff]  }
 0x69c   :  { %11735 = vmatprep.subr.bf16.mxu0 %v16345_v44  ;;  %v16408_v44 = vld [vmem:[%s19440_s11 + $0x4bc] ss:$148 sps:$4 sm:$0xff]  }
 0x73e   :  { %v14510_v32 = vpop.f32.mrf.mxu0 }
 0x740   :  { %v14511_v28 = vpop.f32.mrf.mxu0 }
 0x741   :  { %v14512_v15 = vadd.f32 %v14511_v28, %v14510_v32  ;;  %v16411_v32 = vld [vmem:[%s19440_s11 + $0x4c4] ss:$148 sps:$4 sm:$0xff]  }
 0x742   :  { %v14513_v0 = vpop.f32.mrf.mxu0  ;;  %v16406_v28 = vld [vmem:[%s19440_s11 + $0x4b8] ss:$148 sps:$4 sm:$0xff]  }
 0x743   :  { %v9539_v39 = vadd.f32 %v14512_v15, %v13920_v31  ;;  %v16409_v15 = vld [vmem:[%s19440_s11 + $0x4c0] ss:$148 sps:$4 sm:$0xff]  }
 0x744   :  { %v14514_v53 = vpop.f32.mrf.mxu0 }
 0x745   :  { %v14515_v36 = vadd.f32 %v14514_v53, %v14513_v0  ;;  %v9545_v16 = vmax.f32 %v9539_v39, 0.0  ;;  %v16417_v0 = vld [vmem:[%s19440_s11 + $0x39c] ss:$148 sps:$4 sm:$0xff]   ;;  %v16415_v39 = vld [vmem:[%s19440_s11 + $0x398] ss:$148 sps:$4 sm:$0xff]  }
 0x746   :  { %v16412_v53 = vld [vmem:[%s19440_s11 + $0x390] ss:$148 sps:$4 sm:$0xff]  }
 0x747   :  { %v9542_v48 = vadd.f32 %v14515_v36, %v13920_v31  ;;  %v16414_v31 = vld [vmem:[%s19440_s11 + $0x394] ss:$148 sps:$4 sm:$0xff]   ;;  %v16420_v36 = vld [vmem:[%s19440_s11 + $0x26c] ss:$148 sps:$4 sm:$0xff]  }
 0x749   :  { %v9546_v40 = vmax.f32 %v9542_v48, 0.0  ;;  %v16423_v48 = vld [vmem:[%s19440_s11 + $0x274] ss:$148 sps:$4 sm:$0xff]  }
 0x74b   :  { %v18352_v58 = vpack.c.bf16 %v9546_v40, %v9545_v16  ;;  %v16418_v16 = vld [vmem:[%s19440_s11 + $0x268] ss:$148 sps:$4 sm:$0xff]   ;;  %v16421_v40 = vld [vmem:[%s19440_s11 + $0x270] ss:$148 sps:$4 sm:$0xff]  }
 0x74d   :  { %14551 = vmatmul.mubr.bf16.vlgmr.msra.gmra.mxu1 %v18352_v58  ;;  %11682 = vmatmul.mubr.bf16.vlgmr.msra.gmra.mxu0 %v18352_v58 }
 0x74e   :  { %11693 = vmatpush1.bf16.msra.mxu1 %v16340_v35  ;;  %11736 = vmatpush1.bf16.msra.mxu0 %v16343_v46  ;;  %v16426_v35 = vld [vmem:[%s19440_s11 + $0x144] ss:$148 sps:$4 sm:$0xff]   ;;  %v16429_v46 = vld [vmem:[%s19440_s11 + $0x14c] ss:$148 sps:$4 sm:$0xff]  }
 0x74f   :  { %11694 = vmatprep.subr.bf16.mxu1 %v16348_v61  ;;  %11737 = vmatprep.subr.bf16.mxu0 %v16351_v30  ;;  %v16424_v61 = vld [vmem:[%s19440_s11 + $0x140] ss:$148 sps:$4 sm:$0xff]   ;;  %v16427_v30 = vld [vmem:[%s19440_s11 + $0x148] ss:$148 sps:$4 sm:$0xff]  }
 0x750   :  { %11724 = vmatprep.mubr.bf16.mxu1 %v16784_v27  ;;  %11767 = vmatprep.mubr.bf16.mxu0 %v16784_v27 }
 0x752   :  { %11695 = vmatpush1.bf16.msra.mxu1 %v16346_v43  ;;  %11738 = vmatpush1.bf16.msra.mxu0 %v16349_v59  ;;  %v16432_v43 = vld [vmem:[%s19440_s11 + $0x1c] ss:$148 sps:$4 sm:$0xff]   ;;  %v16435_v59 = vld [vmem:[%s19440_s11 + $0x24] ss:$148 sps:$4 sm:$0xff]  }
 0x753   :  { %11696 = vmatprep.subr.bf16.mxu1 %v16354_v8  ;;  %11739 = vmatprep.subr.bf16.mxu0 %v16357_v18  ;;  %v16430_v8 = vld [vmem:[%s19440_s11 + $0x18] ss:$148 sps:$4 sm:$0xff]   ;;  %v16433_v18 = vld [vmem:[%s19440_s11 + $0x20] ss:$148 sps:$4 sm:$0xff]  }
 0x756   :  { %11697 = vmatpush1.bf16.msra.mxu1 %v16352_v23  ;;  %11740 = vmatpush1.bf16.msra.mxu0 %v16355_v4  ;;  %v16438_v23 = vld [vmem:[%s19440_s11 + $0x844] ss:$148 sps:$4 sm:$0xff]   ;;  %v16441_v4 = vld [vmem:[%s19440_s11 + $0x84c] ss:$148 sps:$4 sm:$0xff]  }
 0x757   :  { %11698 = vmatprep.subr.bf16.mxu1 %v16360_v13  ;;  %11741 = vmatprep.subr.bf16.mxu0 %v16363_v37  ;;  %v16436_v13 = vld [vmem:[%s19440_s11 + $0x840] ss:$148 sps:$4 sm:$0xff]   ;;  %v16439_v37 = vld [vmem:[%s19440_s11 + $0x848] ss:$148 sps:$4 sm:$0xff]  }
 0x75a   :  { %11699 = vmatpush1.bf16.msra.mxu1 %v16358_v11  ;;  %11742 = vmatpush1.bf16.msra.mxu0 %v16361_v63  ;;  %v16444_v11 = vld [vmem:[%s19440_s11 + $0x71c] ss:$148 sps:$4 sm:$0xff]   ;;  %v16447_v63 = vld [vmem:[%s19440_s11 + $0x724] ss:$148 sps:$4 sm:$0xff]  }
 0x75b   :  { %11700 = vmatprep.subr.bf16.mxu1 %v16366_v26  ;;  %11743 = vmatprep.subr.bf16.mxu0 %v16369_v52  ;;  %v16442_v26 = vld [vmem:[%s19440_s11 + $0x718] ss:$148 sps:$4 sm:$0xff]   ;;  %v16445_v52 = vld [vmem:[%s19440_s11 + $0x720] ss:$148 sps:$4 sm:$0xff]  }
 0x75e   :  { %11701 = vmatpush1.bf16.msra.mxu1 %v16364_v6  ;;  %11744 = vmatpush1.bf16.msra.mxu0 %v16367_v14  ;;  %v16450_v6 = vld [vmem:[%s19440_s11 + $0x5f4] ss:$148 sps:$4 sm:$0xff]   ;;  %v16453_v14 = vld [vmem:[%s19440_s11 + $0x5fc] ss:$148 sps:$4 sm:$0xff]  }
 0x75f   :  { %11702 = vmatprep.subr.bf16.mxu1 %v16372_v12  ;;  %11745 = vmatprep.subr.bf16.mxu0 %v16375_v51  ;;  %v16448_v12 = vld [vmem:[%s19440_s11 + $0x5f0] ss:$148 sps:$4 sm:$0xff]   ;;  %v16451_v51 = vld [vmem:[%s19440_s11 + $0x5f8] ss:$148 sps:$4 sm:$0xff]  }
 0x762   :  { %11703 = vmatpush1.bf16.msra.mxu1 %v16370_v20  ;;  %11746 = vmatpush1.bf16.msra.mxu0 %v16373_v55  ;;  %v16456_v20 = vld [vmem:[%s19440_s11 + $0x4cc] ss:$148 sps:$4 sm:$0xff]   ;;  %v16459_v55 = vld [vmem:[%s19440_s11 + $0x4d4] ss:$148 sps:$4 sm:$0xff]  }
 0x763   :  { %11704 = vmatprep.subr.bf16.mxu1 %v16378_v3  ;;  %11747 = vmatprep.subr.bf16.mxu0 %v16381_v1  ;;  %v16454_v3 = vld [vmem:[%s19440_s11 + $0x4c8] ss:$148 sps:$4 sm:$0xff]   ;;  %v16457_v1 = vld [vmem:[%s19440_s11 + $0x4d0] ss:$148 sps:$4 sm:$0xff]  }
 0x766   :  { %11705 = vmatpush1.bf16.msra.mxu1 %v16376_v10  ;;  %11748 = vmatpush1.bf16.msra.mxu0 %v16379_v25  ;;  %v16462_v10 = vld [vmem:[%s19440_s11 + $0x3a4] ss:$148 sps:$4 sm:$0xff]   ;;  %v16465_v25 = vld [vmem:[%s19440_s11 + $0x3ac] ss:$148 sps:$4 sm:$0xff]  }
 0x767   :  { %11706 = vmatprep.subr.bf16.mxu1 %v16384_v38  ;;  %11749 = vmatprep.subr.bf16.mxu0 %v16387_v60  ;;  %v16460_v38 = vld [vmem:[%s19440_s11 + $0x3a0] ss:$148 sps:$4 sm:$0xff]   ;;  %v16463_v60 = vld [vmem:[%s19440_s11 + $0x3a8] ss:$148 sps:$4 sm:$0xff]  }
 0x76a   :  { %11707 = vmatpush1.bf16.msra.mxu1 %v16382_v50  ;;  %11750 = vmatpush1.bf16.msra.mxu0 %v16385_v19  ;;  %v16468_v50 = vld [vmem:[%s19440_s11 + $0x27c] ss:$148 sps:$4 sm:$0xff]   ;;  %v16471_v19 = vld [vmem:[%s19440_s11 + $0x284] ss:$148 sps:$4 sm:$0xff]  }
 0x76b   :  { %11778 = vmatprep.subr.bf16.mxu1 %v16390_v2  ;;  %11821 = vmatprep.subr.bf16.mxu0 %v16393_v29  ;;  %v16466_v2 = vld [vmem:[%s19440_s11 + $0x278] ss:$148 sps:$4 sm:$0xff]   ;;  %v16469_v29 = vld [vmem:[%s19440_s11 + $0x280] ss:$148 sps:$4 sm:$0xff]  }
 0x76d   :  { %11725 = vmatmul.mubr.bf16.vlgmr.msra.gmra.mxu1 %v18352_v58  ;;  %11768 = vmatmul.mubr.bf16.vlgmr.msra.gmra.mxu0 %v18352_v58 }
 0x76e   :  { %11779 = vmatpush1.bf16.msra.mxu1 %v16388_v47  ;;  %11822 = vmatpush1.bf16.msra.mxu0 %v16391_v57  ;;  %v16474_v47 = vld [vmem:[%s19440_s11 + $0x154] ss:$148 sps:$4 sm:$0xff]   ;;  %v16477_v57 = vld [vmem:[%s19440_s11 + $0x15c] ss:$148 sps:$4 sm:$0xff]  }
 0x76f   :  { %11780 = vmatprep.subr.bf16.mxu1 %v16396_v9  ;;  %11823 = vmatprep.subr.bf16.mxu0 %v16399_v5  ;;  %v16472_v9 = vld [vmem:[%s19440_s11 + $0x150] ss:$148 sps:$4 sm:$0xff]   ;;  %v16475_v5 = vld [vmem:[%s19440_s11 + $0x158] ss:$148 sps:$4 sm:$0xff]  }
 0x770   :  { %11810 = vmatprep.mubr.bf16.mxu1 %v16784_v27  ;;  %11853 = vmatprep.mubr.bf16.mxu0 %v16784_v27 }
 0x772   :  { %11781 = vmatpush1.bf16.msra.mxu1 %v16394_v49  ;;  %11824 = vmatpush1.bf16.msra.mxu0 %v16397_v62  ;;  %v16480_v49 = vld [vmem:[%s19440_s11 + $0x2c] ss:$148 sps:$4 sm:$0xff]   ;;  %v16483_v62 = vld [vmem:[%s19440_s11 + $0x34] ss:$148 sps:$4 sm:$0xff]  }
 0x773   :  { %11782 = vmatprep.subr.bf16.mxu1 %v16402_v17  ;;  %11825 = vmatprep.subr.bf16.mxu0 %v16405_v21  ;;  %v16478_v17 = vld [vmem:[%s19440_s11 + $0x28] ss:$148 sps:$4 sm:$0xff]   ;;  %v16481_v21 = vld [vmem:[%s19440_s11 + $0x30] ss:$148 sps:$4 sm:$0xff]  }
 0x776   :  { %11783 = vmatpush1.bf16.msra.mxu1 %v16400_v42  ;;  %11826 = vmatpush1.bf16.msra.mxu0 %v16403_v33  ;;  %v16486_v42 = vld [vmem:[%s19440_s11 + $0x854] ss:$148 sps:$4 sm:$0xff]   ;;  %v16489_v33 = vld [vmem:[%s19440_s11 + $0x85c] ss:$148 sps:$4 sm:$0xff]  }
 0x777   :  { %11784 = vmatprep.subr.bf16.mxu1 %v16408_v44  ;;  %11827 = vmatprep.subr.bf16.mxu0 %v16411_v32  ;;  %v16484_v44 = vld [vmem:[%s19440_s11 + $0x850] ss:$148 sps:$4 sm:$0xff]   ;;  %v16487_v32 = vld [vmem:[%s19440_s11 + $0x858] ss:$148 sps:$4 sm:$0xff]  }
 0x77a   :  { %11785 = vmatpush1.bf16.msra.mxu1 %v16406_v28  ;;  %11828 = vmatpush1.bf16.msra.mxu0 %v16409_v15  ;;  %v16492_v28 = vld [vmem:[%s19440_s11 + $0x72c] ss:$148 sps:$4 sm:$0xff]   ;;  %v16495_v15 = vld [vmem:[%s19440_s11 + $0x734] ss:$148 sps:$4 sm:$0xff]  }
 0x77b   :  { %11786 = vmatprep.subr.bf16.mxu1 %v16414_v31  ;;  %11829 = vmatprep.subr.bf16.mxu0 %v16417_v0  ;;  %v16490_v31 = vld [vmem:[%s19440_s11 + $0x728] ss:$148 sps:$4 sm:$0xff]   ;;  %v16493_v0 = vld [vmem:[%s19440_s11 + $0x730] ss:$148 sps:$4 sm:$0xff]  }
 0x77e   :  { %11787 = vmatpush1.bf16.msra.mxu1 %v16412_v53  ;;  %11830 = vmatpush1.bf16.msra.mxu0 %v16415_v39  ;;  %v16498_v53 = vld [vmem:[%s19440_s11 + $0x604] ss:$148 sps:$4 sm:$0xff]   ;;  %v16501_v39 = vld [vmem:[%s19440_s11 + $0x60c] ss:$148 sps:$4 sm:$0xff]  }
 0x77f   :  { %11788 = vmatprep.subr.bf16.mxu1 %v16420_v36  ;;  %11831 = vmatprep.subr.bf16.mxu0 %v16423_v48  ;;  %v16496_v36 = vld [vmem:[%s19440_s11 + $0x600] ss:$148 sps:$4 sm:$0xff]   ;;  %v16499_v48 = vld [vmem:[%s19440_s11 + $0x608] ss:$148 sps:$4 sm:$0xff]  }
 0x782   :  { %11789 = vmatpush1.bf16.msra.mxu1 %v16418_v16  ;;  %11832 = vmatpush1.bf16.msra.mxu0 %v16421_v40  ;;  %v16504_v16 = vld [vmem:[%s19440_s11 + $0x4dc] ss:$148 sps:$4 sm:$0xff]   ;;  %v16507_v40 = vld [vmem:[%s19440_s11 + $0x4e4] ss:$148 sps:$4 sm:$0xff]  }
 0x783   :  { %11790 = vmatprep.subr.bf16.mxu1 %v16426_v35  ;;  %11833 = vmatprep.subr.bf16.mxu0 %v16429_v46  ;;  %v16502_v35 = vld [vmem:[%s19440_s11 + $0x4d8] ss:$148 sps:$4 sm:$0xff]   ;;  %v16505_v46 = vld [vmem:[%s19440_s11 + $0x4e0] ss:$148 sps:$4 sm:$0xff]  }
 0x786   :  { %11791 = vmatpush1.bf16.msra.mxu1 %v16424_v61  ;;  %11834 = vmatpush1.bf16.msra.mxu0 %v16427_v30  ;;  %v16510_v61 = vld [vmem:[%s19440_s11 + $0x3b4] ss:$148 sps:$4 sm:$0xff]   ;;  %v16513_v30 = vld [vmem:[%s19440_s11 + $0x3bc] ss:$148 sps:$4 sm:$0xff]  }
 0x787   :  { %11792 = vmatprep.subr.bf16.mxu1 %v16432_v43  ;;  %11835 = vmatprep.subr.bf16.mxu0 %v16435_v59  ;;  %v16508_v43 = vld [vmem:[%s19440_s11 + $0x3b0] ss:$148 sps:$4 sm:$0xff]   ;;  %v16511_v59 = vld [vmem:[%s19440_s11 + $0x3b8] ss:$148 sps:$4 sm:$0xff]  }
 0x78a   :  { %11793 = vmatpush1.bf16.msra.mxu1 %v16430_v8  ;;  %11836 = vmatpush1.bf16.msra.mxu0 %v16433_v18  ;;  %v16516_v8 = vld [vmem:[%s19440_s11 + $0x28c] ss:$148 sps:$4 sm:$0xff]   ;;  %v16519_v18 = vld [vmem:[%s19440_s11 + $0x294] ss:$148 sps:$4 sm:$0xff]  }
 0x78b   :  { %11864 = vmatprep.subr.bf16.mxu1 %v16438_v23  ;;  %11907 = vmatprep.subr.bf16.mxu0 %v16441_v4  ;;  %v16514_v23 = vld [vmem:[%s19440_s11 + $0x288] ss:$148 sps:$4 sm:$0xff]   ;;  %v16517_v4 = vld [vmem:[%s19440_s11 + $0x290] ss:$148 sps:$4 sm:$0xff]  }
 0x78d   :  { %11811 = vmatmul.mubr.bf16.vlgmr.msra.gmra.mxu1 %v18352_v58  ;;  %11854 = vmatmul.mubr.bf16.vlgmr.msra.gmra.mxu0 %v18352_v58 }
 0x78e   :  { %11865 = vmatpush1.bf16.msra.mxu1 %v16436_v13  ;;  %11908 = vmatpush1.bf16.msra.mxu0 %v16439_v37  ;;  %v16522_v13 = vld [vmem:[%s19440_s11 + $0x164] ss:$148 sps:$4 sm:$0xff]   ;;  %v16525_v37 = vld [vmem:[%s19440_s11 + $0x16c] ss:$148 sps:$4 sm:$0xff]  }
 0x78f   :  { %11866 = vmatprep.subr.bf16.mxu1 %v16444_v11  ;;  %11909 = vmatprep.subr.bf16.mxu0 %v16447_v63  ;;  %v16520_v11 = vld [vmem:[%s19440_s11 + $0x160] ss:$148 sps:$4 sm:$0xff]   ;;  %v16523_v63 = vld [vmem:[%s19440_s11 + $0x168] ss:$148 sps:$4 sm:$0xff]  }
 0x790   :  { %11896 = vmatprep.mubr.bf16.mxu1 %v16784_v27  ;;  %11939 = vmatprep.mubr.bf16.mxu0 %v16784_v27 }
 0x792   :  { %11867 = vmatpush1.bf16.msra.mxu1 %v16442_v26  ;;  %11910 = vmatpush1.bf16.msra.mxu0 %v16445_v52  ;;  %v16528_v26 = vld [vmem:[%s19440_s11 + $0x3c] ss:$148 sps:$4 sm:$0xff]   ;;  %v16531_v52 = vld [vmem:[%s19440_s11 + $0x44] ss:$148 sps:$4 sm:$0xff]  }
 0x793   :  { %11868 = vmatprep.subr.bf16.mxu1 %v16450_v6  ;;  %11911 = vmatprep.subr.bf16.mxu0 %v16453_v14  ;;  %v16526_v6 = vld [vmem:[%s19440_s11 + $0x38] ss:$148 sps:$4 sm:$0xff]   ;;  %v16529_v14 = vld [vmem:[%s19440_s11 + $0x40] ss:$148 sps:$4 sm:$0xff]  }
 0x796   :  { %11869 = vmatpush1.bf16.msra.mxu1 %v16448_v12  ;;  %11912 = vmatpush1.bf16.msra.mxu0 %v16451_v51  ;;  %v16534_v12 = vld [vmem:[%s19440_s11 + $0x864] ss:$148 sps:$4 sm:$0xff]   ;;  %v16537_v51 = vld [vmem:[%s19440_s11 + $0x86c] ss:$148 sps:$4 sm:$0xff]  }
 0x797   :  { %11870 = vmatprep.subr.bf16.mxu1 %v16456_v20  ;;  %11913 = vmatprep.subr.bf16.mxu0 %v16459_v55  ;;  %v16532_v20 = vld [vmem:[%s19440_s11 + $0x860] ss:$148 sps:$4 sm:$0xff]   ;;  %v16535_v55 = vld [vmem:[%s19440_s11 + $0x868] ss:$148 sps:$4 sm:$0xff]  }
 0x79a   :  { %11871 = vmatpush1.bf16.msra.mxu1 %v16454_v3  ;;  %11914 = vmatpush1.bf16.msra.mxu0 %v16457_v1  ;;  %v16540_v3 = vld [vmem:[%s19440_s11 + $0x73c] ss:$148 sps:$4 sm:$0xff]   ;;  %v16543_v1 = vld [vmem:[%s19440_s11 + $0x744] ss:$148 sps:$4 sm:$0xff]  }
 0x79b   :  { %11872 = vmatprep.subr.bf16.mxu1 %v16462_v10  ;;  %11915 = vmatprep.subr.bf16.mxu0 %v16465_v25  ;;  %v16538_v10 = vld [vmem:[%s19440_s11 + $0x738] ss:$148 sps:$4 sm:$0xff]   ;;  %v16541_v25 = vld [vmem:[%s19440_s11 + $0x740] ss:$148 sps:$4 sm:$0xff]  }
 0x79e   :  { %11873 = vmatpush1.bf16.msra.mxu1 %v16460_v38  ;;  %11916 = vmatpush1.bf16.msra.mxu0 %v16463_v60  ;;  %v16546_v38 = vld [vmem:[%s19440_s11 + $0x614] ss:$148 sps:$4 sm:$0xff]   ;;  %v16549_v60 = vld [vmem:[%s19440_s11 + $0x61c] ss:$148 sps:$4 sm:$0xff]  }
 0x79f   :  { %11874 = vmatprep.subr.bf16.mxu1 %v16468_v50  ;;  %11917 = vmatprep.subr.bf16.mxu0 %v16471_v19  ;;  %v16544_v50 = vld [vmem:[%s19440_s11 + $0x610] ss:$148 sps:$4 sm:$0xff]   ;;  %v16547_v19 = vld [vmem:[%s19440_s11 + $0x618] ss:$148 sps:$4 sm:$0xff]  }
 0x7a2   :  { %11875 = vmatpush1.bf16.msra.mxu1 %v16466_v2  ;;  %11918 = vmatpush1.bf16.msra.mxu0 %v16469_v29  ;;  %v16552_v2 = vld [vmem:[%s19440_s11 + $0x4ec] ss:$148 sps:$4 sm:$0xff]   ;;  %v16555_v29 = vld [vmem:[%s19440_s11 + $0x4f4] ss:$148 sps:$4 sm:$0xff]  }
 0x7a3   :  { %11876 = vmatprep.subr.bf16.mxu1 %v16474_v47  ;;  %11919 = vmatprep.subr.bf16.mxu0 %v16477_v57  ;;  %v16550_v47 = vld [vmem:[%s19440_s11 + $0x4e8] ss:$148 sps:$4 sm:$0xff]   ;;  %v16553_v57 = vld [vmem:[%s19440_s11 + $0x4f0] ss:$148 sps:$4 sm:$0xff]  }
 0x7a6   :  { %11877 = vmatpush1.bf16.msra.mxu1 %v16472_v9  ;;  %11920 = vmatpush1.bf16.msra.mxu0 %v16475_v5  ;;  %v16558_v9 = vld [vmem:[%s19440_s11 + $0x3c4] ss:$148 sps:$4 sm:$0xff]   ;;  %v16561_v5 = vld [vmem:[%s19440_s11 + $0x3cc] ss:$148 sps:$4 sm:$0xff]  }
 0x7a7   :  { %11878 = vmatprep.subr.bf16.mxu1 %v16480_v49  ;;  %11921 = vmatprep.subr.bf16.mxu0 %v16483_v62  ;;  %v16556_v49 = vld [vmem:[%s19440_s11 + $0x3c0] ss:$148 sps:$4 sm:$0xff]   ;;  %v16559_v62 = vld [vmem:[%s19440_s11 + $0x3c8] ss:$148 sps:$4 sm:$0xff]  }
 0x7aa   :  { %11879 = vmatpush1.bf16.msra.mxu1 %v16478_v17  ;;  %11922 = vmatpush1.bf16.msra.mxu0 %v16481_v21  ;;  %v16564_v17 = vld [vmem:[%s19440_s11 + $0x29c] ss:$148 sps:$4 sm:$0xff]   ;;  %v16567_v21 = vld [vmem:[%s19440_s11 + $0x2a4] ss:$148 sps:$4 sm:$0xff]  }
 0x7ab   :  { %11950 = vmatprep.subr.bf16.mxu1 %v16486_v42  ;;  %11993 = vmatprep.subr.bf16.mxu0 %v16489_v33  ;;  %v16562_v42 = vld [vmem:[%s19440_s11 + $0x298] ss:$148 sps:$4 sm:$0xff]   ;;  %v16565_v33 = vld [vmem:[%s19440_s11 + $0x2a0] ss:$148 sps:$4 sm:$0xff]  }
 0x7ad   :  { %11897 = vmatmul.mubr.bf16.vlgmr.msra.gmra.mxu1 %v18352_v58  ;;  %11940 = vmatmul.mubr.bf16.vlgmr.msra.gmra.mxu0 %v18352_v58 }
 0x7ae   :  { %11951 = vmatpush1.bf16.msra.mxu1 %v16484_v44  ;;  %11994 = vmatpush1.bf16.msra.mxu0 %v16487_v32  ;;  %v16570_v44 = vld [vmem:[%s19440_s11 + $0x174] ss:$148 sps:$4 sm:$0xff]   ;;  %v16573_v32 = vld [vmem:[%s19440_s11 + $0x17c] ss:$148 sps:$4 sm:$0xff]  }
 0x7af   :  { %11952 = vmatprep.subr.bf16.mxu1 %v16492_v28  ;;  %11995 = vmatprep.subr.bf16.mxu0 %v16495_v15  ;;  %v16568_v28 = vld [vmem:[%s19440_s11 + $0x170] ss:$148 sps:$4 sm:$0xff]   ;;  %v16571_v15 = vld [vmem:[%s19440_s11 + $0x178] ss:$148 sps:$4 sm:$0xff]  }
 0x7b0   :  { %11982 = vmatprep.mubr.bf16.mxu1 %v16784_v27  ;;  %12025 = vmatprep.mubr.bf16.mxu0 %v16784_v27 }
 0x7b2   :  { %11953 = vmatpush1.bf16.msra.mxu1 %v16490_v31  ;;  %11996 = vmatpush1.bf16.msra.mxu0 %v16493_v0  ;;  %v16576_v31 = vld [vmem:[%s19440_s11 + $0x4c] ss:$148 sps:$4 sm:$0xff]   ;;  %v16579_v0 = vld [vmem:[%s19440_s11 + $0x54] ss:$148 sps:$4 sm:$0xff]  }
 0x7b3   :  { %11954 = vmatprep.subr.bf16.mxu1 %v16498_v53  ;;  %11997 = vmatprep.subr.bf16.mxu0 %v16501_v39  ;;  %v16574_v53 = vld [vmem:[%s19440_s11 + $0x48] ss:$148 sps:$4 sm:$0xff]   ;;  %v16577_v39 = vld [vmem:[%s19440_s11 + $0x50] ss:$148 sps:$4 sm:$0xff]  }
 0x7b6   :  { %11955 = vmatpush1.bf16.msra.mxu1 %v16496_v36  ;;  %11998 = vmatpush1.bf16.msra.mxu0 %v16499_v48  ;;  %v16582_v36 = vld [vmem:[%s19440_s11 + $0x874] ss:$148 sps:$4 sm:$0xff]   ;;  %v16585_v48 = vld [vmem:[%s19440_s11 + $0x87c] ss:$148 sps:$4 sm:$0xff]  }
 0x7b7   :  { %11956 = vmatprep.subr.bf16.mxu1 %v16504_v16  ;;  %11999 = vmatprep.subr.bf16.mxu0 %v16507_v40  ;;  %v16580_v16 = vld [vmem:[%s19440_s11 + $0x870] ss:$148 sps:$4 sm:$0xff]   ;;  %v16583_v40 = vld [vmem:[%s19440_s11 + $0x878] ss:$148 sps:$4 sm:$0xff]  }
 0x7ba   :  { %11957 = vmatpush1.bf16.msra.mxu1 %v16502_v35  ;;  %12000 = vmatpush1.bf16.msra.mxu0 %v16505_v46  ;;  %v16588_v35 = vld [vmem:[%s19440_s11 + $0x74c] ss:$148 sps:$4 sm:$0xff]   ;;  %v16591_v46 = vld [vmem:[%s19440_s11 + $0x754] ss:$148 sps:$4 sm:$0xff]  }
 0x7bb   :  { %11958 = vmatprep.subr.bf16.mxu1 %v16510_v61  ;;  %12001 = vmatprep.subr.bf16.mxu0 %v16513_v30  ;;  %v16586_v61 = vld [vmem:[%s19440_s11 + $0x748] ss:$148 sps:$4 sm:$0xff]   ;;  %v16589_v30 = vld [vmem:[%s19440_s11 + $0x750] ss:$148 sps:$4 sm:$0xff]  }
 0x7be   :  { %11959 = vmatpush1.bf16.msra.mxu1 %v16508_v43  ;;  %12002 = vmatpush1.bf16.msra.mxu0 %v16511_v59  ;;  %v16594_v43 = vld [vmem:[%s19440_s11 + $0x624] ss:$148 sps:$4 sm:$0xff]   ;;  %v16597_v59 = vld [vmem:[%s19440_s11 + $0x62c] ss:$148 sps:$4 sm:$0xff]  }
 0x7bf   :  { %11960 = vmatprep.subr.bf16.mxu1 %v16516_v8  ;;  %12003 = vmatprep.subr.bf16.mxu0 %v16519_v18  ;;  %v16592_v8 = vld [vmem:[%s19440_s11 + $0x620] ss:$148 sps:$4 sm:$0xff]   ;;  %v16595_v18 = vld [vmem:[%s19440_s11 + $0x628] ss:$148 sps:$4 sm:$0xff]  }
 0x7c2   :  { %11961 = vmatpush1.bf16.msra.mxu1 %v16514_v23  ;;  %12004 = vmatpush1.bf16.msra.mxu0 %v16517_v4  ;;  %v16600_v23 = vld [vmem:[%s19440_s11 + $0x4fc] ss:$148 sps:$4 sm:$0xff]   ;;  %v16603_v4 = vld [vmem:[%s19440_s11 + $0x504] ss:$148 sps:$4 sm:$0xff]  }
 0x7c3   :  { %11962 = vmatprep.subr.bf16.mxu1 %v16522_v13  ;;  %12005 = vmatprep.subr.bf16.mxu0 %v16525_v37  ;;  %v16598_v13 = vld [vmem:[%s19440_s11 + $0x4f8] ss:$148 sps:$4 sm:$0xff]   ;;  %v16601_v37 = vld [vmem:[%s19440_s11 + $0x500] ss:$148 sps:$4 sm:$0xff]  }
 0x7c6   :  { %11963 = vmatpush1.bf16.msra.mxu1 %v16520_v11  ;;  %12006 = vmatpush1.bf16.msra.mxu0 %v16523_v63  ;;  %v16606_v11 = vld [vmem:[%s19440_s11 + $0x3d4] ss:$148 sps:$4 sm:$0xff]   ;;  %v16609_v63 = vld [vmem:[%s19440_s11 + $0x3dc] ss:$148 sps:$4 sm:$0xff]  }
 0x7c7   :  { %11964 = vmatprep.subr.bf16.mxu1 %v16528_v26  ;;  %12007 = vmatprep.subr.bf16.mxu0 %v16531_v52  ;;  %v16604_v26 = vld [vmem:[%s19440_s11 + $0x3d0] ss:$148 sps:$4 sm:$0xff]   ;;  %v16607_v52 = vld [vmem:[%s19440_s11 + $0x3d8] ss:$148 sps:$4 sm:$0xff]  }
 0x7ca   :  { %11965 = vmatpush1.bf16.msra.mxu1 %v16526_v6  ;;  %12008 = vmatpush1.bf16.msra.mxu0 %v16529_v14  ;;  %v16612_v6 = vld [vmem:[%s19440_s11 + $0x2ac] ss:$148 sps:$4 sm:$0xff]   ;;  %v16615_v14 = vld [vmem:[%s19440_s11 + $0x2b4] ss:$148 sps:$4 sm:$0xff]  }
 0x7cb   :  { %12036 = vmatprep.subr.bf16.mxu1 %v16534_v12  ;;  %12079 = vmatprep.subr.bf16.mxu0 %v16537_v51  ;;  %v16610_v12 = vld [vmem:[%s19440_s11 + $0x2a8] ss:$148 sps:$4 sm:$0xff]   ;;  %v16613_v51 = vld [vmem:[%s19440_s11 + $0x2b0] ss:$148 sps:$4 sm:$0xff]  }
 0x7cd   :  { %11983 = vmatmul.mubr.bf16.vlgmr.msra.gmra.mxu1 %v18352_v58  ;;  %12026 = vmatmul.mubr.bf16.vlgmr.msra.gmra.mxu0 %v18352_v58 }
 0x7ce   :  { %12037 = vmatpush1.bf16.msra.mxu1 %v16532_v20  ;;  %12080 = vmatpush1.bf16.msra.mxu0 %v16535_v55  ;;  %v16618_v20 = vld [vmem:[%s19440_s11 + $0x184] ss:$148 sps:$4 sm:$0xff]   ;;  %v16621_v55 = vld [vmem:[%s19440_s11 + $0x18c] ss:$148 sps:$4 sm:$0xff]  }
 0x7cf   :  { %12038 = vmatprep.subr.bf16.mxu1 %v16540_v3  ;;  %12081 = vmatprep.subr.bf16.mxu0 %v16543_v1  ;;  %v16616_v3 = vld [vmem:[%s19440_s11 + $0x180] ss:$148 sps:$4 sm:$0xff]   ;;  %v16619_v1 = vld [vmem:[%s19440_s11 + $0x188] ss:$148 sps:$4 sm:$0xff]  }
 0x7d0   :  { %12068 = vmatprep.mubr.bf16.mxu1 %v16784_v27  ;;  %12111 = vmatprep.mubr.bf16.mxu0 %v16784_v27 }
 0x7d2   :  { %12039 = vmatpush1.bf16.msra.mxu1 %v16538_v10  ;;  %12082 = vmatpush1.bf16.msra.mxu0 %v16541_v25  ;;  %v16624_v10 = vld [vmem:[%s19440_s11 + $0x5c] ss:$148 sps:$4 sm:$0xff]   ;;  %v16627_v25 = vld [vmem:[%s19440_s11 + $0x64] ss:$148 sps:$4 sm:$0xff]  }
 0x7d3   :  { %12040 = vmatprep.subr.bf16.mxu1 %v16546_v38  ;;  %12083 = vmatprep.subr.bf16.mxu0 %v16549_v60  ;;  %v16622_v38 = vld [vmem:[%s19440_s11 + $0x58] ss:$148 sps:$4 sm:$0xff]   ;;  %v16625_v60 = vld [vmem:[%s19440_s11 + $0x60] ss:$148 sps:$4 sm:$0xff]  }
 0x7d6   :  { %12041 = vmatpush1.bf16.msra.mxu1 %v16544_v50  ;;  %12084 = vmatpush1.bf16.msra.mxu0 %v16547_v19  ;;  %v16630_v50 = vld [vmem:[%s19440_s11 + $0x884] ss:$148 sps:$4 sm:$0xff]   ;;  %v16633_v19 = vld [vmem:[%s19440_s11 + $0x88c] ss:$148 sps:$4 sm:$0xff]  }
 0x7d7   :  { %12042 = vmatprep.subr.bf16.mxu1 %v16552_v2  ;;  %12085 = vmatprep.subr.bf16.mxu0 %v16555_v29  ;;  %v18951_v2 = vld [vmem:[%s19441_s12] sm:$0xff] }
 0x7d8   :  { %v16628_v29 = vld [vmem:[%s19440_s11 + $0x880] ss:$148 sps:$4 sm:$0xff]  }
 0x7da   :  { %12043 = vmatpush1.bf16.msra.mxu1 %v16550_v47  ;;  %12086 = vmatpush1.bf16.msra.mxu0 %v16553_v57  ;;  %v16631_v47 = vld [vmem:[%s19440_s11 + $0x888] ss:$148 sps:$4 sm:$0xff]   ;;  %v13937_v57 = vld [vmem:[%s19439_s10] ss:$0 sm:$0xff] }
 0x7db   :  { %12044 = vmatprep.subr.bf16.mxu1 %v16558_v9  ;;  %12087 = vmatprep.subr.bf16.mxu0 %v16561_v5  ;;  %v16636_v9 = vld [vmem:[%s19440_s11 + $0x75c] ss:$148 sps:$4 sm:$0xff]   ;;  %v16639_v5 = vld [vmem:[%s19440_s11 + $0x764] ss:$148 sps:$4 sm:$0xff]  }
 0x7de   :  { %12045 = vmatpush1.bf16.msra.mxu1 %v16556_v49  ;;  %12088 = vmatpush1.bf16.msra.mxu0 %v16559_v62  ;;  %v9979_v49 = vrot.slane %v18951_v2, %v19464_v24  ;;  %v9983_v62 = vrot.slane %v18951_v2, %v17187_v45 }
 0x7df   :  { %12046 = vmatprep.subr.bf16.mxu1 %v16564_v17  ;;  %12089 = vmatprep.subr.bf16.mxu0 %v16567_v21 }
 0x7e2   :  { %12047 = vmatpush1.bf16.msra.mxu1 %v16562_v42  ;;  %12090 = vmatpush1.bf16.msra.mxu0 %v16565_v33  ;;  %v16634_v33 = vld [vmem:[%s19440_s11 + $0x758] ss:$148 sps:$4 sm:$0xff]  }
 0x7e3   :  { %12048 = vmatprep.subr.bf16.mxu1 %v16570_v44  ;;  %12091 = vmatprep.subr.bf16.mxu0 %v16573_v32  ;;  %v16637_v44 = vld [vmem:[%s19440_s11 + $0x760] ss:$148 sps:$4 sm:$0xff]  }
 0x7e6   :  { %12049 = vmatpush1.bf16.msra.mxu1 %v16568_v28  ;;  %12092 = vmatpush1.bf16.msra.mxu0 %v16571_v15  ;;  %v16642_v15 = vld [vmem:[%s19440_s11 + $0x634] ss:$148 sps:$4 sm:$0xff]  }
 0x7e7   :  { %12050 = vmatprep.subr.bf16.mxu1 %v16576_v31  ;;  %12093 = vmatprep.subr.bf16.mxu0 %v16579_v0  ;;  %v16645_v31 = vld [vmem:[%s19440_s11 + $0x63c] ss:$148 sps:$4 sm:$0xff]  }
 0x7ea   :  { %12051 = vmatpush1.bf16.msra.mxu1 %v16574_v53  ;;  %12094 = vmatpush1.bf16.msra.mxu0 %v16577_v39 }
 0x7eb   :  { %12122 = vmatprep.subr.bf16.mxu1 %v16582_v36  ;;  %12165 = vmatprep.subr.bf16.mxu0 %v16585_v48 }
 0x7ed   :  { %12069 = vmatmul.mubr.bf16.vlgmr.msra.gmra.mxu1 %v18352_v58  ;;  %12112 = vmatmul.mubr.bf16.vlgmr.msra.gmra.mxu0 %v18352_v58 }
 0x7ee   :  { %12123 = vmatpush1.bf16.msra.mxu1 %v16580_v16  ;;  %12166 = vmatpush1.bf16.msra.mxu0 %v16583_v40  ;;  %v16640_v40 = vld [vmem:[%s19440_s11 + $0x630] ss:$148 sps:$4 sm:$0xff]  }
 0x7ef   :  { %12124 = vmatprep.subr.bf16.mxu1 %v16588_v35  ;;  %12167 = vmatprep.subr.bf16.mxu0 %v16591_v46  ;;  %v16643_v35 = vld [vmem:[%s19440_s11 + $0x638] ss:$148 sps:$4 sm:$0xff]  }
 0x7f0   :  { %12154 = vmatprep.mubr.bf16.mxu1 %v16784_v27  ;;  %12197 = vmatprep.mubr.bf16.mxu0 %v16784_v27 }
 0x7f2   :  { %12125 = vmatpush1.bf16.msra.mxu1 %v16586_v61  ;;  %12168 = vmatpush1.bf16.msra.mxu0 %v16589_v30  ;;  %v16648_v30 = vld [vmem:[%s19440_s11 + $0x50c] ss:$148 sps:$4 sm:$0xff]  }
 0x7f3   :  { %12126 = vmatprep.subr.bf16.mxu1 %v16594_v43  ;;  %12169 = vmatprep.subr.bf16.mxu0 %v16597_v59  ;;  %v16651_v43 = vld [vmem:[%s19440_s11 + $0x514] ss:$148 sps:$4 sm:$0xff]  }
 0x7f6   :  { %12127 = vmatpush1.bf16.msra.mxu1 %v16592_v8  ;;  %12170 = vmatpush1.bf16.msra.mxu0 %v16595_v18 }
 0x7f7   :  { %12128 = vmatprep.subr.bf16.mxu1 %v16600_v23  ;;  %12171 = vmatprep.subr.bf16.mxu0 %v16603_v4  ;;  %v16646_v23 = vld [vmem:[%s19440_s11 + $0x508] ss:$148 sps:$4 sm:$0xff]   ;;  %v16649_v4 = vld [vmem:[%s19440_s11 + $0x510] ss:$148 sps:$4 sm:$0xff]  }
 0x7fa   :  { %12129 = vmatpush1.bf16.msra.mxu1 %v16598_v13  ;;  %12172 = vmatpush1.bf16.msra.mxu0 %v16601_v37  ;;  %v16654_v13 = vld [vmem:[%s19440_s11 + $0x3e4] ss:$148 sps:$4 sm:$0xff]   ;;  %v16657_v37 = vld [vmem:[%s19440_s11 + $0x3ec] ss:$148 sps:$4 sm:$0xff]  }
 0x7fb   :  { %12130 = vmatprep.subr.bf16.mxu1 %v16606_v11  ;;  %12173 = vmatprep.subr.bf16.mxu0 %v16609_v63  ;;  %v16652_v11 = vld [vmem:[%s19440_s11 + $0x3e0] ss:$148 sps:$4 sm:$0xff]   ;;  %v16655_v63 = vld [vmem:[%s19440_s11 + $0x3e8] ss:$148 sps:$4 sm:$0xff]  }
 0x7fe   :  { %12131 = vmatpush1.bf16.msra.mxu1 %v16604_v26  ;;  %12174 = vmatpush1.bf16.msra.mxu0 %v16607_v52  ;;  %v16660_v26 = vld [vmem:[%s19440_s11 + $0x2bc] ss:$148 sps:$4 sm:$0xff]   ;;  %v16663_v52 = vld [vmem:[%s19440_s11 + $0x2c4] ss:$148 sps:$4 sm:$0xff]  }
 0x7ff   :  { %12132 = vmatprep.subr.bf16.mxu1 %v16612_v6  ;;  %12175 = vmatprep.subr.bf16.mxu0 %v16615_v14  ;;  %v16658_v6 = vld [vmem:[%s19440_s11 + $0x2b8] ss:$148 sps:$4 sm:$0xff]   ;;  %v16661_v14 = vld [vmem:[%s19440_s11 + $0x2c0] ss:$148 sps:$4 sm:$0xff]  }
 0x802   :  { %12133 = vmatpush1.bf16.msra.mxu1 %v16610_v12  ;;  %12176 = vmatpush1.bf16.msra.mxu0 %v16613_v51  ;;  %v16666_v12 = vld [vmem:[%s19440_s11 + $0x194] ss:$148 sps:$4 sm:$0xff]   ;;  %v16669_v51 = vld [vmem:[%s19440_s11 + $0x19c] ss:$148 sps:$4 sm:$0xff]  }
 0x803   :  { %12134 = vmatprep.subr.bf16.mxu1 %v16618_v20  ;;  %12177 = vmatprep.subr.bf16.mxu0 %v16621_v55  ;;  %v16664_v20 = vld [vmem:[%s19440_s11 + $0x190] ss:$148 sps:$4 sm:$0xff]   ;;  %v16667_v55 = vld [vmem:[%s19440_s11 + $0x198] ss:$148 sps:$4 sm:$0xff]  }
 0x806   :  { %12135 = vmatpush1.bf16.msra.mxu1 %v16616_v3  ;;  %12178 = vmatpush1.bf16.msra.mxu0 %v16619_v1  ;;  %v16672_v3 = vld [vmem:[%s19440_s11 + $0x6c] ss:$148 sps:$4 sm:$0xff]   ;;  %v16675_v1 = vld [vmem:[%s19440_s11 + $0x74] ss:$148 sps:$4 sm:$0xff]  }
 0x807   :  { %12136 = vmatprep.subr.bf16.mxu1 %v16624_v10  ;;  %12179 = vmatprep.subr.bf16.mxu0 %v16627_v25  ;;  %v16670_v10 = vld [vmem:[%s19440_s11 + $0x68] ss:$148 sps:$4 sm:$0xff]   ;;  %v16673_v25 = vld [vmem:[%s19440_s11 + $0x70] ss:$148 sps:$4 sm:$0xff]  }
 0x80a   :  { %12137 = vmatpush1.bf16.msra.mxu1 %v16622_v38  ;;  %12180 = vmatpush1.bf16.msra.mxu0 %v16625_v60  ;;  %v16678_v38 = vld [vmem:[%s19440_s11 + $0x894] ss:$148 sps:$4 sm:$0xff]   ;;  %v16681_v60 = vld [vmem:[%s19440_s11 + $0x89c] ss:$148 sps:$4 sm:$0xff]  }
 0x80b   :  { %12208 = vmatprep.subr.bf16.mxu1 %v16630_v50  ;;  %12251 = vmatprep.subr.bf16.mxu0 %v16633_v19  ;;  %v16676_v50 = vld [vmem:[%s19440_s11 + $0x890] ss:$148 sps:$4 sm:$0xff]   ;;  %v16679_v19 = vld [vmem:[%s19440_s11 + $0x898] ss:$148 sps:$4 sm:$0xff]  }
 0x80d   :  { %12155 = vmatmul.mubr.bf16.vlgmr.msra.gmra.mxu1 %v18352_v58  ;;  %12198 = vmatmul.mubr.bf16.vlgmr.msra.gmra.mxu0 %v18352_v58  ;;  %v9653_v17 = vpop.f32.mrf.mxu1  ;;  %v11683_v21 = vpop.f32.mrf.mxu0 }
 0x80e   :  { %v9654_v42 = vadd.f32 %v13937_v57, %v9653_v17  ;;  %12209 = vmatpush1.bf16.msra.mxu1 %v16628_v29  ;;  %12252 = vmatpush1.bf16.msra.mxu0 %v16631_v47  ;;  %v11684_v0 = vadd.f32 %v11683_v21, %v9979_v49  ;;  %v9987_v29 = vrot.slane %v18951_v2, %v19465_v22  ;;  %v16684_v47 = vld [vmem:[%s19440_s11 + $0x76c] ss:$148 sps:$4 sm:$0xff]  }
 0x80f   :  { %v14552_v32 = vpop.f32.mrf.mxu1  ;;  %v11685_v28 = vpop.f32.mrf.mxu0  ;;  %12210 = vmatprep.subr.bf16.mxu1 %v16636_v9  ;;  %12253 = vmatprep.subr.bf16.mxu0 %v16639_v5  ;;  %v19466_v9 = vld [vmem:[#allocation12_spill] sm:$0xff] }
 0x810   :  { %9660 = vst [vmem:[%s19442_s13] sm:$0xff] %v9654_v42  ;;  %v11686_v53 = vadd.f32 %v11685_v28, %v9983_v62  ;;  %12240 = vmatprep.mubr.bf16.mxu1 %v16784_v27  ;;  %12283 = vmatprep.mubr.bf16.mxu0 %v16784_v27  ;;  %v9995_v5 = vrot.slane %v18951_v2, %v19466_v9  ;;  %v16682_v42 = vld [vmem:[%s19440_s11 + $0x768] ss:$148 sps:$4 sm:$0xff]   ;;  %v16685_v28 = vld [vmem:[%s19440_s11 + $0x770] ss:$148 sps:$4 sm:$0xff]  }
 0x811   :  { %v9656_v39 = vpop.f32.mrf.mxu1  ;;  %v11687_v36 = vpop.f32.mrf.mxu0 }
 0x812   :  { %v14280_v48 = vpack.c.bf16 %v11686_v53, %v11684_v0  ;;  %v9657_v16 = vadd.f32 %v13937_v57, %v9656_v39  ;;  %12211 = vmatpush1.bf16.msra.mxu1 %v16634_v33  ;;  %12254 = vmatpush1.bf16.msra.mxu0 %v16637_v44  ;;  %v11688_v59 = vadd.f32 %v11687_v36, %v9979_v49  ;;  %v16687_v57 = vld [vmem:[%s19440_s11 + $0x774] ss:$148 sps:$4 sm:$0xff]   ;;  %v16693_v39 = vld [vmem:[%s19440_s11 + $0x64c] ss:$148 sps:$4 sm:$0xff]  }
 0x813   :  { %v14553_v46 = vpop.f32.mrf.mxu1  ;;  %v11689_v61 = vpop.f32.mrf.mxu0  ;;  %12212 = vmatprep.subr.bf16.mxu1 %v16642_v15  ;;  %12255 = vmatprep.subr.bf16.mxu0 %v16645_v31  ;;  %v9991_v49 = vrot.slane %v18951_v2, %v17190_v34  ;;  %v16690_v15 = vld [vmem:[%s19440_s11 + $0x644] ss:$148 sps:$4 sm:$0xff]  }
 0x814   :  { %12688 = vst [vmem:[%s19443_s14] sm:$0xff] %v14280_v48  ;;  %9661 = vst [vmem:[%s19442_s13 + $0x8] sm:$0xff] %v9657_v16  ;;  %v11690_v8 = vadd.f32 %v11689_v61, %v9983_v62  ;;  %v9999_v62 = vrot.slane %v18951_v2, %v17393_v41 }
 0x816   :  { %v14299_v18 = vpack.c.bf16 %v11690_v8, %v11688_v59  ;;  %12213 = vmatpush1.bf16.msra.mxu1 %v16640_v40  ;;  %12256 = vmatpush1.bf16.msra.mxu0 %v16643_v35  ;;  %v16688_v35 = vld [vmem:[%s19440_s11 + $0x640] ss:$148 sps:$4 sm:$0xff]  }
 0x817   :  { %12214 = vmatprep.subr.bf16.mxu1 %v16648_v30  ;;  %12257 = vmatprep.subr.bf16.mxu0 %v16651_v43  ;;  %v16691_v30 = vld [vmem:[%s19440_s11 + $0x648] ss:$148 sps:$4 sm:$0xff]  }
 0x818   :  { %12708 = vst [vmem:[%s19443_s14 + $0x94] sm:$0xff] %v14299_v18  ;;  %v16696_v43 = vld [vmem:[%s19440_s11 + $0x51c] ss:$148 sps:$4 sm:$0xff]  }
 0x81a   :  { %12215 = vmatpush1.bf16.msra.mxu1 %v16646_v23  ;;  %12258 = vmatpush1.bf16.msra.mxu0 %v16649_v4  ;;  %v16699_v4 = vld [vmem:[%s19440_s11 + $0x524] ss:$148 sps:$4 sm:$0xff]  }
 0x81b   :  { %12216 = vmatprep.subr.bf16.mxu1 %v16654_v13  ;;  %12259 = vmatprep.subr.bf16.mxu0 %v16657_v37 }
 0x81e   :  { %12217 = vmatpush1.bf16.msra.mxu1 %v16652_v11  ;;  %12260 = vmatpush1.bf16.msra.mxu0 %v16655_v63  ;;  %v16694_v11 = vld [vmem:[%s19440_s11 + $0x518] ss:$148 sps:$4 sm:$0xff]   ;;  %v16697_v63 = vld [vmem:[%s19440_s11 + $0x520] ss:$148 sps:$4 sm:$0xff]  }
 0x81f   :  { %12218 = vmatprep.subr.bf16.mxu1 %v16660_v26  ;;  %12261 = vmatprep.subr.bf16.mxu0 %v16663_v52  ;;  %v16702_v26 = vld [vmem:[%s19440_s11 + $0x3f4] ss:$148 sps:$4 sm:$0xff]   ;;  %v16705_v52 = vld [vmem:[%s19440_s11 + $0x3fc] ss:$148 sps:$4 sm:$0xff]  }
 0x822   :  { %12219 = vmatpush1.bf16.msra.mxu1 %v16658_v6  ;;  %12262 = vmatpush1.bf16.msra.mxu0 %v16661_v14  ;;  %v16700_v6 = vld [vmem:[%s19440_s11 + $0x3f0] ss:$148 sps:$4 sm:$0xff]   ;;  %v16703_v14 = vld [vmem:[%s19440_s11 + $0x3f8] ss:$148 sps:$4 sm:$0xff]  }
 0x823   :  { %12220 = vmatprep.subr.bf16.mxu1 %v16666_v12  ;;  %12263 = vmatprep.subr.bf16.mxu0 %v16669_v51  ;;  %v16708_v12 = vld [vmem:[%s19440_s11 + $0x2cc] ss:$148 sps:$4 sm:$0xff]   ;;  %v16711_v51 = vld [vmem:[%s19440_s11 + $0x2d4] ss:$148 sps:$4 sm:$0xff]  }
 0x826   :  { %12221 = vmatpush1.bf16.msra.mxu1 %v16664_v20  ;;  %12264 = vmatpush1.bf16.msra.mxu0 %v16667_v55  ;;  %v16706_v20 = vld [vmem:[%s19440_s11 + $0x2c8] ss:$148 sps:$4 sm:$0xff]   ;;  %v16709_v55 = vld [vmem:[%s19440_s11 + $0x2d0] ss:$148 sps:$4 sm:$0xff]  }
 0x827   :  { %12222 = vmatprep.subr.bf16.mxu1 %v16672_v3  ;;  %12265 = vmatprep.subr.bf16.mxu0 %v16675_v1  ;;  %v16714_v3 = vld [vmem:[%s19440_s11 + $0x1a4] ss:$148 sps:$4 sm:$0xff]   ;;  %v16717_v1 = vld [vmem:[%s19440_s11 + $0x1ac] ss:$148 sps:$4 sm:$0xff]  }
 0x82a   :  { %12223 = vmatpush1.bf16.msra.mxu1 %v16670_v10  ;;  %12266 = vmatpush1.bf16.msra.mxu0 %v16673_v25  ;;  %v16712_v10 = vld [vmem:[%s19440_s11 + $0x1a0] ss:$148 sps:$4 sm:$0xff]   ;;  %v16715_v25 = vld [vmem:[%s19440_s11 + $0x1a8] ss:$148 sps:$4 sm:$0xff]  }
 0x82b   :  { %12294 = vmatprep.subr.bf16.mxu1 %v16678_v38  ;;  %12337 = vmatprep.subr.bf16.mxu0 %v16681_v60  ;;  %v16720_v38 = vld [vmem:[%s19440_s11 + $0x7c] ss:$148 sps:$4 sm:$0xff]   ;;  %v16723_v60 = vld [vmem:[%s19440_s11 + $0x84] ss:$148 sps:$4 sm:$0xff]  }
 0x82d   :  { %v11726_v17 = vpop.f32.mrf.mxu1  ;;  %v11769_v21 = vpop.f32.mrf.mxu0  ;;  %12241 = vmatmul.mubr.bf16.vlgmr.msra.gmra.mxu1 %v18352_v58  ;;  %12284 = vmatmul.mubr.bf16.vlgmr.msra.gmra.mxu0 %v18352_v58 }
 0x82e   :  { %12295 = vmatpush1.bf16.msra.mxu1 %v16676_v50  ;;  %12338 = vmatpush1.bf16.msra.mxu0 %v16679_v19  ;;  %v11727_v33 = vadd.f32 %v11726_v17, %v9987_v29  ;;  %v11770_v31 = vadd.f32 %v11769_v21, %v9995_v5  ;;  %v16718_v50 = vld [vmem:[%s19440_s11 + $0x78] ss:$148 sps:$4 sm:$0xff]   ;;  %v16721_v19 = vld [vmem:[%s19440_s11 + $0x80] ss:$148 sps:$4 sm:$0xff]  }
 0x82f   :  { %v11728_v44 = vpop.f32.mrf.mxu1  ;;  %v11771_v32 = vpop.f32.mrf.mxu0  ;;  %12296 = vmatprep.subr.bf16.mxu1 %v16684_v47  ;;  %12339 = vmatprep.subr.bf16.mxu0 %v16687_v57  ;;  %v19190_v47 = vsub.s32 7, %v16991_v7  ;;  %v19195_v57 = vld [vmem:[%s19441_s12 + $0x8] sm:$0xff] }
 0x830   :  { %v11729_v0 = vadd.f32 %v11728_v44, %v9991_v49  ;;  %v11772_v53 = vadd.f32 %v11771_v32, %v9999_v62  ;;  %12326 = vmatprep.mubr.bf16.mxu1 %v16784_v27  ;;  %12369 = vmatprep.mubr.bf16.mxu0 %v16784_v27  ;;  %v16727_v7 = vld [vmem:[%s19440_s11 + $0x8a8] ss:$148 sps:$4 sm:$0xff]   ;;  %v10011_v17 = vrot.slane %v19195_v57, %v19464_v24  ;;  %v16728_v32 = vld [vmem:[%s19440_s11 + $0x778] ss:$148 sps:$4 sm:$0xff]  }
 0x831   :  { %v11730_v36 = vpop.f32.mrf.mxu1  ;;  %v11773_v48 = vpop.f32.mrf.mxu0  ;;  %v10007_v21 = vrot.slane %v18951_v2, %v19190_v47 }
 0x832   :  { %v14281_v16 = vpack.c.bf16 %v11729_v0, %v11727_v33  ;;  %v14282_v40 = vpack.c.bf16 %v11772_v53, %v11770_v31  ;;  %12297 = vmatpush1.bf16.msra.mxu1 %v16682_v42  ;;  %12340 = vmatpush1.bf16.msra.mxu0 %v16685_v28  ;;  %v11731_v59 = vadd.f32 %v11730_v36, %v9987_v29  ;;  %v16726_v29 = vld [vmem:[%s19440_s11 + $0x8a4] ss:$148 sps:$4 sm:$0xff]   ;;  %v16734_v0 = vld [vmem:[%s19440_s11 + $0x654] ss:$148 sps:$4 sm:$0xff]  }
 0x833   :  { %v11732_v46 = vpop.f32.mrf.mxu1  ;;  %v11775_v61 = vpop.f32.mrf.mxu0  ;;  %12298 = vmatprep.subr.bf16.mxu1 %v16690_v15  ;;  %v11774_v8 = vadd.f32 %v11773_v48, %v9995_v5  ;;  %12341 = vmatprep.subr.bf16.mxu0 %v16693_v39  ;;  %v16724_v5 = vld [vmem:[%s19440_s11 + $0x8a0] ss:$148 sps:$4 sm:$0xff]   ;;  %v10015_v42 = vrot.slane %v19195_v57, %v17187_v45 }
 0x834   :  { %12689 = vst [vmem:[%s19443_s14 + $0x8] sm:$0xff] %v14281_v16  ;;  %12690 = vst [vmem:[%s19443_s14 + $0x10] sm:$0xff] %v14282_v40  ;;  %v11733_v18 = vadd.f32 %v11732_v46, %v9991_v49  ;;  %v11776_v23 = vadd.f32 %v11775_v61, %v9999_v62  ;;  %v10003_v49 = vrot.slane %v18951_v2, %v17728_v56  ;;  %v16730_v62 = vld [vmem:[%s19440_s11 + $0x77c] ss:$148 sps:$4 sm:$0xff]   ;;  %v16731_v2 = vld [vmem:[%s19440_s11 + $0x780] ss:$148 sps:$4 sm:$0xff]  }
 0x835   :  { %v16732_v46 = vld [vmem:[%s19440_s11 + $0x650] ss:$148 sps:$4 sm:$0xff]  }
 0x836   :  { %v14300_v13 = vpack.c.bf16 %v11733_v18, %v11731_v59  ;;  %v14301_v37 = vpack.c.bf16 %v11776_v23, %v11774_v8  ;;  %12299 = vmatpush1.bf16.msra.mxu1 %v16688_v35  ;;  %12342 = vmatpush1.bf16.msra.mxu0 %v16691_v30 }
 0x837   :  { %12300 = vmatprep.subr.bf16.mxu1 %v16696_v43  ;;  %12343 = vmatprep.subr.bf16.mxu0 %v16699_v4  ;;  %v16738_v43 = vld [vmem:[%s19440_s11 + $0x52c] ss:$148 sps:$4 sm:$0xff]  }
 0x838   :  { %12709 = vst [vmem:[%s19443_s14 + $0x9c] sm:$0xff] %v14300_v13  ;;  %12710 = vst [vmem:[%s19443_s14 + $0xa4] sm:$0xff] %v14301_v37  ;;  %v16736_v37 = vld [vmem:[%s19440_s11 + $0x528] ss:$148 sps:$4 sm:$0xff]  }
 0x83a   :  { %12301 = vmatpush1.bf16.msra.mxu1 %v16694_v11  ;;  %12344 = vmatpush1.bf16.msra.mxu0 %v16697_v63  ;;  %v16739_v11 = vld [vmem:[%s19440_s11 + $0x530] ss:$148 sps:$4 sm:$0xff]  }
 0x83b   :  { %12302 = vmatprep.subr.bf16.mxu1 %v16702_v26  ;;  %12345 = vmatprep.subr.bf16.mxu0 %v16705_v52  ;;  %v16742_v63 = vld [vmem:[%s19440_s11 + $0x404] ss:$148 sps:$4 sm:$0xff]   ;;  %v16740_v26 = vld [vmem:[%s19440_s11 + $0x400] ss:$148 sps:$4 sm:$0xff]   ;;  %v16743_v52 = vld [vmem:[%s19440_s11 + $0x408] ss:$148 sps:$4 sm:$0xff]  }
 0x83e   :  { %12303 = vmatpush1.bf16.msra.mxu1 %v16700_v6  ;;  %12346 = vmatpush1.bf16.msra.mxu0 %v16703_v14  ;;  %v16746_v6 = vld [vmem:[%s19440_s11 + $0x2dc] ss:$148 sps:$4 sm:$0xff]   ;;  %v16744_v14 = vld [vmem:[%s19440_s11 + $0x2d8] ss:$148 sps:$4 sm:$0xff]  }
 0x83f   :  { %12304 = vmatprep.subr.bf16.mxu1 %v16708_v12  ;;  %12347 = vmatprep.subr.bf16.mxu0 %v16711_v51  ;;  %v16747_v12 = vld [vmem:[%s19440_s11 + $0x2e0] ss:$148 sps:$4 sm:$0xff]  }
 0x840   :  { %v16750_v51 = vld [vmem:[%s19440_s11 + $0x1b4] ss:$148 sps:$4 sm:$0xff]  }
 0x842   :  { %12305 = vmatpush1.bf16.msra.mxu1 %v16706_v20  ;;  %12348 = vmatpush1.bf16.msra.mxu0 %v16709_v55  ;;  %v16748_v20 = vld [vmem:[%s19440_s11 + $0x1b0] ss:$148 sps:$4 sm:$0xff]   ;;  %v16751_v55 = vld [vmem:[%s19440_s11 + $0x1b8] ss:$148 sps:$4 sm:$0xff]  }
 0x843   :  { %12306 = vmatprep.subr.bf16.mxu1 %v16714_v3  ;;  %12349 = vmatprep.subr.bf16.mxu0 %v16717_v1  ;;  %v16754_v3 = vld [vmem:[%s19440_s11 + $0x8c] ss:$148 sps:$4 sm:$0xff]   ;;  %v16752_v1 = vld [vmem:[%s19440_s11 + $0x88] ss:$148 sps:$4 sm:$0xff]  }
 0x846   :  { %12307 = vmatpush1.bf16.msra.mxu1 %v16712_v10  ;;  %12350 = vmatpush1.bf16.msra.mxu0 %v16715_v25  ;;  %v16755_v10 = vld [vmem:[%s19440_s11 + $0x90] ss:$148 sps:$4 sm:$0xff]   ;;  %v10019_v25 = vrot.slane %v19195_v57, %v19465_v22 }
 0x847   :  { %12308 = vmatprep.subr.bf16.mxu1 %v16720_v38  ;;  %12351 = vmatprep.subr.bf16.mxu0 %v16723_v60  ;;  %v10027_v38 = vrot.slane %v19195_v57, %v19466_v9  ;;  %v10023_v60 = vrot.slane %v19195_v57, %v17190_v34 }
 0x84a   :  { %12309 = vmatpush1.bf16.msra.mxu1 %v16718_v50  ;;  %12352 = vmatpush1.bf16.msra.mxu0 %v16721_v19  ;;  %v10031_v50 = vrot.slane %v19195_v57, %v17393_v41 }
 0x84b   :  { %12380 = vmatprep.subr.bf16.mxu1 %v16726_v29  ;;  %14554 = vmatprep.subr.bf16.mxu0 %v16785_v54 }
 0x84d   :  { %v11812_v33 = vpop.f32.mrf.mxu1  ;;  %v11855_v44 = vpop.f32.mrf.mxu0  ;;  %12327 = vmatmul.mubr.bf16.vlgmr.msra.gmra.mxu1 %v18352_v58  ;;  %12370 = vmatmul.mubr.bf16.vlgmr.msra.gmra.mxu0 %v18352_v58 }
 0x84e   :  { %12381 = vmatpush1.bf16.msra.mxu1 %v16724_v5  ;;  %v11813_v28 = vadd.f32 %v11812_v33, %v10003_v49  ;;  %14555 = vmatpush3.bf16.msra.mxu0 %v16727_v7  ;;  %v11856_v53 = vadd.f32 %v11855_v44, %v10011_v17 }
 0x84f   :  { %v11814_v15 = vpop.f32.mrf.mxu1  ;;  %v11857_v31 = vpop.f32.mrf.mxu0  ;;  %12382 = vmatprep.subr.bf16.mxu1 %v16730_v62  ;;  %14556 = vmatprep.subr.bf16.mxu0 %v16785_v54 }
 0x850   :  { %v11815_v39 = vadd.f32 %v11814_v15, %v10007_v21  ;;  %v11858_v36 = vadd.f32 %v11857_v31, %v10015_v42  ;;  %12412 = vmatprep.mubr.bf16.mxu1 %v16784_v27  ;;  %14570 = vmatprep.mubr.msk.bf16.mxu0 %vm16786_vm0, %v16785_v54  ;;  %v16735_v27 = vld [vmem:[%s19440_s11 + $0x658] ss:$148 sps:$4 sm:$0xff]  }
 0x851   :  { %v11816_v48 = vpop.f32.mrf.mxu1  ;;  %v11859_v16 = vpop.f32.mrf.mxu0 }
 0x852   :  { %v14283_v40 = vpack.c.bf16 %v11815_v39, %v11813_v28  ;;  %v14284_v35 = vpack.c.bf16 %v11858_v36, %v11856_v53  ;;  %12383 = vmatpush1.bf16.msra.mxu1 %v16728_v32  ;;  %14557 = vmatpush3.bf16.msra.mxu0 %v16731_v2  ;;  %v11817_v59 = vadd.f32 %v11816_v48, %v10003_v49  ;;  %v9968_v39 = vld [vmem:[%s19441_s12 + $0x10] sm:$0xff] }
 0x853   :  { %v11818_v61 = vpop.f32.mrf.mxu1  ;;  %v11861_v30 = vpop.f32.mrf.mxu0  ;;  %12384 = vmatprep.subr.bf16.mxu1 %v16734_v0  ;;  %v11860_v8 = vadd.f32 %v11859_v16, %v10011_v17  ;;  %14558 = vmatprep.subr.bf16.mxu0 %v16785_v54  ;;  %v10035_v36 = vrot.slane %v19195_v57, %v17728_v56  ;;  %v10043_v48 = vrot.slane %v9968_v39, %v19464_v24 }
 0x854   :  { %12691 = vst [vmem:[%s19443_s14 + $0x18] sm:$0xff] %v14283_v40  ;;  %12692 = vst [vmem:[%s19443_s14 + $0x20] sm:$0xff] %v14284_v35  ;;  %v11819_v18 = vadd.f32 %v11818_v61, %v10007_v21  ;;  %v11862_v23 = vadd.f32 %v11861_v30, %v10015_v42  ;;  %v10039_v16 = vrot.slane %v19195_v57, %v19190_v47 }
 0x855   :  { %v10047_v40 = vrot.slane %v9968_v39, %v17187_v45 }
 0x856   :  { %v14302_v4 = vpack.c.bf16 %v11819_v18, %v11817_v59  ;;  %v14303_v13 = vpack.c.bf16 %v11862_v23, %v11860_v8  ;;  %12385 = vmatpush1.bf16.msra.mxu1 %v16732_v46  ;;  %14559 = vmatpush3.bf16.msra.mxu0 %v16735_v27 }
 0x857   :  { %12386 = vmatprep.subr.bf16.mxu1 %v16738_v43  ;;  %14560 = vmatprep.subr.bf16.mxu0 %v16785_v54 }
 0x858   :  { %12711 = vst [vmem:[%s19443_s14 + $0xac] sm:$0xff] %v14302_v4  ;;  %12712 = vst [vmem:[%s19443_s14 + $0xb4] sm:$0xff] %v14303_v13 }
 0x85a   :  { %12387 = vmatpush1.bf16.msra.mxu1 %v16736_v37  ;;  %14561 = vmatpush3.bf16.msra.mxu0 %v16739_v11 }
 0x85b   :  { %12388 = vmatprep.subr.bf16.mxu1 %v16742_v63  ;;  %14562 = vmatprep.subr.bf16.mxu0 %v16785_v54 }
 0x85e   :  { %12389 = vmatpush1.bf16.msra.mxu1 %v16740_v26  ;;  %14563 = vmatpush3.bf16.msra.mxu0 %v16743_v52 }
 0x85f   :  { %12390 = vmatprep.subr.bf16.mxu1 %v16746_v6  ;;  %14564 = vmatprep.subr.bf16.mxu0 %v16785_v54 }
 0x862   :  { %12391 = vmatpush1.bf16.msra.mxu1 %v16744_v14  ;;  %14565 = vmatpush3.bf16.msra.mxu0 %v16747_v12  ;;  %v10051_v12 = vrot.slane %v9968_v39, %v19465_v22 }
 0x863   :  { %12392 = vmatprep.subr.bf16.mxu1 %v16750_v51  ;;  %14566 = vmatprep.subr.bf16.mxu0 %v16785_v54  ;;  %v10059_v51 = vrot.slane %v9968_v39, %v19466_v9 }
 0x866   :  { %12393 = vmatpush1.bf16.msra.mxu1 %v16748_v20  ;;  %14567 = vmatpush3.bf16.msra.mxu0 %v16751_v55  ;;  %v10055_v20 = vrot.slane %v9968_v39, %v17190_v34  ;;  %v10063_v55 = vrot.slane %v9968_v39, %v17393_v41 }
 0x867   :  { %12394 = vmatprep.subr.bf16.mxu1 %v16754_v3  ;;  %14568 = vmatprep.subr.bf16.mxu0 %v16785_v54 }
 0x86a   :  { %12395 = vmatpush1.bf16.msra.mxu1 %v16752_v1  ;;  %14569 = vmatpush3.bf16.msra.mxu0 %v16755_v10 }
 0x86d   :  { %v11898_v19 = vpop.f32.mrf.mxu1  ;;  %v11941_v29 = vpop.f32.mrf.mxu0  ;;  %12413 = vmatmul.mubr.bf16.vlgmr.msra.gmra.mxu1 %v18352_v58  ;;  %14571 = vmatmul.mubr.bf16.vlgmr.msra.gmra.mxu0 %v18352_v58 }
 0x86e   :  { %v11899_v49 = vadd.f32 %v11898_v19, %v10019_v25  ;;  %v11942_v7 = vadd.f32 %v11941_v29, %v10027_v38 }
 0x86f   :  { %v11900_v54 = vpop.f32.mrf.mxu1  ;;  %v11943_v5 = vpop.f32.mrf.mxu0 }
 0x870   :  { %v11901_v62 = vadd.f32 %v11900_v54, %v10023_v60  ;;  %v11944_v17 = vadd.f32 %v11943_v5, %v10031_v50 }
 0x871   :  { %v11902_v21 = vpop.f32.mrf.mxu1  ;;  %v11945_v42 = vpop.f32.mrf.mxu0 }
 0x872   :  { %v14285_v33 = vpack.c.bf16 %v11901_v62, %v11899_v49  ;;  %v14286_v44 = vpack.c.bf16 %v11944_v17, %v11942_v7  ;;  %v11903_v58 = vadd.f32 %v11902_v21, %v10019_v25  ;;  %v11946_v15 = vadd.f32 %v11945_v42, %v10027_v38 }
 0x873   :  { %v11904_v32 = vpop.f32.mrf.mxu1  ;;  %v11947_v28 = vpop.f32.mrf.mxu0 }
 0x874   :  { %12693 = vst [vmem:[%s19443_s14 + $0x28] sm:$0xff] %v14285_v33  ;;  %12694 = vst [vmem:[%s19443_s14 + $0x30] sm:$0xff] %v14286_v44  ;;  %v11905_v31 = vadd.f32 %v11904_v32, %v10023_v60  ;;  %v11948_v2 = vadd.f32 %v11947_v28, %v10031_v50  ;;  %v9969_v28 = vld [vmem:[%s19441_s12 + $0x18] sm:$0xff] }
 0x876   :  { %v14304_v0 = vpack.c.bf16 %v11905_v31, %v11903_v58  ;;  %v14305_v53 = vpack.c.bf16 %v11948_v2, %v11946_v15  ;;  %v10067_v58 = vrot.slane %v9968_v39, %v17728_v56  ;;  %v10075_v15 = vrot.slane %v9969_v28, %v19464_v24 }
 0x877   :  { %v10071_v31 = vrot.slane %v9968_v39, %v19190_v47  ;;  %v10079_v2 = vrot.slane %v9969_v28, %v17187_v45 }
 0x878   :  { %12713 = vst [vmem:[%s19443_s14 + $0xbc] sm:$0xff] %v14304_v0  ;;  %12714 = vst [vmem:[%s19443_s14 + $0xc4] sm:$0xff] %v14305_v53 }
 0x88d   :  { %v11984_v35 = vpop.f32.mrf.mxu1  ;;  %v12027_v46 = vpop.f32.mrf.mxu0 }
 0x88e   :  { %v11985_v27 = vadd.f32 %v11984_v35, %v10035_v36  ;;  %v12028_v43 = vadd.f32 %v12027_v46, %v10043_v48 }
 0x88f   :  { %v11986_v61 = vpop.f32.mrf.mxu1  ;;  %v12029_v30 = vpop.f32.mrf.mxu0 }
 0x890   :  { %v11987_v59 = vadd.f32 %v11986_v61, %v10039_v16  ;;  %v12030_v8 = vadd.f32 %v12029_v30, %v10047_v40 }
 0x891   :  { %v11988_v18 = vpop.f32.mrf.mxu1  ;;  %v12031_v23 = vpop.f32.mrf.mxu0 }
 0x892   :  { %v14287_v4 = vpack.c.bf16 %v11987_v59, %v11985_v27  ;;  %v14288_v13 = vpack.c.bf16 %v12030_v8, %v12028_v43  ;;  %v11989_v57 = vadd.f32 %v11988_v18, %v10035_v36  ;;  %v12032_v63 = vadd.f32 %v12031_v23, %v10043_v48 }
 0x893   :  { %v11990_v37 = vpop.f32.mrf.mxu1  ;;  %v12033_v11 = vpop.f32.mrf.mxu0 }
 0x894   :  { %12695 = vst [vmem:[%s19443_s14 + $0x38] sm:$0xff] %v14287_v4  ;;  %12696 = vst [vmem:[%s19443_s14 + $0x40] sm:$0xff] %v14288_v13  ;;  %v11991_v26 = vadd.f32 %v11990_v37, %v10039_v16  ;;  %v12034_v52 = vadd.f32 %v12033_v11, %v10047_v40  ;;  %v10083_v11 = vrot.slane %v9969_v28, %v19465_v22 }
 0x896   :  { %v14306_v6 = vpack.c.bf16 %v11991_v26, %v11989_v57  ;;  %v14307_v14 = vpack.c.bf16 %v12034_v52, %v12032_v63  ;;  %v10091_v57 = vrot.slane %v9969_v28, %v19466_v9  ;;  %v10087_v63 = vrot.slane %v9969_v28, %v17190_v34 }
 0x897   :  { %v10095_v26 = vrot.slane %v9969_v28, %v17393_v41 }
 0x898   :  { %12715 = vst [vmem:[%s19443_s14 + $0xcc] sm:$0xff] %v14306_v6  ;;  %12716 = vst [vmem:[%s19443_s14 + $0xd4] sm:$0xff] %v14307_v14 }
 0x8ad   :  { %v12070_v3 = vpop.f32.mrf.mxu1  ;;  %v12113_v1 = vpop.f32.mrf.mxu0 }
 0x8ae   :  { %v12071_v38 = vadd.f32 %v12070_v3, %v10051_v12  ;;  %v12114_v60 = vadd.f32 %v12113_v1, %v10059_v51 }
 0x8af   :  { %v12072_v10 = vpop.f32.mrf.mxu1  ;;  %v12115_v25 = vpop.f32.mrf.mxu0 }
 0x8b0   :  { %v12073_v50 = vadd.f32 %v12072_v10, %v10055_v20  ;;  %v12116_v19 = vadd.f32 %v12115_v25, %v10063_v55 }
 0x8b1   :  { %v12074_v29 = vpop.f32.mrf.mxu1  ;;  %v12117_v54 = vpop.f32.mrf.mxu0 }
 0x8b2   :  { %v14289_v5 = vpack.c.bf16 %v12073_v50, %v12071_v38  ;;  %v14290_v49 = vpack.c.bf16 %v12116_v19, %v12114_v60  ;;  %v12075_v17 = vadd.f32 %v12074_v29, %v10051_v12  ;;  %v12118_v21 = vadd.f32 %v12117_v54, %v10059_v51 }
 0x8b3   :  { %v12076_v7 = vpop.f32.mrf.mxu1  ;;  %v12119_v62 = vpop.f32.mrf.mxu0 }
 0x8b4   :  { %12697 = vst [vmem:[%s19443_s14 + $0x48] sm:$0xff] %v14289_v5  ;;  %12698 = vst [vmem:[%s19443_s14 + $0x50] sm:$0xff] %v14290_v49  ;;  %v12077_v42 = vadd.f32 %v12076_v7, %v10055_v20  ;;  %v12120_v33 = vadd.f32 %v12119_v62, %v10063_v55  ;;  %v9970_v7 = vld [vmem:[%s19441_s12 + $0x20] sm:$0x1f]  ;;  %v10099_v62 = vrot.slane %v9969_v28, %v17728_v56 }
 0x8b6   :  { %v14308_v44 = vpack.c.bf16 %v12077_v42, %v12075_v17  ;;  %v14309_v32 = vpack.c.bf16 %v12120_v33, %v12118_v21  ;;  %v10103_v17 = vrot.slane %v9969_v28, %v19190_v47  ;;  %v10107_v42 = vrot.slane %v9970_v7, %v19464_v24 }
 0x8b7   :  { %v10111_v33 = vrot.slane %v9970_v7, %v17187_v45 }
 0x8b8   :  { %12717 = vst [vmem:[%s19443_s14 + $0xdc] sm:$0xff] %v14308_v44  ;;  %12718 = vst [vmem:[%s19443_s14 + $0xe4] sm:$0xff] %v14309_v32 }
 0x8cd   :  { %v12156_v0 = vpop.f32.mrf.mxu1  ;;  %v12199_v53 = vpop.f32.mrf.mxu0 }
 0x8ce   :  { %v12157_v16 = vadd.f32 %v12156_v0, %v10067_v58  ;;  %v12200_v40 = vadd.f32 %v12199_v53, %v10075_v15 }
 0x8cf   :  { %v12158_v36 = vpop.f32.mrf.mxu1  ;;  %v12201_v48 = vpop.f32.mrf.mxu0 }
 0x8d0   :  { %v12159_v35 = vadd.f32 %v12158_v36, %v10071_v31  ;;  %v12202_v46 = vadd.f32 %v12201_v48, %v10079_v2 }
 0x8d1   :  { %v12160_v61 = vpop.f32.mrf.mxu1  ;;  %v12203_v30 = vpop.f32.mrf.mxu0 }
 0x8d2   :  { %v14291_v27 = vpack.c.bf16 %v12159_v35, %v12157_v16  ;;  %v14292_v43 = vpack.c.bf16 %v12202_v46, %v12200_v40  ;;  %v12161_v39 = vadd.f32 %v12160_v61, %v10067_v58  ;;  %v12204_v18 = vadd.f32 %v12203_v30, %v10075_v15 }
 0x8d3   :  { %v12162_v59 = vpop.f32.mrf.mxu1  ;;  %v12205_v8 = vpop.f32.mrf.mxu0  ;;  %v10123_v61 = vrot.slane %v9970_v7, %v19466_v9  ;;  %v10115_v30 = vrot.slane %v9970_v7, %v19465_v22 }
 0x8d4   :  { %12699 = vst [vmem:[%s19443_s14 + $0x58] sm:$0xff] %v14291_v27  ;;  %12700 = vst [vmem:[%s19443_s14 + $0x60] sm:$0xff] %v14292_v43  ;;  %v12163_v23 = vadd.f32 %v12162_v59, %v10071_v31  ;;  %v12206_v4 = vadd.f32 %v12205_v8, %v10079_v2  ;;  %v10119_v27 = vrot.slane %v9970_v7, %v17190_v34 }
 0x8d6   :  { %v14310_v13 = vpack.c.bf16 %v12163_v23, %v12161_v39  ;;  %v14311_v37 = vpack.c.bf16 %v12206_v4, %v12204_v18 }
 0x8d8   :  { %12719 = vst [vmem:[%s19443_s14 + $0xec] sm:$0xff] %v14310_v13  ;;  %12720 = vst [vmem:[%s19443_s14 + $0xf4] sm:$0xff] %v14311_v37 }
 0x8ed   :  { %v12242_v52 = vpop.f32.mrf.mxu1  ;;  %v12285_v6 = vpop.f32.mrf.mxu0 }
 0x8ee   :  { %v12243_v51 = vadd.f32 %v12242_v52, %v10083_v11  ;;  %v12286_v20 = vadd.f32 %v12285_v6, %v10091_v57 }
 0x8ef   :  { %v12244_v14 = vpop.f32.mrf.mxu1  ;;  %v12287_v12 = vpop.f32.mrf.mxu0 }
 0x8f0   :  { %v12245_v55 = vadd.f32 %v12244_v14, %v10087_v63  ;;  %v12288_v3 = vadd.f32 %v12287_v12, %v10095_v26 }
 0x8f1   :  { %v12246_v1 = vpop.f32.mrf.mxu1  ;;  %v12289_v10 = vpop.f32.mrf.mxu0 }
 0x8f2   :  { %v14293_v25 = vpack.c.bf16 %v12245_v55, %v12243_v51  ;;  %v14294_v38 = vpack.c.bf16 %v12288_v3, %v12286_v20  ;;  %v12247_v41 = vadd.f32 %v12246_v1, %v10083_v11  ;;  %v12290_v19 = vadd.f32 %v12289_v10, %v10091_v57 }
 0x8f3   :  { %v12248_v60 = vpop.f32.mrf.mxu1  ;;  %v12291_v50 = vpop.f32.mrf.mxu0 }
 0x8f4   :  { %12701 = vst [vmem:[%s19443_s14 + $0x68] sm:$0xff] %v14293_v25  ;;  %12702 = vst [vmem:[%s19443_s14 + $0x70] sm:$0xff] %v14294_v38  ;;  %v12249_v29 = vadd.f32 %v12248_v60, %v10087_v63  ;;  %v12292_v54 = vadd.f32 %v12291_v50, %v10095_v26 }
 0x8f6   :  { %v14312_v5 = vpack.c.bf16 %v12249_v29, %v12247_v41  ;;  %v14313_v49 = vpack.c.bf16 %v12292_v54, %v12290_v19 }
 0x8f8   :  { %12721 = vst [vmem:[%s19443_s14 + $0xfc] sm:$0xff] %v14312_v5  ;;  %12722 = vst [vmem:[%s19443_s14 + $0x104] sm:$0xff] %v14313_v49 }
 0x90d   :  { %v12328_v21 = vpop.f32.mrf.mxu1  ;;  %v12371_v44 = vpop.f32.mrf.mxu0 }
 0x90e   :  { %v12329_v58 = vadd.f32 %v12328_v21, %v10099_v62  ;;  %v12372_v2 = vadd.f32 %v12371_v44, %v10107_v42 }
 0x90f   :  { %v12330_v32 = vpop.f32.mrf.mxu1  ;;  %v12373_v31 = vpop.f32.mrf.mxu0 }
 0x910   :  { %v12331_v15 = vadd.f32 %v12330_v32, %v10103_v17  ;;  %v12374_v0 = vadd.f32 %v12373_v31, %v10111_v33 }
 0x911   :  { %v12332_v53 = vpop.f32.mrf.mxu1  ;;  %v12375_v48 = vpop.f32.mrf.mxu0 }
 0x912   :  { %v14295_v36 = vpack.c.bf16 %v12331_v15, %v12329_v58  ;;  %v14296_v16 = vpack.c.bf16 %v12374_v0, %v12372_v2  ;;  %v12333_v56 = vadd.f32 %v12332_v53, %v10099_v62  ;;  %v12376_v45 = vadd.f32 %v12375_v48, %v10107_v42 }
 0x913   :  { %v12334_v40 = vpop.f32.mrf.mxu1  ;;  %v12377_v47 = vpop.f32.mrf.mxu0 }
 0x914   :  { %12703 = vst [vmem:[%s19443_s14 + $0x78] sm:$0xff] %v14295_v36  ;;  %v12335_v24 = vadd.f32 %v12334_v40, %v10103_v17  ;;  %12704 = vst [vmem:[%s19443_s14 + $0x80] sm:$0xff] %v14296_v16  ;;  %v12378_v28 = vadd.f32 %v12377_v47, %v10111_v33 }
 0x916   :  { %v14314_v35 = vpack.c.bf16 %v12335_v24, %v12333_v56  ;;  %v14315_v46 = vpack.c.bf16 %v12378_v28, %v12376_v45 }
 0x918   :  { %12723 = vst [vmem:[%s19443_s14 + $0x10c] sm:$0xff] %v14314_v35  ;;  %12724 = vst [vmem:[%s19443_s14 + $0x114] sm:$0xff] %v14315_v46 }
 0x92d   :  { %v12414_v43 = vpop.f32.mrf.mxu1  ;;  %v12457_v59 = vpop.f32.mrf.mxu0 }
 0x92e   :  { %v12458_v8 = vadd.f32 %v12457_v59, %v10123_v61  ;;  %v12415_v18 = vadd.f32 %v12414_v43, %v10115_v30 }
 0x92f   :  { %v12416_v39 = vpop.f32.mrf.mxu1  ;;  %v14572_v4 = vpop.f32.mrf.mxu0 }
 0x930   :  { %v12417_v23 = vadd.f32 %v12416_v39, %v10119_v27  ;;  %v14298_v13 = vpack.c.bf16 %v12458_v8, %v12458_v8 }
 0x931   :  { %v12418_v37 = vpop.f32.mrf.mxu1  ;;  %v12460_v57 = vpop.f32.mrf.mxu0 }
 0x932   :  { %v14297_v11 = vpack.c.bf16 %v12417_v23, %v12415_v18  ;;  %12707 = vst.msk [vmem:[%s19443_s14 + $0x90] sm:$0xf] %vm12706_vm1, %v14298_v13  ;;  %v12461_v22 = vadd.f32 %v12460_v57, %v10123_v61  ;;  %v12419_v34 = vadd.f32 %v12418_v37, %v10115_v30 }
 0x933   :  { %v12420_v9 = vpop.f32.mrf.mxu1  ;;  %v14573_v26 = vpop.f32.mrf.mxu0 }
 0x934   :  { %12705 = vst [vmem:[%s19443_s14 + $0x88] sm:$0xff] %v14297_v11  ;;  %v12421_v63 = vadd.f32 %v12420_v9, %v10119_v27  ;;  %v14317_v52 = vpack.c.bf16 %v12461_v22, %v12461_v22 }
 0x936   :  { %v14316_v6 = vpack.c.bf16 %v12421_v63, %v12419_v34  ;;  %12726 = vst.msk [vmem:[%s19443_s14 + $0x124] sm:$0xf] %vm12706_vm1, %v14317_v52 }
 0x938   :  { %12725 = vst [vmem:[%s19443_s14 + $0x11c] sm:$0xff] %v14316_v6 }
 0x939   :  { %12735 = vsyncpa [#allocation3], 1 }

</bundles_post_ra>
